<compile_context>
chip_gen: v6e
topology: v6e:2x2x1
jax: 0.10.0
libtpu: 0.0.40
codegen_flags: <defaults>
</compile_context>

<pallas_src>
import jax
import jax.numpy as jnp
from jax.experimental import pallas as pl
from jax.experimental.pallas import tpu as pltpu

BN_EPS = 1e-5


# ----------------------------- fused Pallas kernel -------------------------

def _make_fused_kernel(B, H0, W0, channels):
    n_layers = len(channels) - 1
    hs = [H0 // (2 ** i) for i in range(n_layers)]        # 16, 8, 4, 2
    ws = [W0 // (2 ** i) for i in range(n_layers)]

    def kernel(*refs):
        it = iter(refs)
        x0p_ref = next(it)                                # (B, H0+2, W0+2, C0) padded input
        w_refs, s_refs, b_refs = [], [], []
        for _ in range(n_layers):
            w_refs.append(next(it))                       # (9*Cin, Cout) im2col weights
            s_refs.append(next(it))                       # (1, Cout) folded BN scale
            b_refs.append(next(it))                       # (1, Cout) folded BN bias (+conv bias)
        fcw_ref = next(it)                                # (C_last, num_classes)
        fcb_ref = next(it)                                # (1, num_classes)
        o_ref = next(it)                                  # (B, num_classes) output
        pad_refs = list(it)                               # VMEM scratch: padded inputs, layers 1..3

        xp_ref = x0p_ref
        feat = None
        for li in range(n_layers):
            H, W = hs[li], ws[li]
            cin, cout = channels[li], channels[li + 1]
            M = B * H * W

            # ---- im2col: (M, 9*Cin) from the 9 shifted 3x3 windows (batch in M) ----
            cols = []
            for dy in range(3):
                for dx in range(3):
                    patch = xp_ref[:, pl.ds(dy, H), pl.ds(dx, W), :]    # (B, H, W, Cin)
                    cols.append(patch.reshape(M, cin))
            col = jnp.concatenate(cols, axis=-1)                         # (M, 9*Cin)

            # ---- conv (single MXU matmul) + folded eval-mode BN + ReLU ----
            y = jnp.dot(col, w_refs[li][...],
                        preferred_element_type=jnp.float32)              # (M, Cout)
            y = jnp.maximum(y * s_refs[li][...] + b_refs[li][...], 0.0)

            if li < n_layers - 1:
                # ---- 2x2 max-pool (stride 2), fused with next layer's zero pad ----
                y = jnp.max(y.reshape(B * H * (W // 2), 2, cout), axis=1)      # x-pairs
                y = jnp.max(y.reshape(B * (H // 2), 2, W // 2, cout), axis=1)  # y-pairs
                pooled = y.reshape(B, H // 2, W // 2, cout)
                nxt = pad_refs[li]
                nxt[...] = jnp.zeros(nxt.shape, jnp.float32)                    # zero border
                nxt[:, pl.ds(1, H // 2), pl.ds(1, W // 2), :] = pooled          # interior
                xp_ref = nxt                                                    # stays in VMEM
            else:
                # ---- AdaptiveMaxPool2d((1,1)) -> (B, C_last) ----
                feat = jnp.max(y.reshape(B, H * W, cout), axis=1)

        # ---- fc epilogue ----
        o_ref[...] = (jnp.dot(feat, fcw_ref[...],
                              preferred_element_type=jnp.float32) + fcb_ref[...])

    return kernel


# ------------------------------ parameters ---------------------------------

def init_params(key, width_factor=16, num_classes=10):
    channels = [3] + [width_factor * i for i in [1, 2, 4, 8]]
    layers = []
    for li in range(4):
        cin, cout = channels[li], channels[li + 1]
        key, kw, kb, kg, kbeta, km, kv = jax.random.split(key, 7)
        conv_w = 0.1 * jax.random.normal(kw, (cout, cin, 3, 3), jnp.float32)
        conv_b = 0.1 * jax.random.normal(kb, (cout,), jnp.float32)
        gamma = 1.0 + 0.1 * jax.random.normal(kg, (cout,), jnp.float32)
        beta = 0.1 * jax.random.normal(kbeta, (cout,), jnp.float32)
        run_mean = 0.1 * jax.random.normal(km, (cout,), jnp.float32)
        run_var = jnp.abs(jax.random.normal(kv, (cout,), jnp.float32)) + 0.5

        # Fold eval-mode BN (+ conv bias) into per-channel scale / bias.
        inv_std = 1.0 / jnp.sqrt(run_var + BN_EPS)
        scale = gamma * inv_std                                   # (Cout,)
        bias = beta + (conv_b - run_mean) * scale                 # (Cout,)

        # (Cout, Cin, 3, 3) -> (ky, kx, Cin, Cout) -> (9*Cin, Cout)   [im2col layout]
        w2d = jnp.transpose(conv_w, (2, 3, 1, 0)).reshape(9 * cin, cout)
        layers.append(dict(w=w2d,
                           scale=scale.reshape(1, cout),
                           bias=bias.reshape(1, cout)))

    key, kfw, kfb = jax.random.split(key, 3)
    fc_w = 0.1 * jax.random.normal(kfw, (num_classes, channels[-1]), jnp.float32)
    fc_b = 0.1 * jax.random.normal(kfb, (num_classes,), jnp.float32)
    return dict(layers=layers,
                fc_wt=fc_w.T,                          # (C_last, num_classes)
                fc_b=fc_b.reshape(1, num_classes))


# ------------------------------- forward -----------------------------------

@jax.jit
def cnn_backbone_forward(x_nchw, params):
    B, C0, H0, W0 = x_nchw.shape
    layers = params["layers"]
    channels = [C0] + [l["scale"].shape[-1] for l in layers]
    num_classes = params["fc_b"].shape[-1]
    n_layers = len(layers)

    # One-time NCHW -> NHWC transpose + layer-0 zero padding (padding=1).
    # Everything else is inside the single fused kernel.
    x = jnp.transpose(x_nchw, (0, 2, 3, 1)).astype(jnp.float32)
    xp = jnp.pad(x, ((0, 0), (1, 1), (1, 1), (0, 0)))

    inputs = [xp]
    for l in layers:
        inputs += [l["w"], l["scale"], l["bias"]]
    inputs += [params["fc_wt"], params["fc_b"]]

    vmem = pl.BlockSpec(memory_space=pltpu.MemorySpace.VMEM)
    # Padded-input VMEM scratch for layers 1..3 (pool output + zero border).
    scratch_shapes = [
        pltpu.VMEM((B, (H0 >> (i + 1)) + 2, (W0 >> (i + 1)) + 2, channels[i + 1]),
                   jnp.float32)
        for i in range(n_layers - 1)
    ]

    kernel = _make_fused_kernel(B, H0, W0, channels)
    return pl.pallas_call(
        kernel,
        out_shape=jax.ShapeDtypeStruct((B, num_classes), jnp.float32),
        in_specs=[vmem] * len(inputs),
        out_specs=vmem,
        scratch_shapes=scratch_shapes,
    )(*inputs)


# --------------------------------- main -------------------------------------

if __name__ == "__main__":
    key = jax.random.PRNGKey(0)
    kx, kp = jax.random.split(key)
    # Small shapes consistent with the module: batch=2, 3 input channels,
    # 16x16 spatial, width_factor=16 -> channels [3, 16, 32, 64, 128], 10 classes.
    x = jax.random.normal(kx, (2, 3, 16, 16), jnp.float32)
    params = init_params(kp, width_factor=16, num_classes=10)

    out = cnn_backbone_forward(x, params)
    out = jax.block_until_ready(out)
    assert out.shape == (2, 10), out.shape
    print("KERNEL_OK")
</pallas_src>

<mosaic_0001>
module attributes {stable_mosaic.version = 11 : i64} {
  func.func @kernel(%arg0: memref<2x18x18x3xf32, #tpu.memory_space<vmem>>, %arg1: memref<27x16xf32, #tpu.memory_space<vmem>>, %arg2: memref<1x16xf32, #tpu.memory_space<vmem>>, %arg3: memref<1x16xf32, #tpu.memory_space<vmem>>, %arg4: memref<144x32xf32, #tpu.memory_space<vmem>>, %arg5: memref<1x32xf32, #tpu.memory_space<vmem>>, %arg6: memref<1x32xf32, #tpu.memory_space<vmem>>, %arg7: memref<288x64xf32, #tpu.memory_space<vmem>>, %arg8: memref<1x64xf32, #tpu.memory_space<vmem>>, %arg9: memref<1x64xf32, #tpu.memory_space<vmem>>, %arg10: memref<576x128xf32, #tpu.memory_space<vmem>>, %arg11: memref<1x128xf32, #tpu.memory_space<vmem>>, %arg12: memref<1x128xf32, #tpu.memory_space<vmem>>, %arg13: memref<128x10xf32, #tpu.memory_space<vmem>>, %arg14: memref<1x10xf32, #tpu.memory_space<vmem>>, %arg15: memref<2x10xf32, #tpu.memory_space<vmem>>, %arg16: memref<2x10x10x16xf32, #tpu.memory_space<vmem>>, %arg17: memref<2x6x6x32xf32, #tpu.memory_space<vmem>>, %arg18: memref<2x4x4x64xf32, #tpu.memory_space<vmem>>) attributes {dimension_semantics = [], scalar_prefetch = 0 : i64, scratch_operands = 3 : i64, tpu.core_type = #tpu.core_type<tc>} {
    %c0 = arith.constant 0 : index
    %c0_0 = arith.constant 0 : index
    %c0_1 = arith.constant 0 : index
    %c0_2 = arith.constant 0 : index
    %0 = vector.load %arg0[%c0, %c0_0, %c0_1, %c0_2] : memref<2x18x18x3xf32, #tpu.memory_space<vmem>>, vector<2x16x16x3xf32>
    %1 = vector.shape_cast %0 : vector<2x16x16x3xf32> to vector<512x3xf32>
    %c0_3 = arith.constant 0 : index
    %c0_4 = arith.constant 0 : index
    %c1 = arith.constant 1 : index
    %c0_5 = arith.constant 0 : index
    %2 = vector.load %arg0[%c0_3, %c0_4, %c1, %c0_5] : memref<2x18x18x3xf32, #tpu.memory_space<vmem>>, vector<2x16x16x3xf32>
    %3 = vector.shape_cast %2 : vector<2x16x16x3xf32> to vector<512x3xf32>
    %c0_6 = arith.constant 0 : index
    %c0_7 = arith.constant 0 : index
    %c2 = arith.constant 2 : index
    %c0_8 = arith.constant 0 : index
    %4 = vector.load %arg0[%c0_6, %c0_7, %c2, %c0_8] : memref<2x18x18x3xf32, #tpu.memory_space<vmem>>, vector<2x16x16x3xf32>
    %5 = vector.shape_cast %4 : vector<2x16x16x3xf32> to vector<512x3xf32>
    %c0_9 = arith.constant 0 : index
    %c1_10 = arith.constant 1 : index
    %c0_11 = arith.constant 0 : index
    %c0_12 = arith.constant 0 : index
    %6 = vector.load %arg0[%c0_9, %c1_10, %c0_11, %c0_12] : memref<2x18x18x3xf32, #tpu.memory_space<vmem>>, vector<2x16x16x3xf32>
    %7 = vector.shape_cast %6 : vector<2x16x16x3xf32> to vector<512x3xf32>
    %c0_13 = arith.constant 0 : index
    %c1_14 = arith.constant 1 : index
    %c1_15 = arith.constant 1 : index
    %c0_16 = arith.constant 0 : index
    %8 = vector.load %arg0[%c0_13, %c1_14, %c1_15, %c0_16] : memref<2x18x18x3xf32, #tpu.memory_space<vmem>>, vector<2x16x16x3xf32>
    %9 = vector.shape_cast %8 : vector<2x16x16x3xf32> to vector<512x3xf32>
    %c0_17 = arith.constant 0 : index
    %c1_18 = arith.constant 1 : index
    %c2_19 = arith.constant 2 : index
    %c0_20 = arith.constant 0 : index
    %10 = vector.load %arg0[%c0_17, %c1_18, %c2_19, %c0_20] : memref<2x18x18x3xf32, #tpu.memory_space<vmem>>, vector<2x16x16x3xf32>
    %11 = vector.shape_cast %10 : vector<2x16x16x3xf32> to vector<512x3xf32>
    %c0_21 = arith.constant 0 : index
    %c2_22 = arith.constant 2 : index
    %c0_23 = arith.constant 0 : index
    %c0_24 = arith.constant 0 : index
    %12 = vector.load %arg0[%c0_21, %c2_22, %c0_23, %c0_24] : memref<2x18x18x3xf32, #tpu.memory_space<vmem>>, vector<2x16x16x3xf32>
    %13 = vector.shape_cast %12 : vector<2x16x16x3xf32> to vector<512x3xf32>
    %c0_25 = arith.constant 0 : index
    %c2_26 = arith.constant 2 : index
    %c1_27 = arith.constant 1 : index
    %c0_28 = arith.constant 0 : index
    %14 = vector.load %arg0[%c0_25, %c2_26, %c1_27, %c0_28] : memref<2x18x18x3xf32, #tpu.memory_space<vmem>>, vector<2x16x16x3xf32>
    %15 = vector.shape_cast %14 : vector<2x16x16x3xf32> to vector<512x3xf32>
    %c0_29 = arith.constant 0 : index
    %c2_30 = arith.constant 2 : index
    %c2_31 = arith.constant 2 : index
    %c0_32 = arith.constant 0 : index
    %16 = vector.load %arg0[%c0_29, %c2_30, %c2_31, %c0_32] : memref<2x18x18x3xf32, #tpu.memory_space<vmem>>, vector<2x16x16x3xf32>
    %17 = vector.shape_cast %16 : vector<2x16x16x3xf32> to vector<512x3xf32>
    %18 = tpu.concatenate %1, %3, %5, %7, %9, %11, %13, %15, %17 in 1 : vector<512x3xf32>, vector<512x3xf32>, vector<512x3xf32>, vector<512x3xf32>, vector<512x3xf32>, vector<512x3xf32>, vector<512x3xf32>, vector<512x3xf32>, vector<512x3xf32> -> vector<512x27xf32>
    %c0_33 = arith.constant 0 : index
    %c0_34 = arith.constant 0 : index
    %19 = vector.load %arg1[%c0_33, %c0_34] : memref<27x16xf32, #tpu.memory_space<vmem>>, vector<27x16xf32>
    %cst = arith.constant dense<0.000000e+00> : vector<512x16xf32>
    %20 = tpu.matmul %18, %19, %cst {dimension_numbers = #tpu.dot_dimension_numbers<[1], [0], [0], [1], [0, 0, 1, 1], [], []>} : vector<512x27xf32>, vector<27x16xf32>, vector<512x16xf32> -> vector<512x16xf32>
    %c0_35 = arith.constant 0 : index
    %c0_36 = arith.constant 0 : index
    %21 = vector.load %arg2[%c0_35, %c0_36] : memref<1x16xf32, #tpu.memory_space<vmem>>, vector<1x16xf32>
    %22 = vector.broadcast %21 : vector<1x16xf32> to vector<512x16xf32>
    %23 = arith.mulf %20, %22 : vector<512x16xf32>
    %c0_37 = arith.constant 0 : index
    %c0_38 = arith.constant 0 : index
    %24 = vector.load %arg3[%c0_37, %c0_38] : memref<1x16xf32, #tpu.memory_space<vmem>>, vector<1x16xf32>
    %25 = vector.broadcast %24 : vector<1x16xf32> to vector<512x16xf32>
    %26 = arith.addf %23, %25 : vector<512x16xf32>
    %cst_39 = arith.constant 0.000000e+00 : f32
    %27 = vector.broadcast %cst_39 : f32 to vector<512x16xf32>
    %28 = arith.maximumf %26, %27 : vector<512x16xf32>
    %29 = vector.shape_cast %28 : vector<512x16xf32> to vector<256x2x16xf32>
    %cst_40 = arith.constant dense<0xFF800000> : vector<256x16xf32>
    %30 = vector.multi_reduction <maximumf>, %29, %cst_40 [1] : vector<256x2x16xf32> to vector<256x16xf32>
    %31 = vector.shape_cast %30 : vector<256x16xf32> to vector<16x2x8x16xf32>
    %cst_41 = arith.constant dense<0xFF800000> : vector<16x8x16xf32>
    %32 = vector.multi_reduction <maximumf>, %31, %cst_41 [1] : vector<16x2x8x16xf32> to vector<16x8x16xf32>
    %33 = vector.shape_cast %32 : vector<16x8x16xf32> to vector<2x8x8x16xf32>
    %cst_42 = arith.constant 0.000000e+00 : f32
    %34 = vector.broadcast %cst_42 : f32 to vector<2x10x10x16xf32>
    %c0_43 = arith.constant 0 : index
    %c0_44 = arith.constant 0 : index
    %c0_45 = arith.constant 0 : index
    %c0_46 = arith.constant 0 : index
    %35 = vector.load %arg16[%c0_43, %c0_44, %c0_45, %c0_46] : memref<2x10x10x16xf32, #tpu.memory_space<vmem>>, vector<2x10x10x16xf32>
    tpu.vector_store %arg16[%c0_43, %c0_44, %c0_45, %c0_46], %34 {strides = array<i32>} : memref<2x10x10x16xf32, #tpu.memory_space<vmem>>, vector<2x10x10x16xf32>,
    %c0_47 = arith.constant 0 : index
    %c1_48 = arith.constant 1 : index
    %c1_49 = arith.constant 1 : index
    %c0_50 = arith.constant 0 : index
    %36 = vector.load %arg16[%c0_47, %c1_48, %c1_49, %c0_50] : memref<2x10x10x16xf32, #tpu.memory_space<vmem>>, vector<2x8x8x16xf32>
    tpu.vector_store %arg16[%c0_47, %c1_48, %c1_49, %c0_50], %33 {strides = array<i32>} : memref<2x10x10x16xf32, #tpu.memory_space<vmem>>, vector<2x8x8x16xf32>,
    %c0_51 = arith.constant 0 : index
    %c0_52 = arith.constant 0 : index
    %c0_53 = arith.constant 0 : index
    %c0_54 = arith.constant 0 : index
    %37 = vector.load %arg16[%c0_51, %c0_52, %c0_53, %c0_54] : memref<2x10x10x16xf32, #tpu.memory_space<vmem>>, vector<2x8x8x16xf32>
    %38 = vector.shape_cast %37 : vector<2x8x8x16xf32> to vector<128x16xf32>
    %c0_55 = arith.constant 0 : index
    %c0_56 = arith.constant 0 : index
    %c1_57 = arith.constant 1 : index
    %c0_58 = arith.constant 0 : index
    %39 = vector.load %arg16[%c0_55, %c0_56, %c1_57, %c0_58] : memref<2x10x10x16xf32, #tpu.memory_space<vmem>>, vector<2x8x8x16xf32>
    %40 = vector.shape_cast %39 : vector<2x8x8x16xf32> to vector<128x16xf32>
    %c0_59 = arith.constant 0 : index
    %c0_60 = arith.constant 0 : index
    %c2_61 = arith.constant 2 : index
    %c0_62 = arith.constant 0 : index
    %41 = vector.load %arg16[%c0_59, %c0_60, %c2_61, %c0_62] : memref<2x10x10x16xf32, #tpu.memory_space<vmem>>, vector<2x8x8x16xf32>
    %42 = vector.shape_cast %41 : vector<2x8x8x16xf32> to vector<128x16xf32>
    %c0_63 = arith.constant 0 : index
    %c1_64 = arith.constant 1 : index
    %c0_65 = arith.constant 0 : index
    %c0_66 = arith.constant 0 : index
    %43 = vector.load %arg16[%c0_63, %c1_64, %c0_65, %c0_66] : memref<2x10x10x16xf32, #tpu.memory_space<vmem>>, vector<2x8x8x16xf32>
    %44 = vector.shape_cast %43 : vector<2x8x8x16xf32> to vector<128x16xf32>
    %c0_67 = arith.constant 0 : index
    %c1_68 = arith.constant 1 : index
    %c1_69 = arith.constant 1 : index
    %c0_70 = arith.constant 0 : index
    %45 = vector.load %arg16[%c0_67, %c1_68, %c1_69, %c0_70] : memref<2x10x10x16xf32, #tpu.memory_space<vmem>>, vector<2x8x8x16xf32>
    %46 = vector.shape_cast %45 : vector<2x8x8x16xf32> to vector<128x16xf32>
    %c0_71 = arith.constant 0 : index
    %c1_72 = arith.constant 1 : index
    %c2_73 = arith.constant 2 : index
    %c0_74 = arith.constant 0 : index
    %47 = vector.load %arg16[%c0_71, %c1_72, %c2_73, %c0_74] : memref<2x10x10x16xf32, #tpu.memory_space<vmem>>, vector<2x8x8x16xf32>
    %48 = vector.shape_cast %47 : vector<2x8x8x16xf32> to vector<128x16xf32>
    %c0_75 = arith.constant 0 : index
    %c2_76 = arith.constant 2 : index
    %c0_77 = arith.constant 0 : index
    %c0_78 = arith.constant 0 : index
    %49 = vector.load %arg16[%c0_75, %c2_76, %c0_77, %c0_78] : memref<2x10x10x16xf32, #tpu.memory_space<vmem>>, vector<2x8x8x16xf32>
    %50 = vector.shape_cast %49 : vector<2x8x8x16xf32> to vector<128x16xf32>
    %c0_79 = arith.constant 0 : index
    %c2_80 = arith.constant 2 : index
    %c1_81 = arith.constant 1 : index
    %c0_82 = arith.constant 0 : index
    %51 = vector.load %arg16[%c0_79, %c2_80, %c1_81, %c0_82] : memref<2x10x10x16xf32, #tpu.memory_space<vmem>>, vector<2x8x8x16xf32>
    %52 = vector.shape_cast %51 : vector<2x8x8x16xf32> to vector<128x16xf32>
    %c0_83 = arith.constant 0 : index
    %c2_84 = arith.constant 2 : index
    %c2_85 = arith.constant 2 : index
    %c0_86 = arith.constant 0 : index
    %53 = vector.load %arg16[%c0_83, %c2_84, %c2_85, %c0_86] : memref<2x10x10x16xf32, #tpu.memory_space<vmem>>, vector<2x8x8x16xf32>
    %54 = vector.shape_cast %53 : vector<2x8x8x16xf32> to vector<128x16xf32>
    %55 = tpu.concatenate %38, %40, %42, %44, %46, %48, %50, %52, %54 in 1 : vector<128x16xf32>, vector<128x16xf32>, vector<128x16xf32>, vector<128x16xf32>, vector<128x16xf32>, vector<128x16xf32>, vector<128x16xf32>, vector<128x16xf32>, vector<128x16xf32> -> vector<128x144xf32>
    %c0_87 = arith.constant 0 : index
    %c0_88 = arith.constant 0 : index
    %56 = vector.load %arg4[%c0_87, %c0_88] : memref<144x32xf32, #tpu.memory_space<vmem>>, vector<144x32xf32>
    %cst_89 = arith.constant dense<0.000000e+00> : vector<128x32xf32>
    %57 = tpu.matmul %55, %56, %cst_89 {dimension_numbers = #tpu.dot_dimension_numbers<[1], [0], [0], [1], [0, 0, 1, 1], [], []>} : vector<128x144xf32>, vector<144x32xf32>, vector<128x32xf32> -> vector<128x32xf32>
    %c0_90 = arith.constant 0 : index
    %c0_91 = arith.constant 0 : index
    %58 = vector.load %arg5[%c0_90, %c0_91] : memref<1x32xf32, #tpu.memory_space<vmem>>, vector<1x32xf32>
    %59 = vector.broadcast %58 : vector<1x32xf32> to vector<128x32xf32>
    %60 = arith.mulf %57, %59 : vector<128x32xf32>
    %c0_92 = arith.constant 0 : index
    %c0_93 = arith.constant 0 : index
    %61 = vector.load %arg6[%c0_92, %c0_93] : memref<1x32xf32, #tpu.memory_space<vmem>>, vector<1x32xf32>
    %62 = vector.broadcast %61 : vector<1x32xf32> to vector<128x32xf32>
    %63 = arith.addf %60, %62 : vector<128x32xf32>
    %cst_94 = arith.constant 0.000000e+00 : f32
    %64 = vector.broadcast %cst_94 : f32 to vector<128x32xf32>
    %65 = arith.maximumf %63, %64 : vector<128x32xf32>
    %66 = vector.shape_cast %65 : vector<128x32xf32> to vector<64x2x32xf32>
    %cst_95 = arith.constant dense<0xFF800000> : vector<64x32xf32>
    %67 = vector.multi_reduction <maximumf>, %66, %cst_95 [1] : vector<64x2x32xf32> to vector<64x32xf32>
    %68 = vector.shape_cast %67 : vector<64x32xf32> to vector<8x2x4x32xf32>
    %cst_96 = arith.constant dense<0xFF800000> : vector<8x4x32xf32>
    %69 = vector.multi_reduction <maximumf>, %68, %cst_96 [1] : vector<8x2x4x32xf32> to vector<8x4x32xf32>
    %70 = vector.shape_cast %69 : vector<8x4x32xf32> to vector<2x4x4x32xf32>
    %cst_97 = arith.constant 0.000000e+00 : f32
    %71 = vector.broadcast %cst_97 : f32 to vector<2x6x6x32xf32>
    %c0_98 = arith.constant 0 : index
    %c0_99 = arith.constant 0 : index
    %c0_100 = arith.constant 0 : index
    %c0_101 = arith.constant 0 : index
    %72 = vector.load %arg17[%c0_98, %c0_99, %c0_100, %c0_101] : memref<2x6x6x32xf32, #tpu.memory_space<vmem>>, vector<2x6x6x32xf32>
    tpu.vector_store %arg17[%c0_98, %c0_99, %c0_100, %c0_101], %71 {strides = array<i32>} : memref<2x6x6x32xf32, #tpu.memory_space<vmem>>, vector<2x6x6x32xf32>,
    %c0_102 = arith.constant 0 : index
    %c1_103 = arith.constant 1 : index
    %c1_104 = arith.constant 1 : index
    %c0_105 = arith.constant 0 : index
    %73 = vector.load %arg17[%c0_102, %c1_103, %c1_104, %c0_105] : memref<2x6x6x32xf32, #tpu.memory_space<vmem>>, vector<2x4x4x32xf32>
    tpu.vector_store %arg17[%c0_102, %c1_103, %c1_104, %c0_105], %70 {strides = array<i32>} : memref<2x6x6x32xf32, #tpu.memory_space<vmem>>, vector<2x4x4x32xf32>,
    %c0_106 = arith.constant 0 : index
    %c0_107 = arith.constant 0 : index
    %c0_108 = arith.constant 0 : index
    %c0_109 = arith.constant 0 : index
    %74 = vector.load %arg17[%c0_106, %c0_107, %c0_108, %c0_109] : memref<2x6x6x32xf32, #tpu.memory_space<vmem>>, vector<2x4x4x32xf32>
    %75 = vector.shape_cast %74 : vector<2x4x4x32xf32> to vector<32x32xf32>
    %c0_110 = arith.constant 0 : index
    %c0_111 = arith.constant 0 : index
    %c1_112 = arith.constant 1 : index
    %c0_113 = arith.constant 0 : index
    %76 = vector.load %arg17[%c0_110, %c0_111, %c1_112, %c0_113] : memref<2x6x6x32xf32, #tpu.memory_space<vmem>>, vector<2x4x4x32xf32>
    %77 = vector.shape_cast %76 : vector<2x4x4x32xf32> to vector<32x32xf32>
    %c0_114 = arith.constant 0 : index
    %c0_115 = arith.constant 0 : index
    %c2_116 = arith.constant 2 : index
    %c0_117 = arith.constant 0 : index
    %78 = vector.load %arg17[%c0_114, %c0_115, %c2_116, %c0_117] : memref<2x6x6x32xf32, #tpu.memory_space<vmem>>, vector<2x4x4x32xf32>
    %79 = vector.shape_cast %78 : vector<2x4x4x32xf32> to vector<32x32xf32>
    %c0_118 = arith.constant 0 : index
    %c1_119 = arith.constant 1 : index
    %c0_120 = arith.constant 0 : index
    %c0_121 = arith.constant 0 : index
    %80 = vector.load %arg17[%c0_118, %c1_119, %c0_120, %c0_121] : memref<2x6x6x32xf32, #tpu.memory_space<vmem>>, vector<2x4x4x32xf32>
    %81 = vector.shape_cast %80 : vector<2x4x4x32xf32> to vector<32x32xf32>
    %c0_122 = arith.constant 0 : index
    %c1_123 = arith.constant 1 : index
    %c1_124 = arith.constant 1 : index
    %c0_125 = arith.constant 0 : index
    %82 = vector.load %arg17[%c0_122, %c1_123, %c1_124, %c0_125] : memref<2x6x6x32xf32, #tpu.memory_space<vmem>>, vector<2x4x4x32xf32>
    %83 = vector.shape_cast %82 : vector<2x4x4x32xf32> to vector<32x32xf32>
    %c0_126 = arith.constant 0 : index
    %c1_127 = arith.constant 1 : index
    %c2_128 = arith.constant 2 : index
    %c0_129 = arith.constant 0 : index
    %84 = vector.load %arg17[%c0_126, %c1_127, %c2_128, %c0_129] : memref<2x6x6x32xf32, #tpu.memory_space<vmem>>, vector<2x4x4x32xf32>
    %85 = vector.shape_cast %84 : vector<2x4x4x32xf32> to vector<32x32xf32>
    %c0_130 = arith.constant 0 : index
    %c2_131 = arith.constant 2 : index
    %c0_132 = arith.constant 0 : index
    %c0_133 = arith.constant 0 : index
    %86 = vector.load %arg17[%c0_130, %c2_131, %c0_132, %c0_133] : memref<2x6x6x32xf32, #tpu.memory_space<vmem>>, vector<2x4x4x32xf32>
    %87 = vector.shape_cast %86 : vector<2x4x4x32xf32> to vector<32x32xf32>
    %c0_134 = arith.constant 0 : index
    %c2_135 = arith.constant 2 : index
    %c1_136 = arith.constant 1 : index
    %c0_137 = arith.constant 0 : index
    %88 = vector.load %arg17[%c0_134, %c2_135, %c1_136, %c0_137] : memref<2x6x6x32xf32, #tpu.memory_space<vmem>>, vector<2x4x4x32xf32>
    %89 = vector.shape_cast %88 : vector<2x4x4x32xf32> to vector<32x32xf32>
    %c0_138 = arith.constant 0 : index
    %c2_139 = arith.constant 2 : index
    %c2_140 = arith.constant 2 : index
    %c0_141 = arith.constant 0 : index
    %90 = vector.load %arg17[%c0_138, %c2_139, %c2_140, %c0_141] : memref<2x6x6x32xf32, #tpu.memory_space<vmem>>, vector<2x4x4x32xf32>
    %91 = vector.shape_cast %90 : vector<2x4x4x32xf32> to vector<32x32xf32>
    %92 = tpu.concatenate %75, %77, %79, %81, %83, %85, %87, %89, %91 in 1 : vector<32x32xf32>, vector<32x32xf32>, vector<32x32xf32>, vector<32x32xf32>, vector<32x32xf32>, vector<32x32xf32>, vector<32x32xf32>, vector<32x32xf32>, vector<32x32xf32> -> vector<32x288xf32>
    %c0_142 = arith.constant 0 : index
    %c0_143 = arith.constant 0 : index
    %93 = vector.load %arg7[%c0_142, %c0_143] : memref<288x64xf32, #tpu.memory_space<vmem>>, vector<288x64xf32>
    %cst_144 = arith.constant dense<0.000000e+00> : vector<32x64xf32>
    %94 = tpu.matmul %92, %93, %cst_144 {dimension_numbers = #tpu.dot_dimension_numbers<[1], [0], [0], [1], [0, 0, 1, 1], [], []>} : vector<32x288xf32>, vector<288x64xf32>, vector<32x64xf32> -> vector<32x64xf32>
    %c0_145 = arith.constant 0 : index
    %c0_146 = arith.constant 0 : index
    %95 = vector.load %arg8[%c0_145, %c0_146] : memref<1x64xf32, #tpu.memory_space<vmem>>, vector<1x64xf32>
    %96 = vector.broadcast %95 : vector<1x64xf32> to vector<32x64xf32>
    %97 = arith.mulf %94, %96 : vector<32x64xf32>
    %c0_147 = arith.constant 0 : index
    %c0_148 = arith.constant 0 : index
    %98 = vector.load %arg9[%c0_147, %c0_148] : memref<1x64xf32, #tpu.memory_space<vmem>>, vector<1x64xf32>
    %99 = vector.broadcast %98 : vector<1x64xf32> to vector<32x64xf32>
    %100 = arith.addf %97, %99 : vector<32x64xf32>
    %cst_149 = arith.constant 0.000000e+00 : f32
    %101 = vector.broadcast %cst_149 : f32 to vector<32x64xf32>
    %102 = arith.maximumf %100, %101 : vector<32x64xf32>
    %103 = vector.shape_cast %102 : vector<32x64xf32> to vector<16x2x64xf32>
    %cst_150 = arith.constant dense<0xFF800000> : vector<16x64xf32>
    %104 = vector.multi_reduction <maximumf>, %103, %cst_150 [1] : vector<16x2x64xf32> to vector<16x64xf32>
    %105 = vector.shape_cast %104 : vector<16x64xf32> to vector<4x2x2x64xf32>
    %cst_151 = arith.constant dense<0xFF800000> : vector<4x2x64xf32>
    %106 = vector.multi_reduction <maximumf>, %105, %cst_151 [1] : vector<4x2x2x64xf32> to vector<4x2x64xf32>
    %107 = vector.shape_cast %106 : vector<4x2x64xf32> to vector<2x2x2x64xf32>
    %cst_152 = arith.constant 0.000000e+00 : f32
    %108 = vector.broadcast %cst_152 : f32 to vector<2x4x4x64xf32>
    %c0_153 = arith.constant 0 : index
    %c0_154 = arith.constant 0 : index
    %c0_155 = arith.constant 0 : index
    %c0_156 = arith.constant 0 : index
    %109 = vector.load %arg18[%c0_153, %c0_154, %c0_155, %c0_156] : memref<2x4x4x64xf32, #tpu.memory_space<vmem>>, vector<2x4x4x64xf32>
    tpu.vector_store %arg18[%c0_153, %c0_154, %c0_155, %c0_156], %108 {strides = array<i32>} : memref<2x4x4x64xf32, #tpu.memory_space<vmem>>, vector<2x4x4x64xf32>,
    %c0_157 = arith.constant 0 : index
    %c1_158 = arith.constant 1 : index
    %c1_159 = arith.constant 1 : index
    %c0_160 = arith.constant 0 : index
    %110 = vector.load %arg18[%c0_157, %c1_158, %c1_159, %c0_160] : memref<2x4x4x64xf32, #tpu.memory_space<vmem>>, vector<2x2x2x64xf32>
    tpu.vector_store %arg18[%c0_157, %c1_158, %c1_159, %c0_160], %107 {strides = array<i32>} : memref<2x4x4x64xf32, #tpu.memory_space<vmem>>, vector<2x2x2x64xf32>,
    %c0_161 = arith.constant 0 : index
    %c0_162 = arith.constant 0 : index
    %c0_163 = arith.constant 0 : index
    %c0_164 = arith.constant 0 : index
    %111 = vector.load %arg18[%c0_161, %c0_162, %c0_163, %c0_164] : memref<2x4x4x64xf32, #tpu.memory_space<vmem>>, vector<2x2x2x64xf32>
    %112 = vector.shape_cast %111 : vector<2x2x2x64xf32> to vector<8x64xf32>
    %c0_165 = arith.constant 0 : index
    %c0_166 = arith.constant 0 : index
    %c1_167 = arith.constant 1 : index
    %c0_168 = arith.constant 0 : index
    %113 = vector.load %arg18[%c0_165, %c0_166, %c1_167, %c0_168] : memref<2x4x4x64xf32, #tpu.memory_space<vmem>>, vector<2x2x2x64xf32>
    %114 = vector.shape_cast %113 : vector<2x2x2x64xf32> to vector<8x64xf32>
    %c0_169 = arith.constant 0 : index
    %c0_170 = arith.constant 0 : index
    %c2_171 = arith.constant 2 : index
    %c0_172 = arith.constant 0 : index
    %115 = vector.load %arg18[%c0_169, %c0_170, %c2_171, %c0_172] : memref<2x4x4x64xf32, #tpu.memory_space<vmem>>, vector<2x2x2x64xf32>
    %116 = vector.shape_cast %115 : vector<2x2x2x64xf32> to vector<8x64xf32>
    %c0_173 = arith.constant 0 : index
    %c1_174 = arith.constant 1 : index
    %c0_175 = arith.constant 0 : index
    %c0_176 = arith.constant 0 : index
    %117 = vector.load %arg18[%c0_173, %c1_174, %c0_175, %c0_176] : memref<2x4x4x64xf32, #tpu.memory_space<vmem>>, vector<2x2x2x64xf32>
    %118 = vector.shape_cast %117 : vector<2x2x2x64xf32> to vector<8x64xf32>
    %c0_177 = arith.constant 0 : index
    %c1_178 = arith.constant 1 : index
    %c1_179 = arith.constant 1 : index
    %c0_180 = arith.constant 0 : index
    %119 = vector.load %arg18[%c0_177, %c1_178, %c1_179, %c0_180] : memref<2x4x4x64xf32, #tpu.memory_space<vmem>>, vector<2x2x2x64xf32>
    %120 = vector.shape_cast %119 : vector<2x2x2x64xf32> to vector<8x64xf32>
    %c0_181 = arith.constant 0 : index
    %c1_182 = arith.constant 1 : index
    %c2_183 = arith.constant 2 : index
    %c0_184 = arith.constant 0 : index
    %121 = vector.load %arg18[%c0_181, %c1_182, %c2_183, %c0_184] : memref<2x4x4x64xf32, #tpu.memory_space<vmem>>, vector<2x2x2x64xf32>
    %122 = vector.shape_cast %121 : vector<2x2x2x64xf32> to vector<8x64xf32>
    %c0_185 = arith.constant 0 : index
    %c2_186 = arith.constant 2 : index
    %c0_187 = arith.constant 0 : index
    %c0_188 = arith.constant 0 : index
    %123 = vector.load %arg18[%c0_185, %c2_186, %c0_187, %c0_188] : memref<2x4x4x64xf32, #tpu.memory_space<vmem>>, vector<2x2x2x64xf32>
    %124 = vector.shape_cast %123 : vector<2x2x2x64xf32> to vector<8x64xf32>
    %c0_189 = arith.constant 0 : index
    %c2_190 = arith.constant 2 : index
    %c1_191 = arith.constant 1 : index
    %c0_192 = arith.constant 0 : index
    %125 = vector.load %arg18[%c0_189, %c2_190, %c1_191, %c0_192] : memref<2x4x4x64xf32, #tpu.memory_space<vmem>>, vector<2x2x2x64xf32>
    %126 = vector.shape_cast %125 : vector<2x2x2x64xf32> to vector<8x64xf32>
    %c0_193 = arith.constant 0 : index
    %c2_194 = arith.constant 2 : index
    %c2_195 = arith.constant 2 : index
    %c0_196 = arith.constant 0 : index
    %127 = vector.load %arg18[%c0_193, %c2_194, %c2_195, %c0_196] : memref<2x4x4x64xf32, #tpu.memory_space<vmem>>, vector<2x2x2x64xf32>
    %128 = vector.shape_cast %127 : vector<2x2x2x64xf32> to vector<8x64xf32>
    %129 = tpu.concatenate %112, %114, %116, %118, %120, %122, %124, %126, %128 in 1 : vector<8x64xf32>, vector<8x64xf32>, vector<8x64xf32>, vector<8x64xf32>, vector<8x64xf32>, vector<8x64xf32>, vector<8x64xf32>, vector<8x64xf32>, vector<8x64xf32> -> vector<8x576xf32>
    %c0_197 = arith.constant 0 : index
    %c0_198 = arith.constant 0 : index
    %130 = vector.load %arg10[%c0_197, %c0_198] : memref<576x128xf32, #tpu.memory_space<vmem>>, vector<576x128xf32>
    %cst_199 = arith.constant dense<0.000000e+00> : vector<8x128xf32>
    %131 = tpu.matmul %129, %130, %cst_199 {dimension_numbers = #tpu.dot_dimension_numbers<[1], [0], [0], [1], [0, 0, 1, 1], [], []>} : vector<8x576xf32>, vector<576x128xf32>, vector<8x128xf32> -> vector<8x128xf32>
    %c0_200 = arith.constant 0 : index
    %c0_201 = arith.constant 0 : index
    %132 = vector.load %arg11[%c0_200, %c0_201] : memref<1x128xf32, #tpu.memory_space<vmem>>, vector<1x128xf32>
    %133 = vector.broadcast %132 : vector<1x128xf32> to vector<8x128xf32>
    %134 = arith.mulf %131, %133 : vector<8x128xf32>
    %c0_202 = arith.constant 0 : index
    %c0_203 = arith.constant 0 : index
    %135 = vector.load %arg12[%c0_202, %c0_203] : memref<1x128xf32, #tpu.memory_space<vmem>>, vector<1x128xf32>
    %136 = vector.broadcast %135 : vector<1x128xf32> to vector<8x128xf32>
    %137 = arith.addf %134, %136 : vector<8x128xf32>
    %cst_204 = arith.constant 0.000000e+00 : f32
    %138 = vector.broadcast %cst_204 : f32 to vector<8x128xf32>
    %139 = arith.maximumf %137, %138 : vector<8x128xf32>
    %140 = vector.shape_cast %139 : vector<8x128xf32> to vector<2x4x128xf32>
    %cst_205 = arith.constant dense<0xFF800000> : vector<2x128xf32>
    %141 = vector.multi_reduction <maximumf>, %140, %cst_205 [1] : vector<2x4x128xf32> to vector<2x128xf32>
    %c0_206 = arith.constant 0 : index
    %c0_207 = arith.constant 0 : index
    %142 = vector.load %arg13[%c0_206, %c0_207] : memref<128x10xf32, #tpu.memory_space<vmem>>, vector<128x10xf32>
    %cst_208 = arith.constant dense<0.000000e+00> : vector<2x10xf32>
    %143 = tpu.matmul %141, %142, %cst_208 {dimension_numbers = #tpu.dot_dimension_numbers<[1], [0], [0], [1], [0, 0, 1, 1], [], []>} : vector<2x128xf32>, vector<128x10xf32>, vector<2x10xf32> -> vector<2x10xf32>
    %c0_209 = arith.constant 0 : index
    %c0_210 = arith.constant 0 : index
    %144 = vector.load %arg14[%c0_209, %c0_210] : memref<1x10xf32, #tpu.memory_space<vmem>>, vector<1x10xf32>
    %145 = vector.broadcast %144 : vector<1x10xf32> to vector<2x10xf32>
    %146 = arith.addf %143, %145 : vector<2x10xf32>
    %c0_211 = arith.constant 0 : index
    %c0_212 = arith.constant 0 : index
    %147 = vector.load %arg15[%c0_211, %c0_212] : memref<2x10xf32, #tpu.memory_space<vmem>>, vector<2x10xf32>
    tpu.vector_store %arg15[%c0_211, %c0_212], %146 {strides = array<i32>} : memref<2x10xf32, #tpu.memory_space<vmem>>, vector<2x10xf32>,
    return
  }
}

</mosaic_0001>

<bundles_post_ra>
// kernel: cnn_backbone_forward.1
= control target key start
LH: loop header
LB: loop body
LE: loop exit
PB: predicated region body
PF: predicated region fallthrough
CT: control target
= control target key end

     0   :  { %s12657_s22 = smov 6   ;;  %s12658_s23 = smov 3   ;;  %s19070_s0 = inlined_call_operand.vmem [shape: f32[2,18,18,3], index: 0, kind: input, shape index: {}]   ;;  %s19071_s1 = inlined_call_operand.vmem [shape: f32[27,16], index: 1, kind: input, shape index: {}]   ;;  %s19072_s2 = inlined_call_operand.vmem [shape: f32[1,16], index: 2, kind: input, shape index: {}]   ;;  %s19073_s3 = inlined_call_operand.vmem [shape: f32[1,16], index: 3, kind: input, shape index: {}]   ;;  %s19074_s4 = inlined_call_operand.vmem [shape: f32[144,32], index: 4, kind: input, shape index: {}]   ;;  %s19075_s5 = inlined_call_operand.vmem [shape: f32[1,32], index: 5, kind: input, shape index: {}]   ;;  %s19076_s6 = inlined_call_operand.vmem [shape: f32[1,32], index: 6, kind: input, shape index: {}]   ;;  %s19077_s7 = inlined_call_operand.vmem [shape: f32[288,64], index: 7, kind: input, shape index: {}]   ;;  %s19078_s8 = inlined_call_operand.vmem [shape: f32[1,64], index: 8, kind: input, shape index: {}]   ;;  %s19079_s9 = inlined_call_operand.vmem [shape: f32[1,64], index: 9, kind: input, shape index: {}]   ;;  %s19080_s10 = inlined_call_operand.vmem [shape: f32[576,128], index: 10, kind: input, shape index: {}]   ;;  %s19081_s11 = inlined_call_operand.vmem [shape: f32[1,128], index: 11, kind: input, shape index: {}]   ;;  %s19082_s12 = inlined_call_operand.vmem [shape: f32[1,128], index: 12, kind: input, shape index: {}]   ;;  %s19083_s13 = inlined_call_operand.vmem [shape: f32[128,10], index: 13, kind: input, shape index: {}]   ;;  %s19084_s14 = inlined_call_operand.vmem [shape: f32[1,10], index: 14, kind: input, shape index: {}]   ;;  %s19085_s15 = inlined_call_operand.hbm [shape: f32[2,10], index: 15, kind: output, shape index: {}]  }
   0x1   :  { %v179_v0 = vld [vmem:[%s19070_s0 + $0x2] sm:$0xff]  ;;  %v180_v2 = vld [vmem:[%s19070_s0 + $0xa] sm:$0xff]  ;;  %v12780_v5 = vld [vmem:[%s19070_s0 + $0x18] sm:$0xff]  ;;  %s12659_s17 = smov 9  }
   0x2   :  { %v115_v1 = vld [vmem:[%s19070_s0 + $0x1] sm:$0xff]  ;;  %949 = vrot.lane.b32.xlu1 %v179_v0, %s12657_s22  ;;  %v116_v3 = vld [vmem:[%s19070_s0 + $0x9] sm:$0xff]  ;;  %v117_v6 = vld [vmem:[%s19070_s0 + $0x19] sm:$0xff] }
   0x3   :  { %693 = vrot.lane.b32.xlu0 %v115_v1, %s12658_s23  ;;  %v12775_v4 = vld [vmem:[%s19070_s0 + $0x20] sm:$0xff] }
   0x6   :  { %951 = vrot.lane.b32.xlu1 %v180_v2, %s12657_s22 }
   0x7   :  { %695 = vrot.lane.b32.xlu0 %v116_v3, %s12658_s23 }
   0xa   :  { %1207 = vrot.lane.b32.xlu1 %v12775_v4, %s12659_s17 }
   0xb   :  { %1205 = vrot.lane.b32.xlu0 %v12780_v5, %s12659_s17 }
   0xc   :  { %20 = vsyncpa [#allocation6], 0  ;;  %s12660_s20 = smov 12   ;;  %v11449_v7 = vld [vmem:[%s19070_s0 + $0x1a] sm:$0xff]  ;;  %s12661_s27 = smov 15   ;;  %v12804_v9 = vld [vmem:[%s19070_s0 + $0x30] sm:$0xff] }
   0xd   :  { %v11386_v8 = vld [vmem:[%s19070_s0 + $0x21] sm:$0xff]  ;;  %s12662_s18 = smov 18   ;;  %v3200_v11 = vld [vmem:[%s19071_s1 + $0x18] sm:$0x7]  ;;  %vm3394_vm0 = vcmask 1042432   ;;  %v3199_v14 = vld [vmem:[%s19071_s1 + $0x10] sm:$0xff] }
   0xe   :  { %697 = vrot.lane.b32.xlu1 %v117_v6, %s12658_s23  ;;  %v11450_v10 = vld [vmem:[%s19070_s0 + $0x22] sm:$0xff]  ;;  %v11577_v12 = vld [vmem:[%s19070_s0 + $0x31] sm:$0xff]  ;;  %12016 = vmatprep.subr.msk.mxu0 %vm3394_vm0, %v3200_v11  ;;  %s12663_s21 = smov 21   ;;  %v11578_v18 = vld [vmem:[%s19070_s0 + $0x39] sm:$0xff]  ;;  %s12664_s16 = smov 24   ;;  %vm2677_vm1 = vcmask 23552  }
   0xf   :  { %1461 = vrot.lane.b32.xlu0 %v117_v6, %s12660_s20  ;;  %v12824_v13 = vld [vmem:[%s19070_s0 + $0x38] sm:$0xff]  ;;  %12017 = vmatpush3.msk.msra.mxu0 %vm3394_vm0, %v3200_v11  ;;  %v3198_v15 = vld [vmem:[%s19071_s1 + $0x8] sm:$0xff]  ;;  %v3197_v16 = vld [vmem:[%s19071_s1] sm:$0xff]  ;;  %vm2742_vm2 = vcmask 48128   ;;  %vm2807_vm3 = vcmask 72704   ;;  %vm19086_vm4 = vcmask 97280  }
  0x10   :  { %12018 = vmatprep.subr.mxu0 %v3199_v14  ;;  %v11641_v17 = vld [vmem:[%s19070_s0 + $0x32] sm:$0xff]  ;;  %v11642_v19 = vld [vmem:[%s19070_s0 + $0x3a] sm:$0xff]  ;;  %v12861_v20 = vld [vmem:[%s19070_s0 + $0x48] sm:$0xff]  ;;  %vm19087_vm5 = vcmask 121856   ;;  %vm3002_vm6 = vcmask 146432   ;;  %vm3067_vm7 = vcmask 171008  }
  0x11   :  { %12019 = vmatpush3.msra.mxu0 %v3199_v14  ;;  %v11579_v21 = vld [vmem:[%s19070_s0 + $0x49] sm:$0xff]  ;;  %v11580_v24 = vld [vmem:[%s19070_s0 + $0x51] sm:$0xff]  ;;  %v12903_v26 = vld [vmem:[%s19070_s0 + $0x60] sm:$0xff]  ;;  %vm3132_vm8 = vcmask 195584   ;;  %vm3201_vm9 = vcmask 220160   ;;  %vm5397_vm10 = vcmask 123904  }
  0x12   :  { %1717 = vrot.lane.b32.xlu1 %v11449_v7, %s12661_s27  ;;  %12020 = vmatprep.subr.mxu0 %v3198_v15  ;;  %v12875_v22 = vld [vmem:[%s19070_s0 + $0x50] sm:$0xff]  ;;  %v11581_v27 = vld [vmem:[%s19070_s0 + $0x61] sm:$0xff]  ;;  %v12945_v34 = vld [vmem:[%s19070_s0 + $0x78] sm:$0xff]  ;;  %vm7190_vm11 = vcmask 130048   ;;  %vm7743_vm12 = vcmask 1041409   ;;  %vm7745_vm13 = vcmask 1042434  }
  0x13   :  { %1463 = vrot.lane.b32.xlu0 %v11386_v8, %s12660_s20  ;;  %12021 = vmatpush3.msra.mxu0 %v3198_v15  ;;  %v11643_v23 = vld [vmem:[%s19070_s0 + $0x4a] sm:$0xff]  ;;  %v11644_v25 = vld [vmem:[%s19070_s0 + $0x52] sm:$0xff]  ;;  %v11645_v29 = vld [vmem:[%s19070_s0 + $0x62] sm:$0xff]  ;;  %vm7747_vm14 = vcmask 1043459   ;;  %vm7749_vm15 = vcmask 1044484   ;;  %vm19090_vm0 = vcmask 1045509  }
  0x14   :  { %12022 = vmatprep.subr.mxu0 %v3197_v16  ;;  %v12917_v28 = vld [vmem:[%s19070_s0 + $0x68] sm:$0xff]  ;;  %v11583_v39 = vld [vmem:[%s19070_s0 + $0x79] sm:$0xff]  ;;  %v13006_v59 = vld [vmem:[%s19070_s0 + $0x90] sm:$0xff]  ;;  %s12667_s1 = smov 32   ;;  %s12668_s19 = smov 16  }
  0x15   :  { %12023 = vmatpush3.msra.mxu0 %v3197_v16  ;;  %v11582_v30 = vld [vmem:[%s19070_s0 + $0x69] sm:$0xff]  ;;  %v12963_v40 = vld [vmem:[%s19070_s0 + $0x80] sm:$0xff]  ;;  %v13037_v14 = vld [vmem:[%s19070_s0 + $0x98] sm:$0xff]  ;;  %s12670_s26 = smov 48  }
  0x16   :  { %953 = vrot.lane.b32.xlu1 %v11449_v7, %s12657_s22  ;;  %v11646_v31 = vld [vmem:[%s19070_s0 + $0x6a] sm:$0xff]  ;;  %v11647_v45 = vld [vmem:[%s19070_s0 + $0x7a] sm:$0xff]  ;;  %v11648_v51 = vld [vmem:[%s19070_s0 + $0x82] sm:$0xff] }
  0x17   :  { %699 = vrot.lane.b32.xlu0 %v11386_v8, %s12658_s23  ;;  %v11584_v46 = vld [vmem:[%s19070_s0 + $0x81] sm:$0xff] }
  0x18   :  { %v51_v54 = vld [vmem:[%s19070_s0] sm:$0xff]  ;;  %v52_v63 = vld [vmem:[%s19070_s0 + $0x8] sm:$0xff] }
  0x1a   :  { %1973 = vrot.lane.b32.xlu1 %v12804_v9, %s12662_s18 }
  0x1b   :  { %1719 = vrot.lane.b32.xlu0 %v11450_v10, %s12661_s27 }
  0x1e   :  { %1209 = vrot.lane.b32.xlu1 %v12804_v9, %s12659_s17 }
  0x1f   :  { %955 = vrot.lane.b32.xlu0 %v11450_v10, %s12657_s22 }
  0x22   :  { %2229 = vrot.lane.b32.xlu1 %v11577_v12, %s12663_s21 }
  0x23   :  { %1975 = vrot.lane.b32.xlu0 %v12824_v13, %s12662_s18 }
  0x26   :  { %1465 = vrot.lane.b32.xlu1 %v11577_v12, %s12660_s20 }
  0x27   :  { %1211 = vrot.lane.b32.xlu0 %v12824_v13, %s12659_s17 }
  0x2a   :  { %2485 = vrot.lane.b32.xlu1 %v11641_v17, %s12664_s16 }
  0x2b   :  { %2231 = vrot.lane.b32.xlu0 %v11578_v18, %s12663_s21 }
  0x2e   :  { %1467 = vrot.lane.b32.xlu1 %v11578_v18, %s12660_s20 }
  0x2f   :  { %701 = vrot.lane.b32.xlu0 %v11577_v12, %s12658_s23  ;;  %v11585_v12 = vld [vmem:[%s19070_s0 + $0x91] sm:$0xff] }
  0x32   :  { %2487 = vrot.lane.b32.xlu1 %v11642_v19, %s12664_s16 }
  0x33   :  { %1721 = vrot.lane.b32.xlu0 %v11641_v17, %s12661_s27 }
  0x36   :  { %957 = vrot.lane.b32.xlu1 %v11641_v17, %s12657_s22 }
  0x37   :  { %703 = vrot.lane.b32.xlu0 %v11578_v18, %s12658_s23 }
  0x3a   :  { %1977 = vrot.lane.b32.xlu1 %v12861_v20, %s12662_s18 }
  0x3b   :  { %1723 = vrot.lane.b32.xlu0 %v11642_v19, %s12661_s27 }
  0x3e   :  { %1213 = vrot.lane.b32.xlu1 %v12861_v20, %s12659_s17 }
  0x3f   :  { %959 = vrot.lane.b32.xlu0 %v11642_v19, %s12657_s22 }
  0x42   :  { %2233 = vrot.lane.b32.xlu1 %v11579_v21, %s12663_s21 }
  0x43   :  { %1979 = vrot.lane.b32.xlu0 %v12875_v22, %s12662_s18 }
  0x46   :  { %1469 = vrot.lane.b32.xlu1 %v11579_v21, %s12660_s20 }
  0x47   :  { %1215 = vrot.lane.b32.xlu0 %v12875_v22, %s12659_s17 }
  0x4a   :  { %2489 = vrot.lane.b32.xlu1 %v11643_v23, %s12664_s16 }
  0x4b   :  { %2235 = vrot.lane.b32.xlu0 %v11580_v24, %s12663_s21 }
  0x4e   :  { %1471 = vrot.lane.b32.xlu1 %v11580_v24, %s12660_s20 }
  0x4f   :  { %705 = vrot.lane.b32.xlu0 %v11579_v21, %s12658_s23 }
  0x52   :  { %2491 = vrot.lane.b32.xlu1 %v11644_v25, %s12664_s16 }
  0x53   :  { %1725 = vrot.lane.b32.xlu0 %v11643_v23, %s12661_s27 }
  0x56   :  { %961 = vrot.lane.b32.xlu1 %v11643_v23, %s12657_s22 }
  0x57   :  { %707 = vrot.lane.b32.xlu0 %v11580_v24, %s12658_s23 }
  0x5a   :  { %1981 = vrot.lane.b32.xlu1 %v12903_v26, %s12662_s18 }
  0x5b   :  { %1727 = vrot.lane.b32.xlu0 %v11644_v25, %s12661_s27 }
  0x5e   :  { %1217 = vrot.lane.b32.xlu1 %v12903_v26, %s12659_s17 }
  0x5f   :  { %963 = vrot.lane.b32.xlu0 %v11644_v25, %s12657_s22 }
  0x62   :  { %2237 = vrot.lane.b32.xlu1 %v11581_v27, %s12663_s21 }
  0x63   :  { %1983 = vrot.lane.b32.xlu0 %v12917_v28, %s12662_s18 }
  0x66   :  { %1473 = vrot.lane.b32.xlu1 %v11581_v27, %s12660_s20 }
  0x67   :  { %1219 = vrot.lane.b32.xlu0 %v12917_v28, %s12659_s17 }
  0x6a   :  { %2493 = vrot.lane.b32.xlu1 %v11645_v29, %s12664_s16 }
  0x6b   :  { %2239 = vrot.lane.b32.xlu0 %v11582_v30, %s12663_s21 }
  0x6e   :  { %1475 = vrot.lane.b32.xlu1 %v11582_v30, %s12660_s20 }
  0x6f   :  { %709 = vrot.lane.b32.xlu0 %v11581_v27, %s12658_s23 }
  0x72   :  { %2495 = vrot.lane.b32.xlu1 %v11646_v31, %s12664_s16 }
  0x73   :  { %1729 = vrot.lane.b32.xlu0 %v11645_v29, %s12661_s27 }
  0x74   :  { %v950_v32 = vpop.permute.xlu1 %949 }
  0x75   :  { %v694_v33 = vpop.permute.xlu0 %693 }
  0x76   :  { %965 = vrot.lane.b32.xlu1 %v11645_v29, %s12657_s22  ;;  %v2678_v55 = vsel %vm2677_vm1, %v51_v54, %v694_v33  ;;  %v11649_v29 = vld [vmem:[%s19070_s0 + $0x92] sm:$0xff] }
  0x77   :  { %711 = vrot.lane.b32.xlu0 %v11582_v30, %s12658_s23  ;;  %v2743_v58 = vsel %vm2742_vm2, %v2678_v55, %v950_v32  ;;  %v11586_v30 = vld [vmem:[%s19070_s0 + $0x99] sm:$0xff] }
  0x78   :  { %v12947_v35 = vpop.permute.xlu1 %951 }
  0x79   :  { %v696_v36 = vpop.permute.xlu0 %695 }
  0x7a   :  { %1985 = vrot.lane.b32.xlu1 %v12945_v34, %s12662_s18  ;;  %v2679_v3 = vsel %vm2677_vm1, %v52_v63, %v696_v36  ;;  %v11650_v36 = vld [vmem:[%s19070_s0 + $0x9a] sm:$0xff] }
  0x7b   :  { %1731 = vrot.lane.b32.xlu0 %v11646_v31, %s12661_s27  ;;  %v2744_v11 = vsel %vm2742_vm2, %v2679_v3, %v12947_v35 }
  0x7c   :  { %v12952_v37 = vpop.permute.xlu1 %1207 }
  0x7d   :  { %v1206_v38 = vpop.permute.xlu0 %1205  ;;  %v2809_v15 = vsel %vm2807_vm3, %v2744_v11, %v12952_v37 }
  0x7e   :  { %1221 = vrot.lane.b32.xlu1 %v12945_v34, %s12659_s17  ;;  %v2808_v60 = vsel %vm2807_vm3, %v2743_v58, %v1206_v38  ;;  %v11587_v58 = vld [vmem:[%s19070_s0 + $0xa9] sm:$0xff] }
  0x7f   :  { %967 = vrot.lane.b32.xlu0 %v11646_v31, %s12657_s22 }
  0x80   :  { %v12965_v41 = vpop.permute.xlu1 %697 }
  0x81   :  { %v1462_v42 = vpop.permute.xlu0 %1461 }
  0x82   :  { %2241 = vrot.lane.b32.xlu1 %v11583_v39, %s12663_s21  ;;  %v2873_v0 = vsel %vm19086_vm4, %v2808_v60, %v1462_v42  ;;  %v13118_v60 = vld [vmem:[%s19070_s0 + $0xb0] sm:$0xff] }
  0x83   :  { %1987 = vrot.lane.b32.xlu0 %v12963_v40, %s12662_s18 }
  0x84   :  { %v1718_v43 = vpop.permute.xlu1 %1717 }
  0x85   :  { %v1464_v44 = vpop.permute.xlu0 %1463  ;;  %v2938_v1 = vsel %vm19087_vm5, %v2873_v0, %v1718_v43  ;;  %v2680_v43 = vsel %vm2677_vm1, %v12780_v5, %v12965_v41 }
  0x86   :  { %1477 = vrot.lane.b32.xlu1 %v11583_v39, %s12660_s20  ;;  %v2874_v18 = vsel %vm19086_vm4, %v2809_v15, %v1464_v44  ;;  %v11652_v15 = vld [vmem:[%s19070_s0 + $0xb2] sm:$0xff] }
  0x87   :  { %1223 = vrot.lane.b32.xlu0 %v12963_v40, %s12659_s17 }
  0x88   :  { %v12979_v47 = vpop.permute.xlu1 %953 }
  0x89   :  { %v12981_v48 = vpop.permute.xlu0 %699  ;;  %v2745_v44 = vsel %vm2742_vm2, %v2680_v43, %v12979_v47  ;;  %v11589_v43 = vld [vmem:[%s19070_s0 + $0xc1] sm:$0xff] }
  0x8a   :  { %2497 = vrot.lane.b32.xlu1 %v11647_v45, %s12664_s16 }
  0x8b   :  { %2243 = vrot.lane.b32.xlu0 %v11584_v46, %s12663_s21 }
  0x8c   :  { %v1974_v49 = vpop.permute.xlu1 %1973 }
  0x8d   :  { %v1720_v50 = vpop.permute.xlu0 %1719  ;;  %v3003_v2 = vsel %vm3002_vm6, %v2938_v1, %v1974_v49 }
  0x8e   :  { %1479 = vrot.lane.b32.xlu1 %v11584_v46, %s12660_s20  ;;  %v2939_v19 = vsel %vm19087_vm5, %v2874_v18, %v1720_v50 }
  0x8f   :  { %713 = vrot.lane.b32.xlu0 %v11583_v39, %s12658_s23 }
  0x90   :  { %v12990_v52 = vpop.permute.xlu1 %1209 }
  0x91   :  { %v12992_v53 = vpop.permute.xlu0 %955 }
  0x92   :  { %2499 = vrot.lane.b32.xlu1 %v11648_v51, %s12664_s16 }
  0x93   :  { %1733 = vrot.lane.b32.xlu0 %v11647_v45, %s12661_s27 }
  0x94   :  { %v2230_v56 = vpop.permute.xlu1 %2229 }
  0x95   :  { %v1976_v57 = vpop.permute.xlu0 %1975  ;;  %v3068_v6 = vsel %vm3067_vm7, %v3003_v2, %v2230_v56  ;;  %v2681_v56 = vsel %vm2677_vm1, %v12775_v4, %v12981_v48 }
  0x96   :  { %969 = vrot.lane.b32.xlu1 %v11647_v45, %s12657_s22  ;;  %v3004_v21 = vsel %vm3002_vm6, %v2939_v19, %v1976_v57  ;;  %v13088_v45 = vld [vmem:[%s19070_s0 + $0xa8] sm:$0xff]  ;;  %v2746_v57 = vsel %vm2742_vm2, %v2681_v56, %v12992_v53 }
  0x97   :  { %715 = vrot.lane.b32.xlu0 %v11584_v46, %s12658_s23  ;;  %v2810_v46 = vsel %vm2807_vm3, %v2745_v44, %v12990_v52  ;;  %v13198_v44 = vld [vmem:[%s19070_s0 + $0xc8] sm:$0xff] }
  0x98   :  { %v13009_v61 = vpop.permute.xlu1 %1465 }
  0x99   :  { %v13011_v62 = vpop.permute.xlu0 %1211  ;;  %v2875_v5 = vsel %vm19086_vm4, %v2810_v46, %v13009_v61 }
  0x9a   :  { %1989 = vrot.lane.b32.xlu1 %v13006_v59, %s12662_s18  ;;  %v2811_v4 = vsel %vm2807_vm3, %v2746_v57, %v13011_v62 }
  0x9b   :  { %1735 = vrot.lane.b32.xlu0 %v11648_v51, %s12661_s27 }
  0x9c   :  { %v2486_v7 = vpop.permute.xlu1 %2485 }
  0x9d   :  { %v2232_v8 = vpop.permute.xlu0 %2231  ;;  %v3133_v10 = vsel %vm3132_vm8, %v3068_v6, %v2486_v7  ;;  %v11651_v6 = vld [vmem:[%s19070_s0 + $0xaa] sm:$0xff] }
  0x9e   :  { %1225 = vrot.lane.b32.xlu1 %v13006_v59, %s12659_s17  ;;  %12024 = vmatprep.mubr.msk.f32.mxu0 %vm3201_vm9, %v3133_v10  ;;  %v3069_v23 = vsel %vm3067_vm7, %v3004_v21, %v2232_v8  ;;  %v11588_v7 = vld [vmem:[%s19070_s0 + $0xb1] sm:$0xff] }
  0x9f   :  { %971 = vrot.lane.b32.xlu0 %v11648_v51, %s12657_s22 }
  0xa0   :  { %v1468_v16 = vpop.permute.xlu1 %1467 }
  0xa1   :  { %v13041_v17 = vpop.permute.xlu0 %701  ;;  %v2876_v63 = vsel %vm19086_vm4, %v2811_v4, %v1468_v16  ;;  %v11654_v4 = vld [vmem:[%s19070_s0 + $0xca] sm:$0xff] }
  0xa2   :  { %2245 = vrot.lane.b32.xlu1 %v11585_v12, %s12663_s21 }
  0xa3   :  { %1991 = vrot.lane.b32.xlu0 %v13037_v14, %s12662_s18 }
  0xa4   :  { %v2488_v24 = vpop.permute.xlu1 %2487 }
  0xa5   :  { %v1722_v25 = vpop.permute.xlu0 %1721  ;;  %v3134_v27 = vsel %vm3132_vm8, %v3069_v23, %v2488_v24  ;;  %v2682_v23 = vsel %vm2677_vm1, %v12804_v9, %v13041_v17 }
  0xa6   :  { %1481 = vrot.lane.b32.xlu1 %v11585_v12, %s12660_s20  ;;  %12025 = vmatmul.mubr.msk.f32.vlgmr.msra.gmra.mxu0 %vm3201_vm9, %v3134_v27  ;;  %v2940_v41 = vsel %vm19087_vm5, %v2875_v5, %v1722_v25  ;;  %v13169_v25 = vld [vmem:[%s19070_s0 + $0xc0] sm:$0xff] }
  0xa7   :  { %1227 = vrot.lane.b32.xlu0 %v13037_v14, %s12659_s17 }
  0xa8   :  { %v13061_v31 = vpop.permute.xlu1 %957 }
  0xa9   :  { %v13063_v32 = vpop.permute.xlu0 %703  ;;  %v2747_v24 = vsel %vm2742_vm2, %v2682_v23, %v13061_v31  ;;  %v11591_v23 = vld [vmem:[%s19070_s0 + $0xd9] sm:$0xff] }
  0xaa   :  { %2501 = vrot.lane.b32.xlu1 %v11649_v29, %s12664_s16 }
  0xab   :  { %2247 = vrot.lane.b32.xlu0 %v11586_v30, %s12663_s21 }
  0xac   :  { %v1978_v33 = vpop.permute.xlu1 %1977 }
  0xad   :  { %v1724_v35 = vpop.permute.xlu0 %1723  ;;  %v3005_v47 = vsel %vm3002_vm6, %v2940_v41, %v1978_v33 }
  0xae   :  { %1483 = vrot.lane.b32.xlu1 %v11586_v30, %s12660_s20  ;;  %v2941_v53 = vsel %vm19087_vm5, %v2876_v63, %v1724_v35 }
  0xaf   :  { %717 = vrot.lane.b32.xlu0 %v11585_v12, %s12658_s23 }
  0xb0   :  { %v13072_v37 = vpop.permute.xlu1 %1213 }
  0xb1   :  { %v13074_v38 = vpop.permute.xlu0 %959  ;;  %v2812_v27 = vsel %vm2807_vm3, %v2747_v24, %v13072_v37  ;;  %v11528_v24 = vld [vmem:[%s19070_s0 + $0xe0] sm:$0xff] }
  0xb2   :  { %2503 = vrot.lane.b32.xlu1 %v11650_v36, %s12664_s16 }
  0xb3   :  { %1737 = vrot.lane.b32.xlu0 %v11649_v29, %s12661_s27 }
  0xb4   :  { %v2234_v39 = vpop.permute.xlu1 %2233 }
  0xb5   :  { %v1980_v42 = vpop.permute.xlu0 %1979  ;;  %v3070_v51 = vsel %vm3067_vm7, %v3005_v47, %v2234_v39  ;;  %v2683_v39 = vsel %vm2677_vm1, %v12824_v13, %v13063_v32 }
  0xb6   :  { %973 = vrot.lane.b32.xlu1 %v11649_v29, %s12657_s22  ;;  %v3006_v0 = vsel %vm3002_vm6, %v2941_v53, %v1980_v42  ;;  %v2748_v42 = vsel %vm2742_vm2, %v2683_v39, %v13074_v38 }
  0xb7   :  { %719 = vrot.lane.b32.xlu0 %v11586_v30, %s12658_s23 }
  0xb8   :  { %v1470_v49 = vpop.permute.xlu1 %1469 }
  0xb9   :  { %v13092_v50 = vpop.permute.xlu0 %1215  ;;  %v2877_v9 = vsel %vm19086_vm4, %v2812_v27, %v1470_v49 }
  0xba   :  { %1993 = vrot.lane.b32.xlu1 %v13088_v45, %s12662_s18  ;;  %v2813_v13 = vsel %vm2807_vm3, %v2748_v42, %v13092_v50 }
  0xbb   :  { %1739 = vrot.lane.b32.xlu0 %v11650_v36, %s12661_s27 }
  0xbc   :  { %v2490_v54 = vpop.permute.xlu1 %2489 }
  0xbd   :  { %v2236_v55 = vpop.permute.xlu0 %2235  ;;  %v3135_v52 = vsel %vm3132_vm8, %v3070_v51, %v2490_v54  ;;  %v11653_v54 = vld [vmem:[%s19070_s0 + $0xc2] sm:$0xff] }
  0xbe   :  { %1229 = vrot.lane.b32.xlu1 %v13088_v45, %s12659_s17  ;;  %12027 = vmatprep.mubr.msk.f32.mxu0 %vm3201_vm9, %v3135_v52  ;;  %v3071_v1 = vsel %vm3067_vm7, %v3006_v0, %v2236_v55  ;;  %v11590_v55 = vld [vmem:[%s19070_s0 + $0xc9] sm:$0xff] }
  0xbf   :  { %975 = vrot.lane.b32.xlu0 %v11650_v36, %s12657_s22 }
  0xc0   :  { %v1472_v48 = vpop.permute.xlu1 %1471 }
  0xc1   :  { %v13122_v61 = vpop.permute.xlu0 %705  ;;  %v2878_v49 = vsel %vm19086_vm4, %v2813_v13, %v1472_v48  ;;  %v11656_v13 = vld [vmem:[%s19070_s0 + $0xe2] sm:$0xff] }
  0xc2   :  { %2249 = vrot.lane.b32.xlu1 %v11587_v58, %s12663_s21 }
  0xc3   :  { %1995 = vrot.lane.b32.xlu0 %v13118_v60, %s12662_s18 }
  0xc4   :  { %v2492_v2 = vpop.permute.xlu1 %2491 }
  0xc5   :  { %v1726_v3 = vpop.permute.xlu0 %1725  ;;  %v3136_v62 = vsel %vm3132_vm8, %v3071_v1, %v2492_v2  ;;  %v2684_v1 = vsel %vm2677_vm1, %v12861_v20, %v13122_v61 }
  0xc6   :  { %1485 = vrot.lane.b32.xlu1 %v11587_v58, %s12660_s20  ;;  %12028 = vmatmul.mubr.msk.f32.gmra.mxu0 %vm3201_vm9, %v3136_v62  ;;  %v2942_v17 = vsel %vm19087_vm5, %v2877_v9, %v1726_v3  ;;  %v11527_v3 = vld [vmem:[%s19070_s0 + $0xd8] sm:$0xff] }
  0xc7   :  { %1231 = vrot.lane.b32.xlu0 %v13118_v60, %s12659_s17 }
  0xc8   :  { %v13142_v8 = vpop.permute.xlu1 %961 }
  0xc9   :  { %v13144_v10 = vpop.permute.xlu0 %707  ;;  %v2749_v2 = vsel %vm2742_vm2, %v2684_v1, %v13142_v8  ;;  %v13345_v1 = vld [vmem:[%s19070_s0 + $0xf1] sm:$0xff] }
  0xca   :  { %2505 = vrot.lane.b32.xlu1 %v11651_v6, %s12664_s16 }
  0xcb   :  { %2251 = vrot.lane.b32.xlu0 %v11588_v7, %s12663_s21 }
  0xcc   :  { %v1982_v11 = vpop.permute.xlu1 %1981 }
  0xcd   :  { %v1728_v12 = vpop.permute.xlu0 %1727  ;;  %v3007_v31 = vsel %vm3002_vm6, %v2942_v17, %v1982_v11 }
  0xce   :  { %1487 = vrot.lane.b32.xlu1 %v11588_v7, %s12660_s20  ;;  %v2943_v38 = vsel %vm19087_vm5, %v2878_v49, %v1728_v12 }
  0xcf   :  { %721 = vrot.lane.b32.xlu0 %v11587_v58, %s12658_s23 }
  0xd0   :  { %v13153_v16 = vpop.permute.xlu1 %1217 }
  0xd1   :  { %v13155_v18 = vpop.permute.xlu0 %963  ;;  %v2814_v62 = vsel %vm2807_vm3, %v2749_v2, %v13153_v16  ;;  %v2685_v16 = vsel %vm2677_vm1, %v12875_v22, %v13144_v10  ;;  %v11530_v2 = vld [vmem:[%s19070_s0 + $0xf8] sm:$0xff] }
  0xd2   :  { %2507 = vrot.lane.b32.xlu1 %v11652_v15, %s12664_s16 }
  0xd3   :  { %1741 = vrot.lane.b32.xlu0 %v11651_v6, %s12661_s27 }
  0xd4   :  { %v2238_v19 = vpop.permute.xlu1 %2237 }
  0xd5   :  { %v1984_v21 = vpop.permute.xlu0 %1983  ;;  %v3072_v33 = vsel %vm3067_vm7, %v3007_v31, %v2238_v19 }
  0xd6   :  { %977 = vrot.lane.b32.xlu1 %v11651_v6, %s12657_s22  ;;  %v3008_v5 = vsel %vm3002_vm6, %v2943_v38, %v1984_v21  ;;  %v2750_v21 = vsel %vm2742_vm2, %v2685_v16, %v13155_v18 }
  0xd7   :  { %723 = vrot.lane.b32.xlu0 %v11588_v7, %s12658_s23 }
  0xd8   :  { %v1474_v29 = vpop.permute.xlu1 %1473 }
  0xd9   :  { %v13173_v30 = vpop.permute.xlu0 %1219  ;;  %v2879_v11 = vsel %vm19086_vm4, %v2814_v62, %v1474_v29 }
  0xda   :  { %1997 = vrot.lane.b32.xlu1 %v13169_v25, %s12662_s18  ;;  %v2815_v22 = vsel %vm2807_vm3, %v2750_v21, %v13173_v30  ;;  %v11655_v30 = vld [vmem:[%s19070_s0 + $0xda] sm:$0xff] }
  0xdb   :  { %1743 = vrot.lane.b32.xlu0 %v11652_v15, %s12661_s27 }
  0xdc   :  { %v2494_v35 = vpop.permute.xlu1 %2493 }
  0xdd   :  { %v2240_v36 = vpop.permute.xlu0 %2239  ;;  %v3137_v37 = vsel %vm3132_vm8, %v3072_v33, %v2494_v35 }
  0xde   :  { %1233 = vrot.lane.b32.xlu1 %v13169_v25, %s12659_s17  ;;  %12030 = vmatprep.mubr.msk.f32.mxu0 %vm3201_vm9, %v3137_v37  ;;  %v3073_v41 = vsel %vm3067_vm7, %v3008_v5, %v2240_v36  ;;  %v11592_v36 = vld [vmem:[%s19070_s0 + $0xe1] sm:$0xff] }
  0xdf   :  { %979 = vrot.lane.b32.xlu0 %v11652_v15, %s12657_s22 }
  0xe0   :  { %v1476_v32 = vpop.permute.xlu1 %1475 }
  0xe1   :  { %v13202_v46 = vpop.permute.xlu0 %709  ;;  %v2880_v29 = vsel %vm19086_vm4, %v2815_v22, %v1476_v32 }
  0xe2   :  { %2253 = vrot.lane.b32.xlu1 %v11589_v43, %s12663_s21 }
  0xe3   :  { %1999 = vrot.lane.b32.xlu0 %v13198_v44, %s12662_s18 }
  0xe4   :  { %v2496_v47 = vpop.permute.xlu1 %2495 }
  0xe5   :  { %v1730_v51 = vpop.permute.xlu0 %1729  ;;  %v3138_v50 = vsel %vm3132_vm8, %v3073_v41, %v2496_v47  ;;  %v2686_v41 = vsel %vm2677_vm1, %v12903_v26, %v13202_v46 }
  0xe6   :  { %1489 = vrot.lane.b32.xlu1 %v11589_v43, %s12660_s20  ;;  %12031 = vmatmul.mubr.msk.f32.gmra.mxu0 %vm3201_vm9, %v3138_v50  ;;  %v2944_v20 = vsel %vm19087_vm5, %v2879_v11, %v1730_v51  ;;  %v11529_v51 = vld [vmem:[%s19070_s0 + $0xf0] sm:$0xff] }
  0xe7   :  { %1235 = vrot.lane.b32.xlu0 %v13198_v44, %s12659_s17 }
  0xe8   :  { %v13222_v52 = vpop.permute.xlu1 %965 }
  0xe9   :  { %v13224_v56 = vpop.permute.xlu0 %711  ;;  %v2751_v47 = vsel %vm2742_vm2, %v2686_v41, %v13222_v52  ;;  %v11532_v41 = vld [vmem:[%s19070_s0 + $0x110] sm:$0xff] }
  0xea   :  { %2509 = vrot.lane.b32.xlu1 %v11653_v54, %s12664_s16 }
  0xeb   :  { %2255 = vrot.lane.b32.xlu0 %v11590_v55, %s12663_s21 }
  0xec   :  { %v1986_v57 = vpop.permute.xlu1 %1985 }
  0xed   :  { %v1732_v58 = vpop.permute.xlu0 %1731  ;;  %v3009_v61 = vsel %vm3002_vm6, %v2944_v20, %v1986_v57 }
  0xee   :  { %1491 = vrot.lane.b32.xlu1 %v11590_v55, %s12660_s20  ;;  %v2945_v18 = vsel %vm19087_vm5, %v2880_v29, %v1732_v58 }
  0xef   :  { %725 = vrot.lane.b32.xlu0 %v11589_v43, %s12658_s23 }
  0xf0   :  { %v13233_v48 = vpop.permute.xlu1 %1221 }
  0xf1   :  { %v13235_v63 = vpop.permute.xlu0 %967  ;;  %v2816_v50 = vsel %vm2807_vm3, %v2751_v47, %v13233_v48 }
  0xf2   :  { %2511 = vrot.lane.b32.xlu1 %v11654_v4, %s12664_s16 }
  0xf3   :  { %1745 = vrot.lane.b32.xlu0 %v11653_v54, %s12661_s27 }
  0xf4   :  { %v2242_v53 = vpop.permute.xlu1 %2241 }
  0xf5   :  { %v1988_v0 = vpop.permute.xlu0 %1987  ;;  %v3074_v8 = vsel %vm3067_vm7, %v3009_v61, %v2242_v53  ;;  %v2687_v53 = vsel %vm2677_vm1, %v12917_v28, %v13224_v56 }
  0xf6   :  { %981 = vrot.lane.b32.xlu1 %v11653_v54, %s12657_s22  ;;  %v3010_v9 = vsel %vm3002_vm6, %v2945_v18, %v1988_v0  ;;  %v2752_v0 = vsel %vm2742_vm2, %v2687_v53, %v13235_v63 }
  0xf7   :  { %727 = vrot.lane.b32.xlu0 %v11590_v55, %s12658_s23 }
  0xf8   :  { %v1478_v6 = vpop.permute.xlu1 %1477 }
  0xf9   :  { %v13251_v7 = vpop.permute.xlu0 %1223  ;;  %v2881_v26 = vsel %vm19086_vm4, %v2816_v50, %v1478_v6 }
  0xfa   :  { %2001 = vrot.lane.b32.xlu1 %v11527_v3, %s12662_s18  ;;  %v2817_v28 = vsel %vm2807_vm3, %v2752_v0, %v13251_v7  ;;  %v11660_v0 = vld [vmem:[%s19070_s0 + $0x112] sm:$0xff] }
  0xfb   :  { %1747 = vrot.lane.b32.xlu0 %v11654_v4, %s12661_s27 }
  0xfc   :  { %v2498_v12 = vpop.permute.xlu1 %2497 }
  0xfd   :  { %v2244_v15 = vpop.permute.xlu0 %2243  ;;  %v3139_v19 = vsel %vm3132_vm8, %v3074_v8, %v2498_v12  ;;  %v11657_v8 = vld [vmem:[%s19070_s0 + $0xf2] sm:$0xff] }
  0xfe   :  { %1237 = vrot.lane.b32.xlu1 %v11527_v3, %s12659_s17  ;;  %12033 = vmatprep.mubr.msk.f32.mxu0 %vm3201_vm9, %v3139_v19  ;;  %v3075_v17 = vsel %vm3067_vm7, %v3010_v9, %v2244_v15  ;;  %v11594_v12 = vld [vmem:[%s19070_s0 + $0xf9] sm:$0xff]  ;;  %v12665_v15 = vmov 0.0  }
  0xff   :  { %983 = vrot.lane.b32.xlu0 %v11654_v4, %s12657_s22  ;;  %7577 = vst.msk [vmem:[#allocation2 + $0x10] sm:$0xff] %vm7190_vm11, %v12665_v15  ;;  %7575 = vst.msk [vmem:[#allocation2] sm:$0xff] %vm7190_vm11, %v12665_v15  ;;  %8672 = vmatprep.subr.mxu1 %v12665_v15 }
 0x100   :  { %v1480_v10 = vpop.permute.xlu1 %1479  ;;  %7578 = vst.msk [vmem:[#allocation2 + $0x18] sm:$0x3] %vm5397_vm10, %v12665_v15  ;;  %7576 = vst.msk [vmem:[#allocation2 + $0x8] sm:$0x3] %vm5397_vm10, %v12665_v15 }
 0x101   :  { %v13276_v27 = vpop.permute.xlu0 %713  ;;  %v2882_v63 = vsel %vm19086_vm4, %v2817_v28, %v1480_v10  ;;  %7579 = vst.msk [vmem:[#allocation2 + $0x20] sm:$0xff] %vm7190_vm11, %v12665_v15  ;;  %7581 = vst.msk [vmem:[#allocation2 + $0x30] sm:$0xff] %vm7190_vm11, %v12665_v15 }
 0x102   :  { %2257 = vrot.lane.b32.xlu1 %v11591_v23, %s12663_s21  ;;  %7580 = vst.msk [vmem:[#allocation2 + $0x28] sm:$0x3] %vm5397_vm10, %v12665_v15  ;;  %7582 = vst.msk [vmem:[#allocation2 + $0x38] sm:$0x3] %vm5397_vm10, %v12665_v15  ;;  %v2688_v9 = vsel %vm2677_vm1, %v12945_v34, %v13276_v27 }
 0x103   :  { %2003 = vrot.lane.b32.xlu0 %v11528_v24, %s12662_s18  ;;  %7583 = vst.msk [vmem:[#allocation2 + $0x40] sm:$0xff] %vm7190_vm11, %v12665_v15  ;;  %7585 = vst.msk [vmem:[#allocation2 + $0x50] sm:$0xff] %vm7190_vm11, %v12665_v15 }
 0x104   :  { %v2500_v31 = vpop.permute.xlu1 %2499  ;;  %7584 = vst.msk [vmem:[#allocation2 + $0x48] sm:$0x3] %vm5397_vm10, %v12665_v15  ;;  %7586 = vst.msk [vmem:[#allocation2 + $0x58] sm:$0x3] %vm5397_vm10, %v12665_v15 }
 0x105   :  { %v1734_v33 = vpop.permute.xlu0 %1733  ;;  %v3140_v35 = vsel %vm3132_vm8, %v3075_v17, %v2500_v31  ;;  %7587 = vst.msk [vmem:[#allocation2 + $0x60] sm:$0xff] %vm7190_vm11, %v12665_v15  ;;  %7589 = vst.msk [vmem:[#allocation2 + $0x70] sm:$0xff] %vm7190_vm11, %v12665_v15  ;;  %v11531_v31 = vld [vmem:[%s19070_s0 + $0x108] sm:$0xff] }
 0x106   :  { %1493 = vrot.lane.b32.xlu1 %v11591_v23, %s12660_s20  ;;  %12034 = vmatmul.mubr.msk.f32.gmra.mxu0 %vm3201_vm9, %v3140_v35  ;;  %v2946_v46 = vsel %vm19087_vm5, %v2881_v26, %v1734_v33  ;;  %7588 = vst.msk [vmem:[#allocation2 + $0x68] sm:$0x3] %vm5397_vm10, %v12665_v15  ;;  %7590 = vst.msk [vmem:[#allocation2 + $0x78] sm:$0x3] %vm5397_vm10, %v12665_v15 }
 0x107   :  { %1239 = vrot.lane.b32.xlu0 %v11528_v24, %s12659_s17  ;;  %7591 = vst.msk [vmem:[#allocation2 + $0x80] sm:$0xff] %vm7190_vm11, %v12665_v15  ;;  %7593 = vst.msk [vmem:[#allocation2 + $0x90] sm:$0xff] %vm7190_vm11, %v12665_v15  ;;  %v11658_v24 = vld [vmem:[%s19070_s0 + $0xfa] sm:$0xff] }
 0x108   :  { %v13294_v37 = vpop.permute.xlu1 %969  ;;  %7592 = vst.msk [vmem:[#allocation2 + $0x88] sm:$0x3] %vm5397_vm10, %v12665_v15  ;;  %7594 = vst.msk [vmem:[#allocation2 + $0x98] sm:$0x3] %vm5397_vm10, %v12665_v15 }
 0x109   :  { %v13296_v39 = vpop.permute.xlu0 %715  ;;  %7595 = vst.msk [vmem:[#allocation2 + $0xa0] sm:$0xff] %vm7190_vm11, %v12665_v15  ;;  %7597 = vst.msk [vmem:[#allocation2 + $0xb0] sm:$0xff] %vm7190_vm11, %v12665_v15  ;;  %v2753_v17 = vsel %vm2742_vm2, %v2688_v9, %v13294_v37 }
 0x10a   :  { %2513 = vrot.lane.b32.xlu1 %v11655_v30, %s12664_s16  ;;  %7596 = vst.msk [vmem:[#allocation2 + $0xa8] sm:$0x3] %vm5397_vm10, %v12665_v15  ;;  %7598 = vst.msk [vmem:[#allocation2 + $0xb8] sm:$0x3] %vm5397_vm10, %v12665_v15 }
 0x10b   :  { %2259 = vrot.lane.b32.xlu0 %v11592_v36, %s12663_s21  ;;  %7599 = vst.msk [vmem:[#allocation2 + $0xc0] sm:$0xff] %vm7190_vm11, %v12665_v15  ;;  %7601 = vst.msk [vmem:[#allocation2 + $0xd0] sm:$0xff] %vm7190_vm11, %v12665_v15 }
 0x10c   :  { %v1990_v42 = vpop.permute.xlu1 %1989  ;;  %7600 = vst.msk [vmem:[#allocation2 + $0xc8] sm:$0x3] %vm5397_vm10, %v12665_v15  ;;  %7602 = vst.msk [vmem:[#allocation2 + $0xd8] sm:$0x3] %vm5397_vm10, %v12665_v15 }
 0x10d   :  { %v1736_v43 = vpop.permute.xlu0 %1735  ;;  %v3011_v52 = vsel %vm3002_vm6, %v2946_v46, %v1990_v42  ;;  %7603 = vst.msk [vmem:[#allocation2 + $0xe0] sm:$0xff] %vm7190_vm11, %v12665_v15  ;;  %7605 = vst.msk [vmem:[#allocation2 + $0xf0] sm:$0xff] %vm7190_vm11, %v12665_v15 }
 0x10e   :  { %1495 = vrot.lane.b32.xlu1 %v11592_v36, %s12660_s20  ;;  %v2947_v62 = vsel %vm19087_vm5, %v2882_v63, %v1736_v43  ;;  %7604 = vst.msk [vmem:[#allocation2 + $0xe8] sm:$0x3] %vm5397_vm10, %v12665_v15  ;;  %7606 = vst.msk [vmem:[#allocation2 + $0xf8] sm:$0x3] %vm5397_vm10, %v12665_v15 }
 0x10f   :  { %729 = vrot.lane.b32.xlu0 %v11591_v23, %s12658_s23  ;;  %7607 = vst.msk [vmem:[#allocation2 + $0x100] sm:$0xff] %vm7190_vm11, %v12665_v15  ;;  %7609 = vst.msk [vmem:[#allocation2 + $0x110] sm:$0xff] %vm7190_vm11, %v12665_v15 }
 0x110   :  { %v13305_v32 = vpop.permute.xlu1 %1225  ;;  %7608 = vst.msk [vmem:[#allocation2 + $0x108] sm:$0x3] %vm5397_vm10, %v12665_v15  ;;  %7610 = vst.msk [vmem:[#allocation2 + $0x118] sm:$0x3] %vm5397_vm10, %v12665_v15 }
 0x111   :  { %v13307_v49 = vpop.permute.xlu0 %971  ;;  %7611 = vst.msk [vmem:[#allocation2 + $0x120] sm:$0xff] %vm7190_vm11, %v12665_v15  ;;  %7613 = vst.msk [vmem:[#allocation2 + $0x130] sm:$0xff] %vm7190_vm11, %v12665_v15  ;;  %v2818_v33 = vsel %vm2807_vm3, %v2753_v17, %v13305_v32  ;;  %v2689_v32 = vsel %vm2677_vm1, %v12963_v40, %v13296_v39  ;;  %v12666_v17 = vmov 1983009808  }
 0x112   :  { %2515 = vrot.lane.b32.xlu1 %v11656_v13, %s12664_s16  ;;  %7612 = vst.msk [vmem:[#allocation2 + $0x128] sm:$0x3] %vm5397_vm10, %v12665_v15  ;;  %7614 = vst.msk [vmem:[#allocation2 + $0x138] sm:$0x3] %vm5397_vm10, %v12665_v15 }
 0x113   :  { %1749 = vrot.lane.b32.xlu0 %v11655_v30, %s12661_s27 }
 0x114   :  { %v2246_v38 = vpop.permute.xlu1 %2245 }
 0x115   :  { %v1992_v5 = vpop.permute.xlu0 %1991  ;;  %v3076_v57 = vsel %vm3067_vm7, %v3011_v52, %v2246_v38  ;;  %v2754_v38 = vsel %vm2742_vm2, %v2689_v32, %v13307_v49  ;;  %v11659_v52 = vld [vmem:[%s19070_s0 + $0x10a] sm:$0xff]  ;;  %v13612_v32 = vld [vmem:[%s19073_s3] ss:$0 sm:$0xff] }
 0x116   :  { %985 = vrot.lane.b32.xlu1 %v11655_v30, %s12657_s22  ;;  %v3012_v6 = vsel %vm3002_vm6, %v2947_v62, %v1992_v5  ;;  %v11595_v5 = vld [vmem:[%s19070_s0 + $0x109] sm:$0xff] }
 0x117   :  { %731 = vrot.lane.b32.xlu0 %v11592_v36, %s12658_s23 }
 0x118   :  { %v13323_v54 = vpop.permute.xlu1 %1481 }
 0x119   :  { %v13325_v55 = vpop.permute.xlu0 %1227  ;;  %v2883_v34 = vsel %vm19086_vm4, %v2818_v33, %v13323_v54  ;;  %v4057_v33 = vlaneseq }
 0x11a   :  { %2005 = vrot.lane.b32.xlu1 %v11529_v51, %s12662_s18  ;;  %v2819_v40 = vsel %vm2807_vm3, %v2754_v38, %v13325_v55  ;;  %v11661_v38 = vld [vmem:[%s19070_s0 + $0x122] sm:$0xff] }
 0x11b   :  { %1751 = vrot.lane.b32.xlu0 %v11656_v13, %s12661_s27 }
 0x11c   :  { %v2502_v58 = vpop.permute.xlu1 %2501 }
 0x11d   :  { %v2248_v4 = vpop.permute.xlu0 %2247  ;;  %v3141_v48 = vsel %vm3132_vm8, %v3076_v57, %v2502_v58  ;;  %v11596_v57 = vld [vmem:[%s19070_s0 + $0x111] sm:$0xff] }
 0x11e   :  { %1241 = vrot.lane.b32.xlu1 %v11529_v51, %s12659_s17  ;;  %12036 = vmatprep.mubr.msk.f32.mxu0 %vm3201_vm9, %v3141_v48  ;;  %v3077_v11 = vsel %vm3067_vm7, %v3012_v6, %v2248_v4  ;;  %v11533_v6 = vld [vmem:[%s19070_s0 + $0x120] sm:$0xff] }
 0x11f   :  { %987 = vrot.lane.b32.xlu0 %v11656_v13, %s12657_s22 }
 0x120   :  { %v13352_v56 = vpop.permute.xlu1 %1483 }
 0x121   :  { %v13354_v3 = vpop.permute.xlu0 %717  ;;  %v2884_v51 = vsel %vm19086_vm4, %v2819_v40, %v13352_v56 }
 0x122   :  { %2261 = vrot.lane.b32.xlu1 %v13345_v1, %s12663_s21  ;;  %v2690_v63 = vsel %vm2677_vm1, %v13006_v59, %v13354_v3 }
 0x123   :  { %2007 = vrot.lane.b32.xlu0 %v11530_v2, %s12662_s18 }
 0x124   :  { %v2504_v20 = vpop.permute.xlu1 %2503 }
 0x125   :  { %v13363_v61 = vpop.permute.xlu0 %1737  ;;  %v3142_v7 = vsel %vm3132_vm8, %v3077_v11, %v2504_v20 }
 0x126   :  { %1497 = vrot.lane.b32.xlu1 %v13345_v1, %s12660_s20  ;;  %12037 = vmatmul.mubr.msk.f32.gmra.mxu0 %vm3201_vm9, %v3142_v7  ;;  %v2948_v27 = vsel %vm19087_vm5, %v2883_v34, %v13363_v61 }
 0x127   :  { %1243 = vrot.lane.b32.xlu0 %v11530_v2, %s12659_s17 }
 0x128   :  { %v13457_v19 = vpop.permute.xlu1 %973 }
 0x129   :  { %v13459_v16 = vpop.permute.xlu0 %719  ;;  %v2755_v62 = vsel %vm2742_vm2, %v2690_v63, %v13457_v19 }
 0x12a   :  { %2517 = vrot.lane.b32.xlu1 %v11657_v8, %s12664_s16 }
 0x12b   :  { %2263 = vrot.lane.b32.xlu0 %v11594_v12, %s12663_s21 }
 0x12c   :  { %v1994_v21 = vpop.permute.xlu1 %1993 }
 0x12d   :  { %v1740_v23 = vpop.permute.xlu0 %1739  ;;  %v3013_v36 = vsel %vm3002_vm6, %v2948_v27, %v1994_v21 }
 0x12e   :  { %1499 = vrot.lane.b32.xlu1 %v11594_v12, %s12660_s20  ;;  %v2949_v49 = vsel %vm19087_vm5, %v2884_v51, %v1740_v23  ;;  %v2691_v23 = vsel %vm2677_vm1, %v13037_v14, %v13459_v16 }
 0x12f   :  { %733 = vrot.lane.b32.xlu0 %v13345_v1, %s12658_s23 }
 0x130   :  { %v13469_v22 = vpop.permute.xlu1 %1229 }
 0x131   :  { %v13471_v10 = vpop.permute.xlu0 %975  ;;  %v2820_v11 = vsel %vm2807_vm3, %v2755_v62, %v13469_v22  ;;  %v11597_v22 = vld [vmem:[%s19070_s0 + $0x121] sm:$0xff] }
 0x132   :  { %2519 = vrot.lane.b32.xlu1 %v11658_v24, %s12664_s16 }
 0x133   :  { %1753 = vrot.lane.b32.xlu0 %v11657_v8, %s12661_s27 }
 0x134   :  { %v2250_v29 = vpop.permute.xlu1 %2249 }
 0x135   :  { %v1996_v18 = vpop.permute.xlu0 %1995  ;;  %v3078_v37 = vsel %vm3067_vm7, %v3013_v36, %v2250_v29  ;;  %v11534_v29 = vld [vmem:[%s19070_s0 + $0x128] sm:$0xff] }
 0x136   :  { %989 = vrot.lane.b32.xlu1 %v11657_v8, %s12657_s22  ;;  %v3014_v50 = vsel %vm3002_vm6, %v2949_v49, %v1996_v18 }
 0x137   :  { %735 = vrot.lane.b32.xlu0 %v11594_v12, %s12658_s23 }
 0x138   :  { %v1486_v35 = vpop.permute.xlu1 %1485 }
 0x139   :  { %v13487_v30 = vpop.permute.xlu0 %1231  ;;  %v2885_v59 = vsel %vm19086_vm4, %v2820_v11, %v1486_v35 }
 0x13a   :  { %2009 = vrot.lane.b32.xlu1 %v11531_v31, %s12662_s18 }
 0x13b   :  { %1755 = vrot.lane.b32.xlu0 %v11658_v24, %s12661_s27 }
 0x13c   :  { %v2506_v42 = vpop.permute.xlu1 %2505 }
 0x13d   :  { %v2252_v43 = vpop.permute.xlu0 %2251  ;;  %v3143_v13 = vsel %vm3132_vm8, %v3078_v37, %v2506_v42  ;;  %v13605_v37 = vld [vmem:[%s19072_s2] ss:$0 sm:$0xff] }
 0x13e   :  { %1245 = vrot.lane.b32.xlu1 %v11531_v31, %s12659_s17  ;;  %12039 = vmatprep.mubr.msk.f32.mxu0 %vm3201_vm9, %v3143_v13  ;;  %v3079_v54 = vsel %vm3067_vm7, %v3014_v50, %v2252_v43  ;;  %v4055_v31 = vunpack.c.l.s4 %v12666_v17  ;;  %v4058_v43 = vshrl.u32 %v4057_v33, 7 }
 0x13f   :  { %991 = vrot.lane.b32.xlu0 %v11658_v24, %s12657_s22  ;;  %v2756_v24 = vsel %vm2742_vm2, %v2691_v23, %v13471_v10 }
 0x140   :  { %v1488_v39 = vpop.permute.xlu1 %1487  ;;  %v2821_v14 = vsel %vm2807_vm3, %v2756_v24, %v13487_v30  ;;  %v4056_v42 = vunpack.c.0.s8 %v4055_v31 }
 0x141   :  { %v13514_v47 = vpop.permute.xlu0 %721  ;;  %v2886_v9 = vsel %vm19086_vm4, %v2821_v14, %v1488_v39 }
 0x142   :  { %2265 = vrot.lane.b32.xlu1 %v11595_v5, %s12663_s21  ;;  %v13627_v50 = vsub.s32 %v4056_v42, %v4058_v43 }
 0x143   :  { %2011 = vrot.lane.b32.xlu0 %v11532_v41, %s12662_s18 }
 0x144   :  { %v2508_v26 = vpop.permute.xlu1 %2507 }
 0x145   :  { %v1742_v46 = vpop.permute.xlu0 %1741  ;;  %v3144_v55 = vsel %vm3132_vm8, %v3079_v54, %v2508_v26 }
 0x146   :  { %1501 = vrot.lane.b32.xlu1 %v11595_v5, %s12660_s20  ;;  %12040 = vmatmul.mubr.msk.f32.gmra.mxu0 %vm3201_vm9, %v3144_v55  ;;  %v2950_v3 = vsel %vm19087_vm5, %v2885_v59, %v1742_v46 }
 0x147   :  { %1247 = vrot.lane.b32.xlu0 %v11532_v41, %s12659_s17 }
 0x148   :  { %v13533_v58 = vpop.permute.xlu1 %977 }
 0x149   :  { %v13535_v4 = vpop.permute.xlu0 %723 }
 0x14a   :  { %2521 = vrot.lane.b32.xlu1 %v11659_v52, %s12664_s16 }
 0x14b   :  { %2267 = vrot.lane.b32.xlu0 %v11596_v57, %s12663_s21 }
 0x14c   :  { %v1998_v48 = vpop.permute.xlu1 %1997 }
 0x14d   :  { %v1744_v53 = vpop.permute.xlu0 %1743  ;;  %v3015_v7 = vsel %vm3002_vm6, %v2950_v3, %v1998_v48 }
 0x14e   :  { %1503 = vrot.lane.b32.xlu1 %v11596_v57, %s12660_s20  ;;  %v2951_v10 = vsel %vm19087_vm5, %v2886_v9, %v1744_v53 }
 0x14f   :  { %737 = vrot.lane.b32.xlu0 %v11595_v5, %s12658_s23  ;;  %v11598_v5 = vld [vmem:[%s19070_s0 + $0x129] sm:$0xff] }
 0x150   :  { %v13544_v1 = vpop.permute.xlu1 %1233 }
 0x151   :  { %v13546_v2 = vpop.permute.xlu0 %979 }
 0x152   :  { %2523 = vrot.lane.b32.xlu1 %v11660_v0, %s12664_s16 }
 0x153   :  { %1757 = vrot.lane.b32.xlu0 %v11659_v52, %s12661_s27 }
 0x154   :  { %v2254_v28 = vpop.permute.xlu1 %2253 }
 0x155   :  { %v2000_v56 = vpop.permute.xlu0 %1999  ;;  %v3080_v8 = vsel %vm3067_vm7, %v3015_v7, %v2254_v28 }
 0x156   :  { %993 = vrot.lane.b32.xlu1 %v11659_v52, %s12657_s22  ;;  %v3016_v35 = vsel %vm3002_vm6, %v2951_v10, %v2000_v56 }
 0x157   :  { %739 = vrot.lane.b32.xlu0 %v11596_v57, %s12658_s23 }
 0x158   :  { %v13562_v20 = vpop.permute.xlu1 %1489 }
 0x159   :  { %v13564_v61 = vpop.permute.xlu0 %1235 }
 0x15a   :  { %2013 = vrot.lane.b32.xlu1 %v11533_v6, %s12662_s18 }
 0x15b   :  { %1759 = vrot.lane.b32.xlu0 %v11660_v0, %s12661_s27 }
 0x15c   :  { %v2510_v12 = vpop.permute.xlu1 %2509 }
 0x15d   :  { %v2256_v19 = vpop.permute.xlu0 %2255  ;;  %v3145_v21 = vsel %vm3132_vm8, %v3080_v8, %v2510_v12 }
 0x15e   :  { %1249 = vrot.lane.b32.xlu1 %v11533_v6, %s12659_s17  ;;  %12042 = vmatprep.mubr.msk.f32.mxu0 %vm3201_vm9, %v3145_v21  ;;  %v3081_v34 = vsel %vm3067_vm7, %v3016_v35, %v2256_v19 }
 0x15f   :  { %995 = vrot.lane.b32.xlu0 %v11660_v0, %s12657_s22  ;;  %v11662_v0 = vld [vmem:[%s19070_s0 + $0x12a] sm:$0xff] }
 0x160   :  { %v13589_v16 = vpop.permute.xlu1 %1491 }
 0x161   :  { %v13591_v18 = vpop.permute.xlu0 %725 }
 0x162   :  { %2269 = vrot.lane.b32.xlu1 %v11597_v22, %s12663_s21 }
 0x163   :  { %2015 = vrot.lane.b32.xlu0 %v11534_v29, %s12662_s18 }
 0x164   :  { %v2512_v30 = vpop.permute.xlu1 %2511 }
 0x165   :  { %v13599_v27 = vpop.permute.xlu0 %1745  ;;  %v3146_v36 = vsel %vm3132_vm8, %v3081_v34, %v2512_v30  ;;  %v2692_v34 = vsel %vm2677_vm1, %v13088_v45, %v13514_v47 }
 0x166   :  { %1505 = vrot.lane.b32.xlu1 %v11597_v22, %s12660_s20  ;;  %v12026_v13 = vpop.f32.mrf.mxu0  ;;  %12043 = vmatmul.mubr.msk.f32.gmra.mxu0 %vm3201_vm9, %v3146_v36  ;;  %v2757_v42 = vsel %vm2742_vm2, %v2692_v34, %v13533_v58 }
 0x167   :  { %1251 = vrot.lane.b32.xlu0 %v11534_v29, %s12659_s17  ;;  %v3791_v41 = vmul.f32 %v12026_v13, %v13605_v37  ;;  %v11535_v29 = vld [vmem:[%s19070_s0 + $0x138] sm:$0xff] }
 0x168   :  { %v13622_v40 = vpop.permute.xlu1 %981  ;;  %v3464_v51 = vpop.f32.mrf.mxu0 }
 0x169   :  { %v13624_v39 = vpop.permute.xlu0 %727  ;;  %v3862_v49 = vadd.f32 %v13612_v32, %v3791_v41  ;;  %v3790_v54 = vmul.f32 %v13605_v37, %v3464_v51 }
 0x16a   :  { %2525 = vrot.lane.b32.xlu1 %v11661_v38, %s12664_s16 }
 0x16b   :  { %2271 = vrot.lane.b32.xlu0 %v11598_v5, %s12663_s21  ;;  %v3926_v26 = vmax.f32 %v3862_v49, 0.0  ;;  %v3861_v46 = vadd.f32 %v13612_v32, %v3790_v54 }
 0x16c   :  { %v13633_v55 = vpop.permute.xlu1 %2001 }
 0x16d   :  { %v13635_v52 = vpop.permute.xlu0 %1747  ;;  %v4070_v57 = vcombine.high %v3926_v26, %v3926_v26  ;;  %v4077_v48 = vrot.slane %v3926_v26, %v13627_v50  ;;  %v3925_v53 = vmax.f32 %v3861_v46, 0.0 }
 0x16e   :  { %1507 = vrot.lane.b32.xlu1 %v11598_v5, %s12660_s20 }
 0x16f   :  { %741 = vrot.lane.b32.xlu0 %v11597_v22, %s12658_s23  ;;  %v4084_v28 = vrot.slane %v4070_v57, %v13627_v50  ;;  %v4053_v56 = vcombine.high %v3925_v53, %v3925_v53  ;;  %v4085_v6 = vcombine.high %v4077_v48, %v4077_v48  ;;  %v4060_v59 = vrot.slane %v3925_v53, %v13627_v50  ;;  %v13696_v53 = vld [vmem:[%s19070_s0 + $0x139] sm:$0xff] }
 0x170   :  { %v13644_v63 = vpop.permute.xlu1 %1237  ;;  %v5426_v12 = vsel %vm5397_vm10, %v4077_v48, -inf }
 0x171   :  { %v13646_v62 = vpop.permute.xlu0 %983  ;;  %v4086_v11 = vcombine.high %v4084_v28, %v4084_v28  ;;  %v4067_v3 = vrot.slane %v4053_v56, %v13627_v50  ;;  %v5433_v19 = vsel %vm5397_vm10, %v4085_v6, -inf  ;;  %v5440_v21 = vsel %vm5397_vm10, %v4084_v28, -inf }
 0x172   :  { %2527 = vrot.lane.b32.xlu1 %v11662_v0, %s12664_s16  ;;  %v4068_v24 = vcombine.high %v4060_v59, %v4060_v59  ;;  %v5398_v22 = vsel %vm5397_vm10, %v4060_v59, -inf  ;;  %v5427_v31 = vrot.slane %v5426_v12, 4  ;;  %v5434_v33 = vrot.slane %v5433_v19, 4 }
 0x173   :  { %1761 = vrot.lane.b32.xlu0 %v11661_v38, %s12661_s27  ;;  %v5447_v23 = vsel %vm5397_vm10, %v4086_v11, -inf  ;;  %v4069_v14 = vcombine.high %v4067_v3, %v4067_v3  ;;  %v5412_v9 = vsel %vm5397_vm10, %v4067_v3, -inf  ;;  %v5441_v35 = vrot.slane %v5440_v21, 4 }
 0x174   :  { %v2258_v7 = vpop.permute.xlu1 %2257  ;;  %v5448_v30 = vrot.slane %v5447_v23, 4  ;;  %v5399_v36 = vrot.slane %v5398_v22, 4  ;;  %v5405_v43 = vsel %vm5397_vm10, %v4068_v24, -inf  ;;  %v5413_v13 = vrot.slane %v5412_v9, 4 }
 0x175   :  { %v13652_v8 = vpop.permute.xlu0 %2003  ;;  %v5419_v45 = vsel %vm5397_vm10, %v4069_v14, -inf  ;;  %v5428_v49 = vmax.f32 %v5426_v12, %v5427_v31  ;;  %v5435_v54 = vmax.f32 %v5433_v19, %v5434_v33  ;;  %v5442_v58 = vmax.f32 %v5440_v21, %v5441_v35 }
 0x176   :  { %997 = vrot.lane.b32.xlu1 %v11661_v38, %s12657_s22  ;;  %v2693_v38 = vsel %vm2677_vm1, %v13118_v60, %v13535_v4  ;;  %v5449_v46 = vmax.f32 %v5447_v23, %v5448_v30  ;;  %v5400_v57 = vmax.f32 %v5398_v22, %v5399_v36  ;;  %v5406_v48 = vrot.slane %v5405_v43, 4 }
 0x177   :  { %743 = vrot.lane.b32.xlu0 %v11598_v5, %s12658_s23  ;;  %v2822_v5 = vsel %vm2807_vm3, %v2757_v42, %v13544_v1  ;;  %v2758_v51 = vsel %vm2742_vm2, %v2693_v38, %v13546_v2  ;;  %v5414_v1 = vmax.f32 %v5412_v9, %v5413_v13  ;;  %v5420_v2 = vrot.slane %v5419_v45, 4  ;;  %v13730_v42 = vld [vmem:[%s19070_s0 + $0x13a] sm:$0xff] }
 0x178   :  { %v13665_v10 = vpop.permute.xlu1 %1493  ;;  %v2887_v26 = vsel %vm19086_vm4, %v2822_v5, %v13562_v20  ;;  %v2823_v60 = vsel %vm2807_vm3, %v2758_v51, %v13564_v61  ;;  %v11536_v20 = vld [vmem:[%s19070_s0 + $0x140] sm:$0xff]  ;;  %v5429_v56 = vrot.slane %v5428_v49, 2  ;;  %v5436_v6 = vrot.slane %v5435_v54, 2 }
 0x179   :  { %v13667_v17 = vpop.permute.xlu0 %1239  ;;  %v2952_v4 = vsel %vm19087_vm5, %v2887_v26, %v13599_v27  ;;  %v5443_v11 = vrot.slane %v5442_v58, 2  ;;  %v5450_v3 = vrot.slane %v5449_v46, 2  ;;  %v5401_v12 = vrot.slane %v5400_v57, 2 }
 0x17a   :  { %2017 = vrot.lane.b32.xlu1 %v11535_v29, %s12662_s18  ;;  %v3017_v61 = vsel %vm3002_vm6, %v2952_v4, %v13633_v55  ;;  %v5407_v19 = vmax.f32 %v5405_v43, %v5406_v48  ;;  %v5421_v55 = vmax.f32 %v5419_v45, %v5420_v2  ;;  %v5437_v14 = vmax.f32 %v5435_v54, %v5436_v6  ;;  %v13735_v43 = vld [vmem:[%s19070_s0 + $0x141] sm:$0xff] }
 0x17b   :  { %1763 = vrot.lane.b32.xlu0 %v11662_v0, %s12661_s27  ;;  %v3082_v21 = vsel %vm3067_vm7, %v3017_v61, %v2258_v7  ;;  %v5430_v7 = vmax.f32 %v5428_v49, %v5429_v56  ;;  %v5444_v9 = vmax.f32 %v5442_v58, %v5443_v11  ;;  %v5451_v33 = vmax.f32 %v5449_v46, %v5450_v3 }
 0x17c   :  { %v2514_v47 = vpop.permute.xlu1 %2513  ;;  %v5408_v35 = vrot.slane %v5407_v19, 2  ;;  %v5422_v30 = vrot.slane %v5421_v55, 2  ;;  %v2694_v45 = vsel %vm2677_vm1, %v13169_v25, %v13591_v18 }
 0x17d   :  { %v2260_v41 = vpop.permute.xlu0 %2259  ;;  %v3147_v24 = vsel %vm3132_vm8, %v3082_v21, %v2514_v47  ;;  %v5431_v47 = vrot.slane %v5430_v7, 1  ;;  %v5445_v51 = vrot.slane %v5444_v9, 1  ;;  %v5452_v54 = vrot.slane %v5451_v33, 1 }
 0x17e   :  { %1253 = vrot.lane.b32.xlu1 %v11535_v29, %s12659_s17  ;;  %12045 = vmatprep.mubr.msk.f32.mxu0 %vm3201_vm9, %v3147_v24  ;;  %v2759_v58 = vsel %vm2742_vm2, %v2694_v45, %v13622_v40  ;;  %v13753_v25 = vmax.f32 %v5407_v19, %v5408_v35  ;;  %v13755_v48 = vmax.f32 %v5421_v55, %v5422_v30  ;;  %v13791_v19 = vld [vmem:[%s19070_s0 + $0x142] sm:$0xff] }
 0x17f   :  { %999 = vrot.lane.b32.xlu0 %v11662_v0, %s12657_s22  ;;  %v2888_v0 = vsel %vm19086_vm4, %v2823_v60, %v13589_v16  ;;  %v5415_v16 = vrot.slane %v5414_v1, 2  ;;  %v2695_v40 = vsel %vm2677_vm1, %v13198_v44, %v13624_v39  ;;  %v2824_v60 = vsel %vm2807_vm3, %v2759_v58, %v13644_v63 }
 0x180   :  { %v13705_v28 = vpop.permute.xlu1 %1495  ;;  %v2953_v59 = vsel %vm19087_vm5, %v2888_v0, %v13635_v52  ;;  %v13767_v0 = vmax.f32 %v5430_v7, %v5431_v47  ;;  %v13771_v56 = vmax.f32 %v5444_v9, %v5445_v51  ;;  %v2760_v6 = vsel %vm2742_vm2, %v2695_v40, %v13646_v62 }
 0x181   :  { %v13707_v27 = vpop.permute.xlu0 %729  ;;  %v3018_v23 = vsel %vm3002_vm6, %v2953_v59, %v13652_v8  ;;  %v5402_v8 = vmax.f32 %v5400_v57, %v5401_v12  ;;  %v5416_v34 = vmax.f32 %v5414_v1, %v5415_v16  ;;  %v13775_v44 = vmax.f32 %v5451_v33, %v5452_v54 }
 0x182   :  { %2273 = vrot.lane.b32.xlu1 %v13696_v53, %s12663_s21  ;;  %v3083_v22 = vsel %vm3067_vm7, %v3018_v23, %v2260_v41  ;;  %v5438_v41 = vrot.slane %v5437_v14, 1  ;;  %v5410_v3 = vrot.slane %v13753_v25, 1  ;;  %v5424_v62 = vrot.slane %v13755_v48, 1 }
 0x183   :  { %2019 = vrot.lane.b32.xlu0 %v11536_v20, %s12662_s18  ;;  %v5403_v57 = vrot.slane %v5402_v8, 1  ;;  %v5417_v18 = vrot.slane %v5416_v34, 1 }
 0x184   :  { %v2516_v52 = vpop.permute.xlu1 %2515  ;;  %v13769_v61 = vmax.f32 %v5437_v14, %v5438_v41 }
 0x185   :  { %v13720_v29 = vpop.permute.xlu0 %1749  ;;  %v3148_v31 = vsel %vm3132_vm8, %v3083_v22, %v2516_v52  ;;  %v13782_v59 = vmax.f32 %v5402_v8, %v5403_v57  ;;  %v13785_v12 = vmax.f32 %v5416_v34, %v5417_v18  ;;  %v13801_v22 = vsel %vm19086_vm4, %v2824_v60, %v13665_v10 }
 0x186   :  { %1509 = vrot.lane.b32.xlu1 %v13696_v53, %s12660_s20  ;;  %v12029_v36 = vpop.f32.mrf.mxu0  ;;  %12046 = vmatmul.mubr.msk.f32.gmra.mxu0 %vm3201_vm9, %v3148_v31  ;;  %v13805_v52 = vsel %vm2807_vm3, %v2760_v6, %v13667_v17  ;;  %v11537_v6 = vld [vmem:[%s19070_s0 + $0x150] sm:$0xff] }
 0x187   :  { %1255 = vrot.lane.b32.xlu0 %v11536_v20, %s12659_s17  ;;  %v3793_v13 = vmul.f32 %v12029_v36, %v13605_v37 }
 0x188   :  { %v13738_v38 = vpop.permute.xlu1 %985  ;;  %v3474_v49 = vpop.f32.mrf.mxu0 }
 0x189   :  { %v13740_v5 = vpop.permute.xlu0 %731  ;;  %v3864_v26 = vadd.f32 %v13612_v32, %v3793_v13  ;;  %v3792_v46 = vmul.f32 %v13605_v37, %v3474_v49 }
 0x18a   :  { %2529 = vrot.lane.b32.xlu1 %v13730_v42, %s12664_s16 }
 0x18b   :  { %2275 = vrot.lane.b32.xlu0 %v13735_v43, %s12663_s21  ;;  %v3928_v4 = vmax.f32 %v3864_v26, 0.0  ;;  %v3863_v1 = vadd.f32 %v13612_v32, %v3792_v46 }
 0x18c   :  { %v13763_v2 = vpop.permute.xlu1 %2005 }
 0x18d   :  { %v13765_v20 = vpop.permute.xlu0 %1751  ;;  %v4104_v39 = vcombine.high %v3928_v4, %v3928_v4  ;;  %v4111_v63 = vrot.slane %v3928_v4, %v13627_v50  ;;  %v3927_v11 = vmax.f32 %v3863_v1, 0.0 }
 0x18e   :  { %1511 = vrot.lane.b32.xlu1 %v13735_v43, %s12660_s20 }
 0x18f   :  { %745 = vrot.lane.b32.xlu0 %v13696_v53, %s12658_s23  ;;  %v4118_v21 = vrot.slane %v4104_v39, %v13627_v50  ;;  %v4119_v16 = vcombine.high %v4111_v63, %v4111_v63  ;;  %v5482_v55 = vsel %vm5397_vm10, %v4111_v63, -inf  ;;  %v4087_v23 = vcombine.high %v3927_v11, %v3927_v11 }
 0x190   :  { %v13795_v53 = vpop.permute.xlu1 %1241  ;;  %v5483_v7 = vrot.slane %v5482_v55, 4  ;;  %v4094_v14 = vrot.slane %v3927_v11, %v13627_v50 }
 0x191   :  { %v13797_v24 = vpop.permute.xlu0 %987  ;;  %v4120_v9 = vcombine.high %v4118_v21, %v4118_v21  ;;  %v5489_v31 = vsel %vm5397_vm10, %v4119_v16, -inf  ;;  %v5496_v33 = vsel %vm5397_vm10, %v4118_v21, -inf  ;;  %v4101_v8 = vrot.slane %v4087_v23, %v13627_v50 }
 0x192   :  { %2531 = vrot.lane.b32.xlu1 %v13791_v19, %s12664_s16  ;;  %v5484_v10 = vmax.f32 %v5482_v55, %v5483_v7  ;;  %v5490_v35 = vrot.slane %v5489_v31, 4  ;;  %v5497_v17 = vrot.slane %v5496_v33, 4  ;;  %v4102_v34 = vcombine.high %v4094_v14, %v4094_v14 }
 0x193   :  { %1765 = vrot.lane.b32.xlu0 %v13730_v42, %s12661_s27  ;;  %v5503_v30 = vsel %vm5397_vm10, %v4120_v9, -inf  ;;  %v4103_v36 = vcombine.high %v4101_v8, %v4101_v8  ;;  %v5454_v13 = vsel %vm5397_vm10, %v4094_v14, -inf  ;;  %v5468_v45 = vsel %vm5397_vm10, %v4101_v8, -inf }
 0x194   :  { %v13818_v47 = vpop.permute.xlu1 %2261  ;;  %v5485_v51 = vrot.slane %v5484_v10, 2  ;;  %v5491_v49 = vmax.f32 %v5489_v31, %v5490_v35  ;;  %v5498_v54 = vmax.f32 %v5496_v33, %v5497_v17  ;;  %v5504_v58 = vrot.slane %v5503_v30, 4 }
 0x195   :  { %v13820_v41 = vpop.permute.xlu0 %2007  ;;  %v5455_v26 = vrot.slane %v5454_v13, 4  ;;  %v5461_v46 = vsel %vm5397_vm10, %v4102_v34, -inf  ;;  %v5469_v57 = vrot.slane %v5468_v45, 4  ;;  %v5475_v18 = vsel %vm5397_vm10, %v4103_v36, -inf }
 0x196   :  { %1001 = vrot.lane.b32.xlu1 %v13730_v42, %s12657_s22  ;;  %v5486_v40 = vmax.f32 %v5484_v10, %v5485_v51  ;;  %v5492_v60 = vrot.slane %v5491_v49, 2  ;;  %v5499_v4 = vrot.slane %v5498_v54, 2  ;;  %v5505_v1 = vmax.f32 %v5503_v30, %v5504_v58 }
 0x197   :  { %747 = vrot.lane.b32.xlu0 %v13735_v43, %s12658_s23  ;;  %v5456_v39 = vmax.f32 %v5454_v13, %v5455_v26  ;;  %v5462_v63 = vrot.slane %v5461_v46, 4  ;;  %v5470_v11 = vmax.f32 %v5468_v45, %v5469_v57  ;;  %v5476_v21 = vrot.slane %v5475_v18, 4  ;;  %v11538_v57 = vld [vmem:[%s19070_s0 + $0x158] sm:$0xff] }
 0x198   :  { %v13831_v16 = vpop.permute.xlu1 %1497  ;;  %v5487_v42 = vrot.slane %v5486_v40, 1  ;;  %v5493_v23 = vmax.f32 %v5491_v49, %v5492_v60  ;;  %v5500_v7 = vmax.f32 %v5498_v54, %v5499_v4  ;;  %v5506_v43 = vrot.slane %v5505_v1, 2 }
 0x199   :  { %v13833_v55 = vpop.permute.xlu0 %1243  ;;  %v5457_v14 = vrot.slane %v5456_v39, 2  ;;  %v5463_v9 = vmax.f32 %v5461_v46, %v5462_v63  ;;  %v5471_v31 = vrot.slane %v5470_v11, 2  ;;  %v5477_v33 = vmax.f32 %v5475_v18, %v5476_v21  ;;  %v13861_v46 = vld [vmem:[%s19070_s0 + $0x151] sm:$0xff] }
 0x19a   :  { %2021 = vrot.lane.b32.xlu1 %v11537_v6, %s12662_s18  ;;  %v5411_v8 = vmax.f32 %v13753_v25, %v5410_v3  ;;  %v5425_v10 = vmax.f32 %v13755_v48, %v5424_v62  ;;  %v13842_v35 = vsel %vm7190_vm11, %v13782_v59, -inf  ;;  %v5507_v17 = vmax.f32 %v5505_v1, %v5506_v43 }
 0x19b   :  { %1767 = vrot.lane.b32.xlu0 %v13791_v19, %s12661_s27  ;;  %v5458_v34 = vmax.f32 %v5456_v39, %v5457_v14  ;;  %v5464_v30 = vrot.slane %v5463_v9, 2  ;;  %v5472_v36 = vmax.f32 %v5470_v11, %v5471_v31  ;;  %v5478_v13 = vrot.slane %v5477_v33, 2 }
 0x19c   :  { %v2518_v45 = vpop.permute.xlu1 %2517  ;;  %v13846_v49 = vsel %vm7190_vm11, %v13785_v12, -inf  ;;  %v2890_v25 = vsel %vm19086_vm4, %v13805_v52, %v13705_v28  ;;  %v5488_v48 = vmax.f32 %v5486_v40, %v5487_v42  ;;  %v5494_v3 = vrot.slane %v5493_v23, 1 }
 0x19d   :  { %v2264_v51 = vpop.permute.xlu0 %2263  ;;  %v5501_v59 = vrot.slane %v5500_v7, 1  ;;  %v5459_v62 = vrot.slane %v5458_v34, 1  ;;  %v5465_v54 = vmax.f32 %v5463_v9, %v5464_v30  ;;  %v5473_v58 = vrot.slane %v5472_v36, 1 }
 0x19e   :  { %1257 = vrot.lane.b32.xlu1 %v11537_v6, %s12659_s17  ;;  %v7194_v12 = vsel %vm7190_vm11, %v5411_v8, -inf  ;;  %v2954_v26 = vsel %vm19087_vm5, %v13801_v22, %v13720_v29  ;;  %v5508_v28 = vrot.slane %v5507_v17, 1  ;;  %v5479_v52 = vmax.f32 %v5477_v33, %v5478_v13 }
 0x19f   :  { %1003 = vrot.lane.b32.xlu0 %v13791_v19, %s12657_s22  ;;  %v7200_v19 = vsel %vm7190_vm11, %v5425_v10, -inf  ;;  %v5460_v18 = vmax.f32 %v5458_v34, %v5459_v62  ;;  %v5466_v40 = vrot.slane %v5465_v54, 1  ;;  %v3019_v29 = vsel %vm3002_vm6, %v2954_v26, %v13763_v2 }
 0x1a0   :  { %v13869_v22 = vpop.permute.xlu1 %1499  ;;  %v5495_v4 = vmax.f32 %v5493_v23, %v5494_v3  ;;  %v5474_v1 = vmax.f32 %v5472_v36, %v5473_v58  ;;  %v5480_v6 = vrot.slane %v5479_v52, 1  ;;  %vm19089_vm4 = vcmask 1046534  }
 0x1a1   :  { %v13871_v60 = vpop.permute.xlu0 %733  ;;  %v2955_v39 = vsel %vm19087_vm5, %v2890_v25, %v13765_v20  ;;  %v5502_v63 = vmax.f32 %v5500_v7, %v5501_v59  ;;  %v7204_v11 = vsel %vm7190_vm11, %v5488_v48, -inf  ;;  %v5467_v21 = vmax.f32 %v5465_v54, %v5466_v40  ;;  %v11665_v25 = vld [vmem:[%s19070_s0 + $0x152] sm:$0xff] }
 0x1a2   :  { %v7192_v42 = vsel %vm7190_vm11, %v5460_v18, -inf  ;;  %2277 = vrot.lane.b32.xlu1 %v13861_v46, %s12663_s21  ;;  %v5509_v2 = vmax.f32 %v5507_v17, %v5508_v28  ;;  %v5481_v43 = vmax.f32 %v5479_v52, %v5480_v6  ;;  %v7198_v23 = vsel %vm7190_vm11, %v5474_v1, -inf  ;;  %v11602_v54 = vld [vmem:[%s19070_s0 + $0x159] sm:$0xff] }
 0x1a3   :  { %2023 = vrot.lane.b32.xlu0 %v11538_v57, %s12662_s18  ;;  %v3084_v14 = vsel %vm3067_vm7, %v3019_v29, %v13818_v47  ;;  %v7195_v20 = vsel %vm7190_vm11, %v5467_v21, -inf  ;;  %v7199_v7 = vmax.f32 %v13846_v49, %v7198_v23  ;;  %v3020_v9 = vsel %vm3002_vm6, %v2955_v39, %v13820_v41 }
 0x1a4   :  { %v3149_v31 = vsel %vm3132_vm8, %v3084_v14, %v2518_v45  ;;  %v2520_v33 = vpop.permute.xlu1 %2519  ;;  %v7193_v10 = vmax.f32 %v13842_v35, %v7192_v42  ;;  %v7196_v17 = vmax.f32 %v7194_v12, %v7195_v20  ;;  %v7201_v34 = vsel %vm7190_vm11, %v5481_v43, -inf }
 0x1a5   :  { %v13888_v8 = vpop.permute.xlu0 %1753  ;;  %v3085_v30 = vsel %vm3067_vm7, %v3020_v9, %v2264_v51  ;;  %12048 = vmatprep.mubr.msk.f32.mxu0 %vm3201_vm9, %v3149_v31  ;;  %v7207_v47 = vsel %vm7190_vm11, %v5495_v4, -inf  ;;  %v7202_v36 = vmax.f32 %v7200_v19, %v7201_v34  ;;  %vm19088_vm5 = vcmask 1047559  }
 0x1a6   :  { %v3150_v41 = vsel %vm3132_vm8, %v3085_v30, %v2520_v33  ;;  %1513 = vrot.lane.b32.xlu1 %v13861_v46, %s12660_s20  ;;  %v7203_v13 = vsel %vm7190_vm11, %v13767_v0, -inf  ;;  %v7206_v35 = vsel %vm7190_vm11, %v13769_v61, -inf  ;;  %v7210_v45 = vsel %vm7190_vm11, %v5502_v63, -inf  ;;  %v12032_v49 = vpop.f32.mrf.mxu0 }
 0x1a7   :  { %v7744_v51 = vsel %vm7743_vm12, %v7196_v17, %v7193_v10  ;;  %1259 = vrot.lane.b32.xlu0 %v11538_v57, %s12659_s17  ;;  %12049 = vmatmul.mubr.msk.f32.gmra.mxu0 %vm3201_vm9, %v3150_v41  ;;  %v7205_v48 = vmax.f32 %v7203_v13, %v7204_v11  ;;  %v7213_v3 = vsel %vm7190_vm11, %v5509_v2, -inf  ;;  %v3795_v61 = vmul.f32 %v12032_v49, %v13605_v37  ;;  %v11666_v2 = vld [vmem:[%s19070_s0 + $0x15a] sm:$0xff]  ;;  %v11539_v13 = vld [vmem:[%s19070_s0 + $0x168] sm:$0xff] }
 0x1a8   :  { %v7746_v0 = vsel %vm7745_vm13, %v7199_v7, %v7744_v51  ;;  %v13912_v59 = vpop.permute.xlu1 %989  ;;  %v7209_v58 = vsel %vm7190_vm11, %v13771_v56, -inf  ;;  %v7212_v12 = vsel %vm7190_vm11, %v13775_v44, -inf  ;;  %v7208_v26 = vmax.f32 %v7206_v35, %v7207_v47  ;;  %v3484_v52 = vpop.f32.mrf.mxu0 }
 0x1a9   :  { %v13914_v62 = vpop.permute.xlu0 %735  ;;  %v7748_v28 = vsel %vm7747_vm14, %v7202_v36, %v7746_v0  ;;  %v7211_v57 = vmax.f32 %v7209_v58, %v7210_v45  ;;  %v3866_v18 = vadd.f32 %v13612_v32, %v3795_v61  ;;  %v3794_v40 = vmul.f32 %v13605_v37, %v3484_v52  ;;  %v12596_v0 = vld [vmem:[%s19070_s0 + $0xd8] sm:$0xff]  ;;  %v12597_v52 = vld [vmem:[%s19070_s0 + $0xe0] sm:$0xff] }
 0x1aa   :  { %v7750_v19 = vsel %vm7749_vm15, %v7205_v48, %v7748_v28  ;;  %2533 = vrot.lane.b32.xlu1 %v11665_v25, %s12664_s16  ;;  %v7214_v29 = vmax.f32 %v7212_v12, %v7213_v3  ;;  %v2696_v61 = vsel %vm2677_vm1, %v12596_v0, %v13707_v27 }
 0x1ab   :  { %v7752_v4 = vsel %vm19090_vm0, %v7208_v26, %v7750_v19  ;;  %2279 = vrot.lane.b32.xlu0 %v11602_v54, %s12663_s21  ;;  %v3930_v44 = vmax.f32 %v3866_v18, 0.0  ;;  %v3865_v1 = vadd.f32 %v13612_v32, %v3794_v40  ;;  %v2761_v12 = vsel %vm2742_vm2, %v2696_v61, %v13738_v38 }
 0x1ac   :  { %v7754_v56 = vsel %vm19089_vm4, %v7211_v57, %v7752_v4  ;;  %v13932_v6 = vpop.permute.xlu1 %2009  ;;  %v2697_v57 = vsel %vm2677_vm1, %v12597_v52, %v13740_v5  ;;  %v2826_v27 = vsel %vm2807_vm3, %v2761_v12, %v13795_v53  ;;  %vm19092_vm4 = vcmask 121856   ;;  %v14039_v12 = vld [vmem:[%s19070_s0 + $0x16a] sm:$0xff] }
 0x1ad   :  { %v13934_v39 = vpop.permute.xlu0 %1755  ;;  %v7756_v63 = vsel %vm19088_vm5, %v7214_v29, %v7754_v56  ;;  %v4138_v11 = vcombine.high %v3930_v44, %v3930_v44  ;;  %v4145_v21 = vrot.slane %v3930_v44, %v13627_v50  ;;  %v3929_v42 = vmax.f32 %v3865_v1, 0.0 }
 0x1ae   :  { %7879 = vst.msk [vmem:[#allocation2 + $0x11] sm:$0xff] %vm7190_vm11, %v7756_v63  ;;  %1515 = vrot.lane.b32.xlu1 %v11602_v54, %s12660_s20  ;;  %v2762_v38 = vsel %vm2742_vm2, %v2697_v57, %v13797_v24  ;;  %vm19091_vm5 = vcmask 97280   ;;  %v14002_v24 = vld [vmem:[%s19070_s0 + $0x169] sm:$0xff]  ;;  %v14049_v57 = vld [vmem:[%s19070_s0 + $0x171] sm:$0xff] }
 0x1af   :  { %749 = vrot.lane.b32.xlu0 %v13861_v46, %s12658_s23  ;;  %v4152_v43 = vrot.slane %v4138_v11, %v13627_v50  ;;  %v4121_v23 = vcombine.high %v3929_v42, %v3929_v42  ;;  %v4153_v7 = vcombine.high %v4145_v21, %v4145_v21  ;;  %v4128_v31 = vrot.slane %v3929_v42, %v13627_v50 }
 0x1b0   :  { %v13946_v14 = vpop.permute.xlu1 %1245  ;;  %v5538_v17 = vsel %vm5397_vm10, %v4145_v21, -inf  ;;  %v2891_v44 = vsel %vm19091_vm5, %v2826_v27, %v13831_v16  ;;  %v2827_v5 = vsel %vm2807_vm3, %v2762_v38, %v13833_v55  ;;  %v72_v38 = vld [vmem:[%s19070_s0 + $0xf8] sm:$0xff] }
 0x1b1   :  { %v13948_v20 = vpop.permute.xlu0 %991  ;;  %v4154_v9 = vcombine.high %v4152_v43, %v4152_v43  ;;  %v4135_v46 = vrot.slane %v4121_v23, %v13627_v50  ;;  %v5545_v34 = vsel %vm5397_vm10, %v4153_v7, -inf  ;;  %v5552_v30 = vsel %vm5397_vm10, %v4152_v43, -inf }
 0x1b2   :  { %2535 = vrot.lane.b32.xlu1 %v11666_v2, %s12664_s16  ;;  %v4136_v36 = vcombine.high %v4128_v31, %v4128_v31  ;;  %v5510_v41 = vsel %vm5397_vm10, %v4128_v31, -inf  ;;  %v5539_v48 = vrot.slane %v5538_v17, 4  ;;  %v5553_v3 = vrot.slane %v5552_v30, 4 }
 0x1b3   :  { %1769 = vrot.lane.b32.xlu0 %v11665_v25, %s12661_s27  ;;  %v5559_v47 = vsel %vm5397_vm10, %v4154_v9, -inf  ;;  %v4137_v35 = vcombine.high %v4135_v46, %v4135_v46  ;;  %v5524_v45 = vsel %vm5397_vm10, %v4135_v46, -inf  ;;  %v5511_v58 = vrot.slane %v5510_v41, 4 }
 0x1b4   :  { %v2266_v33 = vpop.permute.xlu1 %2265  ;;  %v5517_v26 = vsel %vm5397_vm10, %v4136_v36, -inf  ;;  %v5525_v28 = vrot.slane %v5524_v45, 4  ;;  %v5540_v29 = vmax.f32 %v5538_v17, %v5539_v48  ;;  %v5554_v56 = vmax.f32 %v5552_v30, %v5553_v3 }
 0x1b5   :  { %v13954_v10 = vpop.permute.xlu0 %2011  ;;  %v5531_v19 = vsel %vm5397_vm10, %v4137_v35, -inf  ;;  %v5512_v63 = vmax.f32 %v5510_v41, %v5511_v58  ;;  %v5518_v11 = vrot.slane %v5517_v26, 4  ;;  %v2956_v53 = vsel %vm19092_vm4, %v2891_v44, %v13888_v8  ;;  %v11540_v8 = vld [vmem:[%s19070_s0 + $0x170] sm:$0xff] }
 0x1b6   :  { %1005 = vrot.lane.b32.xlu1 %v11665_v25, %s12657_s22  ;;  %v5546_v25 = vrot.slane %v5545_v34, 4  ;;  %v5526_v21 = vmax.f32 %v5524_v45, %v5525_v28  ;;  %v5532_v42 = vrot.slane %v5531_v19, 4  ;;  %v2892_v16 = vsel %vm19091_vm5, %v2827_v5, %v13869_v22 }
 0x1b7   :  { %751 = vrot.lane.b32.xlu0 %v11602_v54, %s12658_s23  ;;  %v5560_v54 = vrot.slane %v5559_v47, 4  ;;  %v3021_v43 = vsel %vm3002_vm6, %v2956_v53, %v13932_v6  ;;  %v5555_v9 = vrot.slane %v5554_v56, 2  ;;  %v2957_v31 = vsel %vm19092_vm4, %v2892_v16, %v13934_v39  ;;  %vm19093_vm4 = vmmov %vm19091_vm5 }
 0x1b8   :  { %v13967_v51 = vpop.permute.xlu1 %1501  ;;  %v5547_v4 = vmax.f32 %v5545_v34, %v5546_v25  ;;  %v5513_v17 = vrot.slane %v5512_v63, 2  ;;  %v5519_v22 = vmax.f32 %v5517_v26, %v5518_v11  ;;  %v3086_v34 = vsel %vm3067_vm7, %v3021_v43, %v2266_v33 }
 0x1b9   :  { %v13969_v49 = vpop.permute.xlu0 %1247  ;;  %v5561_v1 = vmax.f32 %v5559_v47, %v5560_v54  ;;  %v5527_v6 = vrot.slane %v5526_v21, 2  ;;  %v5533_v30 = vmax.f32 %v5531_v19, %v5532_v42  ;;  %v3022_v47 = vsel %vm3002_vm6, %v2957_v31, %v13954_v10  ;;  %v71_v10 = vld [vmem:[%s19070_s0 + $0xf0] sm:$0xff] }
 0x1ba   :  { %2025 = vrot.lane.b32.xlu1 %v11539_v13, %s12662_s18  ;;  %v5548_v7 = vrot.slane %v5547_v4, 2  ;;  %v5556_v45 = vmax.f32 %v5554_v56, %v5555_v9  ;;  %v5514_v3 = vmax.f32 %v5512_v63, %v5513_v17  ;;  %v5520_v0 = vrot.slane %v5519_v22, 2 }
 0x1bb   :  { %1771 = vrot.lane.b32.xlu0 %v11666_v2, %s12661_s27  ;;  %v5562_v46 = vrot.slane %v5561_v1, 2  ;;  %v5528_v61 = vmax.f32 %v5526_v21, %v5527_v6  ;;  %v5534_v54 = vrot.slane %v5533_v30, 2  ;;  %v2698_v27 = vsel %vm2677_vm1, %v71_v10, %v13871_v60 }
 0x1bc   :  { %v2522_v18 = vpop.permute.xlu1 %2521  ;;  %v5549_v35 = vmax.f32 %v5547_v4, %v5548_v7  ;;  %v2763_v56 = vsel %vm2742_vm2, %v2698_v27, %v13912_v59  ;;  %v5515_v60 = vrot.slane %v5514_v3, 1  ;;  %v14062_v63 = vmax.f32 %v5519_v22, %v5520_v0 }
 0x1bd   :  { %v2268_v40 = vpop.permute.xlu0 %2267  ;;  %v3151_v36 = vsel %vm3132_vm8, %v3086_v34, %v2522_v18  ;;  %v5563_v25 = vmax.f32 %v5561_v1, %v5562_v46  ;;  %v5529_v11 = vrot.slane %v5528_v61, 1  ;;  %v14064_v5 = vmax.f32 %v5533_v30, %v5534_v54 }
 0x1be   :  { %1261 = vrot.lane.b32.xlu1 %v11539_v13, %s12659_s17  ;;  %v3087_v41 = vsel %vm3067_vm7, %v3022_v47, %v2268_v40  ;;  %12051 = vmatprep.mubr.msk.f32.mxu0 %vm3201_vm9, %v3151_v36  ;;  %v5550_v18 = vrot.slane %v5549_v35, 1  ;;  %v5557_v40 = vrot.slane %v5556_v45, 1  ;;  %v2699_v53 = vsel %vm2677_vm1, %v72_v38, %v13914_v62 }
 0x1bf   :  { %1007 = vrot.lane.b32.xlu0 %v11666_v2, %s12657_s22  ;;  %v5541_v2 = vrot.slane %v5540_v29, 2  ;;  %v5564_v4 = vrot.slane %v5563_v25, 1  ;;  %v2828_v59 = vsel %vm2807_vm3, %v2763_v56, %v13946_v14  ;;  %v2764_v7 = vsel %vm2742_vm2, %v2699_v53, %v13948_v20  ;;  %v14101_v20 = vld [vmem:[%s19070_s0 + $0x172] sm:$0xff] }
 0x1c0   :  { %v14008_v23 = vpop.permute.xlu1 %1503  ;;  %v5522_v46 = vrot.slane %v14062_v63, 1  ;;  %v14093_v17 = vmax.f32 %v5528_v61, %v5529_v11  ;;  %v5536_v22 = vrot.slane %v14064_v5, 1 }
 0x1c1   :  { %v14010_v55 = vpop.permute.xlu0 %737  ;;  %v5542_v33 = vmax.f32 %v5540_v29, %v5541_v2  ;;  %v14081_v2 = vmax.f32 %v5556_v45, %v5557_v40  ;;  %v14085_v62 = vmax.f32 %v5563_v25, %v5564_v4 }
 0x1c2   :  { %2281 = vrot.lane.b32.xlu1 %v14002_v24, %s12663_s21 }
 0x1c3   :  { %2027 = vrot.lane.b32.xlu0 %v11540_v8, %s12662_s18  ;;  %v5543_v19 = vrot.slane %v5542_v33, 1 }
 0x1c4   :  { %v2524_v39 = vpop.permute.xlu1 %2523 }
 0x1c5   :  { %v14026_v13 = vpop.permute.xlu0 %1757  ;;  %v3152_v48 = vsel %vm3132_vm8, %v3087_v41, %v2524_v39  ;;  %v14077_v43 = vmax.f32 %v5542_v33, %v5543_v19  ;;  %v14111_v39 = vsel %vm19091_vm5, %v2828_v59, %v13967_v51  ;;  %vm19094_vm5 = vcmask 121856  }
 0x1c6   :  { %1517 = vrot.lane.b32.xlu1 %v14002_v24, %s12660_s20  ;;  %12052 = vmatmul.mubr.msk.f32.gmra.mxu0 %vm3201_vm9, %v3152_v48  ;;  %v12035_v58 = vpop.f32.mrf.mxu0 }
 0x1c7   :  { %1263 = vrot.lane.b32.xlu0 %v11540_v8, %s12659_s17  ;;  %v3797_v26 = vmul.f32 %v12035_v58, %v13605_v37  ;;  %v14079_v8 = vmax.f32 %v5549_v35, %v5550_v18 }
 0x1c8   :  { %v14042_v28 = vpop.permute.xlu1 %993  ;;  %v3494_v29 = vpop.f32.mrf.mxu0 }
 0x1c9   :  { %v14044_v52 = vpop.permute.xlu0 %739  ;;  %v3868_v44 = vadd.f32 %v13612_v32, %v3797_v26  ;;  %v3796_v1 = vmul.f32 %v13605_v37, %v3494_v29 }
 0x1ca   :  { %2537 = vrot.lane.b32.xlu1 %v14039_v12, %s12664_s16 }
 0x1cb   :  { %2283 = vrot.lane.b32.xlu0 %v14049_v57, %s12663_s21  ;;  %v3932_v21 = vmax.f32 %v3868_v44, 0.0  ;;  %v3867_v37 = vadd.f32 %v13612_v32, %v3796_v1  ;;  %v14090_v32 = vmax.f32 %v5514_v3, %v5515_v60 }
 0x1cc   :  { %v14073_v42 = vpop.permute.xlu1 %2013 }
 0x1cd   :  { %v14075_v16 = vpop.permute.xlu0 %1759  ;;  %v4172_v9 = vcombine.high %v3932_v21, %v3932_v21  ;;  %v4179_v14 = vrot.slane %v3932_v21, %v13627_v50  ;;  %v3931_v31 = vmax.f32 %v3867_v37, 0.0  ;;  %v11541_v21 = vld [vmem:[%s19070_s0 + $0x180] sm:$0xff] }
 0x1ce   :  { %1519 = vrot.lane.b32.xlu1 %v14049_v57, %s12660_s20 }
 0x1cf   :  { %753 = vrot.lane.b32.xlu0 %v14002_v24, %s12658_s23  ;;  %v4186_v34 = vrot.slane %v4172_v9, %v13627_v50  ;;  %v4187_v6 = vcombine.high %v4179_v14, %v4179_v14  ;;  %v5594_v30 = vsel %vm5397_vm10, %v4179_v14, -inf  ;;  %v4155_v47 = vcombine.high %v3931_v31, %v3931_v31 }
 0x1d0   :  { %v14105_v36 = vpop.permute.xlu1 %1249  ;;  %v2829_v24 = vsel %vm2807_vm3, %v2764_v7, %v13969_v49  ;;  %v5595_v33 = vrot.slane %v5594_v30, 4  ;;  %v4162_v35 = vrot.slane %v3931_v31, %v13627_v50 }
 0x1d1   :  { %v14107_v41 = vpop.permute.xlu0 %995  ;;  %v4188_v45 = vcombine.high %v4186_v34, %v4186_v34  ;;  %v5601_v48 = vsel %vm5397_vm10, %v4187_v6, -inf  ;;  %v5608_v10 = vsel %vm5397_vm10, %v4186_v34, -inf  ;;  %v4169_v25 = vrot.slane %v4155_v47, %v13627_v50 }
 0x1d2   :  { %2539 = vrot.lane.b32.xlu1 %v14101_v20, %s12664_s16  ;;  %v5596_v3 = vmax.f32 %v5594_v30, %v5595_v33  ;;  %v5602_v0 = vrot.slane %v5601_v48, 4  ;;  %v5609_v51 = vrot.slane %v5608_v10, 4  ;;  %v4170_v61 = vcombine.high %v4162_v35, %v4162_v35 }
 0x1d3   :  { %1773 = vrot.lane.b32.xlu0 %v14039_v12, %s12661_s27  ;;  %v5615_v49 = vsel %vm5397_vm10, %v4188_v45, -inf  ;;  %v4171_v54 = vcombine.high %v4169_v25, %v4169_v25  ;;  %v5566_v58 = vsel %vm5397_vm10, %v4162_v35, -inf  ;;  %v5580_v26 = vsel %vm5397_vm10, %v4169_v25, -inf }
 0x1d4   :  { %v14126_v27 = vpop.permute.xlu1 %2269  ;;  %v5597_v18 = vrot.slane %v5596_v3, 2  ;;  %v5603_v40 = vmax.f32 %v5601_v48, %v5602_v0  ;;  %v5610_v38 = vmax.f32 %v5608_v10, %v5609_v51  ;;  %v5616_v29 = vrot.slane %v5615_v49, 4 }
 0x1d5   :  { %v14128_v19 = vpop.permute.xlu0 %2015  ;;  %v5567_v4 = vrot.slane %v5566_v58, 4  ;;  %v5573_v56 = vsel %vm5397_vm10, %v4170_v61, -inf  ;;  %v5581_v44 = vrot.slane %v5580_v26, 4  ;;  %v5587_v1 = vsel %vm5397_vm10, %v4171_v54, -inf }
 0x1d6   :  { %1009 = vrot.lane.b32.xlu1 %v14039_v12, %s12657_s22  ;;  %v5598_v60 = vmax.f32 %v5596_v3, %v5597_v18  ;;  %v5604_v11 = vrot.slane %v5603_v40, 2  ;;  %v5611_v53 = vrot.slane %v5610_v38, 2  ;;  %v5617_v59 = vmax.f32 %v5615_v49, %v5616_v29 }
 0x1d7   :  { %755 = vrot.lane.b32.xlu0 %v14049_v57, %s12658_s23  ;;  %v5568_v37 = vmax.f32 %v5566_v58, %v5567_v4  ;;  %v5574_v7 = vrot.slane %v5573_v56, 4  ;;  %v5582_v9 = vmax.f32 %v5580_v26, %v5581_v44  ;;  %v5588_v14 = vrot.slane %v5587_v1, 4 }
 0x1d8   :  { %v14139_v31 = vpop.permute.xlu1 %1505  ;;  %v5599_v12 = vrot.slane %v5598_v60, 1  ;;  %v5605_v6 = vmax.f32 %v5603_v40, %v5604_v11  ;;  %v5612_v30 = vmax.f32 %v5610_v38, %v5611_v53  ;;  %v5618_v47 = vrot.slane %v5617_v59, 2 }
 0x1d9   :  { %v14141_v34 = vpop.permute.xlu0 %1251  ;;  %v5569_v33 = vrot.slane %v5568_v37, 2  ;;  %v5575_v35 = vmax.f32 %v5573_v56, %v5574_v7  ;;  %v5583_v45 = vrot.slane %v5582_v9, 2  ;;  %v5589_v57 = vmax.f32 %v5587_v1, %v5588_v14 }
 0x1da   :  { %2029 = vrot.lane.b32.xlu1 %v11541_v21, %s12662_s18  ;;  %v5523_v48 = vmax.f32 %v14062_v63, %v5522_v46  ;;  %v5537_v10 = vmax.f32 %v14064_v5, %v5536_v22  ;;  %v14148_v25 = vsel %vm7190_vm11, %v14090_v32, -inf  ;;  %v5619_v3 = vmax.f32 %v5617_v59, %v5618_v47 }
 0x1db   :  { %1775 = vrot.lane.b32.xlu0 %v14101_v20, %s12661_s27  ;;  %v5570_v0 = vmax.f32 %v5568_v37, %v5569_v33  ;;  %v5576_v51 = vrot.slane %v5575_v35, 2  ;;  %v5584_v61 = vmax.f32 %v5582_v9, %v5583_v45  ;;  %v5590_v49 = vrot.slane %v5589_v57, 2 }
 0x1dc   :  { %v2526_v54 = vpop.permute.xlu1 %2525  ;;  %v14154_v26 = vsel %vm7190_vm11, %v14093_v17, -inf  ;;  %v2894_v63 = vsel %vm19093_vm4, %v2829_v24, %v14008_v23  ;;  %v5600_v5 = vmax.f32 %v5598_v60, %v5599_v12  ;;  %v5606_v32 = vrot.slane %v5605_v6, 1  ;;  %v11605_v23 = vld [vmem:[%s19070_s0 + $0x181] sm:$0xff]  ;;  %vm19095_vm4 = vmmov %vm19094_vm5 }
 0x1dd   :  { %v2272_v58 = vpop.permute.xlu0 %2271  ;;  %v5613_v46 = vrot.slane %v5612_v30, 1  ;;  %v5571_v22 = vrot.slane %v5570_v0, 1  ;;  %v5577_v18 = vmax.f32 %v5575_v35, %v5576_v51  ;;  %v5585_v40 = vrot.slane %v5584_v61, 1 }
 0x1de   :  { %1265 = vrot.lane.b32.xlu1 %v11541_v21, %s12659_s17  ;;  %v7218_v38 = vsel %vm7190_vm11, %v5523_v48, -inf  ;;  %v2958_v29 = vsel %vm19094_vm5, %v14111_v39, %v14026_v13  ;;  %v5620_v4 = vrot.slane %v5619_v3, 1  ;;  %v5591_v17 = vmax.f32 %v5589_v57, %v5590_v49  ;;  %v11542_v13 = vld [vmem:[%s19070_s0 + $0x188] sm:$0xff] }
 0x1df   :  { %1011 = vrot.lane.b32.xlu0 %v14101_v20, %s12657_s22  ;;  %v7224_v24 = vsel %vm7190_vm11, %v5537_v10, -inf  ;;  %v5572_v56 = vmax.f32 %v5570_v0, %v5571_v22  ;;  %v5578_v44 = vrot.slane %v5577_v18, 1  ;;  %v3023_v1 = vsel %vm3002_vm6, %v2958_v29, %v14073_v42  ;;  %v11606_v22 = vld [vmem:[%s19070_s0 + $0x189] sm:$0xff] }
 0x1e0   :  { %v14171_v60 = vpop.permute.xlu1 %1507  ;;  %v5607_v20 = vmax.f32 %v5605_v6, %v5606_v32  ;;  %v5586_v39 = vmax.f32 %v5584_v61, %v5585_v40  ;;  %v5592_v53 = vrot.slane %v5591_v17, 1  ;;  %v2959_v59 = vsel %vm19095_vm4, %v2894_v63, %v14075_v16 }
 0x1e1   :  { %v14173_v11 = vpop.permute.xlu0 %741  ;;  %v5614_v21 = vmax.f32 %v5612_v30, %v5613_v46  ;;  %v7228_v37 = vsel %vm7190_vm11, %v5600_v5, -inf  ;;  %v5579_v7 = vmax.f32 %v5577_v18, %v5578_v44  ;;  %v7216_v42 = vsel %vm7190_vm11, %v5572_v56, -inf }
 0x1e2   :  { %2285 = vrot.lane.b32.xlu1 %v11605_v23, %s12663_s21  ;;  %v5621_v9 = vmax.f32 %v5619_v3, %v5620_v4  ;;  %v5593_v14 = vmax.f32 %v5591_v17, %v5592_v53  ;;  %v7222_v12 = vsel %vm7190_vm11, %v5586_v39, -inf  ;;  %v3088_v6 = vsel %vm3067_vm7, %v3023_v1, %v14126_v27 }
 0x1e3   :  { %2031 = vrot.lane.b32.xlu0 %v11542_v13, %s12662_s18  ;;  %v7219_v47 = vsel %vm7190_vm11, %v5579_v7, -inf  ;;  %v7223_v16 = vmax.f32 %v14154_v26, %v7222_v12  ;;  %v3024_v30 = vsel %vm3002_vm6, %v2959_v59, %v14128_v19  ;;  %v3153_v33 = vsel %vm3132_vm8, %v3088_v6, %v2526_v54  ;;  %v147_v59 = vld [vmem:[%s19070_s0 + $0x1b1] sm:$0xff] }
 0x1e4   :  { %v2528_v35 = vpop.permute.xlu1 %2527  ;;  %v7217_v57 = vmax.f32 %v14148_v25, %v7216_v42  ;;  %v7220_v48 = vmax.f32 %v7218_v38, %v7219_v47  ;;  %v7225_v10 = vsel %vm7190_vm11, %v5593_v14, -inf  ;;  %v3089_v27 = vsel %vm3067_vm7, %v3024_v30, %v2272_v58  ;;  %12054 = vmatprep.mubr.msk.f32.mxu0 %vm3201_vm9, %v3153_v33  ;;  %v11669_v58 = vld [vmem:[%s19070_s0 + $0x182] sm:$0xff] }
 0x1e5   :  { %v14192_v45 = vpop.permute.xlu0 %1761  ;;  %v7231_v3 = vsel %vm7190_vm11, %v5607_v20, -inf  ;;  %v7226_v0 = vmax.f32 %v7224_v24, %v7225_v10  ;;  %v3154_v51 = vsel %vm3132_vm8, %v3089_v27, %v2528_v35  ;;  %v7227_v19 = vsel %vm7190_vm11, %v14077_v43, -inf  ;;  %v14236_v24 = vld [vmem:[%s19073_s3] ss:$0 sm:$0xff]  ;;  %v211_v35 = vld [vmem:[%s19070_s0 + $0x1b2] sm:$0xff] }
 0x1e6   :  { %1521 = vrot.lane.b32.xlu1 %v11605_v23, %s12660_s20  ;;  %v7230_v25 = vsel %vm7190_vm11, %v14079_v8, -inf  ;;  %v7234_v61 = vsel %vm7190_vm11, %v5614_v21, -inf  ;;  %v7757_v49 = vsel %vm7743_vm12, %v7220_v48, %v7217_v57  ;;  %v12038_v54 = vpop.f32.mrf.mxu0  ;;  %12055 = vmatmul.mubr.msk.f32.gmra.mxu0 %vm3201_vm9, %v3154_v51  ;;  %v7229_v26 = vmax.f32 %v7227_v19, %v7228_v37  ;;  %v14217_v8 = vld [vmem:[%s19072_s2] ss:$0 sm:$0xff] }
 0x1e7   :  { %1267 = vrot.lane.b32.xlu0 %v11542_v13, %s12659_s17  ;;  %v7237_v63 = vsel %vm7190_vm11, %v5621_v9, -inf  ;;  %v7758_v43 = vsel %vm7745_vm13, %v7223_v16, %v7757_v49  ;;  %v3799_v5 = vmul.f32 %v14217_v8, %v12038_v54  ;;  %v7233_v18 = vsel %vm7190_vm11, %v14081_v2, -inf  ;;  %v11670_v9 = vld [vmem:[%s19070_s0 + $0x18a] sm:$0xff]  ;;  %v148_v27 = vld [vmem:[%s19070_s0 + $0x1b9] sm:$0xff] }
 0x1e8   :  { %v14220_v32 = vpop.permute.xlu1 %997  ;;  %v7236_v40 = vsel %vm7190_vm11, %v14085_v62, -inf  ;;  %v7232_v38 = vmax.f32 %v7230_v25, %v7231_v3  ;;  %v7759_v29 = vsel %vm7747_vm14, %v7226_v0, %v7758_v43  ;;  %v3504_v4 = vpop.f32.mrf.mxu0  ;;  %v7235_v17 = vmax.f32 %v7233_v18, %v7234_v61  ;;  %v73_v25 = vld [vmem:[%s19070_s0 + $0x108] sm:$0xff] }
 0x1e9   :  { %v14222_v46 = vpop.permute.xlu0 %743  ;;  %v7760_v23 = vsel %vm7749_vm15, %v7229_v26, %v7759_v29  ;;  %v3870_v56 = vadd.f32 %v14236_v24, %v3799_v5  ;;  %v3798_v44 = vmul.f32 %v14217_v8, %v3504_v4  ;;  %v7238_v2 = vmax.f32 %v7236_v40, %v7237_v63 }
 0x1ea   :  { %2541 = vrot.lane.b32.xlu1 %v11669_v58, %s12664_s16  ;;  %v7761_v62 = vsel %vm19090_vm0, %v7232_v38, %v7760_v23  ;;  %vm19096_vm5 = vcmask 1046534   ;;  %vm19097_vm4 = vcmask 1047559   ;;  %v2700_v29 = vsel %vm2677_vm1, %v73_v25, %v14010_v55 }
 0x1eb   :  { %2287 = vrot.lane.b32.xlu0 %v11606_v22, %s12663_s21  ;;  %v7762_v1 = vsel %vm19096_vm5, %v7235_v17, %v7761_v62  ;;  %v3934_v13 = vmax.f32 %v3870_v56, 0.0  ;;  %v3869_v20 = vadd.f32 %v14236_v24, %v3798_v44  ;;  %v2765_v23 = vsel %vm2742_vm2, %v2700_v29, %v14042_v28  ;;  %v212_v28 = vld [vmem:[%s19070_s0 + $0x1ba] sm:$0xff] }
 0x1ec   :  { %v14245_v39 = vpop.permute.xlu1 %2017  ;;  %v7763_v21 = vsel %vm19097_vm4, %v7238_v2, %v7762_v1  ;;  %v11353_v2 = vld [vmem:[%s19070_s0 + $0x1c8] sm:$0xff]  ;;  %v2830_v55 = vsel %vm2807_vm3, %v2765_v23, %v14105_v36  ;;  %vm19098_vm5 = vcmask 97280   ;;  %vm19099_vm4 = vcmask 121856  }
 0x1ed   :  { %v14247_v53 = vpop.permute.xlu0 %1763  ;;  %7880 = vst.msk [vmem:[#allocation2 + $0x21] sm:$0xff] %vm7190_vm11, %v7763_v21  ;;  %v4206_v37 = vcombine.high %v3934_v13, %v3934_v13  ;;  %v4213_v7 = vrot.slane %v3934_v13, %v13627_v50  ;;  %v3933_v42 = vmax.f32 %v3869_v20, 0.0 }
 0x1ee   :  { %1523 = vrot.lane.b32.xlu1 %v11606_v22, %s12660_s20  ;;  %v74_v22 = vld [vmem:[%s19070_s0 + $0x110] sm:$0xff] }
 0x1ef   :  { %757 = vrot.lane.b32.xlu0 %v147_v59, %s12658_s23  ;;  %v4220_v14 = vrot.slane %v4206_v37, %v13627_v50  ;;  %v4189_v12 = vcombine.high %v3933_v42, %v3933_v42  ;;  %v4221_v16 = vcombine.high %v4213_v7, %v4213_v7  ;;  %v4196_v33 = vrot.slane %v3933_v42, %v13627_v50 }
 0x1f0   :  { %v14261_v6 = vpop.permute.xlu1 %1253  ;;  %v5650_v0 = vsel %vm5397_vm10, %v4213_v7, -inf  ;;  %v2701_v62 = vsel %vm2677_vm1, %v74_v22, %v14044_v52  ;;  %v2895_v52 = vsel %vm19098_vm5, %v2830_v55, %v14139_v31 }
 0x1f1   :  { %v14263_v47 = vpop.permute.xlu0 %999  ;;  %v4222_v30 = vcombine.high %v4220_v14, %v4220_v14  ;;  %v4203_v57 = vrot.slane %v4189_v12, %v13627_v50  ;;  %v5657_v51 = vsel %vm5397_vm10, %v4221_v16, -inf  ;;  %v5664_v19 = vsel %vm5397_vm10, %v4220_v14, -inf }
 0x1f2   :  { %2543 = vrot.lane.b32.xlu1 %v11670_v9, %s12664_s16  ;;  %v4204_v49 = vcombine.high %v4196_v33, %v4196_v33  ;;  %v5622_v54 = vsel %vm5397_vm10, %v4196_v33, -inf  ;;  %v5651_v18 = vrot.slane %v5650_v0, 4  ;;  %v5658_v40 = vrot.slane %v5657_v51, 4 }
 0x1f3   :  { %1777 = vrot.lane.b32.xlu0 %v11669_v58, %s12661_s27  ;;  %v5671_v61 = vsel %vm5397_vm10, %v4222_v30, -inf  ;;  %v11543_v58 = vld [vmem:[%s19070_s0 + $0x198] sm:$0xff]  ;;  %v4205_v26 = vcombine.high %v4203_v57, %v4203_v57  ;;  %v5636_v63 = vsel %vm5397_vm10, %v4203_v57, -inf  ;;  %v5665_v38 = vrot.slane %v5664_v19, 4 }
 0x1f4   :  { %v14272_v48 = vpop.permute.xlu1 %2273  ;;  %v8024_v3 = vld [vmem:[#allocation2 + $0x22] sm:$0xff]  ;;  %v5672_v4 = vrot.slane %v5671_v61, 4  ;;  %v5623_v17 = vrot.slane %v5622_v54, 4  ;;  %v5629_v56 = vsel %vm5397_vm10, %v4204_v49, -inf  ;;  %v5637_v44 = vrot.slane %v5636_v63, 4 }
 0x1f5   :  { %v14274_v10 = vpop.permute.xlu0 %2019  ;;  %11772 = vmatprep.mubr.msk.f32.mxu1 %vm7190_vm11, %v8024_v3  ;;  %v5643_v1 = vsel %vm5397_vm10, %v4205_v26, -inf  ;;  %v2766_v59 = vsel %vm2742_vm2, %v2701_v62, %v14107_v41  ;;  %v5652_v21 = vmax.f32 %v5650_v0, %v5651_v18  ;;  %v5659_v37 = vmax.f32 %v5657_v51, %v5658_v40  ;;  %v11607_v41 = vld [vmem:[%s19070_s0 + $0x199] sm:$0xff] }
 0x1f6   :  { %1013 = vrot.lane.b32.xlu1 %v211_v35, %s12657_s22  ;;  %v5666_v7 = vmax.f32 %v5664_v19, %v5665_v38  ;;  %v5673_v42 = vmax.f32 %v5671_v61, %v5672_v4  ;;  %v5630_v36 = vrot.slane %v5629_v56, 4  ;;  %v2831_v14 = vsel %vm2807_vm3, %v2766_v59, %v14141_v34  ;;  %v75_v38 = vld [vmem:[%s19070_s0 + $0x120] sm:$0xff] }
 0x1f7   :  { %759 = vrot.lane.b32.xlu0 %v148_v27, %s12658_s23  ;;  %v2960_v12 = vsel %vm19099_vm4, %v2895_v52, %v14192_v45  ;;  %v5638_v16 = vmax.f32 %v5636_v63, %v5637_v44  ;;  %v5644_v30 = vrot.slane %v5643_v1, 4  ;;  %v2896_v31 = vsel %vm19098_vm5, %v2831_v14, %v14171_v60  ;;  %v11544_v45 = vld [vmem:[%s19070_s0 + $0x1a0] sm:$0xff]  ;;  %v11354_v63 = vld [vmem:[%s19070_s0 + $0x1d0] sm:$0xff] }
 0x1f8   :  { %v14294_v43 = vpop.permute.xlu1 %1509  ;;  %v3025_v33 = vsel %vm3002_vm6, %v2960_v12, %v14245_v39  ;;  %v5653_v57 = vrot.slane %v5652_v21, 2  ;;  %v5660_v27 = vrot.slane %v5659_v37, 2  ;;  %v5667_v3 = vrot.slane %v5666_v7, 2 }
 0x1f9   :  { %v14296_v5 = vpop.permute.xlu0 %1255  ;;  %v2961_v0 = vsel %vm19099_vm4, %v2896_v31, %v14247_v53  ;;  %v5674_v51 = vrot.slane %v5673_v42, 2  ;;  %v5631_v60 = vmax.f32 %v5629_v56, %v5630_v36  ;;  %v3090_v39 = vsel %vm3067_vm7, %v3025_v33, %v14272_v48  ;;  %v11417_v53 = vld [vmem:[%s19070_s0 + $0x1c9] sm:$0xff]  ;;  %vm19100_vm4 = vmmov %vm19098_vm5 }
 0x1fa   :  { %2033 = vrot.lane.b32.xlu1 %v11543_v58, %s12662_s18  ;;  %v5639_v25 = vrot.slane %v5638_v16, 2  ;;  %v5645_v61 = vmax.f32 %v5643_v1, %v5644_v30  ;;  %v3026_v49 = vsel %vm3002_vm6, %v2961_v0, %v14274_v10  ;;  %v5654_v10 = vmax.f32 %v5652_v21, %v5653_v57  ;;  %v11418_v30 = vld [vmem:[%s19070_s0 + $0x1d1] sm:$0xff] }
 0x1fb   :  { %1779 = vrot.lane.b32.xlu0 %v11670_v9, %s12661_s27  ;;  %v5624_v9 = vmax.f32 %v5622_v54, %v5623_v17  ;;  %v5661_v22 = vmax.f32 %v5659_v37, %v5660_v27  ;;  %v5668_v18 = vmax.f32 %v5666_v7, %v5667_v3  ;;  %v5675_v29 = vmax.f32 %v5673_v42, %v5674_v51  ;;  %v76_v37 = vld [vmem:[%s19070_s0 + $0x128] sm:$0xff] }
 0x1fc   :  { %v2530_v13 = vpop.permute.xlu1 %2529  ;;  %v5632_v17 = vrot.slane %v5631_v60, 2  ;;  %v5640_v23 = vmax.f32 %v5638_v16, %v5639_v25  ;;  %v5646_v56 = vrot.slane %v5645_v61, 2 }
 0x1fd   :  { %v2276_v20 = vpop.permute.xlu0 %2275  ;;  %v5625_v19 = vrot.slane %v5624_v9, 2  ;;  %v3155_v54 = vsel %vm3132_vm8, %v3090_v39, %v2530_v13  ;;  %v11608_v13 = vld [vmem:[%s19070_s0 + $0x1a1] sm:$0xff]  ;;  %v5662_v59 = vrot.slane %v5661_v22, 1  ;;  %v5669_v21 = vrot.slane %v5668_v18, 1 }
 0x1fe   :  { %1269 = vrot.lane.b32.xlu1 %v11353_v2, %s12659_s17  ;;  %v3091_v58 = vsel %vm3067_vm7, %v3026_v49, %v2276_v20  ;;  %12057 = vmatprep.mubr.msk.f32.mxu0 %vm3201_vm9, %v3155_v54  ;;  %v11671_v2 = vld [vmem:[%s19070_s0 + $0x19a] sm:$0xff]  ;;  %v2702_v20 = vsel %vm2677_vm1, %v75_v38, %v14173_v11  ;;  %v5676_v52 = vrot.slane %v5675_v29, 1  ;;  %v14390_v11 = vmax.f32 %v5631_v60, %v5632_v17 }
 0x1ff   :  { %1015 = vrot.lane.b32.xlu0 %v212_v28, %s12657_s22  ;;  %v5626_v4 = vmax.f32 %v5624_v9, %v5625_v19  ;;  %v5655_v28 = vrot.slane %v5654_v10, 1  ;;  %v2767_v42 = vsel %vm2742_vm2, %v2702_v20, %v14220_v32  ;;  %v5641_v12 = vrot.slane %v5640_v23, 1 }
 0x200   :  { %v14336_v35 = vpop.permute.xlu1 %1511  ;;  %v14392_v16 = vmax.f32 %v5645_v61, %v5646_v56  ;;  %v2703_v32 = vsel %vm2677_vm1, %v76_v37, %v14222_v46  ;;  %v14409_v3 = vmax.f32 %v5661_v22, %v5662_v59  ;;  %v14411_v0 = vmax.f32 %v5668_v18, %v5669_v21  ;;  %v11481_v18 = vld [vmem:[%s19070_s0 + $0x1ca] sm:$0xff] }
 0x201   :  { %v14338_v34 = vpop.permute.xlu0 %745  ;;  %v5627_v14 = vrot.slane %v5626_v4, 1  ;;  %v14407_v27 = vmax.f32 %v5654_v10, %v5655_v28  ;;  %v2768_v51 = vsel %vm2742_vm2, %v2703_v32, %v14263_v47  ;;  %v14415_v46 = vmax.f32 %v5675_v29, %v5676_v52  ;;  %v11672_v47 = vld [vmem:[%s19070_s0 + $0x1a2] sm:$0xff] }
 0x202   :  { %2289 = vrot.lane.b32.xlu1 %v11607_v41, %s12663_s21  ;;  %v2832_v41 = vsel %vm2807_vm3, %v2767_v42, %v14261_v6  ;;  %v5634_v25 = vrot.slane %v14390_v11, 1  ;;  %v14422_v61 = vmax.f32 %v5640_v23, %v5641_v12  ;;  %v5648_v49 = vrot.slane %v14392_v16, 1 }
 0x203   :  { %2035 = vrot.lane.b32.xlu0 %v11544_v45, %s12662_s18  ;;  %v14419_v39 = vmax.f32 %v5626_v4, %v5627_v14 }
 0x204   :  { %v2532_v48 = vpop.permute.xlu1 %2531 }
 0x205   :  { %v14357_v26 = vpop.permute.xlu0 %1765  ;;  %v3156_v40 = vsel %vm3132_vm8, %v3091_v58, %v2532_v48 }
 0x206   :  { %1525 = vrot.lane.b32.xlu1 %v11417_v53, %s12660_s20  ;;  %12058 = vmatmul.mubr.msk.f32.gmra.mxu0 %vm3201_vm9, %v3156_v40  ;;  %v12041_v44 = vpop.f32.mrf.mxu0  ;;  %v2833_v40 = vsel %vm2807_vm3, %v2768_v51, %v14296_v5  ;;  %v11545_v51 = vld [vmem:[%s19070_s0 + $0x1e0] sm:$0xff] }
 0x207   :  { %1271 = vrot.lane.b32.xlu0 %v11354_v63, %s12659_s17  ;;  %v3801_v62 = vmul.f32 %v14217_v8, %v12041_v44 }
 0x208   :  { %v14373_v55 = vpop.permute.xlu1 %1001  ;;  %v3514_v7 = vpop.f32.mrf.mxu0 }
 0x209   :  { %v14375_v1 = vpop.permute.xlu0 %747  ;;  %v3872_v9 = vadd.f32 %v14236_v24, %v3801_v62  ;;  %v3800_v36 = vmul.f32 %v14217_v8, %v3514_v7 }
 0x20a   :  { %2545 = vrot.lane.b32.xlu1 %v11671_v2, %s12664_s16 }
 0x20b   :  { %2291 = vrot.lane.b32.xlu0 %v11608_v13, %s12663_s21  ;;  %v3936_v31 = vmax.f32 %v3872_v9, 0.0  ;;  %v3871_v33 = vadd.f32 %v14236_v24, %v3800_v36 }
 0x20c   :  { %v14403_v45 = vpop.permute.xlu1 %2021 }
 0x20d   :  { %v14405_v57 = vpop.permute.xlu0 %1767  ;;  %v4240_v19 = vcombine.high %v3936_v31, %v3936_v31  ;;  %v4247_v6 = vrot.slane %v3936_v31, %v13627_v50  ;;  %v3935_v60 = vmax.f32 %v3871_v33, 0.0 }
 0x20e   :  { %1527 = vrot.lane.b32.xlu1 %v11418_v30, %s12660_s20 }
 0x20f   :  { %761 = vrot.lane.b32.xlu0 %v11417_v53, %s12658_s23  ;;  %v4254_v54 = vrot.slane %v4240_v19, %v13627_v50  ;;  %v4255_v58 = vcombine.high %v4247_v6, %v4247_v6  ;;  %v5706_v48 = vsel %vm5397_vm10, %v4247_v6, -inf  ;;  %v4223_v63 = vcombine.high %v3935_v60, %v3935_v60 }
 0x210   :  { %v14431_v10 = vpop.permute.xlu1 %1257  ;;  %v14440_v53 = vsel %vm19098_vm5, %v2832_v41, %v14294_v43  ;;  %v5707_v38 = vrot.slane %v5706_v48, 4  ;;  %v4230_v29 = vrot.slane %v3935_v60, %v13627_v50  ;;  %vm19101_vm5 = vcmask 121856  }
 0x211   :  { %v14433_v22 = vpop.permute.xlu0 %1003  ;;  %v4256_v4 = vcombine.high %v4254_v54, %v4254_v54  ;;  %v5713_v17 = vsel %vm5397_vm10, %v4255_v58, -inf  ;;  %v5720_v23 = vsel %vm5397_vm10, %v4254_v54, -inf  ;;  %v4237_v56 = vrot.slane %v4223_v63, %v13627_v50  ;;  %v11482_v58 = vld [vmem:[%s19070_s0 + $0x1d2] sm:$0xff] }
 0x212   :  { %2547 = vrot.lane.b32.xlu1 %v11672_v47, %s12664_s16  ;;  %v5708_v44 = vmax.f32 %v5706_v48, %v5707_v38  ;;  %v5714_v2 = vrot.slane %v5713_v17, 4  ;;  %v5721_v62 = vrot.slane %v5720_v23, 4  ;;  %v4238_v43 = vcombine.high %v4230_v29, %v4230_v29 }
 0x213   :  { %1781 = vrot.lane.b32.xlu0 %v11481_v18, %s12661_s27  ;;  %v5727_v5 = vsel %vm5397_vm10, %v4256_v4, -inf  ;;  %v4239_v13 = vcombine.high %v4237_v56, %v4237_v56  ;;  %v5678_v20 = vsel %vm5397_vm10, %v4230_v29, -inf  ;;  %v5692_v28 = vsel %vm5397_vm10, %v4237_v56, -inf }
 0x214   :  { %v14453_v59 = vpop.permute.xlu1 %2277  ;;  %v5709_v37 = vrot.slane %v5708_v44, 2  ;;  %v5715_v7 = vmax.f32 %v5713_v17, %v5714_v2  ;;  %v5722_v52 = vmax.f32 %v5720_v23, %v5721_v62  ;;  %v5728_v42 = vrot.slane %v5727_v5, 4 }
 0x215   :  { %v14455_v21 = vpop.permute.xlu0 %2023  ;;  %v5679_v9 = vrot.slane %v5678_v20, 4  ;;  %v5685_v36 = vsel %vm5397_vm10, %v4238_v43, -inf  ;;  %v5693_v14 = vrot.slane %v5692_v28, 4  ;;  %v5699_v12 = vsel %vm5397_vm10, %v4239_v13, -inf }
 0x216   :  { %1017 = vrot.lane.b32.xlu1 %v11481_v18, %s12657_s22  ;;  %v5710_v32 = vmax.f32 %v5708_v44, %v5709_v37  ;;  %v5716_v41 = vrot.slane %v5715_v7, 2  ;;  %v5723_v31 = vrot.slane %v5722_v52, 2  ;;  %v5729_v33 = vmax.f32 %v5727_v5, %v5728_v42 }
 0x217   :  { %763 = vrot.lane.b32.xlu0 %v11418_v30, %s12658_s23  ;;  %v5680_v19 = vmax.f32 %v5678_v20, %v5679_v9  ;;  %v5686_v6 = vrot.slane %v5685_v36, 4  ;;  %v5694_v60 = vmax.f32 %v5692_v28, %v5693_v14  ;;  %v5700_v47 = vrot.slane %v5699_v12, 4 }
 0x218   :  { %v14464_v54 = vpop.permute.xlu1 %1513  ;;  %v5711_v48 = vrot.slane %v5710_v32, 1  ;;  %v5717_v63 = vmax.f32 %v5715_v7, %v5716_v41  ;;  %v5724_v18 = vmax.f32 %v5722_v52, %v5723_v31  ;;  %v5730_v38 = vrot.slane %v5729_v33, 2 }
 0x219   :  { %v14469_v29 = vpop.permute.xlu0 %1259  ;;  %v5681_v30 = vrot.slane %v5680_v19, 2  ;;  %v5687_v4 = vmax.f32 %v5685_v36, %v5686_v6  ;;  %v5695_v17 = vrot.slane %v5694_v60, 2  ;;  %v5701_v23 = vmax.f32 %v5699_v12, %v5700_v47 }
 0x21a   :  { %2037 = vrot.lane.b32.xlu1 %v11545_v51, %s12662_s18  ;;  %v5635_v56 = vmax.f32 %v14390_v11, %v5634_v25  ;;  %v5649_v44 = vmax.f32 %v14392_v16, %v5648_v49  ;;  %v14478_v2 = vsel %vm7190_vm11, %v14419_v39, -inf  ;;  %v5731_v62 = vmax.f32 %v5729_v33, %v5730_v38 }
 0x21b   :  { %1783 = vrot.lane.b32.xlu0 %v11482_v58, %s12661_s27  ;;  %v5682_v43 = vmax.f32 %v5680_v19, %v5681_v30  ;;  %v5688_v5 = vrot.slane %v5687_v4, 2  ;;  %v5696_v13 = vmax.f32 %v5694_v60, %v5695_v17  ;;  %v5702_v20 = vrot.slane %v5701_v23, 2 }
 0x21c   :  { %v2534_v28 = vpop.permute.xlu1 %2533  ;;  %v14483_v37 = vsel %vm7190_vm11, %v14422_v61, -inf  ;;  %v2898_v11 = vsel %vm19100_vm4, %v2833_v40, %v14336_v35  ;;  %v5712_v16 = vmax.f32 %v5710_v32, %v5711_v48  ;;  %v5718_v25 = vrot.slane %v5717_v63, 1  ;;  %v14496_v35 = vld [vmem:[%s19070_s0 + $0x1e1] sm:$0xff]  ;;  %vm19102_vm4 = vmmov %vm19101_vm5 }
 0x21d   :  { %v2280_v49 = vpop.permute.xlu0 %2279  ;;  %v5725_v39 = vrot.slane %v5724_v18, 1  ;;  %v5683_v7 = vrot.slane %v5682_v43, 1  ;;  %v5689_v52 = vmax.f32 %v5687_v4, %v5688_v5  ;;  %v5697_v42 = vrot.slane %v5696_v13, 1 }
 0x21e   :  { %1273 = vrot.lane.b32.xlu1 %v11545_v51, %s12659_s17  ;;  %v7242_v9 = vsel %vm7190_vm11, %v5635_v56, -inf  ;;  %v2962_v36 = vsel %vm19101_vm5, %v14440_v53, %v14357_v26  ;;  %v5732_v61 = vrot.slane %v5731_v62, 1  ;;  %v5703_v14 = vmax.f32 %v5701_v23, %v5702_v20  ;;  %v11546_v26 = vld [vmem:[%s19070_s0 + $0x1e8] sm:$0xff] }
 0x21f   :  { %1019 = vrot.lane.b32.xlu0 %v11482_v58, %s12657_s22  ;;  %v7248_v40 = vsel %vm7190_vm11, %v5649_v44, -inf  ;;  %v5684_v12 = vmax.f32 %v5682_v43, %v5683_v7  ;;  %v5690_v32 = vrot.slane %v5689_v52, 1  ;;  %v3027_v41 = vsel %vm3002_vm6, %v2962_v36, %v14403_v45  ;;  %v11610_v7 = vld [vmem:[%s19070_s0 + $0x1e9] sm:$0xff] }
 0x220   :  { %v14501_v31 = vpop.permute.xlu1 %1515  ;;  %v5719_v53 = vmax.f32 %v5717_v63, %v5718_v25  ;;  %v5698_v33 = vmax.f32 %v5696_v13, %v5697_v42  ;;  %v5704_v51 = vrot.slane %v5703_v14, 1  ;;  %v2963_v19 = vsel %vm19102_vm4, %v2898_v11, %v14405_v57 }
 0x221   :  { %v14508_v6 = vpop.permute.xlu0 %749  ;;  %v5726_v60 = vmax.f32 %v5724_v18, %v5725_v39  ;;  %v7252_v47 = vsel %vm7190_vm11, %v5712_v16, -inf  ;;  %v5691_v58 = vmax.f32 %v5689_v52, %v5690_v32  ;;  %v7240_v45 = vsel %vm7190_vm11, %v5684_v12, -inf  ;;  %v11673_v16 = vld [vmem:[%s19070_s0 + $0x1e2] sm:$0xff] }
 0x222   :  { %2293 = vrot.lane.b32.xlu1 %v14496_v35, %s12663_s21  ;;  %v5733_v48 = vmax.f32 %v5731_v62, %v5732_v61  ;;  %v5705_v38 = vmax.f32 %v5703_v14, %v5704_v51  ;;  %v7246_v63 = vsel %vm7190_vm11, %v5698_v33, -inf  ;;  %v3092_v30 = vsel %vm3067_vm7, %v3027_v41, %v14453_v59 }
 0x223   :  { %2039 = vrot.lane.b32.xlu0 %v11546_v26, %s12662_s18  ;;  %v7243_v57 = vsel %vm7190_vm11, %v5691_v58, -inf  ;;  %v7247_v18 = vmax.f32 %v14483_v37, %v7246_v63  ;;  %v3028_v4 = vsel %vm3002_vm6, %v2963_v19, %v14455_v21  ;;  %v3157_v17 = vsel %vm3132_vm8, %v3092_v30, %v2534_v28 }
 0x224   :  { %v2536_v23 = vpop.permute.xlu1 %2535  ;;  %v7241_v56 = vmax.f32 %v14478_v2, %v7240_v45  ;;  %v7244_v44 = vmax.f32 %v7242_v9, %v7243_v57  ;;  %v7249_v62 = vsel %vm7190_vm11, %v5705_v38, -inf  ;;  %v3093_v43 = vsel %vm3067_vm7, %v3028_v4, %v2280_v49  ;;  %12060 = vmatprep.mubr.msk.f32.mxu0 %vm3201_vm9, %v3157_v17 }
 0x225   :  { %v14527_v59 = vpop.permute.xlu0 %1769  ;;  %v7255_v5 = vsel %vm7190_vm11, %v5719_v53, -inf  ;;  %v7250_v13 = vmax.f32 %v7248_v40, %v7249_v62  ;;  %v3158_v20 = vsel %vm3132_vm8, %v3093_v43, %v2536_v23  ;;  %v7251_v21 = vsel %vm7190_vm11, %v14407_v27, -inf }
 0x226   :  { %1529 = vrot.lane.b32.xlu1 %v14496_v35, %s12660_s20  ;;  %v7254_v2 = vsel %vm7190_vm11, %v14409_v3, -inf  ;;  %v7258_v28 = vsel %vm7190_vm11, %v5726_v60, -inf  ;;  %v7764_v37 = vsel %vm7743_vm12, %v7244_v44, %v7241_v56  ;;  %v12044_v11 = vpop.f32.mrf.mxu0  ;;  %12061 = vmatmul.mubr.msk.f32.gmra.mxu0 %vm3201_vm9, %v3158_v20  ;;  %v7253_v25 = vmax.f32 %v7251_v21, %v7252_v47  ;;  %v11547_v21 = vld [vmem:[%s19070_s0 + $0x1f8] sm:$0xff] }
 0x227   :  { %1275 = vrot.lane.b32.xlu0 %v11546_v26, %s12659_s17  ;;  %v7261_v49 = vsel %vm7190_vm11, %v5733_v48, -inf  ;;  %v7765_v27 = vsel %vm7745_vm13, %v7247_v18, %v7764_v37  ;;  %v3803_v3 = vmul.f32 %v14217_v8, %v12044_v11  ;;  %v7257_v52 = vsel %vm7190_vm11, %v14411_v0, -inf  ;;  %v11674_v48 = vld [vmem:[%s19070_s0 + $0x1ea] sm:$0xff] }
 0x228   :  { %v14547_v39 = vpop.permute.xlu1 %1005  ;;  %v7260_v42 = vsel %vm7190_vm11, %v14415_v46, -inf  ;;  %v7256_v9 = vmax.f32 %v7254_v2, %v7255_v5  ;;  %v7766_v36 = vsel %vm7747_vm14, %v7250_v13, %v7765_v27  ;;  %v3524_v14 = vpop.f32.mrf.mxu0  ;;  %v7259_v40 = vmax.f32 %v7257_v52, %v7258_v28  ;;  %v77_v2 = vld [vmem:[%s19070_s0 + $0x138] sm:$0xff] }
 0x229   :  { %v14557_v61 = vpop.permute.xlu0 %751  ;;  %v7767_v12 = vsel %vm7749_vm15, %v7253_v25, %v7766_v36  ;;  %v3874_v32 = vadd.f32 %v14236_v24, %v3803_v3  ;;  %v3802_v41 = vmul.f32 %v14217_v8, %v3524_v14  ;;  %v7262_v26 = vmax.f32 %v7260_v42, %v7261_v49  ;;  %v78_v3 = vld [vmem:[%s19070_s0 + $0x140] sm:$0xff] }
 0x22a   :  { %2549 = vrot.lane.b32.xlu1 %v11673_v16, %s12664_s16  ;;  %v7768_v0 = vsel %vm19090_vm0, %v7256_v9, %v7767_v12  ;;  %vm19103_vm5 = vcmask 1046534   ;;  %vm19104_vm4 = vcmask 1047559   ;;  %v2704_v9 = vsel %vm2677_vm1, %v77_v2, %v14338_v34 }
 0x22b   :  { %2295 = vrot.lane.b32.xlu0 %v11610_v7, %s12663_s21  ;;  %v7769_v46 = vsel %vm19103_vm5, %v7259_v40, %v7768_v0  ;;  %v3938_v53 = vmax.f32 %v3874_v32, 0.0  ;;  %v3873_v33 = vadd.f32 %v14236_v24, %v3802_v41  ;;  %v2769_v14 = vsel %vm2742_vm2, %v2704_v9, %v14373_v55 }
 0x22c   :  { %v14567_v51 = vpop.permute.xlu1 %2025  ;;  %v7770_v19 = vsel %vm19104_vm4, %v7262_v26, %v7769_v46  ;;  %v2705_v41 = vsel %vm2677_vm1, %v78_v3, %v14375_v1  ;;  %v2834_v34 = vsel %vm2807_vm3, %v2769_v14, %v14431_v10  ;;  %vm19105_vm5 = vcmask 97280   ;;  %v14635_v10 = vld [vmem:[%s19070_s0 + $0x1f9] sm:$0xff]  ;;  %v14682_v14 = vld [vmem:[%s19070_s0 + $0x201] sm:$0xff] }
 0x22d   :  { %v14570_v60 = vpop.permute.xlu0 %1771  ;;  %7881 = vst.msk [vmem:[#allocation2 + $0x31] sm:$0xff] %vm7190_vm11, %v7770_v19  ;;  %v4274_v47 = vcombine.high %v3938_v53, %v3938_v53  ;;  %v4281_v58 = vrot.slane %v3938_v53, %v13627_v50  ;;  %v3937_v45 = vmax.f32 %v3873_v33, 0.0  ;;  %v2770_v33 = vsel %vm2742_vm2, %v2705_v41, %v14433_v22  ;;  %vm19106_vm4 = vmmov %vm19105_vm5  ;;  %v80_v41 = vld [vmem:[%s19070_s0 + $0x158] sm:$0xff] }
 0x22e   :  { %1531 = vrot.lane.b32.xlu1 %v11610_v7, %s12660_s20  ;;  %v2899_v55 = vsel %vm19105_vm5, %v2834_v34, %v14464_v54  ;;  %v2835_v1 = vsel %vm2807_vm3, %v2770_v33, %v14469_v29  ;;  %vm19107_vm0 = vcmask 121856   ;;  %v11548_v29 = vld [vmem:[%s19070_s0 + $0x200] sm:$0xff] }
 0x22f   :  { %765 = vrot.lane.b32.xlu0 %v14496_v35, %s12658_s23  ;;  %v4288_v38 = vrot.slane %v4274_v47, %v13627_v50  ;;  %v4257_v63 = vcombine.high %v3937_v45, %v3937_v45  ;;  %v4289_v18 = vcombine.high %v4281_v58, %v4281_v58  ;;  %v4264_v4 = vrot.slane %v3937_v45, %v13627_v50  ;;  %vm19108_vm5 = vmmov %vm19107_vm0 }
 0x230   :  { %v14581_v30 = vpop.permute.xlu1 %1261  ;;  %v5762_v56 = vsel %vm5397_vm10, %v4281_v58, -inf  ;;  %v2900_v22 = vsel %vm19106_vm4, %v2835_v1, %v14501_v31 }
 0x231   :  { %v14583_v57 = vpop.permute.xlu0 %1007  ;;  %v4290_v17 = vcombine.high %v4288_v38, %v4288_v38  ;;  %v4271_v35 = vrot.slane %v4257_v63, %v13627_v50  ;;  %v5769_v62 = vsel %vm5397_vm10, %v4289_v18, -inf  ;;  %v5776_v43 = vsel %vm5397_vm10, %v4288_v38, -inf }
 0x232   :  { %2551 = vrot.lane.b32.xlu1 %v11674_v48, %s12664_s16  ;;  %v4272_v5 = vcombine.high %v4264_v4, %v4264_v4  ;;  %v5734_v20 = vsel %vm5397_vm10, %v4264_v4, -inf  ;;  %v5763_v28 = vrot.slane %v5762_v56, 4  ;;  %v5777_v49 = vrot.slane %v5776_v43, 4 }
 0x233   :  { %1785 = vrot.lane.b32.xlu0 %v11673_v16, %s12661_s27  ;;  %v5783_v13 = vsel %vm5397_vm10, %v4290_v17, -inf  ;;  %v4273_v37 = vcombine.high %v4271_v35, %v4271_v35  ;;  %v5748_v11 = vsel %vm5397_vm10, %v4271_v35, -inf  ;;  %v5735_v52 = vrot.slane %v5734_v20, 4 }
 0x234   :  { %v2282_v23 = vpop.permute.xlu1 %2281  ;;  %v5741_v42 = vsel %vm5397_vm10, %v4272_v5, -inf  ;;  %v5749_v36 = vrot.slane %v5748_v11, 4  ;;  %v5764_v40 = vmax.f32 %v5762_v56, %v5763_v28  ;;  %v5778_v0 = vmax.f32 %v5776_v43, %v5777_v49 }
 0x235   :  { %v14590_v44 = vpop.permute.xlu0 %2027  ;;  %v5755_v12 = vsel %vm5397_vm10, %v4273_v37, -inf  ;;  %v5742_v46 = vrot.slane %v5741_v42, 4  ;;  %v5736_v47 = vmax.f32 %v5734_v20, %v5735_v52  ;;  %v2964_v38 = vsel %vm19107_vm0, %v2899_v55, %v14527_v59  ;;  %vm19109_vm0 = vmmov %vm19106_vm4 }
 0x236   :  { %1021 = vrot.lane.b32.xlu1 %v11673_v16, %s12657_s22  ;;  %v5770_v16 = vrot.slane %v5769_v62, 4  ;;  %v5750_v58 = vmax.f32 %v5748_v11, %v5749_v36  ;;  %v5756_v45 = vrot.slane %v5755_v12, 4  ;;  %v5765_v63 = vrot.slane %v5764_v40, 2  ;;  %vm19110_vm4 = vmmov %vm19108_vm5 }
 0x237   :  { %767 = vrot.lane.b32.xlu0 %v11610_v7, %s12658_s23  ;;  %v5784_v7 = vrot.slane %v5783_v13, 4  ;;  %v5743_v4 = vmax.f32 %v5741_v42, %v5742_v46  ;;  %v3029_v17 = vsel %vm3002_vm6, %v2964_v38, %v14567_v51  ;;  %v5737_v31 = vrot.slane %v5736_v47, 2  ;;  %v14674_v42 = vld [vmem:[%s19070_s0 + $0x1fa] sm:$0xff] }
 0x238   :  { %v14605_v25 = vpop.permute.xlu1 %1517  ;;  %v5771_v26 = vmax.f32 %v5769_v62, %v5770_v16  ;;  %v2965_v59 = vsel %vm19108_vm5, %v2900_v22, %v14570_v60  ;;  %v3094_v62 = vsel %vm3067_vm7, %v3029_v17, %v2282_v23  ;;  %v5751_v43 = vrot.slane %v5750_v58, 2  ;;  %vm19111_vm5 = vmmov %vm19109_vm0 }
 0x239   :  { %v14607_v27 = vpop.permute.xlu0 %1263  ;;  %v5785_v19 = vmax.f32 %v5783_v13, %v5784_v7  ;;  %v5757_v5 = vmax.f32 %v5755_v12, %v5756_v45  ;;  %v3030_v13 = vsel %vm3002_vm6, %v2965_v59, %v14590_v44  ;;  %v5766_v51 = vmax.f32 %v5764_v40, %v5765_v63  ;;  %v79_v44 = vld [vmem:[%s19070_s0 + $0x150] sm:$0xff] }
 0x23a   :  { %2041 = vrot.lane.b32.xlu1 %v11547_v21, %s12662_s18  ;;  %v5772_v18 = vrot.slane %v5771_v26, 2  ;;  %v5744_v28 = vrot.slane %v5743_v4, 2  ;;  %v5738_v49 = vmax.f32 %v5736_v47, %v5737_v31  ;;  %v5752_v3 = vmax.f32 %v5750_v58, %v5751_v43 }
 0x23b   :  { %1787 = vrot.lane.b32.xlu0 %v11674_v48, %s12661_s27  ;;  %v5786_v56 = vrot.slane %v5785_v19, 2  ;;  %v5758_v7 = vrot.slane %v5757_v5, 2  ;;  %v5767_v40 = vrot.slane %v5766_v51, 1 }
 0x23c   :  { %v2538_v32 = vpop.permute.xlu1 %2537  ;;  %v5773_v2 = vmax.f32 %v5771_v26, %v5772_v18  ;;  %v5745_v26 = vmax.f32 %v5743_v4, %v5744_v28  ;;  %v5739_v55 = vrot.slane %v5738_v49, 1  ;;  %v5753_v1 = vrot.slane %v5752_v3, 1 }
 0x23d   :  { %v2284_v53 = vpop.permute.xlu0 %2283  ;;  %v3159_v20 = vsel %vm3132_vm8, %v3094_v62, %v2538_v32  ;;  %v5787_v16 = vmax.f32 %v5785_v19, %v5786_v56  ;;  %v14697_v58 = vmax.f32 %v5757_v5, %v5758_v7  ;;  %v14708_v63 = vmax.f32 %v5766_v51, %v5767_v40  ;;  %v14735_v62 = vld [vmem:[%s19070_s0 + $0x202] sm:$0xff] }
 0x23e   :  { %1277 = vrot.lane.b32.xlu1 %v11547_v21, %s12659_s17  ;;  %v3095_v21 = vsel %vm3067_vm7, %v3030_v13, %v2284_v53  ;;  %12063 = vmatprep.mubr.msk.f32.mxu0 %vm3201_vm9, %v3159_v20  ;;  %v5774_v12 = vrot.slane %v5773_v2, 1  ;;  %v2706_v53 = vsel %vm2677_vm1, %v79_v44, %v14508_v6  ;;  %v2707_v6 = vsel %vm2677_vm1, %v80_v41, %v14557_v61 }
 0x23f   :  { %1023 = vrot.lane.b32.xlu0 %v11674_v48, %s12657_s22  ;;  %v5779_v48 = vrot.slane %v5778_v0, 2  ;;  %v5788_v34 = vrot.slane %v5787_v16, 1  ;;  %v2771_v47 = vsel %vm2742_vm2, %v2706_v53, %v14547_v39  ;;  %v5746_v18 = vrot.slane %v5745_v26, 1 }
 0x240   :  { %v14641_v54 = vpop.permute.xlu1 %1519  ;;  %v2836_v45 = vsel %vm2807_vm3, %v2771_v47, %v14581_v30  ;;  %v14710_v39 = vmax.f32 %v5773_v2, %v5774_v12  ;;  %v14723_v56 = vmax.f32 %v5752_v3, %v5753_v1  ;;  %v5760_v31 = vrot.slane %v14697_v58, 1 }
 0x241   :  { %v14648_v35 = vpop.permute.xlu0 %753  ;;  %v5780_v23 = vmax.f32 %v5778_v0, %v5779_v48  ;;  %v14716_v4 = vmax.f32 %v5787_v16, %v5788_v34  ;;  %v14728_v59 = vsel %vm2742_vm2, %v2707_v6, %v14583_v57  ;;  %v14743_v57 = vsel %vm19109_vm0, %v2836_v45, %v14605_v25  ;;  %vm19112_vm0 = vmmov %vm19110_vm4 }
 0x242   :  { %2297 = vrot.lane.b32.xlu1 %v14635_v10, %s12663_s21 }
 0x243   :  { %2043 = vrot.lane.b32.xlu0 %v11548_v29, %s12662_s18  ;;  %v5781_v32 = vrot.slane %v5780_v23, 1 }
 0x244   :  { %v2540_v60 = vpop.permute.xlu1 %2539 }
 0x245   :  { %v3160_v37 = vsel %vm3132_vm8, %v3095_v21, %v2540_v60  ;;  %v14662_v11 = vpop.permute.xlu0 %1773  ;;  %v5747_v21 = vmax.f32 %v5745_v26, %v5746_v18 }
 0x246   :  { %1533 = vrot.lane.b32.xlu1 %v14635_v10, %s12660_s20  ;;  %12064 = vmatmul.mubr.msk.f32.gmra.mxu0 %vm3201_vm9, %v3160_v37  ;;  %v12047_v52 = vpop.f32.mrf.mxu0 }
 0x247   :  { %1279 = vrot.lane.b32.xlu0 %v11548_v29, %s12659_s17  ;;  %v3805_v9 = vmul.f32 %v14217_v8, %v12047_v52  ;;  %v14712_v29 = vmax.f32 %v5780_v23, %v5781_v32 }
 0x248   :  { %v14677_v36 = vpop.permute.xlu1 %1009  ;;  %v3534_v46 = vpop.f32.mrf.mxu0 }
 0x249   :  { %v14687_v0 = vpop.permute.xlu0 %755  ;;  %v3876_v33 = vadd.f32 %v14236_v24, %v3805_v9  ;;  %v3804_v19 = vmul.f32 %v14217_v8, %v3534_v46 }
 0x24a   :  { %2553 = vrot.lane.b32.xlu1 %v14674_v42, %s12664_s16 }
 0x24b   :  { %2299 = vrot.lane.b32.xlu0 %v14682_v14, %s12663_s21  ;;  %v3940_v8 = vmax.f32 %v3876_v33, 0.0  ;;  %v3875_v22 = vadd.f32 %v14236_v24, %v3804_v19  ;;  %v14721_v24 = vmax.f32 %v5738_v49, %v5739_v55 }
 0x24c   :  { %v14706_v38 = vpop.permute.xlu1 %2029 }
 0x24d   :  { %v14714_v48 = vpop.permute.xlu0 %1775  ;;  %v4308_v61 = vcombine.high %v3940_v8, %v3940_v8  ;;  %v4315_v17 = vrot.slane %v3940_v8, %v13627_v50  ;;  %v3939_v30 = vmax.f32 %v3875_v22, 0.0  ;;  %v11549_v8 = vld [vmem:[%s19070_s0 + $0x210] sm:$0xff] }
 0x24e   :  { %1535 = vrot.lane.b32.xlu1 %v14682_v14, %s12660_s20 }
 0x24f   :  { %769 = vrot.lane.b32.xlu0 %v14635_v10, %s12658_s23  ;;  %v4322_v43 = vrot.slane %v4308_v61, %v13627_v50  ;;  %v4323_v5 = vcombine.high %v4315_v17, %v4315_v17  ;;  %v5818_v13 = vsel %vm5397_vm10, %v4315_v17, -inf  ;;  %v4291_v20 = vcombine.high %v3939_v30, %v3939_v30 }
 0x250   :  { %v14739_v51 = vpop.permute.xlu1 %1265  ;;  %v5819_v60 = vrot.slane %v5818_v13, 4  ;;  %v4298_v10 = vrot.slane %v3939_v30, %v13627_v50 }
 0x251   :  { %v14746_v2 = vpop.permute.xlu0 %1011  ;;  %v4324_v23 = vcombine.high %v4322_v43, %v4322_v43  ;;  %v5825_v28 = vsel %vm5397_vm10, %v4323_v5, -inf  ;;  %v5832_v37 = vsel %vm5397_vm10, %v4322_v43, -inf  ;;  %v4305_v16 = vrot.slane %v4291_v20, %v13627_v50 }
 0x252   :  { %2555 = vrot.lane.b32.xlu1 %v14735_v62, %s12664_s16  ;;  %v5820_v44 = vmax.f32 %v5818_v13, %v5819_v60  ;;  %v5826_v49 = vrot.slane %v5825_v28, 4  ;;  %v5833_v3 = vrot.slane %v5832_v37, 4  ;;  %v4306_v25 = vcombine.high %v4298_v10, %v4298_v10 }
 0x253   :  { %1789 = vrot.lane.b32.xlu0 %v14674_v42, %s12661_s27  ;;  %v5839_v7 = vsel %vm5397_vm10, %v4324_v23, -inf  ;;  %v4307_v52 = vcombine.high %v4305_v16, %v4305_v16  ;;  %v5790_v9 = vsel %vm5397_vm10, %v4298_v10, -inf  ;;  %v5804_v40 = vsel %vm5397_vm10, %v4305_v16, -inf }
 0x254   :  { %v14758_v12 = vpop.permute.xlu1 %2285  ;;  %v5821_v32 = vrot.slane %v5820_v44, 2  ;;  %v5827_v41 = vmax.f32 %v5825_v28, %v5826_v49  ;;  %v5834_v26 = vmax.f32 %v5832_v37, %v5833_v3  ;;  %v5840_v46 = vrot.slane %v5839_v7, 4 }
 0x255   :  { %v14760_v53 = vpop.permute.xlu0 %2031  ;;  %v5791_v34 = vrot.slane %v5790_v9, 4  ;;  %v5797_v33 = vsel %vm5397_vm10, %v4306_v25, -inf  ;;  %v5805_v19 = vrot.slane %v5804_v40, 4  ;;  %v5811_v47 = vsel %vm5397_vm10, %v4307_v52, -inf }
 0x256   :  { %1025 = vrot.lane.b32.xlu1 %v14674_v42, %s12657_s22  ;;  %v5822_v55 = vmax.f32 %v5820_v44, %v5821_v32  ;;  %v5828_v1 = vrot.slane %v5827_v41, 2  ;;  %v5835_v6 = vrot.slane %v5834_v26, 2  ;;  %v5841_v45 = vmax.f32 %v5839_v7, %v5840_v46 }
 0x257   :  { %771 = vrot.lane.b32.xlu0 %v14682_v14, %s12658_s23  ;;  %v5792_v22 = vmax.f32 %v5790_v9, %v5791_v34  ;;  %v5798_v18 = vrot.slane %v5797_v33, 4  ;;  %v5806_v61 = vmax.f32 %v5804_v40, %v5805_v19  ;;  %v5812_v17 = vrot.slane %v5811_v47, 4 }
 0x258   :  { %v14771_v30 = vpop.permute.xlu1 %1521  ;;  %v5823_v43 = vrot.slane %v5822_v55, 1  ;;  %v5829_v5 = vmax.f32 %v5827_v41, %v5828_v1  ;;  %v5836_v42 = vmax.f32 %v5834_v26, %v5835_v6  ;;  %v5842_v13 = vrot.slane %v5841_v45, 2 }
 0x259   :  { %v14773_v20 = vpop.permute.xlu0 %1267  ;;  %v5793_v60 = vrot.slane %v5792_v22, 2  ;;  %v5799_v10 = vmax.f32 %v5797_v33, %v5798_v18  ;;  %v5807_v23 = vrot.slane %v5806_v61, 2  ;;  %v5813_v14 = vmax.f32 %v5811_v47, %v5812_v17 }
 0x25a   :  { %2045 = vrot.lane.b32.xlu1 %v11549_v8, %s12662_s18  ;;  %v5761_v28 = vmax.f32 %v14697_v58, %v5760_v31  ;;  %v14779_v37 = vsel %vm7190_vm11, %v14721_v24, -inf  ;;  %v14783_v16 = vsel %vm7190_vm11, %v14723_v56, -inf  ;;  %v5843_v44 = vmax.f32 %v5841_v45, %v5842_v13 }
 0x25b   :  { %1791 = vrot.lane.b32.xlu0 %v14735_v62, %s12661_s27  ;;  %v5794_v49 = vmax.f32 %v5792_v22, %v5793_v60  ;;  %v5800_v3 = vrot.slane %v5799_v10, 2  ;;  %v5808_v25 = vmax.f32 %v5806_v61, %v5807_v23  ;;  %v5814_v7 = vrot.slane %v5813_v14, 2 }
 0x25c   :  { %v2542_v52 = vpop.permute.xlu1 %2541  ;;  %v7266_v9 = vsel %vm7190_vm11, %v5747_v21, -inf  ;;  %v2837_v58 = vsel %vm2807_vm3, %v14728_v59, %v14607_v27  ;;  %v5824_v24 = vmax.f32 %v5822_v55, %v5823_v43  ;;  %v5830_v31 = vrot.slane %v5829_v5, 1  ;;  %v14801_v27 = vld [vmem:[%s19070_s0 + $0x211] sm:$0xff] }
 0x25d   :  { %v2288_v40 = vpop.permute.xlu0 %2287  ;;  %v5837_v56 = vrot.slane %v5836_v42, 1  ;;  %v5795_v32 = vrot.slane %v5794_v49, 1  ;;  %v5801_v41 = vmax.f32 %v5799_v10, %v5800_v3  ;;  %v5809_v26 = vrot.slane %v5808_v25, 1 }
 0x25e   :  { %1281 = vrot.lane.b32.xlu1 %v11549_v8, %s12659_s17  ;;  %v7272_v46 = vsel %vm7190_vm11, %v5761_v28, -inf  ;;  %v2966_v34 = vsel %vm19110_vm4, %v14743_v57, %v14662_v11  ;;  %v5844_v21 = vrot.slane %v5843_v44, 1  ;;  %v5815_v33 = vmax.f32 %v5813_v14, %v5814_v7  ;;  %v11550_v11 = vld [vmem:[%s19070_s0 + $0x218] sm:$0xff] }
 0x25f   :  { %1027 = vrot.lane.b32.xlu0 %v14735_v62, %s12657_s22  ;;  %v2902_v59 = vsel %vm19111_vm5, %v2837_v58, %v14641_v54  ;;  %v5796_v19 = vmax.f32 %v5794_v49, %v5795_v32  ;;  %v5802_v47 = vrot.slane %v5801_v41, 1  ;;  %v3031_v55 = vsel %vm3002_vm6, %v2966_v34, %v14706_v38 }
 0x260   :  { %v14807_v1 = vpop.permute.xlu1 %1523  ;;  %v5831_v62 = vmax.f32 %v5829_v5, %v5830_v31  ;;  %v5810_v57 = vmax.f32 %v5808_v25, %v5809_v26  ;;  %v5816_v6 = vrot.slane %v5815_v33, 1  ;;  %v2967_v45 = vsel %vm19112_vm0, %v2902_v59, %v14714_v48 }
 0x261   :  { %v14814_v8 = vpop.permute.xlu0 %757  ;;  %v5838_v54 = vmax.f32 %v5836_v42, %v5837_v56  ;;  %v7276_v22 = vsel %vm7190_vm11, %v5824_v24, -inf  ;;  %v5803_v18 = vmax.f32 %v5801_v41, %v5802_v47  ;;  %v7264_v38 = vsel %vm7190_vm11, %v5796_v19, -inf  ;;  %v11614_v56 = vld [vmem:[%s19070_s0 + $0x219] sm:$0xff] }
 0x262   :  { %2301 = vrot.lane.b32.xlu1 %v14801_v27, %s12663_s21  ;;  %v5845_v61 = vmax.f32 %v5843_v44, %v5844_v21  ;;  %v5817_v17 = vmax.f32 %v5815_v33, %v5816_v6  ;;  %v7270_v43 = vsel %vm7190_vm11, %v5810_v57, -inf  ;;  %v3096_v5 = vsel %vm3067_vm7, %v3031_v55, %v14758_v12  ;;  %v14874_v19 = vld [vmem:[%s19073_s3] ss:$0 sm:$0xff] }
 0x263   :  { %2047 = vrot.lane.b32.xlu0 %v11550_v11, %s12662_s18  ;;  %v7265_v48 = vmax.f32 %v14779_v37, %v7264_v38  ;;  %v7267_v42 = vsel %vm7190_vm11, %v5803_v18, -inf  ;;  %v7271_v13 = vmax.f32 %v14783_v16, %v7270_v43  ;;  %v3032_v60 = vsel %vm3002_vm6, %v2967_v45, %v14760_v53 }
 0x264   :  { %v2544_v10 = vpop.permute.xlu1 %2543  ;;  %v7268_v23 = vmax.f32 %v7266_v9, %v7267_v42  ;;  %v7273_v14 = vsel %vm7190_vm11, %v5817_v17, -inf  ;;  %v3161_v28 = vsel %vm3132_vm8, %v3096_v5, %v2542_v52  ;;  %v3097_v44 = vsel %vm3067_vm7, %v3032_v60, %v2288_v40  ;;  %v11677_v40 = vld [vmem:[%s19070_s0 + $0x212] sm:$0xff]  ;;  %v11678_v5 = vld [vmem:[%s19070_s0 + $0x21a] sm:$0xff] }
 0x265   :  { %v14832_v12 = vpop.permute.xlu0 %1777  ;;  %v7279_v49 = vsel %vm7190_vm11, %v5831_v62, -inf  ;;  %v7274_v37 = vmax.f32 %v7272_v46, %v7273_v14  ;;  %12066 = vmatprep.mubr.msk.f32.mxu0 %vm3201_vm9, %v3161_v28  ;;  %v3162_v16 = vsel %vm3132_vm8, %v3097_v44, %v2544_v10  ;;  %v7275_v53 = vsel %vm7190_vm11, %v14708_v63, -inf  ;;  %v14851_v63 = vld [vmem:[%s19072_s2] ss:$0 sm:$0xff] }
 0x266   :  { %v7278_v3 = vsel %vm7190_vm11, %v14710_v39, -inf  ;;  %v7282_v25 = vsel %vm7190_vm11, %v5838_v54, -inf  ;;  %v7771_v7 = vsel %vm7743_vm12, %v7268_v23, %v7265_v48  ;;  %1537 = vrot.lane.b32.xlu1 %v14801_v27, %s12660_s20  ;;  %v7277_v9 = vmax.f32 %v7275_v53, %v7276_v22  ;;  %12067 = vmatmul.mubr.msk.f32.gmra.mxu0 %vm3201_vm9, %v3162_v16 }
 0x267   :  { %1283 = vrot.lane.b32.xlu0 %v11550_v11, %s12659_s17  ;;  %v12050_v52 = vpop.f32.mrf.mxu0  ;;  %v7285_v58 = vsel %vm7190_vm11, %v5845_v61, -inf  ;;  %v7772_v24 = vsel %vm7745_vm13, %v7271_v13, %v7771_v7  ;;  %v7281_v32 = vsel %vm7190_vm11, %v14712_v29, -inf  ;;  %v7284_v41 = vsel %vm7190_vm11, %v14716_v4, -inf }
 0x268   :  { %v3807_v39 = vmul.f32 %v14851_v63, %v12050_v52  ;;  %v14855_v31 = vpop.permute.xlu1 %1013  ;;  %v7280_v26 = vmax.f32 %v7278_v3, %v7279_v49  ;;  %v7773_v46 = vsel %vm7747_vm14, %v7274_v37, %v7772_v24  ;;  %v7283_v33 = vmax.f32 %v7281_v32, %v7282_v25  ;;  %v81_v25 = vld [vmem:[%s19070_s0 + $0x168] sm:$0xff] }
 0x269   :  { %v14868_v34 = vpop.permute.xlu0 %759  ;;  %v3544_v21 = vpop.f32.mrf.mxu0  ;;  %v7774_v59 = vsel %vm7749_vm15, %v7277_v9, %v7773_v46  ;;  %v7286_v55 = vmax.f32 %v7284_v41, %v7285_v58  ;;  %vm19113_vm4 = vcmask 1045509   ;;  %vm19114_vm5 = vcmask 1046534   ;;  %v11551_v9 = vld [vmem:[%s19070_s0 + $0x228] sm:$0xff] }
 0x26a   :  { %v3878_v47 = vadd.f32 %v14874_v19, %v3807_v39  ;;  %v3806_v29 = vmul.f32 %v14851_v63, %v3544_v21  ;;  %v7775_v4 = vsel %vm19113_vm4, %v7280_v26, %v7774_v59  ;;  %2557 = vrot.lane.b32.xlu1 %v11677_v40, %s12664_s16  ;;  %vm19115_vm0 = vcmask 1047559   ;;  %v82_v39 = vld [vmem:[%s19070_s0 + $0x170] sm:$0xff] }
 0x26b   :  { %2303 = vrot.lane.b32.xlu0 %v11614_v56, %s12663_s21  ;;  %v7776_v11 = vsel %vm19114_vm5, %v7283_v33, %v7775_v4  ;;  %v2708_v41 = vsel %vm2677_vm1, %v81_v25, %v14648_v35  ;;  %vm19116_vm4 = vcmask 97280  }
 0x26c   :  { %v3942_v62 = vmax.f32 %v3878_v47, 0.0  ;;  %v3877_v57 = vadd.f32 %v14874_v19, %v3806_v29  ;;  %v14883_v6 = vpop.permute.xlu1 %2033  ;;  %v7777_v45 = vsel %vm19115_vm0, %v7286_v55, %v7776_v11  ;;  %v2773_v33 = vsel %vm2742_vm2, %v2708_v41, %v14677_v36  ;;  %vm19117_vm5 = vmmov %vm19116_vm4 }
 0x26d   :  { %v14886_v54 = vpop.permute.xlu0 %1779  ;;  %7882 = vst.msk [vmem:[#allocation2 + $0x41] sm:$0xff] %vm7190_vm11, %v7777_v45  ;;  %v2709_v29 = vsel %vm2677_vm1, %v82_v39, %v14687_v0  ;;  %v2838_v55 = vsel %vm2807_vm3, %v2773_v33, %v14739_v51  ;;  %vm19118_vm0 = vcmask 121856  }
 0x26e   :  { %v4342_v22 = vcombine.high %v3942_v62, %v3942_v62  ;;  %v4349_v18 = vrot.slane %v3942_v62, %v13627_v50  ;;  %v3941_v38 = vmax.f32 %v3877_v57, 0.0  ;;  %1539 = vrot.lane.b32.xlu1 %v11614_v56, %s12660_s20  ;;  %v2774_v62 = vsel %vm2742_vm2, %v2709_v29, %v14746_v2 }
 0x26f   :  { %773 = vrot.lane.b32.xlu0 %v14801_v27, %s12658_s23  ;;  %v2903_v36 = vsel %vm19116_vm4, %v2838_v55, %v14771_v30  ;;  %v14955_v30 = vld [vmem:[%s19070_s0 + $0x229] sm:$0xff]  ;;  %vm19119_vm4 = vmmov %vm19118_vm0 }
 0x270   :  { %v4357_v61 = vcombine.high %v4349_v18, %v4349_v18  ;;  %v4325_v17 = vcombine.high %v3941_v38, %v3941_v38  ;;  %v14893_v43 = vpop.permute.xlu1 %1269  ;;  %v4356_v48 = vrot.slane %v4342_v22, %v13627_v50  ;;  %v5874_v13 = vsel %vm5397_vm10, %v4349_v18, -inf }
 0x271   :  { %v14899_v42 = vpop.permute.xlu0 %1015  ;;  %v4332_v60 = vrot.slane %v3941_v38, %v13627_v50  ;;  %v5875_v49 = vrot.slane %v5874_v13, 4  ;;  %v2839_v18 = vsel %vm2807_vm3, %v2774_v62, %v14773_v20  ;;  %v2968_v2 = vsel %vm19118_vm0, %v2903_v36, %v14832_v12  ;;  %v11552_v12 = vld [vmem:[%s19070_s0 + $0x230] sm:$0xff]  ;;  %vm19120_vm0 = vmmov %vm19117_vm5 }
 0x272   :  { %v4339_v10 = vrot.slane %v4325_v17, %v13627_v50  ;;  %2559 = vrot.lane.b32.xlu1 %v11678_v5, %s12664_s16  ;;  %v5881_v27 = vsel %vm5397_vm10, %v4357_v61, -inf  ;;  %v5888_v14 = vsel %vm5397_vm10, %v4356_v48, -inf  ;;  %v4358_v44 = vcombine.high %v4356_v48, %v4356_v48  ;;  %v15006_v62 = vld [vmem:[%s19070_s0 + $0x231] sm:$0xff] }
 0x273   :  { %1793 = vrot.lane.b32.xlu0 %v11677_v40, %s12661_s27  ;;  %v5882_v37 = vrot.slane %v5881_v27, 4  ;;  %v4340_v16 = vcombine.high %v4332_v60, %v4332_v60  ;;  %v5846_v53 = vsel %vm5397_vm10, %v4332_v60, -inf  ;;  %v5889_v7 = vrot.slane %v5888_v14, 4 }
 0x274   :  { %v2290_v23 = vpop.permute.xlu1 %2289  ;;  %v5860_v3 = vsel %vm5397_vm10, %v4339_v10, -inf  ;;  %v4341_v58 = vcombine.high %v4339_v10, %v4339_v10  ;;  %v5876_v26 = vmax.f32 %v5874_v13, %v5875_v49  ;;  %v2904_v51 = vsel %vm19117_vm5, %v2839_v18, %v14807_v1 }
 0x275   :  { %v2036_v28 = vpop.permute.xlu0 %2035  ;;  %v5861_v32 = vrot.slane %v5860_v3, 4  ;;  %v5883_v46 = vmax.f32 %v5881_v27, %v5882_v37  ;;  %v5853_v21 = vsel %vm5397_vm10, %v4340_v16, -inf  ;;  %v5890_v59 = vmax.f32 %v5888_v14, %v5889_v7 }
 0x276   :  { %1029 = vrot.lane.b32.xlu1 %v11677_v40, %s12657_s22  ;;  %v5895_v40 = vsel %vm5397_vm10, %v4358_v44, -inf  ;;  %v5867_v4 = vsel %vm5397_vm10, %v4341_v58, -inf  ;;  %v5854_v45 = vrot.slane %v5853_v21, 4  ;;  %v5877_v0 = vrot.slane %v5876_v26, 2 }
 0x277   :  { %775 = vrot.lane.b32.xlu0 %v11614_v56, %s12658_s23  ;;  %v5847_v56 = vrot.slane %v5846_v53, 4  ;;  %v5896_v35 = vrot.slane %v5895_v40, 4  ;;  %v5862_v22 = vmax.f32 %v5860_v3, %v5861_v32  ;;  %v5884_v38 = vrot.slane %v5883_v46, 2 }
 0x278   :  { %v14915_v52 = vpop.permute.xlu1 %1525  ;;  %v5891_v61 = vrot.slane %v5890_v59, 2  ;;  %v5868_v17 = vrot.slane %v5867_v4, 4  ;;  %v3033_v13 = vsel %vm3002_vm6, %v2968_v2, %v14883_v6  ;;  %v5855_v10 = vmax.f32 %v5853_v21, %v5854_v45 }
 0x279   :  { %v14920_v24 = vpop.permute.xlu0 %1271  ;;  %v5848_v57 = vmax.f32 %v5846_v53, %v5847_v56  ;;  %v5897_v20 = vmax.f32 %v5895_v40, %v5896_v35  ;;  %v5863_v27 = vrot.slane %v5862_v22, 2  ;;  %v3098_v14 = vsel %vm3067_vm7, %v3033_v13, %v2290_v23 }
 0x27a   :  { %2049 = vrot.lane.b32.xlu1 %v11551_v9, %s12662_s18  ;;  %v5878_v44 = vmax.f32 %v5876_v26, %v5877_v0  ;;  %v5885_v49 = vmax.f32 %v5883_v46, %v5884_v38  ;;  %v5869_v16 = vmax.f32 %v5867_v4, %v5868_v17  ;;  %v5856_v58 = vrot.slane %v5855_v10, 2  ;;  %v84_v46 = vld [vmem:[%s19070_s0 + $0x1b8] sm:$0xff] }
 0x27b   :  { %1795 = vrot.lane.b32.xlu0 %v11678_v5, %s12661_s27  ;;  %v5849_v60 = vrot.slane %v5848_v57, 2  ;;  %v5898_v25 = vrot.slane %v5897_v20, 2  ;;  %v5864_v39 = vmax.f32 %v5862_v22, %v5863_v27  ;;  %v2711_v36 = vsel %vm2677_vm1, %v84_v46, %v14868_v34 }
 0x27c   :  { %v2546_v47 = vpop.permute.xlu1 %2545  ;;  %v5879_v32 = vrot.slane %v5878_v44, 1  ;;  %v5886_v41 = vrot.slane %v5885_v49, 1  ;;  %v5870_v21 = vrot.slane %v5869_v16, 2  ;;  %v15010_v22 = vmax.f32 %v5855_v10, %v5856_v58 }
 0x27d   :  { %v2292_v11 = vpop.permute.xlu0 %2291  ;;  %v3163_v6 = vsel %vm3132_vm8, %v3098_v14, %v2546_v47  ;;  %v14993_v47 = vld [vmem:[%s19070_s0 + $0x22a] sm:$0xff]  ;;  %v14997_v55 = vmax.f32 %v5897_v20, %v5898_v25  ;;  %v15042_v27 = vsel %vm2742_vm2, %v2711_v36, %v14899_v42 }
 0x27e   :  { %1285 = vrot.lane.b32.xlu1 %v11551_v9, %s12659_s17  ;;  %12069 = vmatprep.mubr.msk.f32.mxu0 %vm3201_vm9, %v3163_v6  ;;  %v5850_v9 = vmax.f32 %v5848_v57, %v5849_v60  ;;  %v15021_v2 = vmax.f32 %v5885_v49, %v5886_v41  ;;  %v5858_v60 = vrot.slane %v15010_v22, 1 }
 0x27f   :  { %1031 = vrot.lane.b32.xlu0 %v11678_v5, %s12657_s22  ;;  %v2969_v5 = vsel %vm19119_vm4, %v2904_v51, %v14886_v54  ;;  %v5892_v54 = vmax.f32 %v5890_v59, %v5891_v61  ;;  %v15019_v51 = vmax.f32 %v5878_v44, %v5879_v32  ;;  %v15025_v61 = vmax.f32 %v5869_v16, %v5870_v21 }
 0x280   :  { %v14950_v48 = vpop.permute.xlu1 %1527  ;;  %v3034_v37 = vsel %vm3002_vm6, %v2969_v5, %v2036_v28  ;;  %v83_v28 = vld [vmem:[%s19070_s0 + $0x1b0] sm:$0xff]  ;;  %v5851_v45 = vrot.slane %v5850_v9, 1 }
 0x281   :  { %v14961_v1 = vpop.permute.xlu0 %761  ;;  %v3099_v53 = vsel %vm3067_vm7, %v3034_v37, %v2292_v11  ;;  %v5893_v26 = vrot.slane %v5892_v54, 1  ;;  %v2710_v29 = vsel %vm2677_vm1, %v83_v28, %v14814_v8  ;;  %v5865_v8 = vrot.slane %v5864_v39, 1 }
 0x282   :  { %2305 = vrot.lane.b32.xlu1 %v14955_v30, %s12663_s21  ;;  %v2775_v57 = vsel %vm2742_vm2, %v2710_v29, %v14855_v31  ;;  %v5872_v6 = vrot.slane %v15025_v61, 1 }
 0x283   :  { %2051 = vrot.lane.b32.xlu0 %v11552_v12, %s12662_s18  ;;  %v2840_v18 = vsel %vm2807_vm3, %v2775_v57, %v14893_v43  ;;  %v15023_v31 = vmax.f32 %v5892_v54, %v5893_v26  ;;  %v5900_v43 = vrot.slane %v14997_v55, 1  ;;  %v15038_v10 = vmax.f32 %v5864_v39, %v5865_v8 }
 0x284   :  { %v2548_v3 = vpop.permute.xlu1 %2547  ;;  %v15051_v54 = vsel %vm19117_vm5, %v2840_v18, %v14915_v52  ;;  %vm19121_vm5 = vmmov %vm19119_vm4 }
 0x285   :  { %v3164_v23 = vsel %vm3132_vm8, %v3099_v53, %v2548_v3  ;;  %v14975_v7 = vpop.permute.xlu0 %1781  ;;  %v15061_v3 = vld [vmem:[%s19070_s0 + $0x232] sm:$0xff] }
 0x286   :  { %v12053_v40 = vpop.f32.mrf.mxu0  ;;  %12070 = vmatmul.mubr.msk.f32.gmra.mxu0 %vm3201_vm9, %v3164_v23  ;;  %1541 = vrot.lane.b32.xlu1 %v14955_v30, %s12660_s20 }
 0x287   :  { %v3809_v56 = vmul.f32 %v14851_v63, %v12053_v40  ;;  %1287 = vrot.lane.b32.xlu0 %v11552_v12, %s12659_s17  ;;  %v15035_v12 = vmax.f32 %v5850_v9, %v5851_v45 }
 0x288   :  { %v14988_v33 = vpop.permute.xlu1 %1017  ;;  %v3554_v59 = vpop.f32.mrf.mxu0 }
 0x289   :  { %v3880_v35 = vadd.f32 %v14874_v19, %v3809_v56  ;;  %v15000_v4 = vpop.permute.xlu0 %763  ;;  %v3808_v11 = vmul.f32 %v14851_v63, %v3554_v59 }
 0x28a   :  { %2561 = vrot.lane.b32.xlu1 %v14993_v47, %s12664_s16 }
 0x28b   :  { %v3944_v0 = vmax.f32 %v3880_v35, 0.0  ;;  %v3879_v38 = vadd.f32 %v14874_v19, %v3808_v11  ;;  %2307 = vrot.lane.b32.xlu0 %v15006_v62, %s12663_s21 }
 0x28c   :  { %v15029_v34 = vpop.permute.xlu1 %2037 }
 0x28d   :  { %v4376_v17 = vcombine.high %v3944_v0, %v3944_v0  ;;  %v4383_v20 = vrot.slane %v3944_v0, %v13627_v50  ;;  %v3943_v13 = vmax.f32 %v3879_v38, 0.0  ;;  %v15033_v5 = vpop.permute.xlu0 %1783 }
 0x28e   :  { %1543 = vrot.lane.b32.xlu1 %v15006_v62, %s12660_s20 }
 0x28f   :  { %v4390_v14 = vrot.slane %v4376_v17, %v13627_v50  ;;  %v4391_v44 = vcombine.high %v4383_v20, %v4383_v20  ;;  %v5930_v49 = vsel %vm5397_vm10, %v4383_v20, -inf  ;;  %v4359_v37 = vcombine.high %v3943_v13, %v3943_v13  ;;  %777 = vrot.lane.b32.xlu0 %v14955_v30, %s12658_s23 }
 0x290   :  { %v5931_v16 = vrot.slane %v5930_v49, 4  ;;  %v4366_v53 = vrot.slane %v3943_v13, %v13627_v50  ;;  %v15056_v42 = vpop.permute.xlu1 %1273 }
 0x291   :  { %v4392_v25 = vcombine.high %v4390_v14, %v4390_v14  ;;  %v5937_v23 = vsel %vm5397_vm10, %v4391_v44, -inf  ;;  %v5944_v28 = vsel %vm5397_vm10, %v4390_v14, -inf  ;;  %v4373_v52 = vrot.slane %v4359_v37, %v13627_v50  ;;  %v15066_v9 = vpop.permute.xlu0 %1019 }
 0x292   :  { %v5932_v58 = vmax.f32 %v5930_v49, %v5931_v16  ;;  %v5938_v39 = vrot.slane %v5937_v23, 4  ;;  %v5945_v40 = vrot.slane %v5944_v28, 4  ;;  %v4374_v30 = vcombine.high %v4366_v53, %v4366_v53  ;;  %2563 = vrot.lane.b32.xlu1 %v15061_v3, %s12664_s16 }
 0x293   :  { %v5951_v56 = vsel %vm5397_vm10, %v4392_v25, -inf  ;;  %v4375_v32 = vcombine.high %v4373_v52, %v4373_v52  ;;  %v5902_v41 = vsel %vm5397_vm10, %v4366_v53, -inf  ;;  %v5916_v26 = vsel %vm5397_vm10, %v4373_v52, -inf  ;;  %1797 = vrot.lane.b32.xlu0 %v14993_v47, %s12661_s27 }
 0x294   :  { %v5933_v46 = vrot.slane %v5932_v58, 2  ;;  %v5939_v21 = vmax.f32 %v5937_v23, %v5938_v39  ;;  %v5946_v59 = vmax.f32 %v5944_v28, %v5945_v40  ;;  %v5952_v29 = vrot.slane %v5951_v56, 4  ;;  %v15075_v35 = vpop.permute.xlu1 %2293  ;;  %v11553_v23 = vld [vmem:[%s19070_s0 + $0x240] sm:$0xff] }
 0x295   :  { %v5903_v11 = vrot.slane %v5902_v41, 4  ;;  %v5909_v57 = vsel %vm5397_vm10, %v4374_v30, -inf  ;;  %v5917_v45 = vrot.slane %v5916_v26, 4  ;;  %v5923_v8 = vsel %vm5397_vm10, %v4375_v32, -inf  ;;  %v15079_v36 = vpop.permute.xlu0 %2039 }
 0x296   :  { %v5934_v18 = vmax.f32 %v5932_v58, %v5933_v46  ;;  %v5940_v0 = vrot.slane %v5939_v21, 2  ;;  %v5947_v38 = vrot.slane %v5946_v59, 2  ;;  %v5953_v17 = vmax.f32 %v5951_v56, %v5952_v29  ;;  %1033 = vrot.lane.b32.xlu1 %v14993_v47, %s12657_s22 }
 0x297   :  { %v5904_v20 = vmax.f32 %v5902_v41, %v5903_v11  ;;  %v5910_v13 = vrot.slane %v5909_v57, 4  ;;  %v5918_v14 = vmax.f32 %v5916_v26, %v5917_v45  ;;  %v5924_v44 = vrot.slane %v5923_v8, 4  ;;  %779 = vrot.lane.b32.xlu0 %v15006_v62, %s12658_s23 }
 0x298   :  { %v5859_v49 = vmax.f32 %v15010_v22, %v5858_v60  ;;  %v5941_v37 = vmax.f32 %v5939_v21, %v5940_v0  ;;  %v5948_v16 = vmax.f32 %v5946_v59, %v5947_v38  ;;  %v5954_v53 = vrot.slane %v5953_v17, 2  ;;  %v15086_v25 = vpop.permute.xlu1 %1529 }
 0x299   :  { %v5905_v28 = vrot.slane %v5904_v20, 2  ;;  %v5911_v52 = vmax.f32 %v5909_v57, %v5910_v13  ;;  %v5919_v58 = vrot.slane %v5918_v14, 2  ;;  %v5925_v39 = vmax.f32 %v5923_v8, %v5924_v44  ;;  %v15091_v40 = vpop.permute.xlu0 %1275 }
 0x29a   :  { %v5873_v47 = vmax.f32 %v15025_v61, %v5872_v6  ;;  %v15096_v22 = vsel %vm7190_vm11, %v15035_v12, -inf  ;;  %v5935_v60 = vrot.slane %v5934_v18, 1  ;;  %v5955_v62 = vmax.f32 %v5953_v17, %v5954_v53  ;;  %2053 = vrot.lane.b32.xlu1 %v11553_v23, %s12662_s18 }
 0x29b   :  { %v5906_v30 = vmax.f32 %v5904_v20, %v5905_v28  ;;  %v5912_v56 = vrot.slane %v5911_v52, 2  ;;  %v5920_v32 = vmax.f32 %v5918_v14, %v5919_v58  ;;  %v5926_v41 = vrot.slane %v5925_v39, 2  ;;  %1799 = vrot.lane.b32.xlu0 %v15061_v3, %s12661_s27 }
 0x29c   :  { %v7290_v26 = vsel %vm7190_vm11, %v5859_v49, -inf  ;;  %v7293_v46 = vsel %vm7190_vm11, %v15038_v10, -inf  ;;  %v2841_v61 = vsel %vm2807_vm3, %v15042_v27, %v14920_v24  ;;  %v5942_v6 = vrot.slane %v5941_v37, 1  ;;  %v2550_v12 = vpop.permute.xlu1 %2549 }
 0x29d   :  { %v5949_v21 = vrot.slane %v5948_v16, 1  ;;  %v5907_v59 = vrot.slane %v5906_v30, 1  ;;  %v5913_v29 = vmax.f32 %v5911_v52, %v5912_v56  ;;  %v5921_v11 = vrot.slane %v5920_v32, 1  ;;  %v2296_v57 = vpop.permute.xlu0 %2295 }
 0x29e   :  { %v7296_v45 = vsel %vm7190_vm11, %v5873_v47, -inf  ;;  %v5936_v8 = vmax.f32 %v5934_v18, %v5935_v60  ;;  %v5956_v0 = vrot.slane %v5955_v62, 1  ;;  %v5927_v38 = vmax.f32 %v5925_v39, %v5926_v41  ;;  %1289 = vrot.lane.b32.xlu1 %v11553_v23, %s12659_s17 }
 0x29f   :  { %v2906_v10 = vsel %vm19120_vm0, %v2841_v61, %v14950_v48  ;;  %v2970_v24 = vsel %vm19119_vm4, %v15051_v54, %v14975_v7  ;;  %v5908_v27 = vmax.f32 %v5906_v30, %v5907_v59  ;;  %v5914_v17 = vrot.slane %v5913_v29, 1  ;;  %1035 = vrot.lane.b32.xlu0 %v15061_v3, %s12657_s22  ;;  %v15125_v7 = vld [vmem:[%s19070_s0 + $0x241] sm:$0xff] }
 0x2a0   :  { %v5922_v20 = vmax.f32 %v5920_v32, %v5921_v11  ;;  %v5928_v13 = vrot.slane %v5927_v38, 1  ;;  %v3035_v14 = vsel %vm3002_vm6, %v2970_v24, %v15029_v34  ;;  %v2971_v18 = vsel %vm19121_vm5, %v2906_v10, %v15033_v5  ;;  %v15120_v48 = vpop.permute.xlu1 %1531  ;;  %v11554_v34 = vld [vmem:[%s19070_s0 + $0x248] sm:$0xff] }
 0x2a1   :  { %v5943_v54 = vmax.f32 %v5941_v37, %v5942_v6  ;;  %v5950_v44 = vmax.f32 %v5948_v16, %v5949_v21  ;;  %v5915_v49 = vmax.f32 %v5913_v29, %v5914_v17  ;;  %v7288_v53 = vsel %vm7190_vm11, %v5908_v27, -inf  ;;  %v15128_v23 = vpop.permute.xlu0 %765  ;;  %v11618_v24 = vld [vmem:[%s19070_s0 + $0x249] sm:$0xff] }
 0x2a2   :  { %v5957_v5 = vmax.f32 %v5955_v62, %v5956_v0  ;;  %v7300_v3 = vsel %vm7190_vm11, %v5936_v8, -inf  ;;  %v5929_v28 = vmax.f32 %v5927_v38, %v5928_v13  ;;  %v7294_v52 = vsel %vm7190_vm11, %v5922_v20, -inf  ;;  %2309 = vrot.lane.b32.xlu1 %v15125_v7, %s12663_s21 }
 0x2a3   :  { %v7289_v58 = vmax.f32 %v15096_v22, %v7288_v53  ;;  %v7291_v37 = vsel %vm7190_vm11, %v5915_v49, -inf  ;;  %v7295_v16 = vmax.f32 %v7293_v46, %v7294_v52  ;;  %v3100_v39 = vsel %vm3067_vm7, %v3035_v14, %v15075_v35  ;;  %2055 = vrot.lane.b32.xlu0 %v11554_v34, %s12662_s18 }
 0x2a4   :  { %v7292_v47 = vmax.f32 %v7290_v26, %v7291_v37  ;;  %v7297_v60 = vsel %vm7190_vm11, %v5929_v28, -inf  ;;  %v3036_v62 = vsel %vm3002_vm6, %v2971_v18, %v15079_v36  ;;  %v3165_v30 = vsel %vm3132_vm8, %v3100_v39, %v2550_v12  ;;  %v2552_v22 = vpop.permute.xlu1 %2551  ;;  %v11682_v37 = vld [vmem:[%s19070_s0 + $0x24a] sm:$0xff] }
 0x2a5   :  { %v5901_v56 = vmax.f32 %v14997_v55, %v5900_v43  ;;  %v7303_v35 = vsel %vm7190_vm11, %v5943_v54, -inf  ;;  %v7298_v32 = vmax.f32 %v7296_v45, %v7297_v60  ;;  %v3101_v41 = vsel %vm3067_vm7, %v3036_v62, %v2296_v57  ;;  %12072 = vmatprep.mubr.msk.f32.mxu0 %vm3201_vm9, %v3165_v30  ;;  %v15152_v26 = vpop.permute.xlu0 %1785  ;;  %v11681_v45 = vld [vmem:[%s19070_s0 + $0x242] sm:$0xff] }
 0x2a6   :  { %v7299_v36 = vsel %vm7190_vm11, %v15019_v51, -inf  ;;  %v7306_v46 = vsel %vm7190_vm11, %v5950_v44, -inf  ;;  %v7778_v61 = vsel %vm7743_vm12, %v7292_v47, %v7289_v58  ;;  %v3166_v6 = vsel %vm3132_vm8, %v3101_v41, %v2552_v22  ;;  %1545 = vrot.lane.b32.xlu1 %v15125_v7, %s12660_s20  ;;  %v12056_v59 = vpop.f32.mrf.mxu0 }
 0x2a7   :  { %v7302_v55 = vsel %vm7190_vm11, %v15021_v2, -inf  ;;  %v7301_v43 = vmax.f32 %v7299_v36, %v7300_v3  ;;  %v7309_v12 = vsel %vm7190_vm11, %v5957_v5, -inf  ;;  %v7779_v21 = vsel %vm7745_vm13, %v7295_v16, %v7778_v61  ;;  %12073 = vmatmul.mubr.msk.f32.gmra.mxu0 %vm3201_vm9, %v3166_v6  ;;  %1291 = vrot.lane.b32.xlu0 %v11554_v34, %s12659_s17  ;;  %v85_v6 = vld [vmem:[%s19070_s0 + $0x1c8] sm:$0xff] }
 0x2a8   :  { %v7305_v51 = vsel %vm7190_vm11, %v15023_v31, -inf  ;;  %v7304_v29 = vmax.f32 %v7302_v55, %v7303_v35  ;;  %v7780_v11 = vsel %vm7747_vm14, %v7298_v32, %v7779_v21  ;;  %v3811_v2 = vmul.f32 %v14851_v63, %v12056_v59  ;;  %v15171_v57 = vpop.permute.xlu1 %1021  ;;  %v3564_v31 = vpop.f32.mrf.mxu0 }
 0x2a9   :  { %v7308_v8 = vsel %vm7190_vm11, %v5901_v56, -inf  ;;  %v7307_v0 = vmax.f32 %v7305_v51, %v7306_v46  ;;  %v7781_v38 = vsel %vm7749_vm15, %v7301_v43, %v7780_v11  ;;  %v15178_v10 = vpop.permute.xlu0 %767  ;;  %vm19122_vm0 = vcmask 1045509   ;;  %v86_v51 = vld [vmem:[%s19070_s0 + $0x1d0] sm:$0xff] }
 0x2aa   :  { %v7310_v27 = vmax.f32 %v7308_v8, %v7309_v12  ;;  %v7782_v17 = vsel %vm19122_vm0, %v7304_v29, %v7781_v38  ;;  %v3882_v20 = vadd.f32 %v14874_v19, %v3811_v2  ;;  %v3810_v13 = vmul.f32 %v14851_v63, %v3564_v31  ;;  %2565 = vrot.lane.b32.xlu1 %v11681_v45, %s12664_s16  ;;  %v11555_v12 = vld [vmem:[%s19070_s0 + $0x258] sm:$0xff] }
 0x2ab   :  { %vm19123_vm4 = vcmask 1046534   ;;  %vm19124_vm5 = vcmask 1047559   ;;  %2311 = vrot.lane.b32.xlu0 %v11618_v24, %s12663_s21  ;;  %vm19125_vm0 = vcmask 97280  }
 0x2ac   :  { %v7783_v14 = vsel %vm19123_vm4, %v7307_v0, %v7782_v17  ;;  %v3946_v54 = vmax.f32 %v3882_v20, 0.0  ;;  %v3881_v44 = vadd.f32 %v14874_v19, %v3810_v13  ;;  %v15191_v49 = vpop.permute.xlu1 %2041  ;;  %v2713_v17 = vsel %vm2677_vm1, %v86_v51, %v15000_v4  ;;  %vm19126_vm4 = vmmov %vm19125_vm0 }
 0x2ad   :  { %v7784_v18 = vsel %vm19124_vm5, %v7310_v27, %v7783_v14  ;;  %v15194_v53 = vpop.permute.xlu0 %1787  ;;  %vm19127_vm5 = vcmask 121856  }
 0x2ae   :  { %7883 = vst.msk [vmem:[#allocation2 + $0x51] sm:$0xff] %vm7190_vm11, %v7784_v18  ;;  %v4410_v34 = vcombine.high %v3946_v54, %v3946_v54  ;;  %v4417_v5 = vrot.slane %v3946_v54, %v13627_v50  ;;  %v3945_v3 = vmax.f32 %v3881_v44, 0.0  ;;  %1547 = vrot.lane.b32.xlu1 %v11618_v24, %s12660_s20  ;;  %v2778_v18 = vsel %vm2742_vm2, %v2713_v17, %v15066_v9 }
 0x2af   :  { %781 = vrot.lane.b32.xlu0 %v15125_v7, %s12658_s23 }
 0x2b0   :  { %v4425_v28 = vcombine.high %v4417_v5, %v4417_v5  ;;  %v4393_v52 = vcombine.high %v3945_v3, %v3945_v3  ;;  %v15200_v58 = vpop.permute.xlu1 %1277  ;;  %v4424_v16 = vrot.slane %v4410_v34, %v13627_v50  ;;  %v5986_v47 = vsel %vm5397_vm10, %v4417_v5, -inf }
 0x2b1   :  { %v15206_v39 = vpop.permute.xlu0 %1023  ;;  %v4400_v60 = vrot.slane %v3945_v3, %v13627_v50  ;;  %v5987_v32 = vrot.slane %v5986_v47, 4  ;;  %v2843_v5 = vsel %vm2807_vm3, %v2778_v18, %v15091_v40  ;;  %v15313_v18 = vld [vmem:[%s19070_s0 + $0x261] sm:$0xff] }
 0x2b2   :  { %v4407_v62 = vrot.slane %v4393_v52, %v13627_v50  ;;  %2567 = vrot.lane.b32.xlu1 %v11682_v37, %s12664_s16  ;;  %v5993_v7 = vsel %vm5397_vm10, %v4425_v28, -inf  ;;  %v6000_v22 = vsel %vm5397_vm10, %v4424_v16, -inf  ;;  %v4426_v35 = vcombine.high %v4424_v16, %v4424_v16 }
 0x2b3   :  { %1801 = vrot.lane.b32.xlu0 %v11681_v45, %s12661_s27  ;;  %v5994_v41 = vrot.slane %v5993_v7, 4  ;;  %v4408_v36 = vcombine.high %v4400_v60, %v4400_v60  ;;  %v5958_v46 = vsel %vm5397_vm10, %v4400_v60, -inf  ;;  %v6001_v55 = vrot.slane %v6000_v22, 4 }
 0x2b4   :  { %v2298_v30 = vpop.permute.xlu1 %2297  ;;  %v5972_v61 = vsel %vm5397_vm10, %v4407_v62, -inf  ;;  %v4409_v21 = vcombine.high %v4407_v62, %v4407_v62  ;;  %v6007_v29 = vsel %vm5397_vm10, %v4426_v35, -inf  ;;  %v5959_v11 = vrot.slane %v5958_v46, 4 }
 0x2b5   :  { %v2044_v56 = vpop.permute.xlu0 %2043  ;;  %v5973_v2 = vrot.slane %v5972_v61, 4  ;;  %v5988_v8 = vmax.f32 %v5986_v47, %v5987_v32  ;;  %v5995_v0 = vmax.f32 %v5993_v7, %v5994_v41  ;;  %v5965_v38 = vsel %vm5397_vm10, %v4408_v36, -inf }
 0x2b6   :  { %1037 = vrot.lane.b32.xlu1 %v11681_v45, %s12657_s22  ;;  %v2712_v45 = vsel %vm2677_vm1, %v85_v6, %v14961_v1  ;;  %v6008_v1 = vrot.slane %v6007_v29, 4  ;;  %v5979_v13 = vsel %vm5397_vm10, %v4409_v21, -inf  ;;  %v5960_v54 = vmax.f32 %v5958_v46, %v5959_v11 }
 0x2b7   :  { %783 = vrot.lane.b32.xlu0 %v11618_v24, %s12658_s23  ;;  %v2777_v31 = vsel %vm2742_vm2, %v2712_v45, %v14988_v33  ;;  %v6002_v24 = vmax.f32 %v6000_v22, %v6001_v55  ;;  %v5966_v44 = vrot.slane %v5965_v38, 4  ;;  %v5974_v33 = vmax.f32 %v5972_v61, %v5973_v2 }
 0x2b8   :  { %v15222_v43 = vpop.permute.xlu1 %1533  ;;  %v2842_v20 = vsel %vm2807_vm3, %v2777_v31, %v15056_v42  ;;  %v5989_v4 = vrot.slane %v5988_v8, 2  ;;  %v5996_v3 = vrot.slane %v5995_v0, 2  ;;  %v2908_v42 = vsel %vm19126_vm4, %v2843_v5, %v15120_v48 }
 0x2b9   :  { %v15227_v59 = vpop.permute.xlu0 %1279  ;;  %v2907_v34 = vsel %vm19125_vm0, %v2842_v20, %v15086_v25  ;;  %v6003_v9 = vrot.slane %v6002_v24, 2  ;;  %v5980_v52 = vrot.slane %v5979_v13, 4  ;;  %v15262_v25 = vld [vmem:[%s19070_s0 + $0x259] sm:$0xff]  ;;  %v6009_v40 = vmax.f32 %v6007_v29, %v6008_v1  ;;  %vm19128_vm0 = vmmov %vm19127_vm5 }
 0x2ba   :  { %2057 = vrot.lane.b32.xlu1 %v11555_v12, %s12662_s18  ;;  %v2972_v28 = vsel %vm19127_vm5, %v2907_v34, %v15152_v26  ;;  %v2973_v48 = vsel %vm19128_vm0, %v2908_v42, %v15194_v53  ;;  %v11556_v26 = vld [vmem:[%s19070_s0 + $0x260] sm:$0xff]  ;;  %v5967_v62 = vmax.f32 %v5965_v38, %v5966_v44  ;;  %v5975_v7 = vrot.slane %v5974_v33, 2  ;;  %vm19129_vm5 = vmmov %vm19126_vm4 }
 0x2bb   :  { %1803 = vrot.lane.b32.xlu0 %v11682_v37, %s12661_s27  ;;  %v3037_v47 = vsel %vm3002_vm6, %v2972_v28, %v15191_v49  ;;  %v5990_v35 = vmax.f32 %v5988_v8, %v5989_v4  ;;  %v5997_v32 = vmax.f32 %v5995_v0, %v5996_v3  ;;  %v3038_v41 = vsel %vm3002_vm6, %v2973_v48, %v2044_v56  ;;  %v87_v56 = vld [vmem:[%s19070_s0 + $0x1e0] sm:$0xff]  ;;  %v88_v0 = vld [vmem:[%s19070_s0 + $0x1e8] sm:$0xff] }
 0x2bc   :  { %v2554_v27 = vpop.permute.xlu1 %2553  ;;  %v3102_v22 = vsel %vm3067_vm7, %v3037_v47, %v2298_v30  ;;  %v6004_v53 = vmax.f32 %v6002_v24, %v6003_v9  ;;  %v5981_v36 = vmax.f32 %v5979_v13, %v5980_v52  ;;  %v6010_v6 = vrot.slane %v6009_v40, 2 }
 0x2bd   :  { %v2300_v14 = vpop.permute.xlu0 %2299  ;;  %v3167_v49 = vsel %vm3132_vm8, %v3102_v22, %v2554_v27  ;;  %v5968_v21 = vrot.slane %v5967_v62, 2  ;;  %v5976_v51 = vmax.f32 %v5974_v33, %v5975_v7  ;;  %v5991_v2 = vrot.slane %v5990_v35, 1  ;;  %v15300_v27 = vld [vmem:[%s19070_s0 + $0x25a] sm:$0xff] }
 0x2be   :  { %1293 = vrot.lane.b32.xlu1 %v11555_v12, %s12659_s17  ;;  %v3103_v46 = vsel %vm3067_vm7, %v3038_v41, %v2300_v14  ;;  %12075 = vmatprep.mubr.msk.f32.mxu0 %vm3201_vm9, %v3167_v49  ;;  %v5998_v45 = vrot.slane %v5997_v32, 1  ;;  %v6005_v8 = vrot.slane %v6004_v53, 1  ;;  %v5982_v38 = vrot.slane %v5981_v36, 2 }
 0x2bf   :  { %1039 = vrot.lane.b32.xlu0 %v11682_v37, %s12657_s22  ;;  %v5961_v37 = vrot.slane %v5960_v54, 2  ;;  %v2714_v17 = vsel %vm2677_vm1, %v87_v56, %v15128_v23  ;;  %v15304_v20 = vmax.f32 %v6009_v40, %v6010_v6  ;;  %v15317_v33 = vmax.f32 %v5967_v62, %v5968_v21 }
 0x2c0   :  { %v15257_v16 = vpop.permute.xlu1 %1535  ;;  %v5977_v23 = vrot.slane %v5976_v51, 1  ;;  %v2715_v34 = vsel %vm2677_vm1, %v88_v0, %v15178_v10  ;;  %v15326_v3 = vmax.f32 %v5990_v35, %v5991_v2  ;;  %v15328_v42 = vmax.f32 %v5997_v32, %v5998_v45 }
 0x2c1   :  { %v15268_v60 = vpop.permute.xlu0 %769  ;;  %v5962_v12 = vmax.f32 %v5960_v54, %v5961_v37  ;;  %v2779_v54 = vsel %vm2742_vm2, %v2714_v17, %v15171_v57  ;;  %v15330_v57 = vmax.f32 %v6004_v53, %v6005_v8  ;;  %v15332_v28 = vmax.f32 %v5981_v36, %v5982_v38  ;;  %v15368_v36 = vld [vmem:[%s19070_s0 + $0x262] sm:$0xff] }
 0x2c2   :  { %2313 = vrot.lane.b32.xlu1 %v15262_v25, %s12663_s21  ;;  %v2844_v5 = vsel %vm2807_vm3, %v2779_v54, %v15200_v58  ;;  %v6012_v58 = vrot.slane %v15304_v20, 1  ;;  %v5970_v48 = vrot.slane %v15317_v33, 1  ;;  %v15349_v37 = vsel %vm2742_vm2, %v2715_v34, %v15206_v39 }
 0x2c3   :  { %2059 = vrot.lane.b32.xlu0 %v11556_v26, %s12662_s18  ;;  %v5963_v44 = vrot.slane %v5962_v12, 1  ;;  %v5984_v32 = vrot.slane %v15332_v28, 1  ;;  %v15358_v41 = vsel %vm19126_vm4, %v2844_v5, %v15222_v43  ;;  %vm19130_vm4 = vmmov %vm19128_vm0 }
 0x2c4   :  { %v2556_v61 = vpop.permute.xlu1 %2555 }
 0x2c5   :  { %v3168_v30 = vsel %vm3132_vm8, %v3103_v46, %v2556_v61  ;;  %v15282_v55 = vpop.permute.xlu0 %1789  ;;  %v15342_v47 = vmax.f32 %v5962_v12, %v5963_v44 }
 0x2c6   :  { %v12059_v29 = vpop.f32.mrf.mxu0  ;;  %12076 = vmatmul.mubr.msk.f32.gmra.mxu0 %vm3201_vm9, %v3168_v30  ;;  %1549 = vrot.lane.b32.xlu1 %v15262_v25, %s12660_s20 }
 0x2c7   :  { %v3813_v11 = vmul.f32 %v14851_v63, %v12059_v29  ;;  %1295 = vrot.lane.b32.xlu0 %v11556_v26, %s12659_s17  ;;  %v15345_v26 = vmax.f32 %v5976_v51, %v5977_v23 }
 0x2c8   :  { %v15295_v31 = vpop.permute.xlu1 %1025  ;;  %v3574_v24 = vpop.f32.mrf.mxu0 }
 0x2c9   :  { %v3884_v1 = vadd.f32 %v14874_v19, %v3813_v11  ;;  %v15307_v13 = vpop.permute.xlu0 %771  ;;  %v3812_v14 = vmul.f32 %v14851_v63, %v3574_v24 }
 0x2ca   :  { %2569 = vrot.lane.b32.xlu1 %v15300_v27, %s12664_s16 }
 0x2cb   :  { %v3948_v4 = vmax.f32 %v3884_v1, 0.0  ;;  %v3883_v63 = vadd.f32 %v14874_v19, %v3812_v14  ;;  %2315 = vrot.lane.b32.xlu0 %v15313_v18, %s12663_s21 }
 0x2cc   :  { %v15336_v10 = vpop.permute.xlu1 %2045 }
 0x2cd   :  { %v4444_v9 = vcombine.high %v3948_v4, %v3948_v4  ;;  %v4451_v19 = vrot.slane %v3948_v4, %v13627_v50  ;;  %v3947_v52 = vmax.f32 %v3883_v63, 0.0  ;;  %v15340_v40 = vpop.permute.xlu0 %1791 }
 0x2ce   :  { %1551 = vrot.lane.b32.xlu1 %v15313_v18, %s12660_s20 }
 0x2cf   :  { %v4458_v62 = vrot.slane %v4444_v9, %v13627_v50  ;;  %v4459_v7 = vcombine.high %v4451_v19, %v4451_v19  ;;  %v6042_v22 = vsel %vm5397_vm10, %v4451_v19, -inf  ;;  %v4427_v35 = vcombine.high %v3947_v52, %v3947_v52  ;;  %785 = vrot.lane.b32.xlu0 %v15262_v25, %s12658_s23 }
 0x2d0   :  { %v6043_v49 = vrot.slane %v6042_v22, 4  ;;  %v4434_v53 = vrot.slane %v3947_v52, %v13627_v50  ;;  %v15363_v39 = vpop.permute.xlu1 %1281 }
 0x2d1   :  { %v4460_v46 = vcombine.high %v4458_v62, %v4458_v62  ;;  %v6049_v61 = vsel %vm5397_vm10, %v4459_v7, -inf  ;;  %v6056_v6 = vsel %vm5397_vm10, %v4458_v62, -inf  ;;  %v4441_v43 = vrot.slane %v4427_v35, %v13627_v50  ;;  %v15373_v30 = vpop.permute.xlu0 %1027 }
 0x2d2   :  { %v6044_v56 = vmax.f32 %v6042_v22, %v6043_v49  ;;  %v6050_v12 = vrot.slane %v6049_v61, 4  ;;  %v6057_v21 = vrot.slane %v6056_v6, 4  ;;  %v4442_v25 = vcombine.high %v4434_v53, %v4434_v53  ;;  %2571 = vrot.lane.b32.xlu1 %v15368_v36, %s12664_s16  ;;  %v11557_v49 = vld [vmem:[%s19070_s0 + $0x270] sm:$0xff] }
 0x2d3   :  { %v6063_v51 = vsel %vm5397_vm10, %v4460_v46, -inf  ;;  %v4443_v29 = vcombine.high %v4441_v43, %v4441_v43  ;;  %v6014_v11 = vsel %vm5397_vm10, %v4434_v53, -inf  ;;  %v6028_v2 = vsel %vm5397_vm10, %v4441_v43, -inf  ;;  %1805 = vrot.lane.b32.xlu0 %v15300_v27, %s12661_s27 }
 0x2d4   :  { %v6045_v45 = vrot.slane %v6044_v56, 2  ;;  %v6051_v8 = vmax.f32 %v6049_v61, %v6050_v12  ;;  %v6058_v0 = vmax.f32 %v6056_v6, %v6057_v21  ;;  %v6064_v38 = vrot.slane %v6063_v51, 4  ;;  %v15382_v24 = vpop.permute.xlu1 %2301 }
 0x2d5   :  { %v6015_v17 = vrot.slane %v6014_v11, 4  ;;  %v6021_v1 = vsel %vm5397_vm10, %v4442_v25, -inf  ;;  %v6029_v14 = vrot.slane %v6028_v2, 4  ;;  %v6035_v54 = vsel %vm5397_vm10, %v4443_v29, -inf  ;;  %v15386_v44 = vpop.permute.xlu0 %2047 }
 0x2d6   :  { %v6046_v23 = vmax.f32 %v6044_v56, %v6045_v45  ;;  %v6052_v34 = vrot.slane %v6051_v8, 2  ;;  %v6059_v5 = vrot.slane %v6058_v0, 2  ;;  %v6065_v4 = vmax.f32 %v6063_v51, %v6064_v38  ;;  %1041 = vrot.lane.b32.xlu1 %v15300_v27, %s12657_s22 }
 0x2d7   :  { %v6016_v63 = vmax.f32 %v6014_v11, %v6015_v17  ;;  %v6022_v9 = vrot.slane %v6021_v1, 4  ;;  %v6030_v19 = vmax.f32 %v6028_v2, %v6029_v14  ;;  %v6036_v52 = vrot.slane %v6035_v54, 4  ;;  %787 = vrot.lane.b32.xlu0 %v15313_v18, %s12658_s23 }
 0x2d8   :  { %v5971_v62 = vmax.f32 %v15317_v33, %v5970_v48  ;;  %v6053_v7 = vmax.f32 %v6051_v8, %v6052_v34  ;;  %v6060_v22 = vmax.f32 %v6058_v0, %v6059_v5  ;;  %v6066_v35 = vrot.slane %v6065_v4, 2  ;;  %v15396_v43 = vpop.permute.xlu1 %1537 }
 0x2d9   :  { %v6017_v53 = vrot.slane %v6016_v63, 2  ;;  %v6023_v46 = vmax.f32 %v6021_v1, %v6022_v9  ;;  %v6031_v61 = vrot.slane %v6030_v19, 2  ;;  %v6037_v6 = vmax.f32 %v6035_v54, %v6036_v52  ;;  %v15398_v56 = vpop.permute.xlu0 %1283 }
 0x2da   :  { %v5985_v27 = vmax.f32 %v15332_v28, %v5984_v32  ;;  %v15403_v33 = vsel %vm7190_vm11, %v15342_v47, -inf  ;;  %v6047_v48 = vrot.slane %v6046_v23, 1  ;;  %v6067_v18 = vmax.f32 %v6065_v4, %v6066_v35  ;;  %2061 = vrot.lane.b32.xlu1 %v11557_v49, %s12662_s18 }
 0x2db   :  { %v6018_v12 = vmax.f32 %v6016_v63, %v6017_v53  ;;  %v6024_v21 = vrot.slane %v6023_v46, 2  ;;  %v6032_v25 = vmax.f32 %v6030_v19, %v6031_v61  ;;  %v6038_v51 = vrot.slane %v6037_v6, 2  ;;  %1807 = vrot.lane.b32.xlu0 %v15368_v36, %s12661_s27 }
 0x2dc   :  { %v7314_v29 = vsel %vm7190_vm11, %v5971_v62, -inf  ;;  %v7317_v11 = vsel %vm7190_vm11, %v15345_v26, -inf  ;;  %v2845_v28 = vsel %vm2807_vm3, %v15349_v37, %v15227_v59  ;;  %v6054_v32 = vrot.slane %v6053_v7, 1  ;;  %v2558_v0 = vpop.permute.xlu1 %2557 }
 0x2dd   :  { %v6061_v47 = vrot.slane %v6060_v22, 1  ;;  %v6019_v2 = vrot.slane %v6018_v12, 1  ;;  %v6025_v45 = vmax.f32 %v6023_v46, %v6024_v21  ;;  %v6033_v8 = vrot.slane %v6032_v25, 1  ;;  %v2304_v38 = vpop.permute.xlu0 %2303 }
 0x2de   :  { %v7320_v17 = vsel %vm7190_vm11, %v5985_v27, -inf  ;;  %v6048_v1 = vmax.f32 %v6046_v23, %v6047_v48  ;;  %v6068_v14 = vrot.slane %v6067_v18, 1  ;;  %v6039_v54 = vmax.f32 %v6037_v6, %v6038_v51  ;;  %1297 = vrot.lane.b32.xlu1 %v11557_v49, %s12659_s17 }
 0x2df   :  { %v2910_v26 = vsel %vm19129_vm5, %v2845_v28, %v15257_v16  ;;  %v2974_v59 = vsel %vm19128_vm0, %v15358_v41, %v15282_v55  ;;  %v6020_v37 = vmax.f32 %v6018_v12, %v6019_v2  ;;  %v6026_v34 = vrot.slane %v6025_v45, 1  ;;  %1043 = vrot.lane.b32.xlu0 %v15368_v36, %s12657_s22  ;;  %v15430_v16 = vld [vmem:[%s19070_s0 + $0x271] sm:$0xff] }
 0x2e0   :  { %v6034_v5 = vmax.f32 %v6032_v25, %v6033_v8  ;;  %v6040_v4 = vrot.slane %v6039_v54, 1  ;;  %v3039_v63 = vsel %vm3002_vm6, %v2974_v59, %v15336_v10  ;;  %v2975_v23 = vsel %vm19130_vm4, %v2910_v26, %v15340_v40  ;;  %v15433_v52 = vpop.permute.xlu1 %1539  ;;  %v11558_v10 = vld [vmem:[%s19070_s0 + $0x278] sm:$0xff] }
 0x2e1   :  { %v6055_v55 = vmax.f32 %v6053_v7, %v6054_v32  ;;  %v6062_v41 = vmax.f32 %v6060_v22, %v6061_v47  ;;  %v6027_v9 = vmax.f32 %v6025_v45, %v6026_v34  ;;  %v7312_v19 = vsel %vm7190_vm11, %v6020_v37, -inf  ;;  %v15435_v62 = vpop.permute.xlu0 %773  ;;  %v15499_v37 = vld [vmem:[%s19073_s3] ss:$0 sm:$0xff] }
 0x2e2   :  { %v6069_v40 = vmax.f32 %v6067_v18, %v6068_v14  ;;  %v7324_v36 = vsel %vm7190_vm11, %v6048_v1, -inf  ;;  %v6041_v35 = vmax.f32 %v6039_v54, %v6040_v4  ;;  %v7318_v49 = vsel %vm7190_vm11, %v6034_v5, -inf  ;;  %2317 = vrot.lane.b32.xlu1 %v15430_v16, %s12663_s21  ;;  %v11622_v54 = vld [vmem:[%s19070_s0 + $0x279] sm:$0xff] }
 0x2e3   :  { %v7313_v7 = vmax.f32 %v15403_v33, %v7312_v19  ;;  %v7315_v22 = vsel %vm7190_vm11, %v6027_v9, -inf  ;;  %v7319_v53 = vmax.f32 %v7317_v11, %v7318_v49  ;;  %v3104_v46 = vsel %vm3067_vm7, %v3039_v63, %v15382_v24  ;;  %2063 = vrot.lane.b32.xlu0 %v11558_v10, %s12662_s18  ;;  %v11686_v49 = vld [vmem:[%s19070_s0 + $0x27a] sm:$0xff] }
 0x2e4   :  { %v7316_v61 = vmax.f32 %v7314_v29, %v7315_v22  ;;  %v7321_v6 = vsel %vm7190_vm11, %v6041_v35, -inf  ;;  %v3040_v27 = vsel %vm3002_vm6, %v2975_v23, %v15386_v44  ;;  %v3169_v48 = vsel %vm3132_vm8, %v3104_v46, %v2558_v0  ;;  %v2560_v21 = vpop.permute.xlu1 %2559  ;;  %v11685_v0 = vld [vmem:[%s19070_s0 + $0x272] sm:$0xff] }
 0x2e5   :  { %v6013_v33 = vmax.f32 %v15304_v20, %v6012_v58  ;;  %v7327_v18 = vsel %vm7190_vm11, %v6055_v55, -inf  ;;  %v7322_v24 = vmax.f32 %v7320_v17, %v7321_v6  ;;  %v3105_v12 = vsel %vm3067_vm7, %v3040_v27, %v2304_v38  ;;  %12078 = vmatprep.mubr.msk.f32.mxu0 %vm3201_vm9, %v3169_v48  ;;  %v15459_v25 = vpop.permute.xlu0 %1793 }
 0x2e6   :  { %v7323_v44 = vsel %vm7190_vm11, %v15326_v3, -inf  ;;  %v7330_v51 = vsel %vm7190_vm11, %v6062_v41, -inf  ;;  %v7785_v29 = vsel %vm7743_vm12, %v7316_v61, %v7313_v7  ;;  %v3170_v11 = vsel %vm3132_vm8, %v3105_v12, %v2560_v21  ;;  %1553 = vrot.lane.b32.xlu1 %v15430_v16, %s12660_s20  ;;  %v12062_v47 = vpop.f32.mrf.mxu0 }
 0x2e7   :  { %v7326_v20 = vsel %vm7190_vm11, %v15328_v42, -inf  ;;  %v7325_v58 = vmax.f32 %v7323_v44, %v7324_v36  ;;  %v7333_v28 = vsel %vm7190_vm11, %v6069_v40, -inf  ;;  %v7786_v32 = vsel %vm7745_vm13, %v7319_v53, %v7785_v29  ;;  %12079 = vmatmul.mubr.msk.f32.gmra.mxu0 %vm3201_vm9, %v3170_v11  ;;  %1299 = vrot.lane.b32.xlu0 %v11558_v10, %s12659_s17  ;;  %v15480_v42 = vld [vmem:[%s19072_s2] ss:$0 sm:$0xff]  ;;  %v11559_v11 = vld [vmem:[%s19070_s0 + $0x288] sm:$0xff] }
 0x2e8   :  { %v7329_v3 = vsel %vm7190_vm11, %v15330_v57, -inf  ;;  %v7328_v2 = vmax.f32 %v7326_v20, %v7327_v18  ;;  %v7787_v45 = vsel %vm7747_vm14, %v7322_v24, %v7786_v32  ;;  %v3815_v8 = vmul.f32 %v15480_v42, %v12062_v47  ;;  %v15488_v1 = vpop.permute.xlu1 %1029  ;;  %v3584_v5 = vpop.f32.mrf.mxu0  ;;  %v89_v20 = vld [vmem:[%s19070_s0 + $0x1f8] sm:$0xff]  ;;  %v90_v32 = vld [vmem:[%s19070_s0 + $0x200] sm:$0xff] }
 0x2e9   :  { %v7332_v38 = vsel %vm7190_vm11, %v6013_v33, -inf  ;;  %v7331_v17 = vmax.f32 %v7329_v3, %v7330_v51  ;;  %v7788_v57 = vsel %vm7749_vm15, %v7325_v58, %v7787_v45  ;;  %v15490_v14 = vpop.permute.xlu0 %775  ;;  %vm19131_vm5 = vcmask 1045509  }
 0x2ea   :  { %v7334_v26 = vmax.f32 %v7332_v38, %v7333_v28  ;;  %v7789_v59 = vsel %vm19131_vm5, %v7328_v2, %v7788_v57  ;;  %v3886_v34 = vadd.f32 %v15499_v37, %v3815_v8  ;;  %vm19132_vm0 = vcmask 1046534   ;;  %2573 = vrot.lane.b32.xlu1 %v11685_v0, %s12664_s16 }
 0x2eb   :  { %v7790_v4 = vsel %vm19132_vm0, %v7331_v17, %v7789_v59  ;;  %v3814_v63 = vmul.f32 %v15480_v42, %v3584_v5  ;;  %vm19133_vm4 = vcmask 1047559   ;;  %2319 = vrot.lane.b32.xlu0 %v11622_v54, %s12663_s21  ;;  %v2716_v17 = vsel %vm2677_vm1, %v89_v20, %v15268_v60 }
 0x2ec   :  { %v7791_v23 = vsel %vm19133_vm4, %v7334_v26, %v7790_v4  ;;  %v3950_v55 = vmax.f32 %v3886_v34, 0.0  ;;  %v15509_v9 = vpop.permute.xlu1 %2049  ;;  %v2717_v26 = vsel %vm2677_vm1, %v90_v32, %v15307_v13  ;;  %vm19134_vm5 = vcmask 97280  }
 0x2ed   :  { %7884 = vst.msk [vmem:[#allocation2 + $0x61] sm:$0xff] %vm7190_vm11, %v7791_v23  ;;  %v3885_v41 = vadd.f32 %v15499_v37, %v3814_v63  ;;  %v15511_v19 = vpop.permute.xlu0 %1795  ;;  %vm19135_vm0 = vcmask 121856   ;;  %vm19136_vm4 = vmmov %vm19134_vm5 }
 0x2ee   :  { %v4478_v10 = vcombine.high %v3950_v55, %v3950_v55  ;;  %v4485_v40 = vrot.slane %v3950_v55, %v13627_v50  ;;  %1555 = vrot.lane.b32.xlu1 %v11622_v54, %s12660_s20 }
 0x2ef   :  { %v3949_v36 = vmax.f32 %v3885_v41, 0.0  ;;  %789 = vrot.lane.b32.xlu0 %v15430_v16, %s12658_s23  ;;  %v2782_v41 = vsel %vm2742_vm2, %v2717_v26, %v15373_v30  ;;  %v15577_v30 = vld [vmem:[%s19070_s0 + $0x289] sm:$0xff] }
 0x2f0   :  { %v4493_v35 = vcombine.high %v4485_v40, %v4485_v40  ;;  %v4492_v7 = vrot.slane %v4478_v10, %v13627_v50  ;;  %v15521_v53 = vpop.permute.xlu1 %1285  ;;  %v6098_v6 = vsel %vm5397_vm10, %v4485_v40, -inf  ;;  %v2847_v13 = vsel %vm2807_vm3, %v2782_v41, %v15398_v56 }
 0x2f1   :  { %v4461_v22 = vcombine.high %v3949_v36, %v3949_v36  ;;  %v15523_v46 = vpop.permute.xlu0 %1031  ;;  %v4468_v61 = vrot.slane %v3949_v36, %v13627_v50  ;;  %v6099_v12 = vrot.slane %v6098_v6, 4 }
 0x2f2   :  { %2575 = vrot.lane.b32.xlu1 %v11686_v49, %s12664_s16  ;;  %v6105_v27 = vsel %vm5397_vm10, %v4493_v35, -inf  ;;  %v6112_v16 = vsel %vm5397_vm10, %v4492_v7, -inf  ;;  %v4494_v18 = vcombine.high %v4492_v7, %v4492_v7 }
 0x2f3   :  { %1809 = vrot.lane.b32.xlu0 %v11685_v0, %s12661_s27  ;;  %v4475_v48 = vrot.slane %v4461_v22, %v13627_v50  ;;  %v6106_v21 = vrot.slane %v6105_v27, 4  ;;  %v4476_v44 = vcombine.high %v4468_v61, %v4468_v61  ;;  %v6070_v51 = vsel %vm5397_vm10, %v4468_v61, -inf }
 0x2f4   :  { %v2306_v33 = vpop.permute.xlu1 %2305  ;;  %v6113_v29 = vrot.slane %v6112_v16, 4  ;;  %v6119_v47 = vsel %vm5397_vm10, %v4494_v18, -inf  ;;  %v6071_v3 = vrot.slane %v6070_v51, 4  ;;  %v6100_v45 = vmax.f32 %v6098_v6, %v6099_v12  ;;  %v91_v12 = vld [vmem:[%s19070_s0 + $0x210] sm:$0xff] }
 0x2f5   :  { %v15532_v24 = vpop.permute.xlu0 %2051  ;;  %v4477_v58 = vcombine.high %v4475_v48, %v4475_v48  ;;  %v6107_v8 = vmax.f32 %v6105_v27, %v6106_v21  ;;  %v6084_v38 = vsel %vm5397_vm10, %v4475_v48, -inf  ;;  %v6120_v59 = vrot.slane %v6119_v47, 4 }
 0x2f6   :  { %1045 = vrot.lane.b32.xlu1 %v11685_v0, %s12657_s22  ;;  %v6077_v0 = vsel %vm5397_vm10, %v4476_v44, -inf  ;;  %v6114_v57 = vmax.f32 %v6112_v16, %v6113_v29  ;;  %v6072_v63 = vmax.f32 %v6070_v51, %v6071_v3  ;;  %v6085_v55 = vrot.slane %v6084_v38, 4 }
 0x2f7   :  { %791 = vrot.lane.b32.xlu0 %v11622_v54, %s12658_s23  ;;  %v2781_v54 = vsel %vm2742_vm2, %v2716_v17, %v15295_v31  ;;  %v6091_v34 = vsel %vm5397_vm10, %v4477_v58, -inf  ;;  %v6078_v23 = vrot.slane %v6077_v0, 4  ;;  %v6101_v10 = vrot.slane %v6100_v45, 2 }
 0x2f8   :  { %v15543_v28 = vpop.permute.xlu1 %1541  ;;  %v2846_v4 = vsel %vm2807_vm3, %v2781_v54, %v15363_v39  ;;  %v6108_v40 = vrot.slane %v6107_v8, 2  ;;  %v6115_v36 = vrot.slane %v6114_v57, 2  ;;  %v6092_v35 = vrot.slane %v6091_v34, 4 }
 0x2f9   :  { %v15549_v2 = vpop.permute.xlu0 %1287  ;;  %v2911_v31 = vsel %vm19134_vm5, %v2846_v4, %v15396_v43  ;;  %v2912_v43 = vsel %vm19136_vm4, %v2847_v13, %v15433_v52  ;;  %v6121_v7 = vmax.f32 %v6119_v47, %v6120_v59  ;;  %v6073_v61 = vrot.slane %v6072_v63, 2  ;;  %vm19137_vm5 = vmmov %vm19135_vm0 }
 0x2fa   :  { %2065 = vrot.lane.b32.xlu1 %v11559_v11, %s12662_s18  ;;  %v2976_v39 = vsel %vm19135_vm0, %v2911_v31, %v15459_v25  ;;  %v11560_v25 = vld [vmem:[%s19070_s0 + $0x290] sm:$0xff]  ;;  %v6086_v6 = vmax.f32 %v6084_v38, %v6085_v55  ;;  %v6102_v48 = vmax.f32 %v6100_v45, %v6101_v10  ;;  %v6109_v18 = vmax.f32 %v6107_v8, %v6108_v40  ;;  %vm19138_vm0 = vmmov %vm19136_vm4 }
 0x2fb   :  { %1811 = vrot.lane.b32.xlu0 %v11686_v49, %s12661_s27  ;;  %v3041_v22 = vsel %vm3002_vm6, %v2976_v39, %v15509_v9  ;;  %v2977_v52 = vsel %vm19137_vm5, %v2912_v43, %v15511_v19  ;;  %v6116_v21 = vmax.f32 %v6114_v57, %v6115_v36  ;;  %v6093_v44 = vmax.f32 %v6091_v34, %v6092_v35  ;;  %vm19139_vm4 = vmmov %vm19138_vm0 }
 0x2fc   :  { %v2562_v5 = vpop.permute.xlu1 %2561  ;;  %v3106_v27 = vsel %vm3067_vm7, %v3041_v22, %v2306_v33  ;;  %v3042_v33 = vsel %vm3002_vm6, %v2977_v52, %v15532_v24  ;;  %v6122_v51 = vrot.slane %v6121_v7, 2  ;;  %v6087_v58 = vrot.slane %v6086_v6, 2  ;;  %v92_v24 = vld [vmem:[%s19070_s0 + $0x218] sm:$0xff] }
 0x2fd   :  { %v2308_v60 = vpop.permute.xlu0 %2307  ;;  %v3171_v9 = vsel %vm3132_vm8, %v3106_v27, %v2562_v5  ;;  %v2718_v45 = vsel %vm2677_vm1, %v91_v12, %v15435_v62  ;;  %v6110_v38 = vrot.slane %v6109_v18, 1  ;;  %v6117_v17 = vrot.slane %v6116_v21, 1  ;;  %v15620_v62 = vld [vmem:[%s19070_s0 + $0x28a] sm:$0xff] }
 0x2fe   :  { %1301 = vrot.lane.b32.xlu1 %v11559_v11, %s12659_s17  ;;  %12081 = vmatprep.mubr.msk.f32.mxu0 %vm3201_vm9, %v3171_v9  ;;  %v3107_v19 = vsel %vm3067_vm7, %v3042_v33, %v2308_v60  ;;  %v6074_v11 = vmax.f32 %v6072_v63, %v6073_v61  ;;  %v6094_v57 = vrot.slane %v6093_v44, 2  ;;  %v15622_v26 = vmax.f32 %v6121_v7, %v6122_v51  ;;  %v15633_v63 = vld [vmem:[%s19070_s0 + $0x291] sm:$0xff] }
 0x2ff   :  { %1047 = vrot.lane.b32.xlu0 %v11686_v49, %s12657_s22  ;;  %v6079_v49 = vmax.f32 %v6077_v0, %v6078_v23  ;;  %v6103_v0 = vrot.slane %v6102_v48, 1  ;;  %v2783_v59 = vsel %vm2742_vm2, %v2718_v45, %v15488_v1  ;;  %v2719_v23 = vsel %vm2677_vm1, %v92_v24, %v15490_v14  ;;  %v15689_v33 = vld [vmem:[%s19070_s0 + $0x292] sm:$0xff] }
 0x300   :  { %v15583_v56 = vpop.permute.xlu1 %1543  ;;  %v6075_v55 = vrot.slane %v6074_v11, 1  ;;  %v15639_v41 = vmax.f32 %v6086_v6, %v6087_v58  ;;  %v2848_v31 = vsel %vm2807_vm3, %v2783_v59, %v15521_v53  ;;  %v2784_v10 = vsel %vm2742_vm2, %v2719_v23, %v15523_v46 }
 0x301   :  { %v15589_v16 = vpop.permute.xlu0 %777  ;;  %v6080_v20 = vrot.slane %v6079_v49, 2  ;;  %v15650_v14 = vmax.f32 %v6102_v48, %v6103_v0  ;;  %v15652_v39 = vmax.f32 %v6109_v18, %v6110_v38  ;;  %v15654_v36 = vmax.f32 %v6116_v21, %v6117_v17 }
 0x302   :  { %2321 = vrot.lane.b32.xlu1 %v15577_v30, %s12663_s21  ;;  %v15656_v35 = vmax.f32 %v6093_v44, %v6094_v57  ;;  %v6124_v53 = vrot.slane %v15622_v26, 1  ;;  %v15670_v6 = vsel %vm19138_vm0, %v2848_v31, %v15543_v28  ;;  %v15681_v21 = vsel %vm2807_vm3, %v2784_v10, %v15549_v2  ;;  %vm19140_vm0 = vmmov %vm19137_vm5 }
 0x303   :  { %2067 = vrot.lane.b32.xlu0 %v11560_v25, %s12662_s18  ;;  %v15637_v60 = vmax.f32 %v6079_v49, %v6080_v20  ;;  %v6089_v49 = vrot.slane %v15639_v41, 1 }
 0x304   :  { %v2564_v29 = vpop.permute.xlu1 %2563  ;;  %v6096_v12 = vrot.slane %v15656_v35, 1 }
 0x305   :  { %v3172_v32 = vsel %vm3132_vm8, %v3107_v19, %v2564_v29  ;;  %v15605_v47 = vpop.permute.xlu0 %1797  ;;  %v6082_v61 = vrot.slane %v15637_v60, 1 }
 0x306   :  { %v12065_v3 = vpop.f32.mrf.mxu0  ;;  %1557 = vrot.lane.b32.xlu1 %v15577_v30, %s12660_s20  ;;  %12082 = vmatmul.mubr.msk.f32.gmra.mxu0 %vm3201_vm9, %v3172_v32 }
 0x307   :  { %v3817_v8 = vmul.f32 %v15480_v42, %v12065_v3  ;;  %1303 = vrot.lane.b32.xlu0 %v11560_v25, %s12659_s17  ;;  %v15664_v25 = vmax.f32 %v6074_v11, %v6075_v55 }
 0x308   :  { %v3594_v54 = vpop.f32.mrf.mxu0  ;;  %v15627_v5 = vpop.permute.xlu1 %1033 }
 0x309   :  { %v3888_v34 = vadd.f32 %v15499_v37, %v3817_v8  ;;  %v3816_v4 = vmul.f32 %v15480_v42, %v3594_v54  ;;  %v15641_v1 = vpop.permute.xlu0 %779 }
 0x30a   :  { %2577 = vrot.lane.b32.xlu1 %v15620_v62, %s12664_s16 }
 0x30b   :  { %v3952_v40 = vmax.f32 %v3888_v34, 0.0  ;;  %v3887_v13 = vadd.f32 %v15499_v37, %v3816_v4  ;;  %2323 = vrot.lane.b32.xlu0 %v15633_v63, %s12663_s21 }
 0x30c   :  { %v15662_v22 = vpop.permute.xlu1 %2053 }
 0x30d   :  { %v4512_v46 = vcombine.high %v3952_v40, %v3952_v40  ;;  %v4519_v43 = vrot.slane %v3952_v40, %v13627_v50  ;;  %v3951_v7 = vmax.f32 %v3887_v13, 0.0  ;;  %v15672_v27 = vpop.permute.xlu0 %1799 }
 0x30e   :  { %1559 = vrot.lane.b32.xlu1 %v15633_v63, %s12660_s20 }
 0x30f   :  { %v4526_v48 = vrot.slane %v4512_v46, %v13627_v50  ;;  %v4527_v18 = vcombine.high %v4519_v43, %v4519_v43  ;;  %v6154_v52 = vsel %vm5397_vm10, %v4519_v43, -inf  ;;  %v4495_v9 = vcombine.high %v3951_v7, %v3951_v7  ;;  %793 = vrot.lane.b32.xlu0 %v15577_v30, %s12658_s23 }
 0x310   :  { %v6155_v44 = vrot.slane %v6154_v52, 4  ;;  %v4502_v28 = vrot.slane %v3951_v7, %v13627_v50  ;;  %v15694_v2 = vpop.permute.xlu1 %1289 }
 0x311   :  { %v4528_v51 = vcombine.high %v4526_v48, %v4526_v48  ;;  %v6161_v19 = vsel %vm5397_vm10, %v4527_v18, -inf  ;;  %v6168_v29 = vsel %vm5397_vm10, %v4526_v48, -inf  ;;  %v4509_v11 = vrot.slane %v4495_v9, %v13627_v50  ;;  %v15696_v45 = vpop.permute.xlu0 %1035 }
 0x312   :  { %v6156_v20 = vmax.f32 %v6154_v52, %v6155_v44  ;;  %v6162_v58 = vrot.slane %v6161_v19, 4  ;;  %v6169_v32 = vrot.slane %v6168_v29, 4  ;;  %v4510_v3 = vcombine.high %v4502_v28, %v4502_v28  ;;  %2579 = vrot.lane.b32.xlu1 %v15689_v33, %s12664_s16 }
 0x313   :  { %v6175_v30 = vsel %vm5397_vm10, %v4528_v51, -inf  ;;  %v4511_v24 = vcombine.high %v4509_v11, %v4509_v11  ;;  %v6126_v8 = vsel %vm5397_vm10, %v4502_v28, -inf  ;;  %v6140_v0 = vsel %vm5397_vm10, %v4509_v11, -inf  ;;  %1813 = vrot.lane.b32.xlu0 %v15620_v62, %s12661_s27  ;;  %v11561_v51 = vld [vmem:[%s19070_s0 + $0x2a0] sm:$0xff] }
 0x314   :  { %v6157_v38 = vrot.slane %v6156_v20, 2  ;;  %v6163_v17 = vmax.f32 %v6161_v19, %v6162_v58  ;;  %v6170_v57 = vmax.f32 %v6168_v29, %v6169_v32  ;;  %v6176_v54 = vrot.slane %v6175_v30, 4  ;;  %v15707_v55 = vpop.permute.xlu1 %2309 }
 0x315   :  { %v6127_v59 = vrot.slane %v6126_v8, 4  ;;  %v6133_v34 = vsel %vm5397_vm10, %v4510_v3, -inf  ;;  %v6141_v4 = vrot.slane %v6140_v0, 4  ;;  %v6147_v23 = vsel %vm5397_vm10, %v4511_v24, -inf  ;;  %v15709_v46 = vpop.permute.xlu0 %2055 }
 0x316   :  { %v6158_v31 = vmax.f32 %v6156_v20, %v6157_v38  ;;  %v6164_v10 = vrot.slane %v6163_v17, 2  ;;  %v6171_v40 = vrot.slane %v6170_v57, 2  ;;  %v6177_v13 = vmax.f32 %v6175_v30, %v6176_v54  ;;  %1049 = vrot.lane.b32.xlu1 %v15620_v62, %s12657_s22 }
 0x317   :  { %v6128_v43 = vmax.f32 %v6126_v8, %v6127_v59  ;;  %v6134_v7 = vrot.slane %v6133_v34, 4  ;;  %v6142_v48 = vmax.f32 %v6140_v0, %v6141_v4  ;;  %v6148_v18 = vrot.slane %v6147_v23, 4  ;;  %795 = vrot.lane.b32.xlu0 %v15633_v63, %s12658_s23 }
 0x318   :  { %v6083_v52 = vmax.f32 %v15637_v60, %v6082_v61  ;;  %v6165_v9 = vmax.f32 %v6163_v17, %v6164_v10  ;;  %v6172_v44 = vmax.f32 %v6170_v57, %v6171_v40  ;;  %v6178_v28 = vrot.slane %v6177_v13, 2  ;;  %v15719_v58 = vpop.permute.xlu1 %1545 }
 0x319   :  { %v6129_v19 = vrot.slane %v6128_v43, 2  ;;  %v6135_v29 = vmax.f32 %v6133_v34, %v6134_v7  ;;  %v6143_v11 = vrot.slane %v6142_v48, 2  ;;  %v6149_v20 = vmax.f32 %v6147_v23, %v6148_v18  ;;  %v15723_v3 = vpop.permute.xlu0 %1291 }
 0x31a   :  { %v6090_v62 = vmax.f32 %v15639_v41, %v6089_v49  ;;  %v6097_v60 = vmax.f32 %v15656_v35, %v6096_v12  ;;  %v6159_v61 = vrot.slane %v6158_v31, 1  ;;  %v6179_v32 = vmax.f32 %v6177_v13, %v6178_v28  ;;  %2069 = vrot.lane.b32.xlu1 %v11561_v51, %s12662_s18 }
 0x31b   :  { %v6130_v30 = vmax.f32 %v6128_v43, %v6129_v19  ;;  %v6136_v63 = vrot.slane %v6135_v29, 2  ;;  %v6144_v24 = vmax.f32 %v6142_v48, %v6143_v11  ;;  %v6150_v8 = vrot.slane %v6149_v20, 2  ;;  %1815 = vrot.lane.b32.xlu0 %v15689_v33, %s12661_s27  ;;  %v15749_v48 = vld [vmem:[%s19070_s0 + $0x2a1] sm:$0xff] }
 0x31c   :  { %v7335_v0 = vsel %vm7190_vm11, %v15664_v25, -inf  ;;  %v7338_v38 = vsel %vm7190_vm11, %v6083_v52, -inf  ;;  %v2914_v41 = vsel %vm19139_vm4, %v15681_v21, %v15583_v56  ;;  %v6166_v35 = vrot.slane %v6165_v9, 1  ;;  %v2566_v54 = vpop.permute.xlu1 %2565 }
 0x31d   :  { %v6173_v49 = vrot.slane %v6172_v44, 1  ;;  %v6131_v12 = vrot.slane %v6130_v30, 1  ;;  %v6137_v17 = vmax.f32 %v6135_v29, %v6136_v63  ;;  %v6145_v57 = vrot.slane %v6144_v24, 1  ;;  %v2312_v23 = vpop.permute.xlu0 %2311 }
 0x31e   :  { %v7341_v59 = vsel %vm7190_vm11, %v6090_v62, -inf  ;;  %v6160_v34 = vmax.f32 %v6158_v31, %v6159_v61  ;;  %v6180_v4 = vrot.slane %v6179_v32, 1  ;;  %v6151_v25 = vmax.f32 %v6149_v20, %v6150_v8  ;;  %1305 = vrot.lane.b32.xlu1 %v11561_v51, %s12659_s17 }
 0x31f   :  { %v7344_v10 = vsel %vm7190_vm11, %v6097_v60, -inf  ;;  %v2978_v56 = vsel %vm19137_vm5, %v15670_v6, %v15605_v47  ;;  %v6132_v21 = vmax.f32 %v6130_v30, %v6131_v12  ;;  %v6138_v40 = vrot.slane %v6137_v17, 1  ;;  %1051 = vrot.lane.b32.xlu0 %v15689_v33, %s12657_s22 }
 0x320   :  { %v6146_v13 = vmax.f32 %v6144_v24, %v6145_v57  ;;  %v6152_v43 = vrot.slane %v6151_v25, 1  ;;  %v3043_v7 = vsel %vm3002_vm6, %v2978_v56, %v15662_v22  ;;  %v2979_v31 = vsel %vm19140_vm0, %v2914_v41, %v15672_v27  ;;  %v15752_v28 = vpop.permute.xlu1 %1547  ;;  %v11562_v22 = vld [vmem:[%s19070_s0 + $0x2a8] sm:$0xff] }
 0x321   :  { %v6167_v47 = vmax.f32 %v6165_v9, %v6166_v35  ;;  %v6174_v6 = vmax.f32 %v6172_v44, %v6173_v49  ;;  %v6139_v18 = vmax.f32 %v6137_v17, %v6138_v40  ;;  %v7336_v52 = vsel %vm7190_vm11, %v6132_v21, -inf  ;;  %v15759_v29 = vpop.permute.xlu0 %781 }
 0x322   :  { %v6181_v27 = vmax.f32 %v6179_v32, %v6180_v4  ;;  %v7348_v51 = vsel %vm7190_vm11, %v6160_v34, -inf  ;;  %v6153_v33 = vmax.f32 %v6151_v25, %v6152_v43  ;;  %v7342_v19 = vsel %vm7190_vm11, %v6146_v13, -inf  ;;  %2325 = vrot.lane.b32.xlu1 %v15749_v48, %s12663_s21 }
 0x323   :  { %v7337_v11 = vmax.f32 %v7335_v0, %v7336_v52  ;;  %v7339_v9 = vsel %vm7190_vm11, %v6139_v18, -inf  ;;  %v7343_v44 = vmax.f32 %v7341_v59, %v7342_v19  ;;  %v3108_v20 = vsel %vm3067_vm7, %v3043_v7, %v15707_v55  ;;  %2071 = vrot.lane.b32.xlu0 %v11562_v22, %s12662_s18 }
 0x324   :  { %v7340_v62 = vmax.f32 %v7338_v38, %v7339_v9  ;;  %v7345_v60 = vsel %vm7190_vm11, %v6153_v33, -inf  ;;  %v3044_v61 = vsel %vm3002_vm6, %v2979_v31, %v15709_v46  ;;  %v3173_v32 = vsel %vm3132_vm8, %v3108_v20, %v2566_v54  ;;  %v2568_v8 = vpop.permute.xlu1 %2567  ;;  %v11690_v33 = vld [vmem:[%s19070_s0 + $0x2aa] sm:$0xff] }
 0x325   :  { %v6125_v30 = vmax.f32 %v15622_v26, %v6124_v53  ;;  %v7351_v63 = vsel %vm7190_vm11, %v6167_v47, -inf  ;;  %v7346_v55 = vmax.f32 %v7344_v10, %v7345_v60  ;;  %v3109_v24 = vsel %vm3067_vm7, %v3044_v61, %v2312_v23  ;;  %12084 = vmatprep.mubr.msk.f32.mxu0 %vm3201_vm9, %v3173_v32  ;;  %v15782_v35 = vpop.permute.xlu0 %1801 }
 0x326   :  { %v7347_v0 = vsel %vm7190_vm11, %v15650_v14, -inf  ;;  %v7354_v46 = vsel %vm7190_vm11, %v6174_v6, -inf  ;;  %v7792_v38 = vsel %vm7743_vm12, %v7340_v62, %v7337_v11  ;;  %v3174_v41 = vsel %vm3132_vm8, %v3109_v24, %v2568_v8  ;;  %1561 = vrot.lane.b32.xlu1 %v15749_v48, %s12660_s20  ;;  %v12068_v54 = vpop.f32.mrf.mxu0 }
 0x327   :  { %v7350_v26 = vsel %vm7190_vm11, %v15652_v39, -inf  ;;  %v7349_v53 = vmax.f32 %v7347_v0, %v7348_v51  ;;  %v7357_v49 = vsel %vm7190_vm11, %v6181_v27, -inf  ;;  %v7793_v12 = vsel %vm7745_vm13, %v7343_v44, %v7792_v38  ;;  %12085 = vmatmul.mubr.msk.f32.gmra.mxu0 %vm3201_vm9, %v3174_v41  ;;  %1307 = vrot.lane.b32.xlu0 %v11562_v22, %s12659_s17  ;;  %v11689_v39 = vld [vmem:[%s19070_s0 + $0x2a2] sm:$0xff] }
 0x328   :  { %v7353_v14 = vsel %vm7190_vm11, %v15654_v36, -inf  ;;  %v7352_v17 = vmax.f32 %v7350_v26, %v7351_v63  ;;  %v7794_v57 = vsel %vm7747_vm14, %v7346_v55, %v7793_v12  ;;  %v7356_v59 = vsel %vm7190_vm11, %v6125_v30, -inf  ;;  %v15801_v23 = vpop.permute.xlu1 %1037  ;;  %v11626_v36 = vld [vmem:[%s19070_s0 + $0x2a9] sm:$0xff]  ;;  %v3604_v40 = vpop.f32.mrf.mxu0  ;;  %v11563_v26 = vld [vmem:[%s19070_s0 + $0x2b8] sm:$0xff] }
 0x329   :  { %v7355_v34 = vmax.f32 %v7353_v14, %v7354_v46  ;;  %v7795_v4 = vsel %vm7749_vm15, %v7349_v53, %v7794_v57  ;;  %v3819_v25 = vmul.f32 %v15480_v42, %v12068_v54  ;;  %v7358_v10 = vmax.f32 %v7356_v59, %v7357_v49  ;;  %v15807_v21 = vpop.permute.xlu0 %783  ;;  %v93_v53 = vld [vmem:[%s19070_s0 + $0x228] sm:$0xff] }
 0x32a   :  { %vm19141_vm4 = vcmask 1045509   ;;  %vm19142_vm5 = vcmask 1046534   ;;  %v3818_v7 = vmul.f32 %v15480_v42, %v3604_v40  ;;  %2581 = vrot.lane.b32.xlu1 %v11689_v39, %s12664_s16  ;;  %vm19143_vm0 = vcmask 1047559  }
 0x32b   :  { %v7796_v56 = vsel %vm19141_vm4, %v7352_v17, %v7795_v4  ;;  %v3890_v43 = vadd.f32 %v15499_v37, %v3819_v25  ;;  %2327 = vrot.lane.b32.xlu0 %v11626_v36, %s12663_s21  ;;  %v2720_v25 = vsel %vm2677_vm1, %v93_v53, %v15589_v16  ;;  %vm19144_vm4 = vcmask 97280  }
 0x32c   :  { %v7797_v13 = vsel %vm19142_vm5, %v7355_v34, %v7796_v56  ;;  %v3889_v6 = vadd.f32 %v15499_v37, %v3818_v7  ;;  %v15817_v18 = vpop.permute.xlu1 %2057  ;;  %vm19145_vm5 = vmmov %vm19144_vm4 }
 0x32d   :  { %v7798_v31 = vsel %vm19143_vm0, %v7358_v10, %v7797_v13  ;;  %v3954_v47 = vmax.f32 %v3890_v43, 0.0  ;;  %v15819_v52 = vpop.permute.xlu0 %1803  ;;  %v2785_v10 = vsel %vm2742_vm2, %v2720_v25, %v15627_v5  ;;  %vm19146_vm0 = vcmask 121856  }
 0x32e   :  { %7885 = vst.msk [vmem:[#allocation2 + $0x71] sm:$0xff] %vm7190_vm11, %v7798_v31  ;;  %v3953_v51 = vmax.f32 %v3889_v6, 0.0  ;;  %1563 = vrot.lane.b32.xlu1 %v11626_v36, %s12660_s20  ;;  %v2850_v16 = vsel %vm2807_vm3, %v2785_v10, %v15694_v2  ;;  %v15881_v2 = vld [vmem:[%s19070_s0 + $0x2b9] sm:$0xff] }
 0x32f   :  { %v4546_v22 = vcombine.high %v3954_v47, %v3954_v47  ;;  %v4553_v27 = vrot.slane %v3954_v47, %v13627_v50  ;;  %797 = vrot.lane.b32.xlu0 %v15749_v48, %s12658_s23  ;;  %v2915_v5 = vsel %vm19144_vm4, %v2850_v16, %v15719_v58  ;;  %vm19147_vm4 = vmmov %vm19146_vm0  ;;  %v15923_v10 = vld [vmem:[%s19070_s0 + $0x2ba] sm:$0xff] }
 0x330   :  { %v4529_v9 = vcombine.high %v3953_v51, %v3953_v51  ;;  %v15829_v44 = vpop.permute.xlu1 %1293  ;;  %v4536_v60 = vrot.slane %v3953_v51, %v13627_v50 }
 0x331   :  { %v4560_v19 = vrot.slane %v4546_v22, %v13627_v50  ;;  %v4561_v11 = vcombine.high %v4553_v27, %v4553_v27  ;;  %v15831_v20 = vpop.permute.xlu0 %1039  ;;  %v6210_v62 = vsel %vm5397_vm10, %v4553_v27, -inf }
 0x332   :  { %v4543_v61 = vrot.slane %v4529_v9, %v13627_v50  ;;  %2583 = vrot.lane.b32.xlu1 %v11690_v33, %s12664_s16  ;;  %v6211_v55 = vrot.slane %v6210_v62, 4  ;;  %v4544_v0 = vcombine.high %v4536_v60, %v4536_v60  ;;  %v6182_v46 = vsel %vm5397_vm10, %v4536_v60, -inf }
 0x333   :  { %v6217_v48 = vsel %vm5397_vm10, %v4561_v11, -inf  ;;  %1817 = vrot.lane.b32.xlu0 %v11689_v39, %s12661_s27  ;;  %v6224_v32 = vsel %vm5397_vm10, %v4560_v19, -inf  ;;  %v4562_v63 = vcombine.high %v4560_v19, %v4560_v19  ;;  %v6183_v17 = vrot.slane %v6182_v46, 4 }
 0x334   :  { %v2314_v30 = vpop.permute.xlu1 %2313  ;;  %v6218_v8 = vrot.slane %v6217_v48, 4  ;;  %v6196_v38 = vsel %vm5397_vm10, %v4543_v61, -inf  ;;  %v6225_v41 = vrot.slane %v6224_v32, 4  ;;  %v4545_v49 = vcombine.high %v4543_v61, %v4543_v61 }
 0x335   :  { %v2060_v24 = vpop.permute.xlu0 %2059  ;;  %v6231_v14 = vsel %vm5397_vm10, %v4562_v63, -inf  ;;  %v6197_v57 = vrot.slane %v6196_v38, 4  ;;  %v6212_v59 = vmax.f32 %v6210_v62, %v6211_v55  ;;  %v6189_v4 = vsel %vm5397_vm10, %v4544_v0, -inf }
 0x336   :  { %1053 = vrot.lane.b32.xlu1 %v11689_v39, %s12657_s22  ;;  %v94_v39 = vld [vmem:[%s19070_s0 + $0x230] sm:$0xff]  ;;  %v6219_v34 = vmax.f32 %v6217_v48, %v6218_v8  ;;  %v6232_v56 = vrot.slane %v6231_v14, 4  ;;  %v6203_v40 = vsel %vm5397_vm10, %v4545_v49, -inf  ;;  %v6184_v7 = vmax.f32 %v6182_v46, %v6183_v17 }
 0x337   :  { %799 = vrot.lane.b32.xlu0 %v11626_v36, %s12658_s23  ;;  %v6226_v36 = vmax.f32 %v6224_v32, %v6225_v41  ;;  %v2721_v43 = vsel %vm2677_vm1, %v94_v39, %v15641_v1  ;;  %v6190_v31 = vrot.slane %v6189_v4, 4  ;;  %v6198_v47 = vmax.f32 %v6196_v38, %v6197_v57 }
 0x338   :  { %v15850_v12 = vpop.permute.xlu1 %1549  ;;  %v2786_v22 = vsel %vm2742_vm2, %v2721_v43, %v15696_v45  ;;  %v6213_v27 = vrot.slane %v6212_v59, 2  ;;  %v6220_v51 = vrot.slane %v6219_v34, 2  ;;  %v6204_v11 = vrot.slane %v6203_v40, 4 }
 0x339   :  { %v15853_v54 = vpop.permute.xlu0 %1295  ;;  %v2851_v1 = vsel %vm2807_vm3, %v2786_v22, %v15723_v3  ;;  %v6227_v19 = vrot.slane %v6226_v36, 2  ;;  %v2980_v9 = vsel %vm19146_vm0, %v2915_v5, %v15782_v35  ;;  %v6233_v62 = vmax.f32 %v6231_v14, %v6232_v56  ;;  %v11564_v3 = vld [vmem:[%s19070_s0 + $0x2c0] sm:$0xff]  ;;  %vm19148_vm0 = vmmov %vm19145_vm5 }
 0x33a   :  { %2073 = vrot.lane.b32.xlu1 %v11563_v26, %s12662_s18  ;;  %v2916_v45 = vsel %vm19145_vm5, %v2851_v1, %v15752_v28  ;;  %v6185_v60 = vrot.slane %v6184_v7, 2  ;;  %v6199_v61 = vrot.slane %v6198_v47, 2  ;;  %v3045_v48 = vsel %vm3002_vm6, %v2980_v9, %v15817_v18 }
 0x33b   :  { %1819 = vrot.lane.b32.xlu0 %v11690_v33, %s12661_s27  ;;  %v6214_v63 = vmax.f32 %v6212_v59, %v6213_v27  ;;  %v6221_v28 = vmax.f32 %v6219_v34, %v6220_v51  ;;  %v2981_v35 = vsel %vm19147_vm4, %v2916_v45, %v15819_v52  ;;  %v3110_v55 = vsel %vm3067_vm7, %v3045_v48, %v2314_v30  ;;  %v95_v52 = vld [vmem:[%s19070_s0 + $0x240] sm:$0xff] }
 0x33c   :  { %v2570_v13 = vpop.permute.xlu1 %2569  ;;  %v6228_v8 = vmax.f32 %v6226_v36, %v6227_v19  ;;  %v6205_v0 = vmax.f32 %v6203_v40, %v6204_v11  ;;  %v3046_v46 = vsel %vm3002_vm6, %v2981_v35, %v2060_v24  ;;  %v6234_v18 = vrot.slane %v6233_v62, 2 }
 0x33d   :  { %v2316_v6 = vpop.permute.xlu0 %2315  ;;  %v3175_v38 = vsel %vm3132_vm8, %v3110_v55, %v2570_v13  ;;  %v6186_v30 = vmax.f32 %v6184_v7, %v6185_v60  ;;  %v6200_v49 = vmax.f32 %v6198_v47, %v6199_v61  ;;  %v6215_v39 = vrot.slane %v6214_v63, 1 }
 0x33e   :  { %1309 = vrot.lane.b32.xlu1 %v11563_v26, %s12659_s17  ;;  %v3111_v41 = vsel %vm3067_vm7, %v3046_v46, %v2316_v6  ;;  %12087 = vmatprep.mubr.msk.f32.mxu0 %vm3201_vm9, %v3175_v38  ;;  %v6222_v59 = vrot.slane %v6221_v28, 1  ;;  %v6229_v34 = vrot.slane %v6228_v8, 1  ;;  %v6206_v25 = vrot.slane %v6205_v0, 2  ;;  %v15991_v46 = vld [vmem:[%s19070_s0 + $0x2c2] sm:$0xff] }
 0x33f   :  { %1055 = vrot.lane.b32.xlu0 %v11690_v33, %s12657_s22  ;;  %v6191_v33 = vmax.f32 %v6189_v4, %v6190_v31  ;;  %v96_v4 = vld [vmem:[%s19070_s0 + $0x248] sm:$0xff]  ;;  %v2722_v56 = vsel %vm2677_vm1, %v95_v52, %v15759_v29  ;;  %v15927_v40 = vmax.f32 %v6233_v62, %v6234_v18  ;;  %v6187_v6 = vrot.slane %v6186_v30, 1 }
 0x340   :  { %v15887_v58 = vpop.permute.xlu1 %1551  ;;  %v15936_v31 = vld [vmem:[%s19070_s0 + $0x2c1] sm:$0xff]  ;;  %v2787_v47 = vsel %vm2742_vm2, %v2722_v56, %v15801_v23  ;;  %v6201_v29 = vrot.slane %v6200_v49, 1  ;;  %v2723_v27 = vsel %vm2677_vm1, %v96_v4, %v15807_v21  ;;  %v15951_v1 = vmax.f32 %v6214_v63, %v6215_v39 }
 0x341   :  { %v15894_v32 = vpop.permute.xlu0 %785  ;;  %v6192_v53 = vrot.slane %v6191_v33, 2  ;;  %v15953_v23 = vmax.f32 %v6221_v28, %v6222_v59  ;;  %v15955_v19 = vmax.f32 %v6228_v8, %v6229_v34  ;;  %v15957_v11 = vmax.f32 %v6205_v0, %v6206_v25 }
 0x342   :  { %2329 = vrot.lane.b32.xlu1 %v15881_v2, %s12663_s21  ;;  %v6236_v21 = vrot.slane %v15927_v40, 1  ;;  %v15965_v62 = vmax.f32 %v6186_v30, %v6187_v6  ;;  %v15968_v60 = vmax.f32 %v6200_v49, %v6201_v29 }
 0x343   :  { %2075 = vrot.lane.b32.xlu0 %v11564_v3, %s12662_s18  ;;  %v15940_v16 = vmax.f32 %v6191_v33, %v6192_v53  ;;  %v15972_v33 = vsel %vm2742_vm2, %v2723_v27, %v15831_v20  ;;  %v6208_v55 = vrot.slane %v15957_v11, 1 }
 0x344   :  { %v2572_v26 = vpop.permute.xlu1 %2571 }
 0x345   :  { %v3176_v14 = vsel %vm3132_vm8, %v3111_v41, %v2572_v26  ;;  %v15910_v24 = vpop.permute.xlu0 %1805 }
 0x346   :  { %v12071_v17 = vpop.f32.mrf.mxu0  ;;  %1565 = vrot.lane.b32.xlu1 %v15881_v2, %s12660_s20  ;;  %12088 = vmatmul.mubr.msk.f32.gmra.mxu0 %vm3201_vm9, %v3176_v14 }
 0x347   :  { %v3821_v57 = vmul.f32 %v15480_v42, %v12071_v17  ;;  %1311 = vrot.lane.b32.xlu0 %v11564_v3, %s12659_s17  ;;  %v6194_v3 = vrot.slane %v15940_v16, 1 }
 0x348   :  { %v3614_v36 = vpop.f32.mrf.mxu0  ;;  %v15930_v43 = vpop.permute.xlu1 %1041 }
 0x349   :  { %v3892_v13 = vadd.f32 %v15499_v37, %v3821_v57  ;;  %v3820_v7 = vmul.f32 %v15480_v42, %v3614_v36  ;;  %v15942_v22 = vpop.permute.xlu0 %787  ;;  %v2852_v42 = vsel %vm2807_vm3, %v2787_v47, %v15829_v44 }
 0x34a   :  { %2585 = vrot.lane.b32.xlu1 %v15923_v10, %s12664_s16  ;;  %v15983_v8 = vsel %vm19145_vm5, %v2852_v42, %v15850_v12  ;;  %vm19149_vm5 = vmmov %vm19147_vm4 }
 0x34b   :  { %v3956_v51 = vmax.f32 %v3892_v13, 0.0  ;;  %v3891_v5 = vadd.f32 %v15499_v37, %v3820_v7  ;;  %2331 = vrot.lane.b32.xlu0 %v15936_v31, %s12663_s21 }
 0x34c   :  { %v15963_v9 = vpop.permute.xlu1 %2061 }
 0x34d   :  { %v4580_v44 = vcombine.high %v3956_v51, %v3956_v51  ;;  %v4587_v45 = vrot.slane %v3956_v51, %v13627_v50  ;;  %v3955_v37 = vmax.f32 %v3891_v5, 0.0  ;;  %v15974_v61 = vpop.permute.xlu0 %1807 }
 0x34e   :  { %1567 = vrot.lane.b32.xlu1 %v15936_v31, %s12660_s20 }
 0x34f   :  { %v4594_v48 = vrot.slane %v4580_v44, %v13627_v50  ;;  %v4595_v63 = vcombine.high %v4587_v45, %v4587_v45  ;;  %v6266_v28 = vsel %vm5397_vm10, %v4587_v45, -inf  ;;  %v4563_v35 = vcombine.high %v3955_v37, %v3955_v37  ;;  %801 = vrot.lane.b32.xlu0 %v15881_v2, %s12658_s23 }
 0x350   :  { %v6267_v0 = vrot.slane %v6266_v28, 4  ;;  %v4570_v20 = vrot.slane %v3955_v37, %v13627_v50  ;;  %v15996_v12 = vpop.permute.xlu1 %1297 }
 0x351   :  { %v4596_v38 = vcombine.high %v4594_v48, %v4594_v48  ;;  %v6273_v18 = vsel %vm5397_vm10, %v4595_v63, -inf  ;;  %v6280_v41 = vsel %vm5397_vm10, %v4594_v48, -inf  ;;  %v4577_v26 = vrot.slane %v4563_v35, %v13627_v50  ;;  %v15998_v14 = vpop.permute.xlu0 %1043 }
 0x352   :  { %v6268_v52 = vmax.f32 %v6266_v28, %v6267_v0  ;;  %v6274_v30 = vrot.slane %v6273_v18, 4  ;;  %v6281_v53 = vrot.slane %v6280_v41, 4  ;;  %v4578_v49 = vcombine.high %v4570_v20, %v4570_v20  ;;  %2587 = vrot.lane.b32.xlu1 %v15991_v46, %s12664_s16  ;;  %v11565_v0 = vld [vmem:[%s19070_s0 + $0x2d0] sm:$0xff] }
 0x353   :  { %v6287_v2 = vsel %vm5397_vm10, %v4596_v38, -inf  ;;  %v4579_v17 = vcombine.high %v4577_v26, %v4577_v26  ;;  %v6238_v57 = vsel %vm5397_vm10, %v4570_v20, -inf  ;;  %v6252_v39 = vsel %vm5397_vm10, %v4577_v26, -inf  ;;  %1821 = vrot.lane.b32.xlu0 %v15923_v10, %s12661_s27 }
 0x354   :  { %v6269_v59 = vrot.slane %v6268_v52, 2  ;;  %v6275_v34 = vmax.f32 %v6273_v18, %v6274_v30  ;;  %v6282_v4 = vmax.f32 %v6280_v41, %v6281_v53  ;;  %v6288_v25 = vrot.slane %v6287_v2, 4  ;;  %v16009_v47 = vpop.permute.xlu1 %2317 }
 0x355   :  { %v6239_v36 = vrot.slane %v6238_v57, 4  ;;  %v6245_v56 = vsel %vm5397_vm10, %v4578_v49, -inf  ;;  %v6253_v13 = vrot.slane %v6252_v39, 4  ;;  %v6259_v7 = vsel %vm5397_vm10, %v4579_v17, -inf  ;;  %v16011_v51 = vpop.permute.xlu0 %2063 }
 0x356   :  { %v6270_v6 = vmax.f32 %v6268_v52, %v6269_v59  ;;  %v6276_v29 = vrot.slane %v6275_v34, 2  ;;  %v6283_v27 = vrot.slane %v6282_v4, 2  ;;  %v6289_v42 = vmax.f32 %v6287_v2, %v6288_v25  ;;  %1057 = vrot.lane.b32.xlu1 %v15923_v10, %s12657_s22 }
 0x357   :  { %v6240_v5 = vmax.f32 %v6238_v57, %v6239_v36  ;;  %v6246_v44 = vrot.slane %v6245_v56, 4  ;;  %v6254_v45 = vmax.f32 %v6252_v39, %v6253_v13  ;;  %v6260_v37 = vrot.slane %v6259_v7, 4  ;;  %803 = vrot.lane.b32.xlu0 %v15936_v31, %s12658_s23 }
 0x358   :  { %v6195_v48 = vmax.f32 %v15940_v16, %v6194_v3  ;;  %v6277_v63 = vmax.f32 %v6275_v34, %v6276_v29  ;;  %v6284_v28 = vmax.f32 %v6282_v4, %v6283_v27  ;;  %v6290_v35 = vrot.slane %v6289_v42, 2  ;;  %v16021_v26 = vpop.permute.xlu1 %1553 }
 0x359   :  { %v6241_v20 = vrot.slane %v6240_v5, 2  ;;  %v6247_v38 = vmax.f32 %v6245_v56, %v6246_v44  ;;  %v6255_v18 = vrot.slane %v6254_v45, 2  ;;  %v6261_v41 = vmax.f32 %v6259_v7, %v6260_v37  ;;  %v16028_v30 = vpop.permute.xlu0 %1299 }
 0x35a   :  { %v6209_v10 = vmax.f32 %v15957_v11, %v6208_v55  ;;  %v16026_v16 = vsel %vm7190_vm11, %v15965_v62, -inf  ;;  %v6271_v3 = vrot.slane %v6270_v6, 1  ;;  %v6291_v52 = vmax.f32 %v6289_v42, %v6290_v35  ;;  %2077 = vrot.lane.b32.xlu1 %v11565_v0, %s12662_s18 }
 0x35b   :  { %v6242_v31 = vmax.f32 %v6240_v5, %v6241_v20  ;;  %v6248_v53 = vrot.slane %v6247_v38, 2  ;;  %v6256_v49 = vmax.f32 %v6254_v45, %v6255_v18  ;;  %v6262_v2 = vrot.slane %v6261_v41, 2  ;;  %1823 = vrot.lane.b32.xlu0 %v15991_v46, %s12661_s27 }
 0x35c   :  { %v7362_v17 = vsel %vm7190_vm11, %v6195_v48, -inf  ;;  %v7365_v57 = vsel %vm7190_vm11, %v15968_v60, -inf  ;;  %v2853_v11 = vsel %vm2807_vm3, %v15972_v33, %v15853_v54  ;;  %v6278_v62 = vrot.slane %v6277_v63, 1  ;;  %v2574_v4 = vpop.permute.xlu1 %2573 }
 0x35d   :  { %v6285_v55 = vrot.slane %v6284_v28, 1  ;;  %v6243_v39 = vrot.slane %v6242_v31, 1  ;;  %v6249_v59 = vmax.f32 %v6247_v38, %v6248_v53  ;;  %v6257_v34 = vrot.slane %v6256_v49, 1  ;;  %v2320_v7 = vpop.permute.xlu0 %2319 }
 0x35e   :  { %v7368_v25 = vsel %vm7190_vm11, %v6209_v10, -inf  ;;  %v6272_v36 = vmax.f32 %v6270_v6, %v6271_v3  ;;  %v6292_v56 = vrot.slane %v6291_v52, 1  ;;  %v6263_v13 = vmax.f32 %v6261_v41, %v6262_v2  ;;  %1313 = vrot.lane.b32.xlu1 %v11565_v0, %s12659_s17 }
 0x35f   :  { %v2918_v60 = vsel %vm19148_vm0, %v2853_v11, %v15887_v58  ;;  %v2982_v54 = vsel %vm19147_vm4, %v15983_v8, %v15910_v24  ;;  %v6244_v33 = vmax.f32 %v6242_v31, %v6243_v39  ;;  %v6250_v29 = vrot.slane %v6249_v59, 1  ;;  %1059 = vrot.lane.b32.xlu0 %v15991_v46, %s12657_s22  ;;  %v16055_v58 = vld [vmem:[%s19070_s0 + $0x2d1] sm:$0xff] }
 0x360   :  { %v6258_v27 = vmax.f32 %v6256_v49, %v6257_v34  ;;  %v6264_v42 = vrot.slane %v6263_v13, 1  ;;  %v3047_v5 = vsel %vm3002_vm6, %v2982_v54, %v15963_v9  ;;  %v2983_v6 = vsel %vm19149_vm5, %v2918_v60, %v15974_v61  ;;  %v16058_v37 = vpop.permute.xlu1 %1555  ;;  %v11566_v9 = vld [vmem:[%s19070_s0 + $0x2d8] sm:$0xff] }
 0x361   :  { %v6279_v24 = vmax.f32 %v6277_v63, %v6278_v62  ;;  %v6286_v8 = vmax.f32 %v6284_v28, %v6285_v55  ;;  %v6251_v44 = vmax.f32 %v6249_v59, %v6250_v29  ;;  %v7360_v45 = vsel %vm7190_vm11, %v6244_v33, -inf  ;;  %v16065_v0 = vpop.permute.xlu0 %789  ;;  %v16122_v33 = vld [vmem:[%s19073_s3] ss:$0 sm:$0xff] }
 0x362   :  { %v6293_v61 = vmax.f32 %v6291_v52, %v6292_v56  ;;  %v7372_v48 = vsel %vm7190_vm11, %v6272_v36, -inf  ;;  %v6265_v46 = vmax.f32 %v6263_v13, %v6264_v42  ;;  %v7366_v35 = vsel %vm7190_vm11, %v6258_v27, -inf  ;;  %2333 = vrot.lane.b32.xlu1 %v16055_v58, %s12663_s21 }
 0x363   :  { %v7361_v63 = vmax.f32 %v16026_v16, %v7360_v45  ;;  %v7363_v28 = vsel %vm7190_vm11, %v6251_v44, -inf  ;;  %v7367_v20 = vmax.f32 %v7365_v57, %v7366_v35  ;;  %v3112_v38 = vsel %vm3067_vm7, %v3047_v5, %v16009_v47  ;;  %2079 = vrot.lane.b32.xlu0 %v11566_v9, %s12662_s18  ;;  %v11694_v35 = vld [vmem:[%s19070_s0 + $0x2da] sm:$0xff] }
 0x364   :  { %v7364_v18 = vmax.f32 %v7362_v17, %v7363_v28  ;;  %v7369_v41 = vsel %vm7190_vm11, %v6265_v46, -inf  ;;  %v3048_v10 = vsel %vm3002_vm6, %v2983_v6, %v16011_v51  ;;  %v3177_v3 = vsel %vm3132_vm8, %v3112_v38, %v2574_v4  ;;  %v2576_v53 = vpop.permute.xlu1 %2575  ;;  %v11693_v4 = vld [vmem:[%s19070_s0 + $0x2d2] sm:$0xff] }
 0x365   :  { %v6237_v16 = vmax.f32 %v15927_v40, %v6236_v21  ;;  %v7375_v52 = vsel %vm7190_vm11, %v6279_v24, -inf  ;;  %v7370_v47 = vmax.f32 %v7368_v25, %v7369_v41  ;;  %v3113_v31 = vsel %vm3067_vm7, %v3048_v10, %v2320_v7  ;;  %12090 = vmatprep.mubr.msk.f32.mxu0 %vm3201_vm9, %v3177_v3  ;;  %v16089_v57 = vpop.permute.xlu0 %1809  ;;  %v11630_v7 = vld [vmem:[%s19070_s0 + $0x2d9] sm:$0xff] }
 0x366   :  { %v7371_v49 = vsel %vm7190_vm11, %v15951_v1, -inf  ;;  %v7378_v51 = vsel %vm7190_vm11, %v6286_v8, -inf  ;;  %v7799_v2 = vsel %vm7743_vm12, %v7364_v18, %v7361_v63  ;;  %v3178_v17 = vsel %vm3132_vm8, %v3113_v31, %v2576_v53  ;;  %1569 = vrot.lane.b32.xlu1 %v16055_v58, %s12660_s20 }
 0x367   :  { %v7374_v40 = vsel %vm7190_vm11, %v15953_v23, -inf  ;;  %v7373_v21 = vmax.f32 %v7371_v49, %v7372_v48  ;;  %v7381_v11 = vsel %vm7190_vm11, %v6293_v61, -inf  ;;  %v7800_v62 = vsel %vm7745_vm13, %v7367_v20, %v7799_v2  ;;  %v12074_v1 = vpop.f32.mrf.mxu0  ;;  %12091 = vmatmul.mubr.msk.f32.gmra.mxu0 %vm3201_vm9, %v3178_v17  ;;  %1315 = vrot.lane.b32.xlu0 %v11566_v9, %s12659_s17  ;;  %v16105_v23 = vld [vmem:[%s19072_s2] ss:$0 sm:$0xff]  ;;  %v97_v17 = vld [vmem:[%s19070_s0 + $0x258] sm:$0xff] }
 0x368   :  { %v7377_v55 = vsel %vm7190_vm11, %v15955_v19, -inf  ;;  %v7376_v39 = vmax.f32 %v7374_v40, %v7375_v52  ;;  %v7801_v59 = vsel %vm7747_vm14, %v7370_v47, %v7800_v62  ;;  %v3823_v34 = vmul.f32 %v16105_v23, %v12074_v1  ;;  %v16113_v56 = vpop.permute.xlu1 %1045 }
 0x369   :  { %v7380_v25 = vsel %vm7190_vm11, %v6237_v16, -inf  ;;  %v7379_v36 = vmax.f32 %v7377_v55, %v7378_v51  ;;  %v7802_v19 = vsel %vm7749_vm15, %v7373_v21, %v7801_v59  ;;  %v3624_v13 = vpop.f32.mrf.mxu0  ;;  %vm19150_vm0 = vcmask 1045509   ;;  %v16125_v27 = vpop.permute.xlu0 %791  ;;  %v98_v55 = vld [vmem:[%s19070_s0 + $0x260] sm:$0xff] }
 0x36a   :  { %v7382_v60 = vmax.f32 %v7380_v25, %v7381_v11  ;;  %v7803_v54 = vsel %vm19150_vm0, %v7376_v39, %v7802_v19  ;;  %v3894_v29 = vadd.f32 %v16122_v33, %v3823_v34  ;;  %v3822_v42 = vmul.f32 %v16105_v23, %v3624_v13  ;;  %2589 = vrot.lane.b32.xlu1 %v11693_v4, %s12664_s16  ;;  %v11567_v11 = vld [vmem:[%s19070_s0 + $0x2e8] sm:$0xff] }
 0x36b   :  { %vm19151_vm4 = vcmask 1046534   ;;  %vm19152_vm5 = vcmask 1047559   ;;  %2335 = vrot.lane.b32.xlu0 %v11630_v7, %s12663_s21  ;;  %v2724_v25 = vsel %vm2677_vm1, %v97_v17, %v15894_v32  ;;  %vm19153_vm0 = vcmask 97280  }
 0x36c   :  { %v7804_v5 = vsel %vm19151_vm4, %v7379_v36, %v7803_v54  ;;  %v3958_v24 = vmax.f32 %v3894_v29, 0.0  ;;  %v3893_v8 = vadd.f32 %v16122_v33, %v3822_v42  ;;  %v16134_v44 = vpop.permute.xlu1 %2065  ;;  %v2789_v13 = vsel %vm2742_vm2, %v2724_v25, %v15930_v43 }
 0x36d   :  { %v7805_v6 = vsel %vm19152_vm5, %v7382_v60, %v7804_v5  ;;  %v16137_v48 = vpop.permute.xlu0 %1811  ;;  %v2725_v29 = vsel %vm2677_vm1, %v98_v55, %v15942_v22  ;;  %v2854_v42 = vsel %vm2807_vm3, %v2789_v13, %v15996_v12  ;;  %vm19154_vm4 = vcmask 121856   ;;  %vm19155_vm5 = vmmov %vm19153_vm0 }
 0x36e   :  { %7886 = vst.msk [vmem:[#allocation2 + $0x81] sm:$0xff] %vm7190_vm11, %v7805_v6  ;;  %v4614_v45 = vcombine.high %v3958_v24, %v3958_v24  ;;  %v4621_v9 = vrot.slane %v3958_v24, %v13627_v50  ;;  %v3957_v61 = vmax.f32 %v3893_v8, 0.0  ;;  %1571 = vrot.lane.b32.xlu1 %v11630_v7, %s12660_s20  ;;  %v2790_v6 = vsel %vm2742_vm2, %v2725_v29, %v15998_v14  ;;  %v16202_v14 = vld [vmem:[%s19070_s0 + $0x2e9] sm:$0xff] }
 0x36f   :  { %805 = vrot.lane.b32.xlu0 %v16055_v58, %s12658_s23 }
 0x370   :  { %v4597_v46 = vcombine.high %v3957_v61, %v3957_v61  ;;  %v4628_v63 = vrot.slane %v4614_v45, %v13627_v50  ;;  %v4629_v28 = vcombine.high %v4621_v9, %v4621_v9  ;;  %v4604_v20 = vrot.slane %v3957_v61, %v13627_v50  ;;  %v16147_v38 = vpop.permute.xlu1 %1301 }
 0x371   :  { %v16149_v18 = vpop.permute.xlu0 %1047  ;;  %v6322_v10 = vsel %vm5397_vm10, %v4621_v9, -inf  ;;  %v2919_v9 = vsel %vm19153_vm0, %v2854_v42, %v16021_v26  ;;  %v2855_v61 = vsel %vm2807_vm3, %v2790_v6, %v16028_v30  ;;  %vm19156_vm0 = vmmov %vm19154_vm4 }
 0x372   :  { %v4611_v41 = vrot.slane %v4597_v46, %v13627_v50  ;;  %2591 = vrot.lane.b32.xlu1 %v11694_v35, %s12664_s16  ;;  %v6329_v58 = vsel %vm5397_vm10, %v4629_v28, -inf  ;;  %v6336_v3 = vsel %vm5397_vm10, %v4628_v63, -inf  ;;  %v4612_v16 = vcombine.high %v4604_v20, %v4604_v20 }
 0x373   :  { %1825 = vrot.lane.b32.xlu0 %v11693_v4, %s12661_s27  ;;  %v4630_v47 = vcombine.high %v4628_v63, %v4628_v63  ;;  %v6323_v53 = vrot.slane %v6322_v10, 4  ;;  %v6294_v51 = vsel %vm5397_vm10, %v4604_v20, -inf  ;;  %v6330_v40 = vrot.slane %v6329_v58, 4 }
 0x374   :  { %v2322_v52 = vpop.permute.xlu1 %2321  ;;  %v4613_v49 = vcombine.high %v4611_v41, %v4611_v41  ;;  %v6308_v2 = vsel %vm5397_vm10, %v4611_v41, -inf  ;;  %v6337_v21 = vrot.slane %v6336_v3, 4  ;;  %v6301_v62 = vsel %vm5397_vm10, %v4612_v16, -inf }
 0x375   :  { %v16157_v31 = vpop.permute.xlu0 %2067  ;;  %v6343_v39 = vsel %vm5397_vm10, %v4630_v47, -inf  ;;  %v6295_v59 = vrot.slane %v6294_v51, 4  ;;  %v6309_v34 = vrot.slane %v6308_v2, 4  ;;  %v6324_v36 = vmax.f32 %v6322_v10, %v6323_v53 }
 0x376   :  { %1061 = vrot.lane.b32.xlu1 %v11693_v4, %s12657_s22  ;;  %v6315_v19 = vsel %vm5397_vm10, %v4613_v49, -inf  ;;  %v6338_v60 = vmax.f32 %v6336_v3, %v6337_v21  ;;  %v6302_v54 = vrot.slane %v6301_v62, 4  ;;  %v6344_v32 = vrot.slane %v6343_v39, 4 }
 0x377   :  { %807 = vrot.lane.b32.xlu0 %v11630_v7, %s12658_s23  ;;  %v6331_v7 = vmax.f32 %v6329_v58, %v6330_v40  ;;  %v6296_v24 = vmax.f32 %v6294_v51, %v6295_v59  ;;  %v6310_v8 = vmax.f32 %v6308_v2, %v6309_v34  ;;  %v6316_v45 = vrot.slane %v6315_v19, 4 }
 0x378   :  { %v16170_v1 = vpop.permute.xlu1 %1557  ;;  %v6325_v46 = vrot.slane %v6324_v36, 2  ;;  %v2984_v22 = vsel %vm19154_vm4, %v2919_v9, %v16089_v57  ;;  %v6339_v63 = vrot.slane %v6338_v60, 2  ;;  %v6303_v28 = vmax.f32 %v6301_v62, %v6302_v54  ;;  %v11568_v57 = vld [vmem:[%s19070_s0 + $0x2f0] sm:$0xff]  ;;  %vm19157_vm4 = vmmov %vm19155_vm5 }
 0x379   :  { %v16176_v4 = vpop.permute.xlu0 %1303  ;;  %v6332_v12 = vrot.slane %v6331_v7, 2  ;;  %v2920_v26 = vsel %vm19155_vm5, %v2855_v61, %v16058_v37  ;;  %v6345_v30 = vmax.f32 %v6343_v39, %v6344_v32  ;;  %v3049_v20 = vsel %vm3002_vm6, %v2984_v22, %v16134_v44  ;;  %vm19158_vm5 = vmmov %vm19157_vm4 }
 0x37a   :  { %2081 = vrot.lane.b32.xlu1 %v11567_v11, %s12662_s18  ;;  %v6297_v10 = vrot.slane %v6296_v24, 2  ;;  %v6317_v58 = vmax.f32 %v6315_v19, %v6316_v45  ;;  %v3114_v3 = vsel %vm3067_vm7, %v3049_v20, %v2322_v52  ;;  %v6326_v47 = vmax.f32 %v6324_v36, %v6325_v46  ;;  %v100_v19 = vld [vmem:[%s19070_s0 + $0x278] sm:$0xff] }
 0x37b   :  { %1827 = vrot.lane.b32.xlu0 %v11694_v35, %s12661_s27  ;;  %v2985_v37 = vsel %vm19156_vm0, %v2920_v26, %v16137_v48  ;;  %v6333_v44 = vmax.f32 %v6331_v7, %v6332_v12  ;;  %v6340_v49 = vmax.f32 %v6338_v60, %v6339_v63  ;;  %v6304_v51 = vrot.slane %v6303_v28, 2  ;;  %v16243_v60 = vld [vmem:[%s19070_s0 + $0x2ea] sm:$0xff] }
 0x37c   :  { %v2578_v5 = vpop.permute.xlu1 %2577  ;;  %v3050_v2 = vsel %vm3002_vm6, %v2985_v37, %v16157_v31  ;;  %v6346_v52 = vrot.slane %v6345_v30, 2  ;;  %v6298_v48 = vmax.f32 %v6296_v24, %v6297_v10  ;;  %v99_v31 = vld [vmem:[%s19070_s0 + $0x270] sm:$0xff]  ;;  %v6327_v34 = vrot.slane %v6326_v47, 1 }
 0x37d   :  { %v2324_v43 = vpop.permute.xlu0 %2323  ;;  %v3179_v53 = vsel %vm3132_vm8, %v3114_v3, %v2578_v5  ;;  %v6334_v25 = vrot.slane %v6333_v44, 1  ;;  %v6341_v36 = vrot.slane %v6340_v49, 1  ;;  %v6305_v13 = vmax.f32 %v6303_v28, %v6304_v51  ;;  %v16254_v5 = vld [vmem:[%s19070_s0 + $0x2f1] sm:$0xff] }
 0x37e   :  { %1317 = vrot.lane.b32.xlu1 %v11567_v11, %s12659_s17  ;;  %12093 = vmatprep.mubr.msk.f32.mxu0 %vm3201_vm9, %v3179_v53  ;;  %v3115_v17 = vsel %vm3067_vm7, %v3050_v2, %v2324_v43  ;;  %v6318_v11 = vrot.slane %v6317_v58, 2  ;;  %v16245_v54 = vmax.f32 %v6345_v30, %v6346_v52  ;;  %v2726_v6 = vsel %vm2677_vm1, %v99_v31, %v16065_v0  ;;  %v16302_v52 = vld [vmem:[%s19070_s0 + $0x2f2] sm:$0xff] }
 0x37f   :  { %1063 = vrot.lane.b32.xlu0 %v11694_v35, %s12657_s22  ;;  %v6311_v35 = vrot.slane %v6310_v8, 2  ;;  %v6299_v24 = vrot.slane %v6298_v48, 1  ;;  %v2791_v9 = vsel %vm2742_vm2, %v2726_v6, %v16113_v56  ;;  %v2727_v61 = vsel %vm2677_vm1, %v100_v19, %v16125_v27 }
 0x380   :  { %v16208_v41 = vpop.permute.xlu1 %1559  ;;  %v16258_v45 = vmax.f32 %v6317_v58, %v6318_v11  ;;  %v16269_v12 = vmax.f32 %v6326_v47, %v6327_v34  ;;  %v16271_v0 = vmax.f32 %v6333_v44, %v6334_v25  ;;  %v16273_v63 = vmax.f32 %v6340_v49, %v6341_v36 }
 0x381   :  { %v16214_v16 = vpop.permute.xlu0 %793  ;;  %v6312_v21 = vmax.f32 %v6310_v8, %v6311_v35  ;;  %v6306_v28 = vrot.slane %v6305_v13, 1  ;;  %v6348_v56 = vrot.slane %v16245_v54, 1  ;;  %v16284_v58 = vsel %vm2807_vm3, %v2791_v9, %v16147_v38 }
 0x382   :  { %2337 = vrot.lane.b32.xlu1 %v16202_v14, %s12663_s21  ;;  %v6320_v35 = vrot.slane %v16258_v45, 1  ;;  %v16294_v51 = vsel %vm2742_vm2, %v2727_v61, %v16149_v18 }
 0x383   :  { %2083 = vrot.lane.b32.xlu0 %v11568_v57, %s12662_s18  ;;  %v6313_v8 = vrot.slane %v6312_v21, 1  ;;  %v6307_v49 = vmax.f32 %v6305_v13, %v6306_v28 }
 0x384   :  { %v2580_v40 = vpop.permute.xlu1 %2579 }
 0x385   :  { %v3180_v62 = vsel %vm3132_vm8, %v3115_v17, %v2580_v40  ;;  %v16227_v55 = vpop.permute.xlu0 %1813  ;;  %v6314_v10 = vmax.f32 %v6312_v21, %v6313_v8 }
 0x386   :  { %v12077_v39 = vpop.f32.mrf.mxu0  ;;  %1573 = vrot.lane.b32.xlu1 %v16202_v14, %s12660_s20  ;;  %12094 = vmatmul.mubr.msk.f32.gmra.mxu0 %vm3201_vm9, %v3180_v62 }
 0x387   :  { %v3825_v59 = vmul.f32 %v16105_v23, %v12077_v39  ;;  %1319 = vrot.lane.b32.xlu0 %v11568_v57, %s12659_s17  ;;  %v6300_v57 = vmax.f32 %v6298_v48, %v6299_v24 }
 0x388   :  { %v3634_v7 = vpop.f32.mrf.mxu0  ;;  %v16248_v42 = vpop.permute.xlu1 %1049 }
 0x389   :  { %v3896_v29 = vadd.f32 %v16122_v33, %v3825_v59  ;;  %v3824_v32 = vmul.f32 %v16105_v23, %v3634_v7  ;;  %v16260_v43 = vpop.permute.xlu0 %795 }
 0x38a   :  { %2593 = vrot.lane.b32.xlu1 %v16243_v60, %s12664_s16 }
 0x38b   :  { %v3960_v46 = vmax.f32 %v3896_v29, 0.0  ;;  %v3895_v22 = vadd.f32 %v16122_v33, %v3824_v32  ;;  %2339 = vrot.lane.b32.xlu0 %v16254_v5, %s12663_s21 }
 0x38c   :  { %v16279_v20 = vpop.permute.xlu1 %2069 }
 0x38d   :  { %v4648_v26 = vcombine.high %v3960_v46, %v3960_v46  ;;  %v4655_v27 = vrot.slane %v3960_v46, %v13627_v50  ;;  %v3959_v30 = vmax.f32 %v3895_v22, 0.0  ;;  %v16286_v3 = vpop.permute.xlu0 %1815 }
 0x38e   :  { %1575 = vrot.lane.b32.xlu1 %v16254_v5, %s12660_s20 }
 0x38f   :  { %v4662_v47 = vrot.slane %v4648_v26, %v13627_v50  ;;  %v4663_v37 = vcombine.high %v4655_v27, %v4655_v27  ;;  %v6378_v53 = vsel %vm5397_vm10, %v4655_v27, -inf  ;;  %v4631_v44 = vcombine.high %v3959_v30, %v3959_v30  ;;  %809 = vrot.lane.b32.xlu0 %v16202_v14, %s12658_s23 }
 0x390   :  { %v6379_v2 = vrot.slane %v6378_v53, 4  ;;  %v4638_v38 = vrot.slane %v3959_v30, %v13627_v50  ;;  %v16307_v18 = vpop.permute.xlu1 %1305 }
 0x391   :  { %v4664_v17 = vcombine.high %v4662_v47, %v4662_v47  ;;  %v6385_v40 = vsel %vm5397_vm10, %v4663_v37, -inf  ;;  %v6392_v48 = vsel %vm5397_vm10, %v4662_v47, -inf  ;;  %v4645_v21 = vrot.slane %v4631_v44, %v13627_v50  ;;  %v16309_v59 = vpop.permute.xlu0 %1051 }
 0x392   :  { %v6380_v11 = vmax.f32 %v6378_v53, %v6379_v2  ;;  %v6386_v62 = vrot.slane %v6385_v40, 4  ;;  %v6393_v39 = vrot.slane %v6392_v48, 4  ;;  %v4646_v31 = vcombine.high %v4638_v38, %v4638_v38  ;;  %2595 = vrot.lane.b32.xlu1 %v16302_v52, %s12664_s16 }
 0x393   :  { %v6399_v14 = vsel %vm5397_vm10, %v4664_v17, -inf  ;;  %v4647_v34 = vcombine.high %v4645_v21, %v4645_v21  ;;  %v6350_v25 = vsel %vm5397_vm10, %v4638_v38, -inf  ;;  %v6364_v36 = vsel %vm5397_vm10, %v4645_v21, -inf  ;;  %1829 = vrot.lane.b32.xlu0 %v16243_v60, %s12661_s27  ;;  %v11569_v17 = vld [vmem:[%s19070_s0 + $0x300] sm:$0xff] }
 0x394   :  { %v6381_v19 = vrot.slane %v6380_v11, 2  ;;  %v6387_v13 = vmax.f32 %v6385_v40, %v6386_v62  ;;  %v6394_v7 = vmax.f32 %v6392_v48, %v6393_v39  ;;  %v6400_v29 = vrot.slane %v6399_v14, 4  ;;  %v16320_v9 = vpop.permute.xlu1 %2325 }
 0x395   :  { %v6351_v32 = vrot.slane %v6350_v25, 4  ;;  %v6357_v6 = vsel %vm5397_vm10, %v4646_v31, -inf  ;;  %v6365_v24 = vrot.slane %v6364_v36, 4  ;;  %v6371_v8 = vsel %vm5397_vm10, %v4647_v34, -inf  ;;  %v16322_v26 = vpop.permute.xlu0 %2071 }
 0x396   :  { %v6382_v61 = vmax.f32 %v6380_v11, %v6381_v19  ;;  %v6388_v46 = vrot.slane %v6387_v13, 2  ;;  %v6395_v22 = vrot.slane %v6394_v7, 2  ;;  %v6401_v28 = vmax.f32 %v6399_v14, %v6400_v29  ;;  %1065 = vrot.lane.b32.xlu1 %v16243_v60, %s12657_s22 }
 0x397   :  { %v6352_v27 = vmax.f32 %v6350_v25, %v6351_v32  ;;  %v6358_v30 = vrot.slane %v6357_v6, 4  ;;  %v6366_v47 = vmax.f32 %v6364_v36, %v6365_v24  ;;  %v6372_v37 = vrot.slane %v6371_v8, 4  ;;  %811 = vrot.lane.b32.xlu0 %v16254_v5, %s12658_s23 }
 0x398   :  { %v6321_v53 = vmax.f32 %v16258_v45, %v6320_v35  ;;  %v6389_v44 = vmax.f32 %v6387_v13, %v6388_v46  ;;  %v6396_v2 = vmax.f32 %v6394_v7, %v6395_v22  ;;  %v6402_v38 = vrot.slane %v6401_v28, 2  ;;  %v16332_v62 = vpop.permute.xlu1 %1561 }
 0x399   :  { %v6353_v40 = vrot.slane %v6352_v27, 2  ;;  %v6359_v48 = vmax.f32 %v6357_v6, %v6358_v30  ;;  %v6367_v21 = vrot.slane %v6366_v47, 2  ;;  %v6373_v11 = vmax.f32 %v6371_v8, %v6372_v37  ;;  %v16340_v31 = vpop.permute.xlu0 %1307 }
 0x39a   :  { %v16335_v60 = vsel %vm7190_vm11, %v6300_v57, -inf  ;;  %v16338_v45 = vsel %vm7190_vm11, %v6314_v10, -inf  ;;  %v6383_v35 = vrot.slane %v6382_v61, 1  ;;  %v6403_v39 = vmax.f32 %v6401_v28, %v6402_v38  ;;  %2085 = vrot.lane.b32.xlu1 %v11569_v17, %s12662_s18 }
 0x39b   :  { %v6354_v5 = vmax.f32 %v6352_v27, %v6353_v40  ;;  %v6360_v14 = vrot.slane %v6359_v48, 2  ;;  %v6368_v34 = vmax.f32 %v6366_v47, %v6367_v21  ;;  %v6374_v25 = vrot.slane %v6373_v11, 2  ;;  %1831 = vrot.lane.b32.xlu0 %v16302_v52, %s12661_s27 }
 0x39c   :  { %v7386_v36 = vsel %vm7190_vm11, %v6307_v49, -inf  ;;  %v2921_v57 = vsel %vm19157_vm4, %v16284_v58, %v16170_v1  ;;  %v2857_v10 = vsel %vm2807_vm3, %v16294_v51, %v16176_v4  ;;  %v6390_v19 = vrot.slane %v6389_v44, 1  ;;  %v2582_v6 = vpop.permute.xlu1 %2581  ;;  %vm19159_vm4 = vmmov %vm19156_vm0 }
 0x39d   :  { %v6397_v13 = vrot.slane %v6396_v2, 1  ;;  %v6355_v7 = vrot.slane %v6354_v5, 1  ;;  %v6361_v29 = vmax.f32 %v6359_v48, %v6360_v14  ;;  %v6369_v32 = vrot.slane %v6368_v34, 1  ;;  %v2328_v22 = vpop.permute.xlu0 %2327 }
 0x39e   :  { %v7392_v24 = vsel %vm7190_vm11, %v6321_v53, -inf  ;;  %v6384_v49 = vmax.f32 %v6382_v61, %v6383_v35  ;;  %v6404_v8 = vrot.slane %v6403_v39, 1  ;;  %v6375_v46 = vmax.f32 %v6373_v11, %v6374_v25  ;;  %1321 = vrot.lane.b32.xlu1 %v11569_v17, %s12659_s17 }
 0x39f   :  { %v2922_v1 = vsel %vm19158_vm5, %v2857_v10, %v16208_v41  ;;  %v2986_v4 = vsel %vm19156_vm0, %v2921_v57, %v16227_v55  ;;  %v6356_v58 = vmax.f32 %v6354_v5, %v6355_v7  ;;  %v6362_v51 = vrot.slane %v6361_v29, 1  ;;  %1067 = vrot.lane.b32.xlu0 %v16302_v52, %s12657_s22  ;;  %v16367_v41 = vld [vmem:[%s19070_s0 + $0x301] sm:$0xff] }
 0x3a0   :  { %v6370_v28 = vmax.f32 %v6368_v34, %v6369_v32  ;;  %v6376_v27 = vrot.slane %v6375_v46, 1  ;;  %v3051_v30 = vsel %vm3002_vm6, %v2986_v4, %v16279_v20  ;;  %v2987_v61 = vsel %vm19159_vm4, %v2922_v1, %v16286_v3  ;;  %v16370_v38 = vpop.permute.xlu1 %1563  ;;  %v11570_v20 = vld [vmem:[%s19070_s0 + $0x308] sm:$0xff] }
 0x3a1   :  { %v6391_v55 = vmax.f32 %v6389_v44, %v6390_v19  ;;  %v6398_v47 = vmax.f32 %v6396_v2, %v6397_v13  ;;  %v6363_v37 = vmax.f32 %v6361_v29, %v6362_v51  ;;  %v7384_v53 = vsel %vm7190_vm11, %v6356_v58, -inf  ;;  %v16377_v48 = vpop.permute.xlu0 %797 }
 0x3a2   :  { %v6405_v3 = vmax.f32 %v6403_v39, %v6404_v8  ;;  %v7396_v17 = vsel %vm7190_vm11, %v6384_v49, -inf  ;;  %v6377_v52 = vmax.f32 %v6375_v46, %v6376_v27  ;;  %v7390_v40 = vsel %vm7190_vm11, %v6370_v28, -inf  ;;  %2341 = vrot.lane.b32.xlu1 %v16367_v41, %s12663_s21 }
 0x3a3   :  { %v7385_v44 = vmax.f32 %v16335_v60, %v7384_v53  ;;  %v7387_v2 = vsel %vm7190_vm11, %v6363_v37, -inf  ;;  %v7391_v21 = vmax.f32 %v16338_v45, %v7390_v40  ;;  %v3116_v11 = vsel %vm3067_vm7, %v3051_v30, %v16320_v9  ;;  %2087 = vrot.lane.b32.xlu0 %v11570_v20, %s12662_s18 }
 0x3a4   :  { %v7388_v35 = vmax.f32 %v7386_v36, %v7387_v2  ;;  %v7393_v39 = vsel %vm7190_vm11, %v6377_v52, -inf  ;;  %v3052_v5 = vsel %vm3002_vm6, %v2987_v61, %v16322_v26  ;;  %v3181_v14 = vsel %vm3132_vm8, %v3116_v11, %v2582_v6  ;;  %v2584_v25 = vpop.permute.xlu1 %2583 }
 0x3a5   :  { %v6349_v60 = vmax.f32 %v16245_v54, %v6348_v56  ;;  %v7399_v45 = vsel %vm7190_vm11, %v6391_v55, -inf  ;;  %v7394_v9 = vmax.f32 %v7392_v24, %v7393_v39  ;;  %v3117_v34 = vsel %vm3067_vm7, %v3052_v5, %v2328_v22  ;;  %12096 = vmatprep.mubr.msk.f32.mxu0 %vm3201_vm9, %v3181_v14  ;;  %v16402_v19 = vpop.permute.xlu0 %1817  ;;  %v11697_v24 = vld [vmem:[%s19070_s0 + $0x302] sm:$0xff] }
 0x3a6   :  { %v7395_v36 = vsel %vm7190_vm11, %v16269_v12, -inf  ;;  %v7402_v26 = vsel %vm7190_vm11, %v6398_v47, -inf  ;;  %v7806_v57 = vsel %vm7743_vm12, %v7388_v35, %v7385_v44  ;;  %v3182_v10 = vsel %vm3132_vm8, %v3117_v34, %v2584_v25  ;;  %1577 = vrot.lane.b32.xlu1 %v16367_v41, %s12660_s20  ;;  %v11698_v44 = vld [vmem:[%s19070_s0 + $0x30a] sm:$0xff] }
 0x3a7   :  { %v7398_v54 = vsel %vm7190_vm11, %v16271_v0, -inf  ;;  %v7397_v56 = vmax.f32 %v7395_v36, %v7396_v17  ;;  %v7405_v13 = vsel %vm7190_vm11, %v6405_v3, -inf  ;;  %v7807_v7 = vsel %vm7745_vm13, %v7391_v21, %v7806_v57  ;;  %v12080_v12 = vpop.f32.mrf.mxu0  ;;  %12097 = vmatmul.mubr.msk.f32.gmra.mxu0 %vm3201_vm9, %v3182_v10  ;;  %1323 = vrot.lane.b32.xlu0 %v11570_v20, %s12659_s17  ;;  %v101_v36 = vld [vmem:[%s19070_s0 + $0x288] sm:$0xff] }
 0x3a8   :  { %v7401_v29 = vsel %vm7190_vm11, %v16273_v63, -inf  ;;  %v7400_v32 = vmax.f32 %v7398_v54, %v7399_v45  ;;  %v7808_v6 = vsel %vm7747_vm14, %v7394_v9, %v7807_v7  ;;  %v3827_v0 = vmul.f32 %v16105_v23, %v12080_v12  ;;  %v16421_v22 = vpop.permute.xlu1 %1053  ;;  %v11634_v63 = vld [vmem:[%s19070_s0 + $0x309] sm:$0xff] }
 0x3a9   :  { %v7404_v49 = vsel %vm7190_vm11, %v6349_v60, -inf  ;;  %v7403_v8 = vmax.f32 %v7401_v29, %v7402_v26  ;;  %v7809_v46 = vsel %vm7749_vm15, %v7397_v56, %v7808_v6  ;;  %v3644_v1 = vpop.f32.mrf.mxu0  ;;  %vm19160_vm5 = vcmask 1045509   ;;  %v16428_v28 = vpop.permute.xlu0 %799  ;;  %v11571_v56 = vld [vmem:[%s19070_s0 + $0x318] sm:$0xff] }
 0x3aa   :  { %v7406_v4 = vmax.f32 %v7404_v49, %v7405_v13  ;;  %v7810_v58 = vsel %vm19160_vm5, %v7400_v32, %v7809_v46  ;;  %v3898_v51 = vadd.f32 %v16122_v33, %v3827_v0  ;;  %v3826_v27 = vmul.f32 %v16105_v23, %v3644_v1  ;;  %2597 = vrot.lane.b32.xlu1 %v11697_v24, %s12664_s16  ;;  %v102_v13 = vld [vmem:[%s19070_s0 + $0x290] sm:$0xff] }
 0x3ab   :  { %vm19161_vm0 = vcmask 1046534   ;;  %vm19162_vm4 = vcmask 1047559   ;;  %2343 = vrot.lane.b32.xlu0 %v11634_v63, %s12663_s21  ;;  %v2729_v1 = vsel %vm2677_vm1, %v102_v13, %v16260_v43  ;;  %vm19163_vm5 = vcmask 97280  }
 0x3ac   :  { %v7811_v30 = vsel %vm19161_vm0, %v7403_v8, %v7810_v58  ;;  %v3962_v55 = vmax.f32 %v3898_v51, 0.0  ;;  %v3897_v47 = vadd.f32 %v16122_v33, %v3826_v27  ;;  %v16437_v37 = vpop.permute.xlu1 %2073  ;;  %vm19164_vm0 = vmmov %vm19163_vm5 }
 0x3ad   :  { %v7812_v61 = vsel %vm19162_vm4, %v7406_v4, %v7811_v30  ;;  %v16440_v17 = vpop.permute.xlu0 %1819  ;;  %vm19165_vm4 = vcmask 121856  }
 0x3ae   :  { %7887 = vst.msk [vmem:[#allocation2 + $0xb1] sm:$0xff] %vm7190_vm11, %v7812_v61  ;;  %v4682_v53 = vcombine.high %v3962_v55, %v3962_v55  ;;  %v4689_v20 = vrot.slane %v3962_v55, %v13627_v50  ;;  %v3961_v3 = vmax.f32 %v3897_v47, 0.0  ;;  %1579 = vrot.lane.b32.xlu1 %v11634_v63, %s12660_s20  ;;  %v2794_v61 = vsel %vm2742_vm2, %v2729_v1, %v16309_v59 }
 0x3af   :  { %813 = vrot.lane.b32.xlu0 %v16367_v41, %s12658_s23  ;;  %v2859_v47 = vsel %vm2807_vm3, %v2794_v61, %v16340_v31 }
 0x3b0   :  { %v4696_v52 = vrot.slane %v4682_v53, %v13627_v50  ;;  %v4665_v40 = vcombine.high %v3961_v3, %v3961_v3  ;;  %v16449_v2 = vpop.permute.xlu1 %1309  ;;  %v4697_v21 = vcombine.high %v4689_v20, %v4689_v20  ;;  %v4672_v11 = vrot.slane %v3961_v3, %v13627_v50 }
 0x3b1   :  { %v16452_v35 = vpop.permute.xlu0 %1055  ;;  %v6434_v41 = vsel %vm5397_vm10, %v4689_v20, -inf }
 0x3b2   :  { %v4698_v39 = vcombine.high %v4696_v52, %v4696_v52  ;;  %2599 = vrot.lane.b32.xlu1 %v11698_v44, %s12664_s16  ;;  %v4679_v5 = vrot.slane %v4665_v40, %v13627_v50  ;;  %v6441_v60 = vsel %vm5397_vm10, %v4697_v21, -inf  ;;  %v6448_v45 = vsel %vm5397_vm10, %v4696_v52, -inf }
 0x3b3   :  { %1833 = vrot.lane.b32.xlu0 %v11697_v24, %s12661_s27  ;;  %v4680_v9 = vcombine.high %v4672_v11, %v4672_v11  ;;  %v6435_v26 = vrot.slane %v6434_v41, 4  ;;  %v6406_v10 = vsel %vm5397_vm10, %v4672_v11, -inf  ;;  %v6442_v7 = vrot.slane %v6441_v60, 4 }
 0x3b4   :  { %v2330_v14 = vpop.permute.xlu1 %2329  ;;  %v6455_v25 = vsel %vm5397_vm10, %v4698_v39, -inf  ;;  %v4681_v57 = vcombine.high %v4679_v5, %v4679_v5  ;;  %v6420_v54 = vsel %vm5397_vm10, %v4679_v5, -inf  ;;  %v6449_v12 = vrot.slane %v6448_v45, 4 }
 0x3b5   :  { %v2076_v34 = vpop.permute.xlu0 %2075  ;;  %v6456_v32 = vrot.slane %v6455_v25, 4  ;;  %v6413_v6 = vsel %vm5397_vm10, %v4680_v9, -inf  ;;  %v6407_v49 = vrot.slane %v6406_v10, 4  ;;  %v6421_v8 = vrot.slane %v6420_v54, 4 }
 0x3b6   :  { %1069 = vrot.lane.b32.xlu1 %v11697_v24, %s12657_s22  ;;  %v2728_v24 = vsel %vm2677_vm1, %v101_v36, %v16214_v16  ;;  %v6427_v4 = vsel %vm5397_vm10, %v4681_v57, -inf  ;;  %v6443_v51 = vmax.f32 %v6441_v60, %v6442_v7  ;;  %v6450_v16 = vmax.f32 %v6448_v45, %v6449_v12 }
 0x3b7   :  { %815 = vrot.lane.b32.xlu0 %v11634_v63, %s12658_s23  ;;  %v2793_v46 = vsel %vm2742_vm2, %v2728_v24, %v16248_v42  ;;  %v6436_v63 = vmax.f32 %v6434_v41, %v6435_v26  ;;  %v6414_v27 = vrot.slane %v6413_v6, 4  ;;  %v6457_v55 = vmax.f32 %v6455_v25, %v6456_v32 }
 0x3b8   :  { %v16474_v29 = vpop.permute.xlu1 %1565  ;;  %v2858_v58 = vsel %vm2807_vm3, %v2793_v46, %v16307_v18  ;;  %v6408_v53 = vmax.f32 %v6406_v10, %v6407_v49  ;;  %v6422_v20 = vmax.f32 %v6420_v54, %v6421_v8  ;;  %v6428_v3 = vrot.slane %v6427_v4, 4  ;;  %v16540_v49 = vld [vmem:[%s19070_s0 + $0x31a] sm:$0xff] }
 0x3b9   :  { %v16477_v0 = vpop.permute.xlu0 %1311  ;;  %v2923_v42 = vsel %vm19163_vm5, %v2858_v58, %v16332_v62  ;;  %v2924_v18 = vsel %vm19164_vm0, %v2859_v47, %v16370_v38  ;;  %v6437_v59 = vrot.slane %v6436_v63, 2  ;;  %v16505_v62 = vld [vmem:[%s19070_s0 + $0x319] sm:$0xff]  ;;  %v6444_v31 = vrot.slane %v6443_v51, 2  ;;  %vm19166_vm5 = vmmov %vm19165_vm4 }
 0x3ba   :  { %2089 = vrot.lane.b32.xlu1 %v11571_v56, %s12662_s18  ;;  %v2988_v52 = vsel %vm19165_vm4, %v2923_v42, %v16402_v19  ;;  %v6451_v40 = vrot.slane %v6450_v16, 2  ;;  %v6415_v21 = vmax.f32 %v6413_v6, %v6414_v27  ;;  %v11572_v38 = vld [vmem:[%s19070_s0 + $0x320] sm:$0xff]  ;;  %v6458_v19 = vrot.slane %v6457_v55, 2  ;;  %vm19167_vm4 = vmmov %vm19164_vm0 }
 0x3bb   :  { %1835 = vrot.lane.b32.xlu0 %v11698_v44, %s12661_s27  ;;  %v3053_v11 = vsel %vm3002_vm6, %v2988_v52, %v16437_v37  ;;  %v6409_v60 = vrot.slane %v6408_v53, 2  ;;  %v6423_v45 = vrot.slane %v6422_v20, 2  ;;  %v6429_v9 = vmax.f32 %v6427_v4, %v6428_v3  ;;  %v103_v6 = vld [vmem:[%s19070_s0 + $0x2a0] sm:$0xff] }
 0x3bc   :  { %v2586_v30 = vpop.permute.xlu1 %2585  ;;  %v3118_v5 = vsel %vm3067_vm7, %v3053_v11, %v2330_v14  ;;  %v6438_v37 = vmax.f32 %v6436_v63, %v6437_v59  ;;  %v6452_v26 = vmax.f32 %v6450_v16, %v6451_v40  ;;  %v6416_v14 = vrot.slane %v6415_v21, 2  ;;  %v104_v63 = vld [vmem:[%s19070_s0 + $0x2a8] sm:$0xff] }
 0x3bd   :  { %v2332_v43 = vpop.permute.xlu0 %2331  ;;  %v3183_v25 = vsel %vm3132_vm8, %v3118_v5, %v2586_v30  ;;  %v6459_v54 = vmax.f32 %v6457_v55, %v6458_v19  ;;  %v6410_v7 = vmax.f32 %v6408_v53, %v6409_v60  ;;  %v6424_v12 = vmax.f32 %v6422_v20, %v6423_v45  ;;  %v16550_v16 = vld [vmem:[%s19070_s0 + $0x321] sm:$0xff] }
 0x3be   :  { %1325 = vrot.lane.b32.xlu1 %v11571_v56, %s12659_s17  ;;  %12099 = vmatprep.mubr.msk.f32.mxu0 %vm3201_vm9, %v3183_v25  ;;  %v6430_v32 = vrot.slane %v6429_v9, 2  ;;  %v6439_v8 = vrot.slane %v6438_v37, 1  ;;  %v6453_v1 = vrot.slane %v6452_v26, 1  ;;  %v6417_v4 = vmax.f32 %v6415_v21, %v6416_v14 }
 0x3bf   :  { %1071 = vrot.lane.b32.xlu0 %v11698_v44, %s12657_s22  ;;  %v2989_v44 = vsel %vm19166_vm5, %v2924_v18, %v16440_v17  ;;  %v6445_v17 = vmax.f32 %v6443_v51, %v6444_v31  ;;  %v6460_v27 = vrot.slane %v6459_v54, 1  ;;  %v2730_v55 = vsel %vm2677_vm1, %v103_v6, %v16377_v48 }
 0x3c0   :  { %v16509_v39 = vpop.permute.xlu1 %1567  ;;  %v3054_v36 = vsel %vm3002_vm6, %v2989_v44, %v2076_v34  ;;  %v6425_v47 = vrot.slane %v6424_v12, 1  ;;  %v16558_v53 = vmax.f32 %v6429_v9, %v6430_v32  ;;  %v2795_v20 = vsel %vm2742_vm2, %v2730_v55, %v16421_v22 }
 0x3c1   :  { %v16517_v41 = vpop.permute.xlu0 %801  ;;  %v3119_v57 = vsel %vm3067_vm7, %v3054_v36, %v2332_v43  ;;  %v6446_v46 = vrot.slane %v6445_v17, 1  ;;  %v6411_v43 = vrot.slane %v6410_v7, 1  ;;  %v2731_v3 = vsel %vm2677_vm1, %v104_v63, %v16428_v28 }
 0x3c2   :  { %2345 = vrot.lane.b32.xlu1 %v16505_v62, %s12663_s21  ;;  %v16573_v59 = vmax.f32 %v6452_v26, %v6453_v1  ;;  %v6418_v31 = vrot.slane %v6417_v4, 1  ;;  %v16577_v21 = vmax.f32 %v6459_v54, %v6460_v27  ;;  %v6426_v19 = vmax.f32 %v6424_v12, %v6425_v47 }
 0x3c3   :  { %2091 = vrot.lane.b32.xlu0 %v11572_v38, %s12662_s18  ;;  %v16571_v48 = vmax.f32 %v6445_v17, %v6446_v46  ;;  %v6432_v44 = vrot.slane %v16558_v53, 1  ;;  %v16585_v5 = vsel %vm2807_vm3, %v2795_v20, %v16449_v2  ;;  %v16600_v2 = vsel %vm2742_vm2, %v2731_v3, %v16452_v35 }
 0x3c4   :  { %v2588_v10 = vpop.permute.xlu1 %2587  ;;  %v6419_v36 = vmax.f32 %v6417_v4, %v6418_v31 }
 0x3c5   :  { %v3184_v56 = vsel %vm3132_vm8, %v3119_v57, %v2588_v10  ;;  %v16527_v13 = vpop.permute.xlu0 %1821 }
 0x3c6   :  { %1581 = vrot.lane.b32.xlu1 %v16505_v62, %s12660_s20  ;;  %v12083_v34 = vpop.f32.mrf.mxu0  ;;  %12100 = vmatmul.mubr.msk.f32.gmra.mxu0 %vm3201_vm9, %v3184_v56 }
 0x3c7   :  { %1327 = vrot.lane.b32.xlu0 %v11572_v38, %s12659_s17  ;;  %v3829_v24 = vmul.f32 %v16105_v23, %v12083_v34 }
 0x3c8   :  { %v16545_v58 = vpop.permute.xlu1 %1057  ;;  %v3654_v51 = vpop.f32.mrf.mxu0 }
 0x3c9   :  { %v3900_v30 = vadd.f32 %v16122_v33, %v3829_v24  ;;  %v16553_v61 = vpop.permute.xlu0 %803  ;;  %v3828_v42 = vmul.f32 %v16105_v23, %v3654_v51  ;;  %v16569_v23 = vmax.f32 %v6438_v37, %v6439_v8  ;;  %v16596_v37 = vld [vmem:[%s19070_s0 + $0x322] sm:$0xff] }
 0x3ca   :  { %2601 = vrot.lane.b32.xlu1 %v16540_v49, %s12664_s16 }
 0x3cb   :  { %v3964_v18 = vmax.f32 %v3900_v30, 0.0  ;;  %v3899_v52 = vadd.f32 %v16122_v33, %v3828_v42  ;;  %2347 = vrot.lane.b32.xlu0 %v16550_v16, %s12663_s21  ;;  %v6412_v33 = vmax.f32 %v6410_v7, %v6411_v43 }
 0x3cc   :  { %v16575_v40 = vpop.permute.xlu1 %2077 }
 0x3cd   :  { %v4716_v22 = vcombine.high %v3964_v18, %v3964_v18  ;;  %v4723_v28 = vrot.slane %v3964_v18, %v13627_v50  ;;  %v3963_v11 = vmax.f32 %v3899_v52, 0.0  ;;  %v16580_v38 = vpop.permute.xlu0 %1823 }
 0x3ce   :  { %1583 = vrot.lane.b32.xlu1 %v16550_v16, %s12660_s20 }
 0x3cf   :  { %v4730_v60 = vrot.slane %v4716_v22, %v13627_v50  ;;  %v4731_v45 = vcombine.high %v4723_v28, %v4723_v28  ;;  %v6490_v9 = vsel %vm5397_vm10, %v4723_v28, -inf  ;;  %v4699_v25 = vcombine.high %v3963_v11, %v3963_v11  ;;  %817 = vrot.lane.b32.xlu0 %v16505_v62, %s12658_s23 }
 0x3d0   :  { %v6491_v17 = vrot.slane %v6490_v9, 4  ;;  %v4706_v26 = vrot.slane %v3963_v11, %v13627_v50  ;;  %v16603_v14 = vpop.permute.xlu1 %1313  ;;  %v11573_v11 = vld [vmem:[%s19070_s0 + $0x330] sm:$0xff] }
 0x3d1   :  { %v4732_v57 = vcombine.high %v4730_v60, %v4730_v60  ;;  %v6497_v10 = vsel %vm5397_vm10, %v4731_v45, -inf  ;;  %v6504_v62 = vsel %vm5397_vm10, %v4730_v60, -inf  ;;  %v4713_v54 = vrot.slane %v4699_v25, %v13627_v50  ;;  %v16608_v56 = vpop.permute.xlu0 %1059 }
 0x3d2   :  { %v6492_v7 = vmax.f32 %v6490_v9, %v6491_v17  ;;  %v6498_v12 = vrot.slane %v6497_v10, 4  ;;  %v6505_v32 = vrot.slane %v6504_v62, 4  ;;  %v4714_v34 = vcombine.high %v4706_v26, %v4706_v26  ;;  %2603 = vrot.lane.b32.xlu1 %v16596_v37, %s12664_s16 }
 0x3d3   :  { %v6511_v35 = vsel %vm5397_vm10, %v4732_v57, -inf  ;;  %v4715_v6 = vcombine.high %v4713_v54, %v4713_v54  ;;  %v6462_v24 = vsel %vm5397_vm10, %v4706_v26, -inf  ;;  %v6476_v8 = vsel %vm5397_vm10, %v4713_v54, -inf  ;;  %1837 = vrot.lane.b32.xlu0 %v16540_v49, %s12661_s27 }
 0x3d4   :  { %v6493_v46 = vrot.slane %v6492_v7, 2  ;;  %v6499_v1 = vmax.f32 %v6497_v10, %v6498_v12  ;;  %v6506_v63 = vmax.f32 %v6504_v62, %v6505_v32  ;;  %v6512_v4 = vrot.slane %v6511_v35, 4  ;;  %v16617_v51 = vpop.permute.xlu1 %2333 }
 0x3d5   :  { %v6463_v27 = vrot.slane %v6462_v24, 4  ;;  %v6469_v30 = vsel %vm5397_vm10, %v4714_v34, -inf  ;;  %v6477_v42 = vrot.slane %v6476_v8, 4  ;;  %v6483_v55 = vsel %vm5397_vm10, %v4715_v6, -inf  ;;  %v16621_v43 = vpop.permute.xlu0 %2079 }
 0x3d6   :  { %v6494_v47 = vmax.f32 %v6492_v7, %v6493_v46  ;;  %v6500_v20 = vrot.slane %v6499_v1, 2  ;;  %v6507_v3 = vrot.slane %v6506_v63, 2  ;;  %v6513_v18 = vmax.f32 %v6511_v35, %v6512_v4  ;;  %1073 = vrot.lane.b32.xlu1 %v16540_v49, %s12657_s22 }
 0x3d7   :  { %v6464_v52 = vmax.f32 %v6462_v24, %v6463_v27  ;;  %v6470_v31 = vrot.slane %v6469_v30, 4  ;;  %v6478_v22 = vmax.f32 %v6476_v8, %v6477_v42  ;;  %v6484_v28 = vrot.slane %v6483_v55, 4  ;;  %819 = vrot.lane.b32.xlu0 %v16550_v16, %s12658_s23 }
 0x3d8   :  { %v6433_v60 = vmax.f32 %v16558_v53, %v6432_v44  ;;  %v6501_v45 = vmax.f32 %v6499_v1, %v6500_v20  ;;  %v6508_v9 = vmax.f32 %v6506_v63, %v6507_v3  ;;  %v6514_v25 = vrot.slane %v6513_v18, 2  ;;  %v16631_v17 = vpop.permute.xlu1 %1569 }
 0x3d9   :  { %v6465_v26 = vrot.slane %v6464_v52, 2  ;;  %v6471_v49 = vmax.f32 %v6469_v30, %v6470_v31  ;;  %v6479_v57 = vrot.slane %v6478_v22, 2  ;;  %v6485_v10 = vmax.f32 %v6483_v55, %v6484_v28  ;;  %v16633_v62 = vpop.permute.xlu0 %1315  ;;  %v11637_v55 = vld [vmem:[%s19070_s0 + $0x331] sm:$0xff] }
 0x3da   :  { %v16636_v54 = vsel %vm7190_vm11, %v6412_v33, -inf  ;;  %v16639_v16 = vsel %vm7190_vm11, %v6426_v19, -inf  ;;  %v6495_v7 = vrot.slane %v6494_v47, 1  ;;  %v6515_v12 = vmax.f32 %v6513_v18, %v6514_v25  ;;  %2093 = vrot.lane.b32.xlu1 %v11573_v11, %s12662_s18 }
 0x3db   :  { %v6466_v53 = vmax.f32 %v6464_v52, %v6465_v26  ;;  %v6472_v44 = vrot.slane %v6471_v49, 2  ;;  %v6480_v32 = vmax.f32 %v6478_v22, %v6479_v57  ;;  %v6486_v34 = vrot.slane %v6485_v10, 2  ;;  %1839 = vrot.lane.b32.xlu0 %v16596_v37, %s12661_s27 }
 0x3dc   :  { %v7410_v35 = vsel %vm7190_vm11, %v6419_v36, -inf  ;;  %v2925_v33 = vsel %vm19164_vm0, %v16585_v5, %v16474_v29  ;;  %v2861_v19 = vsel %vm2807_vm3, %v16600_v2, %v16477_v0  ;;  %v6502_v6 = vrot.slane %v6501_v45, 1  ;;  %v2590_v24 = vpop.permute.xlu1 %2589  ;;  %vm19168_vm0 = vmmov %vm19166_vm5 }
 0x3dd   :  { %v6509_v8 = vrot.slane %v6508_v9, 1  ;;  %v6467_v46 = vrot.slane %v6466_v53, 1  ;;  %v6473_v1 = vmax.f32 %v6471_v49, %v6472_v44  ;;  %v6481_v63 = vrot.slane %v6480_v32, 1  ;;  %v2336_v4 = vpop.permute.xlu0 %2335 }
 0x3de   :  { %v7416_v27 = vsel %vm7190_vm11, %v6433_v60, -inf  ;;  %v6496_v30 = vmax.f32 %v6494_v47, %v6495_v7  ;;  %v6516_v42 = vrot.slane %v6515_v12, 1  ;;  %v6487_v36 = vmax.f32 %v6485_v10, %v6486_v34  ;;  %1329 = vrot.lane.b32.xlu1 %v11573_v11, %s12659_s17 }
 0x3df   :  { %v2926_v29 = vsel %vm19167_vm4, %v2861_v19, %v16509_v39  ;;  %v2990_v0 = vsel %vm19166_vm5, %v2925_v33, %v16527_v13  ;;  %v6468_v5 = vmax.f32 %v6466_v53, %v6467_v46  ;;  %v6474_v2 = vrot.slane %v6473_v1, 1  ;;  %1075 = vrot.lane.b32.xlu0 %v16596_v37, %s12657_s22  ;;  %v11574_v13 = vld [vmem:[%s19070_s0 + $0x338] sm:$0xff] }
 0x3e0   :  { %v6482_v47 = vmax.f32 %v6480_v32, %v6481_v63  ;;  %v6488_v20 = vrot.slane %v6487_v36, 1  ;;  %v3055_v3 = vsel %vm3002_vm6, %v2990_v0, %v16575_v40  ;;  %v2991_v39 = vsel %vm19168_vm0, %v2926_v29, %v16580_v38  ;;  %v16666_v18 = vpop.permute.xlu1 %1571 }
 0x3e1   :  { %v6503_v52 = vmax.f32 %v6501_v45, %v6502_v6  ;;  %v6510_v37 = vmax.f32 %v6508_v9, %v6509_v8  ;;  %v6475_v31 = vmax.f32 %v6473_v1, %v6474_v2  ;;  %v7408_v22 = vsel %vm7190_vm11, %v6468_v5, -inf  ;;  %v16672_v28 = vpop.permute.xlu0 %805  ;;  %v11701_v8 = vld [vmem:[%s19070_s0 + $0x332] sm:$0xff] }
 0x3e2   :  { %v6517_v11 = vmax.f32 %v6515_v12, %v6516_v42  ;;  %v7420_v60 = vsel %vm7190_vm11, %v6496_v30, -inf  ;;  %v6489_v40 = vmax.f32 %v6487_v36, %v6488_v20  ;;  %v7414_v25 = vsel %vm7190_vm11, %v6482_v47, -inf  ;;  %2349 = vrot.lane.b32.xlu1 %v11637_v55, %s12663_s21  ;;  %v11638_v42 = vld [vmem:[%s19070_s0 + $0x339] sm:$0xff] }
 0x3e3   :  { %v7409_v38 = vmax.f32 %v16636_v54, %v7408_v22  ;;  %v7411_v26 = vsel %vm7190_vm11, %v6475_v31, -inf  ;;  %v7415_v45 = vmax.f32 %v16639_v16, %v7414_v25  ;;  %v3120_v9 = vsel %vm3067_vm7, %v3055_v3, %v16617_v51  ;;  %2095 = vrot.lane.b32.xlu0 %v11574_v13, %s12662_s18 }
 0x3e4   :  { %v7412_v49 = vmax.f32 %v7410_v35, %v7411_v26  ;;  %v7417_v57 = vsel %vm7190_vm11, %v6489_v40, -inf  ;;  %v3056_v10 = vsel %vm3002_vm6, %v2991_v39, %v16621_v43  ;;  %v3185_v7 = vsel %vm3132_vm8, %v3120_v9, %v2590_v24  ;;  %v2592_v12 = vpop.permute.xlu1 %2591  ;;  %v8619_v26 = vld [vmem:[%s19074_s4 + $0x68] sm:$0xff] }
 0x3e5   :  { %v7419_v54 = vsel %vm7190_vm11, %v16569_v23, -inf  ;;  %v7423_v53 = vsel %vm7190_vm11, %v6503_v52, -inf  ;;  %v7418_v16 = vmax.f32 %v7416_v27, %v7417_v57  ;;  %v3121_v44 = vsel %vm3067_vm7, %v3056_v10, %v2336_v4  ;;  %12102 = vmatprep.mubr.msk.f32.mxu0 %vm3201_vm9, %v3185_v7  ;;  %v16692_v51 = vpop.permute.xlu0 %1825  ;;  %v16766_v10 = vld [vmem:[#allocation2 + $0x2] sm:$0xff] }
 0x3e6   :  { %v7422_v32 = vsel %vm7190_vm11, %v16571_v48, -inf  ;;  %v7426_v43 = vsel %vm7190_vm11, %v6510_v37, -inf  ;;  %v7813_v34 = vsel %vm7743_vm12, %v7412_v49, %v7409_v38  ;;  %v3186_v35 = vsel %vm3132_vm8, %v3121_v44, %v2592_v12  ;;  %1585 = vrot.lane.b32.xlu1 %v11637_v55, %s12660_s20  ;;  %v16706_v48 = vld [vmem:[%s19072_s2] ss:$0 sm:$0xff]  ;;  %v16770_v12 = vld [vmem:[#allocation2 + $0x12] sm:$0xff] }
 0x3e7   :  { %v12086_v23 = vpop.f32.mrf.mxu0  ;;  %v7421_v33 = vmax.f32 %v7419_v54, %v7420_v60  ;;  %v7429_v19 = vsel %vm7190_vm11, %v6517_v11, -inf  ;;  %v7814_v6 = vsel %vm7745_vm13, %v7415_v45, %v7813_v34  ;;  %1331 = vrot.lane.b32.xlu0 %v11574_v13, %s12659_s17  ;;  %12103 = vmatmul.mubr.msk.f32.gmra.mxu0 %vm3201_vm9, %v3186_v35  ;;  %v7425_v46 = vsel %vm7190_vm11, %v16573_v59, -inf  ;;  %v16727_v59 = vld [vmem:[%s19073_s3] ss:$0 sm:$0xff]  ;;  %v8621_v11 = vld [vmem:[%s19074_s4 + $0x78] sm:$0xff]  ;;  %v8620_v60 = vld [vmem:[%s19074_s4 + $0x70] sm:$0xff] }
 0x3e8   :  { %v3831_v24 = vmul.f32 %v16706_v48, %v12086_v23  ;;  %v7428_v1 = vsel %vm7190_vm11, %v16577_v21, -inf  ;;  %v7424_v63 = vmax.f32 %v7422_v32, %v7423_v53  ;;  %v7815_v4 = vsel %vm7747_vm14, %v7418_v16, %v7814_v6  ;;  %v16718_v27 = vpop.permute.xlu1 %1061  ;;  %8673 = vmatpush1.msra.mxu1 %v8621_v11  ;;  %v11512_v38 = vld [vmem:[%s19070_s0 + $0x33a] sm:$0xff]  ;;  %v16774_v53 = vld [vmem:[#allocation2 + $0x11] sm:$0xff]  ;;  %v11575_v23 = vld [vmem:[%s19070_s0 + $0x348] sm:$0xff]  ;;  %s12672_s17 = smov 80  }
 0x3e9   :  { %v3664_v30 = vpop.f32.mrf.mxu0  ;;  %v7427_v36 = vmax.f32 %v7425_v46, %v7426_v43  ;;  %v7816_v29 = vsel %vm7749_vm15, %v7421_v33, %v7815_v4  ;;  %v16730_v0 = vpop.permute.xlu0 %807  ;;  %v7430_v2 = vmax.f32 %v7428_v1, %v7429_v19  ;;  %vm19169_vm4 = vcmask 1045509   ;;  %8674 = vmatprep.subr.mxu1 %v12665_v15  ;;  %v16772_v54 = vld [vmem:[#allocation2 + $0x1] sm:$0xff]  ;;  %v11576_v44 = vld [vmem:[%s19070_s0 + $0x350] sm:$0xff] }
 0x3ea   :  { %v3902_v21 = vadd.f32 %v16727_v59, %v3831_v24  ;;  %v3830_v5 = vmul.f32 %v16706_v48, %v3664_v30  ;;  %v7817_v55 = vsel %vm19169_vm4, %v7424_v63, %v7816_v29  ;;  %2605 = vrot.lane.b32.xlu1 %v11701_v8, %s12664_s16  ;;  %vm19170_vm5 = vcmask 1046534   ;;  %8675 = vmatpush1.msra.mxu1 %v8620_v60  ;;  %v16781_v32 = vld [vmem:[#allocation2 + $0x21] sm:$0xff]  ;;  %v16798_v46 = vld [vmem:[#allocation2 + $0x10] sm:$0xff] }
 0x3eb   :  { %v7818_v47 = vsel %vm19170_vm5, %v7427_v36, %v7817_v55  ;;  %2351 = vrot.lane.b32.xlu0 %v11638_v42, %s12663_s21  ;;  %vm19171_vm0 = vcmask 1047559   ;;  %8676 = vmatprep.subr.mxu1 %v12665_v15  ;;  %v16783_v43 = vld [vmem:[#allocation2 + $0x20] sm:$0xff]  ;;  %v16802_v63 = vld [vmem:[#allocation2 + $0x30] sm:$0xff]  ;;  %vm19172_vm4 = vcmask 97280  }
 0x3ec   :  { %v3966_v20 = vmax.f32 %v3902_v21, 0.0  ;;  %v3901_v3 = vadd.f32 %v16727_v59, %v3830_v5  ;;  %v7819_v39 = vsel %vm19171_vm0, %v7430_v2, %v7818_v47  ;;  %v16739_v13 = vpop.permute.xlu1 %2081  ;;  %8677 = vmatpush1.msra.mxu1 %v8619_v26  ;;  %v16800_v1 = vld [vmem:[#allocation2 + $0x22] sm:$0xff]  ;;  %v16812_v29 = vld [vmem:[#allocation2 + $0x31] sm:$0xff]  ;;  %vm19173_vm5 = vmmov %vm19172_vm4  ;;  %vm19174_vm0 = vcmask 121856  }
 0x3ed   :  { %7888 = vst.msk [vmem:[#allocation2 + $0xc1] sm:$0xff] %vm7190_vm11, %v7819_v39  ;;  %v16743_v22 = vpop.permute.xlu0 %1827  ;;  %8678 = vmatprep.subr.mxu1 %v12665_v15  ;;  %v16814_v21 = vld [vmem:[#allocation2 + $0x32] sm:$0xff]  ;;  %v16825_v39 = vld [vmem:[#allocation2 + $0x40] sm:$0xff]  ;;  %v11639_v60 = vld [vmem:[%s19070_s0 + $0x349] sm:$0xff] }
 0x3ee   :  { %v4750_v52 = vcombine.high %v3966_v20, %v3966_v20  ;;  %v4757_v37 = vrot.slane %v3966_v20, %v13627_v50  ;;  %v3965_v31 = vmax.f32 %v3901_v3, 0.0  ;;  %1841 = vrot.lane.b32.xlu1 %v11701_v8, %s12661_s27  ;;  %v12212_v8 = vpack.i.bf16 %v16770_v12, %v16766_v10  ;;  %v105_v5 = vld [vmem:[%s19070_s0 + $0x2b8] sm:$0xff] }
 0x3ef   :  { %1587 = vrot.lane.b32.xlu0 %v11638_v42, %s12660_s20  ;;  %v11640_v3 = vld [vmem:[%s19070_s0 + $0x351] sm:$0xff]  ;;  %s12669_s20 = smov 64  }
 0x3f0   :  { %v4764_v40 = vrot.slane %v4750_v52, %v13627_v50  ;;  %v4733_v25 = vcombine.high %v3965_v31, %v3965_v31  ;;  %v16761_v45 = vpop.permute.xlu1 %1317  ;;  %v4765_v9 = vcombine.high %v4757_v37, %v4757_v37  ;;  %v4740_v49 = vrot.slane %v3965_v31, %v13627_v50  ;;  %v106_v52 = vld [vmem:[%s19070_s0 + $0x2c0] sm:$0xff] }
 0x3f1   :  { %v16764_v57 = vpop.permute.xlu0 %1063  ;;  %v6546_v34 = vsel %vm5397_vm10, %v4757_v37, -inf  ;;  %v2733_v36 = vsel %vm2677_vm1, %v106_v52, %v16553_v61  ;;  %v16876_v52 = vld [vmem:[#allocation2 + $0x42] sm:$0xff] }
 0x3f2   :  { %v4766_v7 = vcombine.high %v4764_v40, %v4764_v40  ;;  %1843 = vrot.lane.b32.xlu1 %v11512_v38, %s12661_s27  ;;  %v4747_v16 = vrot.slane %v4733_v25, %v13627_v50  ;;  %v6553_v33 = vsel %vm5397_vm10, %v4765_v9, -inf  ;;  %v6560_v19 = vsel %vm5397_vm10, %v4764_v40, -inf  ;;  %v16856_v25 = vld [vmem:[#allocation2 + $0x41] sm:$0xff] }
 0x3f3   :  { %2607 = vrot.lane.b32.xlu0 %v11512_v38, %s12664_s16  ;;  %v4748_v6 = vcombine.high %v4740_v49, %v4740_v49  ;;  %v6547_v2 = vrot.slane %v6546_v34, 4  ;;  %v6518_v47 = vsel %vm5397_vm10, %v4740_v49, -inf  ;;  %v6554_v37 = vrot.slane %v6553_v33, 4 }
 0x3f4   :  { %v16787_v35 = vpop.permute.xlu1 %2337  ;;  %v6567_v4 = vsel %vm5397_vm10, %v4766_v7, -inf  ;;  %v4749_v55 = vcombine.high %v4747_v16, %v4747_v16  ;;  %v6532_v20 = vsel %vm5397_vm10, %v4747_v16, -inf  ;;  %v6561_v31 = vrot.slane %v6560_v19, 4  ;;  %v8618_v16 = vld [vmem:[%s19074_s4 + $0x60] sm:$0xff] }
 0x3f5   :  { %v16794_v24 = vpop.permute.xlu0 %2083  ;;  %v6568_v38 = vrot.slane %v6567_v4, 4  ;;  %v6525_v26 = vsel %vm5397_vm10, %v4748_v6, -inf  ;;  %v16844_v49 = vpack.i.bf16 %v16812_v29, %v16781_v32  ;;  %v6533_v40 = vrot.slane %v6532_v20, 4  ;;  %8679 = vmatpush1.msra.mxu1 %v8618_v16 }
 0x3f6   :  { %2099 = vrot.lane.b32.xlu1 %v11576_v44, %s12662_s18  ;;  %v2732_v44 = vsel %vm2677_vm1, %v105_v5, %v16517_v41  ;;  %v6548_v42 = vmax.f32 %v6546_v34, %v6547_v2  ;;  %v6539_v30 = vsel %vm5397_vm10, %v4749_v55, -inf  ;;  %v11704_v41 = vld [vmem:[%s19070_s0 + $0x352] sm:$0xff]  ;;  %8680 = vmatprep.subr.mxu1 %v12665_v15  ;;  %v6562_v61 = vmax.f32 %v6560_v19, %v6561_v31  ;;  %v11703_v55 = vld [vmem:[%s19070_s0 + $0x34a] sm:$0xff] }
 0x3f7   :  { %2097 = vrot.lane.b32.xlu0 %v11575_v23, %s12662_s18  ;;  %v6519_v23 = vrot.slane %v6518_v47, 4  ;;  %v2797_v7 = vsel %vm2742_vm2, %v2732_v44, %v16545_v58  ;;  %v8617_v5 = vld [vmem:[%s19074_s4 + $0x58] sm:$0xff]  ;;  %v6526_v34 = vrot.slane %v6525_v26, 4  ;;  %v6569_v44 = vmax.f32 %v6567_v4, %v6568_v38 }
 0x3f8   :  { %v16830_v11 = vpop.permute.xlu1 %1573  ;;  %v2862_v58 = vsel %vm2807_vm3, %v2797_v7, %v16603_v14  ;;  %8681 = vmatpush1.msra.mxu1 %v8617_v5  ;;  %v6534_v31 = vmax.f32 %v6532_v20, %v6533_v40  ;;  %v6549_v38 = vrot.slane %v6548_v42, 2  ;;  %v6563_v40 = vrot.slane %v6562_v61, 2 }
 0x3f9   :  { %v16840_v9 = vpop.permute.xlu0 %1319  ;;  %v2927_v16 = vsel %vm19172_vm4, %v2862_v58, %v16631_v17  ;;  %8682 = vmatprep.subr.mxu1 %v12665_v15  ;;  %v16891_v17 = vld [vmem:[#allocation2 + $0x51] sm:$0xff]  ;;  %v16904_v7 = vmax.f32 %v6525_v26, %v6526_v34  ;;  %vm19175_vm4 = vmmov %vm19174_vm0 }
 0x3fa   :  { %2355 = vrot.lane.b32.xlu1 %v11640_v3, %s12663_s21  ;;  %v6555_v3 = vmax.f32 %v6553_v33, %v6554_v37  ;;  %v8616_v33 = vld [vmem:[%s19074_s4 + $0x50] sm:$0xff]  ;;  %v6520_v37 = vmax.f32 %v6518_v47, %v6519_v23  ;;  %v8615_v47 = vld [vmem:[%s19074_s4 + $0x48] sm:$0xff]  ;;  %v16920_v26 = vpack.i.bf16 %v16891_v17, %v16856_v25 }
 0x3fb   :  { %2353 = vrot.lane.b32.xlu0 %v11639_v60, %s12663_s21  ;;  %v2798_v60 = vsel %vm2742_vm2, %v2733_v36, %v16608_v56  ;;  %v6540_v56 = vrot.slane %v6539_v30, 4  ;;  %8683 = vmatpush1.msra.mxu1 %v8616_v33  ;;  %v2992_v36 = vsel %vm19174_vm0, %v2927_v16, %v16692_v51  ;;  %v16910_v23 = vld [vmem:[#allocation2 + $0x50] sm:$0xff]  ;;  %v16935_v33 = vld [vmem:[#allocation2 + $0x61] sm:$0xff]  ;;  %s12673_s21 = smov 112   ;;  %vm19190_vm0 = vmmov %vm19173_vm5 }
 0x3fc   :  { %v2594_v2 = vpop.permute.xlu1 %2593  ;;  %v2863_v19 = vsel %vm2807_vm3, %v2798_v60, %v16633_v62  ;;  %v12262_v62 = vpack.i.bf16 %v16876_v52, %v16814_v21  ;;  %8684 = vmatprep.subr.mxu1 %v12665_v15  ;;  %v6556_v20 = vrot.slane %v6555_v3, 2  ;;  %v6521_v34 = vrot.slane %v6520_v37, 2 }
 0x3fd   :  { %v2340_v6 = vpop.permute.xlu0 %2339  ;;  %v2928_v4 = vsel %vm19173_vm5, %v2863_v19, %v16666_v18  ;;  %v3057_v18 = vsel %vm3002_vm6, %v2992_v36, %v16739_v13  ;;  %8685 = vmatpush1.msra.mxu1 %v8615_v47  ;;  %v8614_v13 = vld [vmem:[%s19074_s4 + $0x40] sm:$0xff]  ;;  %v6535_v60 = vrot.slane %v6534_v31, 2  ;;  %v16926_v16 = vmax.f32 %v6539_v30, %v6540_v56  ;;  %v16958_v47 = vld [vmem:[#allocation2 + $0x70] sm:$0xff] }
 0x3fe   :  { %2611 = vrot.lane.b32.xlu1 %v11704_v41, %s12664_s16  ;;  %v6570_v41 = vrot.slane %v6569_v44, 2  ;;  %v2993_v5 = vsel %vm19175_vm4, %v2928_v4, %v16743_v22  ;;  %v3122_v58 = vsel %vm3067_vm7, %v3057_v18, %v16787_v35  ;;  %8686 = vmatprep.subr.mxu1 %v12665_v15  ;;  %v16933_v35 = vld [vmem:[#allocation2 + $0x52] sm:$0xff]  ;;  %v16937_v19 = vmax.f32 %v6548_v42, %v6549_v38  ;;  %v16956_v38 = vld [vmem:[#allocation2 + $0x62] sm:$0xff] }
 0x3ff   :  { %2609 = vrot.lane.b32.xlu0 %v11703_v55, %s12664_s16  ;;  %v3187_v22 = vsel %vm3132_vm8, %v3122_v58, %v2594_v2  ;;  %v3058_v4 = vsel %vm3002_vm6, %v2993_v5, %v16794_v24  ;;  %v19176_v30 = vpack.i.bf16 %v16774_v53, %v16772_v54  ;;  %v16950_v2 = vmax.f32 %v6555_v3, %v6556_v20  ;;  %v8613_v54 = vld [vmem:[%s19074_s4 + $0x38] sm:$0xff]  ;;  %s12671_s16 = smov 96  }
 0x400   :  { %v16908_v51 = vpop.permute.xlu1 %1575  ;;  %12105 = vmatprep.mubr.msk.f32.mxu0 %vm3201_vm9, %v3187_v22  ;;  %v16952_v42 = vmax.f32 %v6562_v61, %v6563_v40  ;;  %v6528_v56 = vrot.slane %v16904_v7, 2  ;;  %v3123_v24 = vsel %vm3067_vm7, %v3058_v4, %v2340_v6  ;;  %8687 = vmatpush1.msra.mxu1 %v8614_v13  ;;  %v6571_v18 = vmax.f32 %v6569_v44, %v6570_v41  ;;  %v16979_v22 = vld [vmem:[#allocation2 + $0x71] sm:$0xff] }
 0x401   :  { %v16916_v55 = vpop.permute.xlu0 %809  ;;  %8688 = vmatprep.subr.mxu1 %v12665_v15  ;;  %v6522_v40 = vmax.f32 %v6520_v37, %v6521_v34  ;;  %v6536_v5 = vmax.f32 %v6534_v31, %v6535_v60  ;;  %v6542_v58 = vrot.slane %v16926_v16, 2  ;;  %v19177_v44 = vpack.i.bf16 %v16781_v32, %v16774_v53  ;;  %v8612_v37 = vld [vmem:[%s19074_s4 + $0x30] sm:$0xff] }
 0x402   :  { %12213 = vrot.lane.b32.xlu1 %v12212_v8, %s12667_s1  ;;  %v16948_v8 = vld [vmem:[#allocation2 + $0x60] sm:$0xff]  ;;  %v107_v31 = vld [vmem:[%s19070_s0 + $0x2d0] sm:$0xff]  ;;  %v19178_v53 = vpack.i.bf16 %v16783_v43, %v16798_v46  ;;  %8689 = vmatpush1.msra.mxu1 %v8613_v54  ;;  %v6551_v4 = vrot.slane %v16937_v19, 1  ;;  %v108_v46 = vld [vmem:[%s19070_s0 + $0x2d8] sm:$0xff]  ;;  %v17015_v13 = vpack.i.bf16 %v16979_v22, %v16935_v33 }
 0x403   :  { %12208 = vrot.lane.b32.xlu0 %v19176_v30, %s12668_s19  ;;  %v6558_v30 = vrot.slane %v16950_v2, 1  ;;  %8690 = vmatprep.subr.mxu1 %v12665_v15  ;;  %v8611_v54 = vld [vmem:[%s19074_s4 + $0x28] sm:$0xff]  ;;  %v6537_v6 = vrot.slane %v6536_v5, 1  ;;  %v17020_v61 = vmax.f32 %v16926_v16, %v6542_v58 }
 0x404   :  { %v2596_v36 = vpop.permute.xlu1 %2595  ;;  %8691 = vmatpush1.msra.mxu1 %v8612_v37  ;;  %v8610_v37 = vld [vmem:[%s19074_s4 + $0x20] sm:$0xff] }
 0x405   :  { %v3188_v3 = vsel %vm3132_vm8, %v3123_v24, %v2596_v36  ;;  %v16964_v20 = vpop.permute.xlu0 %1829  ;;  %v6565_v24 = vrot.slane %v16952_v42, 1  ;;  %v6529_v36 = vmax.f32 %v16904_v7, %v6528_v56  ;;  %v2734_v7 = vsel %vm2677_vm1, %v107_v31, %v16672_v28  ;;  %8692 = vmatprep.subr.mxu1 %v12665_v15 }
 0x406   :  { %12106 = vmatmul.mubr.msk.f32.gmra.mxu0 %vm3201_vm9, %v3188_v3  ;;  %12223 = vrot.lane.b32.xlu1 %v19177_v44, %s12669_s20  ;;  %v12089_v41 = vpop.f32.mrf.mxu0  ;;  %v6523_v56 = vrot.slane %v6522_v40, 1  ;;  %v2799_v28 = vsel %vm2742_vm2, %v2734_v7, %v16718_v27  ;;  %v2735_v31 = vsel %vm2677_vm1, %v108_v46, %v16730_v0 }
 0x407   :  { %12218 = vrot.lane.b32.xlu0 %v19178_v53, %s12670_s26  ;;  %v3833_v32 = vmul.f32 %v16706_v48, %v12089_v41  ;;  %v6572_v41 = vrot.slane %v6571_v18, 1  ;;  %8693 = vmatpush1.msra.mxu1 %v8611_v54  ;;  %v17046_v27 = vmax.f32 %v16952_v42, %v6565_v24  ;;  %v6530_v0 = vrot.slane %v6529_v36, 1 }
 0x408   :  { %v17003_v3 = vpop.permute.xlu1 %1065  ;;  %v3674_v44 = vpop.f32.mrf.mxu0  ;;  %8694 = vmatprep.subr.mxu1 %v12665_v15  ;;  %v17059_v42 = vmax.f32 %v6522_v40, %v6523_v56  ;;  %v17082_v7 = vsel %vm2742_vm2, %v2735_v31, %v16764_v57 }
 0x409   :  { %v3904_v53 = vadd.f32 %v16727_v59, %v3833_v32  ;;  %v17010_v34 = vpop.permute.xlu0 %811  ;;  %v3832_v60 = vmul.f32 %v16706_v48, %v3674_v44  ;;  %v19180_v32 = vpack.i.bf16 %v16802_v63, %v16783_v43  ;;  %v19181_v43 = vpack.i.bf16 %v16800_v1, %v16770_v12  ;;  %v8609_v12 = vld [vmem:[%s19074_s4 + $0x18] sm:$0xff]  ;;  %8695 = vmatpush1.msra.mxu1 %v8610_v37 }
 0x40a   :  { %19179 = vst [vmem:[#allocation8_spill] sm:$0xff] %v17010_v34  ;;  %v17040_v44 = vmax.f32 %v16937_v19, %v6551_v4  ;;  %8696 = vmatprep.subr.mxu1 %v12665_v15 }
 0x40b   :  { %12233 = vrot.lane.b32.xlu1 %v19180_v32, %s12671_s16  ;;  %v3968_v16 = vmax.f32 %v3904_v53, 0.0  ;;  %v3903_v58 = vadd.f32 %v16727_v59, %v3832_v60  ;;  %12228 = vrot.lane.b32.xlu0 %v19181_v43, %s12672_s17  ;;  %v17043_v32 = vmax.f32 %v16950_v2, %v6558_v30  ;;  %v17054_v60 = vmax.f32 %v6571_v18, %v6572_v41  ;;  %v8608_v18 = vld [vmem:[%s19074_s4 + $0x10] sm:$0xff] }
 0x40c   :  { %v17048_v46 = vpop.permute.xlu1 %2085  ;;  %v17061_v30 = vmax.f32 %v6536_v5, %v6537_v6  ;;  %v17066_v53 = vsel %vm2807_vm3, %v2799_v28, %v16761_v45  ;;  %8697 = vmatpush1.msra.mxu1 %v8609_v12  ;;  %v17078_v45 = vmax.f32 %v6529_v36, %v6530_v0 }
 0x40d   :  { %v4784_v54 = vcombine.high %v3968_v16, %v3968_v16  ;;  %v4791_v19 = vrot.slane %v3968_v16, %v13627_v50  ;;  %v3967_v4 = vmax.f32 %v3903_v58, 0.0  ;;  %v17057_v2 = vpop.permute.xlu0 %1831  ;;  %8698 = vmatprep.subr.mxu1 %v12665_v15  ;;  %v8607_v16 = vld [vmem:[%s19074_s4 + $0x8] sm:$0xff] }
 0x40e   :  { %8699 = vmatpush1.msra.mxu1 %v8608_v18 }
 0x40f   :  { %12243 = vrot.lane.b32.xlu1 %v16844_v49, %s12668_s19  ;;  %v4798_v40 = vrot.slane %v4784_v54, %v13627_v50  ;;  %v4799_v41 = vcombine.high %v4791_v19, %v4791_v19  ;;  %v6602_v6 = vsel %vm5397_vm10, %v4791_v19, -inf  ;;  %v4767_v5 = vcombine.high %v3967_v4, %v3967_v4  ;;  %12238 = vrot.lane.b32.xlu0 %v16844_v49, %s12673_s21 }
 0x410   :  { %v6603_v56 = vrot.slane %v6602_v6, 4  ;;  %v4774_v37 = vrot.slane %v3967_v4, %v13627_v50  ;;  %v17085_v28 = vpop.permute.xlu1 %1321  ;;  %v19184_v19 = vpack.i.bf16 %v16825_v39, %v16802_v63  ;;  %8700 = vmatprep.subr.mxu1 %v12665_v15  ;;  %v8606_v4 = vld [vmem:[%s19074_s4] sm:$0xff] }
 0x411   :  { %19182 = vst [vmem:[#allocation9_spill] sm:$0xff] %v17085_v28  ;;  %v4800_v58 = vcombine.high %v4798_v40, %v4798_v40  ;;  %v6609_v49 = vsel %vm5397_vm10, %v4799_v41, -inf  ;;  %v6616_v36 = vsel %vm5397_vm10, %v4798_v40, -inf  ;;  %v4781_v43 = vrot.slane %v4767_v5, %v13627_v50  ;;  %v17094_v57 = vpop.permute.xlu0 %1067  ;;  %8701 = vmatpush1.msra.mxu1 %v8607_v16 }
 0x412   :  { %19183 = vst [vmem:[#allocation10_spill] sm:$0xff] %v17094_v57  ;;  %v6604_v31 = vmax.f32 %v6602_v6, %v6603_v56  ;;  %v6610_v0 = vrot.slane %v6609_v49, 4  ;;  %v6617_v12 = vrot.slane %v6616_v36, 4  ;;  %v4782_v54 = vcombine.high %v4774_v37, %v4774_v37  ;;  %8702 = vmatprep.subr.mxu1 %v12665_v15 }
 0x413   :  { %12253 = vrot.lane.b32.xlu1 %v19184_v19, %s12670_s26  ;;  %v6623_v40 = vsel %vm5397_vm10, %v4800_v58, -inf  ;;  %v4783_v41 = vcombine.high %v4781_v43, %v4781_v43  ;;  %v6574_v18 = vsel %vm5397_vm10, %v4774_v37, -inf  ;;  %v6588_v6 = vsel %vm5397_vm10, %v4781_v43, -inf  ;;  %v8623_v37 = vld [vmem:[%s19074_s4 + $0x88] sm:$0xff]  ;;  %8703 = vmatpush1.msra.mxu1 %v8606_v4 }
 0x414   :  { %v19185_v5 = vpack.i.bf16 %v16814_v21, %v16800_v1  ;;  %v6605_v63 = vrot.slane %v6604_v31, 2  ;;  %v6611_v56 = vmax.f32 %v6609_v49, %v6610_v0  ;;  %v6618_v19 = vmax.f32 %v6616_v36, %v6617_v12  ;;  %v17111_v24 = vpop.permute.xlu1 %2341  ;;  %8732 = vmatprep.subr.mxu1 %v12665_v15  ;;  %v8622_v12 = vld [vmem:[%s19074_s4 + $0x80] sm:$0xff] }
 0x415   :  { %v6624_v10 = vrot.slane %v6623_v40, 4  ;;  %v6575_v58 = vrot.slane %v6574_v18, 4  ;;  %v6581_v43 = vsel %vm5397_vm10, %v4782_v54, -inf  ;;  %v6589_v14 = vrot.slane %v6588_v6, 4  ;;  %8733 = vmatpush2.msra.mxu1 %v8623_v37 }
 0x416   :  { %12248 = vrot.lane.b32.xlu0 %v19185_v5, %s12667_s1  ;;  %v6595_v1 = vsel %vm5397_vm10, %v4783_v41, -inf  ;;  %v17119_v5 = vpop.permute.xlu0 %2087  ;;  %v6606_v16 = vmax.f32 %v6604_v31, %v6605_v63  ;;  %v6612_v49 = vrot.slane %v6611_v56, 2  ;;  %v6619_v36 = vrot.slane %v6618_v19, 2  ;;  %8734 = vmatprep.subr.mxu1 %v12665_v15 }
 0x417   :  { %v6625_v0 = vmax.f32 %v6623_v40, %v6624_v10  ;;  %12263 = vrot.lane.b32.xlu1 %v12262_v62, %s12672_s17  ;;  %v6576_v54 = vmax.f32 %v6574_v18, %v6575_v58  ;;  %v6582_v41 = vrot.slane %v6581_v43, 4  ;;  %v6590_v57 = vmax.f32 %v6588_v6, %v6589_v14  ;;  %8735 = vmatpush2.msra.mxu1 %v8622_v12 }
 0x418   :  { %v6596_v28 = vrot.slane %v6595_v1, 4  ;;  %v19186_v31 = vpack.i.bf16 %v16856_v25, %v16812_v29  ;;  %v19187_v10 = vrot.slane %v17020_v61, 1  ;;  %v6613_v62 = vmax.f32 %v6611_v56, %v6612_v49  ;;  %v17136_v63 = vpop.permute.xlu1 %1577 }
 0x419   :  { %v6620_v4 = vmax.f32 %v6618_v19, %v6619_v36  ;;  %v6626_v40 = vrot.slane %v6625_v0, 2  ;;  %v6577_v18 = vrot.slane %v6576_v54, 2  ;;  %v6583_v14 = vmax.f32 %v6581_v43, %v6582_v41 }
 0x41a   :  { %12258 = vrot.lane.b32.xlu0 %v19186_v31, %s12669_s20  ;;  %v6545_v21 = vmax.f32 %v17020_v61, %v19187_v10  ;;  %v6591_v6 = vrot.slane %v6590_v57, 2  ;;  %v6597_v58 = vmax.f32 %v6595_v1, %v6596_v28  ;;  %v17139_v34 = vpop.permute.xlu0 %1323  ;;  %v17143_v29 = vsel %vm7190_vm11, %v17059_v42, -inf }
 0x41b   :  { %v17147_v25 = vsel %vm7190_vm11, %v17061_v30, -inf  ;;  %v6607_v61 = vrot.slane %v6606_v16, 1  ;;  %v6627_v56 = vmax.f32 %v6625_v0, %v6626_v40  ;;  %12273 = vrot.lane.b32.xlu1 %v16920_v26, %s12673_s21  ;;  %v6578_v19 = vmax.f32 %v6576_v54, %v6577_v18 }
 0x41c   :  { %v6584_v37 = vrot.slane %v6583_v14, 2  ;;  %v6592_v43 = vmax.f32 %v6590_v57, %v6591_v6  ;;  %v6598_v28 = vrot.slane %v6597_v58, 2  ;;  %v19188_v1 = vpack.i.bf16 %v16910_v23, %v16825_v39  ;;  %v2598_v0 = vpop.permute.xlu1 %2597 }
 0x41d   :  { %v7434_v42 = vsel %vm7190_vm11, %v17078_v45, -inf  ;;  %v2929_v30 = vsel %vm19173_vm5, %v17066_v53, %v16830_v11  ;;  %v2865_v49 = vsel %vm2807_vm3, %v17082_v7, %v16840_v9  ;;  %v6614_v36 = vrot.slane %v6613_v62, 1  ;;  %vm19191_vm5 = vmmov %vm19175_vm4 }
 0x41e   :  { %12268 = vrot.lane.b32.xlu0 %v19188_v1, %s12671_s16  ;;  %v6621_v57 = vrot.slane %v6620_v4, 1  ;;  %v6579_v12 = vrot.slane %v6578_v19, 1  ;;  %v6585_v54 = vmax.f32 %v6583_v14, %v6584_v37  ;;  %v6593_v41 = vrot.slane %v6592_v43, 1  ;;  %v2344_v31 = vpop.permute.xlu0 %2343 }
 0x41f   :  { %v7440_v39 = vsel %vm7190_vm11, %v6545_v21, -inf  ;;  %v6608_v10 = vmax.f32 %v6606_v16, %v6607_v61  ;;  %v6628_v40 = vrot.slane %v6627_v56, 1  ;;  %v6599_v45 = vmax.f32 %v6597_v58, %v6598_v28 }
 0x420   :  { %v19189_v11 = vpack.i.bf16 %v16933_v35, %v16876_v52  ;;  %v2930_v9 = vsel %vm19190_vm0, %v2865_v49, %v16908_v51  ;;  %v2994_v53 = vsel %vm19175_vm4, %v2929_v30, %v16964_v20  ;;  %v6580_v7 = vmax.f32 %v6578_v19, %v6579_v12  ;;  %v17178_v6 = vpop.permute.xlu1 %1579 }
 0x421   :  { %v6586_v18 = vrot.slane %v6585_v54, 1  ;;  %v6594_v21 = vmax.f32 %v6592_v43, %v6593_v41  ;;  %v6600_v16 = vrot.slane %v6599_v45, 1  ;;  %v3059_v14 = vsel %vm3002_vm6, %v2994_v53, %v17048_v46 }
 0x422   :  { %12283 = vrot.lane.b32.xlu1 %v19189_v11, %s12667_s1  ;;  %12278 = vrot.lane.b32.xlu0 %v16920_v26, %s12668_s19  ;;  %v2995_v52 = vsel %vm19191_vm5, %v2930_v9, %v17057_v2  ;;  %v6615_v58 = vmax.f32 %v6613_v62, %v6614_v36  ;;  %v6622_v51 = vmax.f32 %v6620_v4, %v6621_v57  ;;  %v7432_v20 = vsel %vm7190_vm11, %v6580_v7, -inf  ;;  %v17181_v19 = vpop.permute.xlu0 %813 }
 0x423   :  { %v6587_v61 = vmax.f32 %v6585_v54, %v6586_v18  ;;  %v6629_v37 = vmax.f32 %v6627_v56, %v6628_v40  ;;  %v7444_v26 = vsel %vm7190_vm11, %v6608_v10, -inf  ;;  %v6601_v43 = vmax.f32 %v6599_v45, %v6600_v16 }
 0x424   :  { %v7438_v28 = vsel %vm7190_vm11, %v6594_v21, -inf  ;;  %v19192_v46 = vpack.i.bf16 %v16935_v33, %v16891_v17  ;;  %v7433_v2 = vmax.f32 %v17143_v29, %v7432_v20  ;;  %v3124_v1 = vsel %vm3067_vm7, %v3059_v14, %v17111_v24  ;;  %v2600_v29 = vpop.permute.xlu1 %2599  ;;  %v7950_v14 = vld [vmem:[#allocation2 + $0x80] sm:$0xff] }
 0x425   :  { %v7435_v62 = vsel %vm7190_vm11, %v6587_v61, -inf  ;;  %v7439_v4 = vmax.f32 %v17147_v25, %v7438_v28  ;;  %v19193_v56 = vpack.i.bf16 %v16948_v8, %v16910_v23  ;;  %v7441_v49 = vsel %vm7190_vm11, %v6601_v43, -inf }
 0x426   :  { %12293 = vrot.lane.b32.xlu1 %v19192_v46, %s12669_s20  ;;  %v7436_v30 = vmax.f32 %v7434_v42, %v7435_v62  ;;  %v3060_v17 = vsel %vm3002_vm6, %v2995_v52, %v17119_v5  ;;  %v3189_v33 = vsel %vm3132_vm8, %v3124_v1, %v2598_v0  ;;  %v7443_v25 = vsel %vm7190_vm11, %v17040_v44, -inf  ;;  %v17207_v23 = vpop.permute.xlu0 %1833 }
 0x427   :  { %12288 = vrot.lane.b32.xlu0 %v19193_v56, %s12670_s26  ;;  %v7447_v36 = vsel %vm7190_vm11, %v6615_v58, -inf  ;;  %v7442_v24 = vmax.f32 %v7440_v39, %v7441_v49  ;;  %v3125_v57 = vsel %vm3067_vm7, %v3060_v17, %v2344_v31  ;;  %12108 = vmatprep.mubr.msk.f32.mxu0 %vm3201_vm9, %v3189_v33  ;;  %v7446_v42 = vsel %vm7190_vm11, %v17043_v32, -inf  ;;  %v12092_v54 = vpop.f32.mrf.mxu0  ;;  %v8015_v33 = vld [vmem:[#allocation2 + $0x91] sm:$0xff] }
 0x428   :  { %v7450_v5 = vsel %vm7190_vm11, %v6622_v51, -inf  ;;  %v7820_v0 = vsel %vm7743_vm12, %v7436_v30, %v7433_v2  ;;  %v3190_v12 = vsel %vm3132_vm8, %v3125_v57, %v2600_v29  ;;  %v19194_v44 = vpack.i.bf16 %v16958_v47, %v16948_v8  ;;  %v17231_v9 = vpop.permute.xlu1 %1069 }
 0x429   :  { %v7445_v41 = vmax.f32 %v7443_v25, %v7444_v26  ;;  %v7453_v31 = vsel %vm7190_vm11, %v6629_v37, -inf  ;;  %v7821_v39 = vsel %vm7745_vm13, %v7439_v4, %v7820_v0  ;;  %12109 = vmatmul.mubr.msk.f32.gmra.mxu0 %vm3201_vm9, %v3190_v12  ;;  %v19195_v32 = vpack.i.bf16 %v16956_v38, %v16933_v35  ;;  %v3684_v53 = vpop.f32.mrf.mxu0 }
 0x42a   :  { %12303 = vrot.lane.b32.xlu1 %v19194_v44, %s12671_s16  ;;  %v3835_v10 = vmul.f32 %v16706_v48, %v12092_v54  ;;  %v7449_v40 = vsel %vm7190_vm11, %v17046_v27, -inf  ;;  %v7452_v8 = vsel %vm7190_vm11, %v17054_v60, -inf  ;;  %v7448_v45 = vmax.f32 %v7446_v42, %v7447_v36  ;;  %v17235_v21 = vpop.permute.xlu0 %815  ;;  %v7934_v60 = vld [vmem:[#allocation2 + $0x72] sm:$0xff]  ;;  %v7935_v54 = vld [vmem:[#allocation2 + $0xa2] sm:$0xff] }
 0x42b   :  { %12298 = vrot.lane.b32.xlu0 %v19195_v32, %s12672_s17  ;;  %v7822_v11 = vsel %vm7747_vm14, %v7442_v24, %v7821_v39  ;;  %v7451_v7 = vmax.f32 %v7449_v40, %v7450_v5  ;;  %v3834_v16 = vmul.f32 %v16706_v48, %v3684_v53  ;;  %v7454_v27 = vmax.f32 %v7452_v8, %v7453_v31  ;;  %v7999_v36 = vld [vmem:[#allocation2 + $0x90] sm:$0xff]  ;;  %v7919_v32 = vld [vmem:[#allocation2 + $0xa1] sm:$0xff] }
 0x42c   :  { %v7823_v18 = vsel %vm7749_vm15, %v7445_v41, %v7822_v11  ;;  %v3906_v35 = vadd.f32 %v16727_v59, %v3835_v10  ;;  %vm19196_vm0 = vcmask 1045509   ;;  %vm19197_vm4 = vcmask 1046534   ;;  %v17246_v37 = vpop.permute.xlu1 %2089  ;;  %v17273_v41 = vld [vmem:[#allocation2 + $0xb2] sm:$0xff]  ;;  %v109_v40 = vld [vmem:[%s19070_s0 + $0x2e8] sm:$0xff] }
 0x42d   :  { %v7824_v52 = vsel %vm19196_vm0, %v7448_v45, %v7823_v18  ;;  %v3905_v61 = vadd.f32 %v16727_v59, %v3834_v16  ;;  %vm19198_vm5 = vcmask 1047559   ;;  %v12322_v48 = vpack.i.bf16 %v7950_v14, %v16958_v47  ;;  %v7982_v59 = vld [vmem:[#allocation2 + $0x82] sm:$0xff]  ;;  %v7920_v10 = vld [vmem:[#allocation2 + $0xb1] sm:$0xff] }
 0x42e   :  { %12313 = vrot.lane.b32.xlu1 %v17015_v13, %s12668_s19  ;;  %v7825_v58 = vsel %vm19197_vm4, %v7451_v7, %v7824_v52  ;;  %v3970_v51 = vmax.f32 %v3906_v35, 0.0  ;;  %v17251_v46 = vpop.permute.xlu0 %1835  ;;  %v12317_v2 = vpack.i.bf16 %v7934_v60, %v16956_v38  ;;  %v12332_v30 = vpack.i.bf16 %v7982_v59, %v7934_v60  ;;  %v17286_v16 = vld [vmem:[#allocation2 + $0xc1] sm:$0xff] }
 0x42f   :  { %12308 = vrot.lane.b32.xlu0 %v17015_v13, %s12673_s21  ;;  %v7826_v20 = vsel %vm19198_vm5, %v7454_v27, %v7825_v58  ;;  %v3969_v28 = vmax.f32 %v3905_v61, 0.0  ;;  %v7966_v13 = vld [vmem:[#allocation2 + $0x81] sm:$0xff]  ;;  %v12352_v35 = vpack.i.bf16 %v17273_v41, %v7935_v54  ;;  %v12347_v58 = vpack.i.bf16 %v7920_v10, %v7919_v32 }
 0x430   :  { %7889 = vst.msk [vmem:[#allocation2 + $0xd1] sm:$0xff] %vm7190_vm11, %v7826_v20  ;;  %v4818_v26 = vcombine.high %v3970_v51, %v3970_v51  ;;  %v4825_v43 = vrot.slane %v3970_v51, %v13627_v50  ;;  %v17258_v56 = vpop.permute.xlu1 %1325  ;;  %v12327_v38 = vpack.i.bf16 %v7966_v13, %v16979_v22  ;;  %v12342_v5 = vpack.i.bf16 %v8015_v33, %v7966_v13  ;;  %v19199_v13 = vld [vmem:[#allocation8_spill] sm:$0xff] }
 0x431   :  { %v4801_v1 = vcombine.high %v3969_v28, %v3969_v28  ;;  %v4808_v49 = vrot.slane %v3969_v28, %v13627_v50  ;;  %v12337_v22 = vpack.i.bf16 %v7999_v36, %v7950_v14  ;;  %v110_v14 = vld [vmem:[%s19070_s0 + $0x2f0] sm:$0xff]  ;;  %v2736_v51 = vsel %vm2677_vm1, %v109_v40, %v16916_v55 }
 0x432   :  { %12323 = vrot.lane.b32.xlu1 %v12322_v48, %s12670_s26  ;;  %v4832_v62 = vrot.slane %v4818_v26, %v13627_v50  ;;  %v6658_v4 = vsel %vm5397_vm10, %v4825_v43, -inf  ;;  %v4833_v47 = vcombine.high %v4825_v43, %v4825_v43  ;;  %v17261_v17 = vpop.permute.xlu0 %1071  ;;  %v7952_v48 = vld [vmem:[#allocation2 + $0xc0] sm:$0xff]  ;;  %v2801_v59 = vsel %vm2742_vm2, %v2736_v51, %v17003_v3 }
 0x433   :  { %12318 = vrot.lane.b32.xlu0 %v12317_v2, %s12667_s1  ;;  %v6659_v25 = vrot.slane %v6658_v4, 4  ;;  %v4815_v24 = vrot.slane %v4801_v1, %v13627_v50  ;;  %v4816_v12 = vcombine.high %v4808_v49, %v4808_v49  ;;  %v6630_v11 = vsel %vm5397_vm10, %v4808_v49, -inf }
 0x434   :  { %v4834_v29 = vcombine.high %v4832_v62, %v4832_v62  ;;  %v6665_v57 = vsel %vm5397_vm10, %v4833_v47, -inf  ;;  %v17268_v42 = vpop.permute.xlu1 %2345  ;;  %v6672_v0 = vsel %vm5397_vm10, %v4832_v62, -inf  ;;  %v6631_v61 = vrot.slane %v6630_v11, 4  ;;  %v7951_v47 = vld [vmem:[#allocation2 + $0xb0] sm:$0xff] }
 0x435   :  { %v6660_v31 = vmax.f32 %v6658_v4, %v6659_v25  ;;  %v6666_v8 = vrot.slane %v6665_v57, 4  ;;  %v4817_v45 = vcombine.high %v4815_v24, %v4815_v24  ;;  %v6644_v53 = vsel %vm5397_vm10, %v4815_v24, -inf }
 0x436   :  { %12333 = vrot.lane.b32.xlu1 %v12332_v30, %s12672_s17  ;;  %v17271_v44 = vpop.permute.xlu0 %2091  ;;  %v6679_v39 = vsel %vm5397_vm10, %v4834_v29, -inf  ;;  %v6673_v7 = vrot.slane %v6672_v0, 4  ;;  %v6637_v52 = vsel %vm5397_vm10, %v4816_v12, -inf  ;;  %v6645_v20 = vrot.slane %v6644_v53, 4  ;;  %v19200_v30 = vld [vmem:[#allocation9_spill] sm:$0xff] }
 0x437   :  { %12328 = vrot.lane.b32.xlu0 %v12327_v38, %s12669_s20  ;;  %v6680_v27 = vrot.slane %v6679_v39, 4  ;;  %v6661_v26 = vrot.slane %v6660_v31, 2  ;;  %v6667_v43 = vmax.f32 %v6665_v57, %v6666_v8  ;;  %v6651_v28 = vsel %vm5397_vm10, %v4817_v45, -inf  ;;  %v19201_v38 = vld [vmem:[#allocation10_spill] sm:$0xff] }
 0x438   :  { %v17283_v18 = vpop.permute.xlu1 %1581  ;;  %v12362_v2 = vpack.i.bf16 %v17286_v16, %v7920_v10  ;;  %v2737_v62 = vsel %vm2677_vm1, %v110_v14, %v19199_v13  ;;  %v6674_v55 = vmax.f32 %v6672_v0, %v6673_v7  ;;  %v6638_v4 = vrot.slane %v6637_v52, 4  ;;  %v17311_v0 = vld [vmem:[#allocation2 + $0xc2] sm:$0xff]  ;;  %v17335_v14 = vld [vmem:[#allocation2 + $0xd1] sm:$0xff] }
 0x439   :  { %v2866_v49 = vsel %vm2807_vm3, %v2801_v59, %v19200_v30  ;;  %v2802_v33 = vsel %vm2742_vm2, %v2737_v62, %v19201_v38  ;;  %v6681_v29 = vmax.f32 %v6679_v39, %v6680_v27  ;;  %v12357_v36 = vpack.i.bf16 %v7952_v48, %v7951_v47  ;;  %v17350_v62 = vld [vmem:[#allocation2 + $0xd2] sm:$0xff]  ;;  %v112_v30 = vld [vmem:[%s19070_s0 + $0x308] sm:$0xff] }
 0x43a   :  { %12343 = vrot.lane.b32.xlu1 %v12342_v5, %s12673_s21  ;;  %v17292_v60 = vpop.permute.xlu0 %1327  ;;  %vm19202_vm0 = vcmask 97280   ;;  %v6632_v3 = vmax.f32 %v6630_v11, %v6631_v61  ;;  %v6646_v57 = vmax.f32 %v6644_v53, %v6645_v20  ;;  %v6652_v5 = vrot.slane %v6651_v28, 4 }
 0x43b   :  { %12338 = vrot.lane.b32.xlu0 %v12337_v22, %s12671_s16  ;;  %v2931_v24 = vsel %vm19202_vm0, %v2866_v49, %v17136_v63  ;;  %v2867_v12 = vsel %vm2807_vm3, %v2802_v33, %v17139_v34  ;;  %vm19203_vm4 = vcmask 121856   ;;  %v6662_v54 = vmax.f32 %v6660_v31, %v6661_v26  ;;  %vm19204_vm5 = vmmov %vm19202_vm0 }
 0x43c   :  { %v2602_v1 = vpop.permute.xlu1 %2601  ;;  %v2996_v22 = vsel %vm19203_vm4, %v2931_v24, %v17207_v23  ;;  %v6668_v39 = vrot.slane %v6667_v43, 2  ;;  %v2932_v63 = vsel %vm19204_vm5, %v2867_v12, %v17178_v6  ;;  %v6675_v32 = vrot.slane %v6674_v55, 2  ;;  %vm19205_vm0 = vmmov %vm19203_vm4  ;;  %v17332_v6 = vld [vmem:[#allocation2 + $0xd0] sm:$0xff] }
 0x43d   :  { %v6639_v10 = vmax.f32 %v6637_v52, %v6638_v4  ;;  %v3061_v40 = vsel %vm3002_vm6, %v2996_v22, %v17246_v37  ;;  %v6682_v45 = vrot.slane %v6681_v29, 2  ;;  %v2997_v34 = vsel %vm19205_vm0, %v2932_v63, %v17251_v46  ;;  %vm19206_vm4 = vmmov %vm19204_vm5 }
 0x43e   :  { %12353 = vrot.lane.b32.xlu1 %v12352_v35, %s12667_s1  ;;  %v2348_v25 = vpop.permute.xlu0 %2347  ;;  %v3126_v23 = vsel %vm3067_vm7, %v3061_v40, %v17268_v42  ;;  %v12367_v11 = vpack.i.bf16 %v17311_v0, %v17273_v41  ;;  %v6633_v53 = vrot.slane %v6632_v3, 2  ;;  %v6647_v7 = vrot.slane %v6646_v57, 2  ;;  %vm19207_vm5 = vmmov %vm19206_vm4 }
 0x43f   :  { %12348 = vrot.lane.b32.xlu0 %v12347_v58, %s12668_s19  ;;  %v6653_v35 = vmax.f32 %v6651_v28, %v6652_v5  ;;  %v3191_v37 = vsel %vm3132_vm8, %v3126_v23, %v2602_v1  ;;  %v6663_v27 = vrot.slane %v6662_v54, 1  ;;  %v6669_v52 = vmax.f32 %v6667_v43, %v6668_v39 }
 0x440   :  { %v17322_v8 = vpop.permute.xlu1 %1583  ;;  %v3062_v46 = vsel %vm3002_vm6, %v2997_v34, %v17271_v44  ;;  %12111 = vmatprep.mubr.msk.f32.mxu0 %vm3201_vm9, %v3191_v37  ;;  %v6676_v42 = vmax.f32 %v6674_v55, %v6675_v32  ;;  %v6640_v41 = vrot.slane %v6639_v10, 2  ;;  %v12372_v51 = vpack.i.bf16 %v17332_v6, %v7952_v48  ;;  %v111_v48 = vld [vmem:[%s19070_s0 + $0x300] sm:$0xff] }
 0x441   :  { %v3127_v58 = vsel %vm3067_vm7, %v3062_v46, %v2348_v25  ;;  %v6683_v20 = vmax.f32 %v6681_v29, %v6682_v45  ;;  %v12377_v43 = vpack.i.bf16 %v17335_v14, %v17286_v16  ;;  %v6634_v44 = vmax.f32 %v6632_v3, %v6633_v53  ;;  %v17359_v16 = vld [vmem:[%s19072_s2] ss:$0 sm:$0xff] }
 0x442   :  { %12363 = vrot.lane.b32.xlu1 %v12362_v2, %s12669_s20  ;;  %v17328_v31 = vpop.permute.xlu0 %817  ;;  %v6648_v2 = vmax.f32 %v6646_v57, %v6647_v7  ;;  %v6654_v59 = vrot.slane %v6653_v35, 2  ;;  %v6664_v4 = vmax.f32 %v6662_v54, %v6663_v27  ;;  %v6670_v1 = vrot.slane %v6669_v52, 1  ;;  %v17370_v25 = vld [vmem:[%s19073_s3] ss:$0 sm:$0xff] }
 0x443   :  { %12358 = vrot.lane.b32.xlu0 %v12357_v36, %s12670_s26  ;;  %v6677_v47 = vrot.slane %v6676_v42, 1  ;;  %v6641_v49 = vmax.f32 %v6639_v10, %v6640_v41  ;;  %v6684_v29 = vrot.slane %v6683_v20, 1  ;;  %v12387_v57 = vpack.i.bf16 %v17350_v62, %v17311_v0 }
 0x444   :  { %v2604_v61 = vpop.permute.xlu1 %2603  ;;  %v2738_v5 = vsel %vm2677_vm1, %v111_v48, %v17181_v19  ;;  %v6635_v12 = vrot.slane %v6634_v44, 1  ;;  %v6649_v22 = vrot.slane %v6648_v2, 1  ;;  %v6655_v54 = vmax.f32 %v6653_v35, %v6654_v59 }
 0x445   :  { %v3192_v26 = vsel %vm3132_vm8, %v3127_v58, %v2604_v61  ;;  %v2803_v39 = vsel %vm2742_vm2, %v2738_v5, %v17231_v9  ;;  %v2739_v63 = vsel %vm2677_vm1, %v112_v30, %v17235_v21  ;;  %v17387_v0 = vmax.f32 %v6669_v52, %v6670_v1 }
 0x446   :  { %v17344_v28 = vpop.permute.xlu0 %1837  ;;  %12373 = vrot.lane.b32.xlu1 %v12372_v51, %s12671_s16  ;;  %12112 = vmatmul.mubr.msk.f32.gmra.mxu0 %vm3201_vm9, %v3192_v26  ;;  %v12095_v13 = vpop.f32.mrf.mxu0  ;;  %v17389_v40 = vmax.f32 %v6676_v42, %v6677_v47  ;;  %v17392_v19 = vsel %vm7190_vm11, %v6664_v4, -inf  ;;  %v6642_v45 = vrot.slane %v6641_v49, 1  ;;  %v17396_v23 = vmax.f32 %v6683_v20, %v6684_v29 }
 0x447   :  { %12368 = vrot.lane.b32.xlu0 %v12367_v11, %s12672_s17  ;;  %v3837_v55 = vmul.f32 %v17359_v16, %v12095_v13  ;;  %v6636_v7 = vmax.f32 %v6634_v44, %v6635_v12  ;;  %v6650_v35 = vmax.f32 %v6648_v2, %v6649_v22  ;;  %v6656_v37 = vrot.slane %v6655_v54, 1 }
 0x448   :  { %v17365_v38 = vpop.permute.xlu1 %1073  ;;  %v3694_v33 = vpop.f32.mrf.mxu0  ;;  %v2868_v27 = vsel %vm2807_vm3, %v2803_v39, %v17258_v56  ;;  %v6643_v58 = vmax.f32 %v6641_v49, %v6642_v45  ;;  %v2804_v51 = vsel %vm2742_vm2, %v2739_v63, %v17261_v17 }
 0x449   :  { %v3908_v36 = vadd.f32 %v17370_v25, %v3837_v55  ;;  %v3836_v3 = vmul.f32 %v17359_v16, %v3694_v33 }
 0x44a   :  { %v17373_v24 = vpop.permute.xlu0 %819  ;;  %12383 = vrot.lane.b32.xlu1 %v12377_v43, %s12668_s19 }
 0x44b   :  { %12378 = vrot.lane.b32.xlu0 %v12377_v43, %s12673_s21  ;;  %v3972_v32 = vmax.f32 %v3908_v36, 0.0  ;;  %v3907_v10 = vadd.f32 %v17370_v25, %v3836_v3 }
 0x44c   :  { %v17394_v34 = vpop.permute.xlu1 %2093 }
 0x44d   :  { %v4852_v9 = vcombine.high %v3972_v32, %v3972_v32  ;;  %v4859_v21 = vrot.slane %v3972_v32, %v13627_v50  ;;  %v3971_v11 = vmax.f32 %v3907_v10, 0.0 }
 0x44e   :  { %v17399_v53 = vpop.permute.xlu0 %1839 }
 0x44f   :  { %12388 = vrot.lane.b32.xlu0 %v12387_v57, %s12667_s1  ;;  %v4866_v52 = vrot.slane %v4852_v9, %v13627_v50  ;;  %v4867_v46 = vcombine.high %v4859_v21, %v4859_v21  ;;  %v6714_v42 = vsel %vm5397_vm10, %v4859_v21, -inf  ;;  %v4835_v41 = vcombine.high %v3971_v11, %v3971_v11 }
 0x450   :  { %v6715_v61 = vrot.slane %v6714_v42, 4  ;;  %v4842_v20 = vrot.slane %v3971_v11, %v13627_v50  ;;  %v17408_v26 = vpop.permute.xlu1 %1329 }
 0x451   :  { %v4868_v43 = vcombine.high %v4866_v52, %v4866_v52  ;;  %v6721_v44 = vsel %vm5397_vm10, %v4867_v46, -inf  ;;  %v6728_v56 = vsel %vm5397_vm10, %v4866_v52, -inf  ;;  %v4849_v2 = vrot.slane %v4835_v41, %v13627_v50 }
 0x452   :  { %v17413_v59 = vpop.permute.xlu0 %1075  ;;  %v6716_v13 = vmax.f32 %v6714_v42, %v6715_v61  ;;  %v6722_v48 = vrot.slane %v6721_v44, 4  ;;  %v6729_v55 = vrot.slane %v6728_v56, 4  ;;  %v4850_v4 = vcombine.high %v4842_v20, %v4842_v20 }
 0x453   :  { %v6735_v17 = vsel %vm5397_vm10, %v4868_v43, -inf  ;;  %v4851_v1 = vcombine.high %v4849_v2, %v4849_v2  ;;  %v6686_v47 = vsel %vm5397_vm10, %v4842_v20, -inf  ;;  %v6700_v30 = vsel %vm5397_vm10, %v4849_v2, -inf }
 0x454   :  { %v6717_v49 = vrot.slane %v6716_v13, 2  ;;  %v6723_v33 = vmax.f32 %v6721_v44, %v6722_v48  ;;  %v6730_v29 = vmax.f32 %v6728_v56, %v6729_v55  ;;  %v6736_v36 = vrot.slane %v6735_v17, 4  ;;  %v17418_v3 = vpop.permute.xlu1 %2349 }
 0x455   :  { %v6687_v57 = vrot.slane %v6686_v47, 4  ;;  %v6693_v5 = vsel %vm5397_vm10, %v4850_v4, -inf  ;;  %v6701_v12 = vrot.slane %v6700_v30, 4  ;;  %v6707_v22 = vsel %vm5397_vm10, %v4851_v1, -inf }
 0x456   :  { %v17422_v39 = vpop.permute.xlu0 %2095  ;;  %v6718_v63 = vmax.f32 %v6716_v13, %v6717_v49  ;;  %v6724_v32 = vrot.slane %v6723_v33, 2  ;;  %v6731_v10 = vrot.slane %v6730_v29, 2  ;;  %v6737_v45 = vmax.f32 %v6735_v17, %v6736_v36 }
 0x457   :  { %v6688_v9 = vmax.f32 %v6686_v47, %v6687_v57  ;;  %v6694_v21 = vrot.slane %v6693_v5, 4  ;;  %v6702_v11 = vmax.f32 %v6700_v30, %v6701_v12  ;;  %v6708_v52 = vrot.slane %v6707_v22, 4 }
 0x458   :  { %v6657_v46 = vmax.f32 %v6655_v54, %v6656_v37  ;;  %v6725_v42 = vmax.f32 %v6723_v33, %v6724_v32  ;;  %v6732_v41 = vmax.f32 %v6730_v29, %v6731_v10  ;;  %v6738_v61 = vrot.slane %v6737_v45, 2  ;;  %v17424_v20 = vpop.permute.xlu1 %1585 }
 0x459   :  { %v6689_v43 = vrot.slane %v6688_v9, 2  ;;  %v6695_v44 = vmax.f32 %v6693_v5, %v6694_v21  ;;  %v6703_v56 = vrot.slane %v6702_v11, 2  ;;  %v6709_v2 = vmax.f32 %v6707_v22, %v6708_v52 }
 0x45a   :  { %v17426_v48 = vpop.permute.xlu0 %1331  ;;  %v7455_v13 = vsel %vm7190_vm11, %v6636_v7, -inf  ;;  %v17430_v55 = vsel %vm7190_vm11, %v6650_v35, -inf  ;;  %v6719_v4 = vrot.slane %v6718_v63, 1  ;;  %v6739_v17 = vmax.f32 %v6737_v45, %v6738_v61 }
 0x45b   :  { %v6690_v1 = vmax.f32 %v6688_v9, %v6689_v43  ;;  %v6696_v54 = vrot.slane %v6695_v44, 2  ;;  %v6704_v37 = vmax.f32 %v6702_v11, %v6703_v56  ;;  %v6710_v47 = vrot.slane %v6709_v2, 2 }
 0x45c   :  { %v7458_v30 = vsel %vm7190_vm11, %v6643_v58, -inf  ;;  %v2933_v49 = vsel %vm19206_vm4, %v2868_v27, %v17283_v18  ;;  %v2869_v33 = vsel %vm2807_vm3, %v2804_v51, %v17292_v60  ;;  %v6726_v29 = vrot.slane %v6725_v42, 1  ;;  %v2606_v36 = vpop.permute.xlu1 %2605  ;;  %vm19208_vm4 = vmmov %vm19205_vm0 }
 0x45d   :  { %v6733_v7 = vrot.slane %v6732_v41, 1  ;;  %v6691_v57 = vrot.slane %v6690_v1, 1  ;;  %v6697_v35 = vmax.f32 %v6695_v44, %v6696_v54  ;;  %v6705_v5 = vrot.slane %v6704_v37, 1 }
 0x45e   :  { %v2352_v12 = vpop.permute.xlu0 %2351  ;;  %v7464_v22 = vsel %vm7190_vm11, %v6657_v46, -inf  ;;  %v6720_v32 = vmax.f32 %v6718_v63, %v6719_v4  ;;  %v6740_v10 = vrot.slane %v6739_v17, 1  ;;  %v6711_v45 = vmax.f32 %v6709_v2, %v6710_v47 }
 0x45f   :  { %v2934_v58 = vsel %vm19207_vm5, %v2869_v33, %v17322_v8  ;;  %v2998_v18 = vsel %vm19205_vm0, %v2933_v49, %v17344_v28  ;;  %v6692_v27 = vmax.f32 %v6690_v1, %v6691_v57  ;;  %v6698_v60 = vrot.slane %v6697_v35, 1 }
 0x460   :  { %v6706_v51 = vmax.f32 %v6704_v37, %v6705_v5  ;;  %v6712_v9 = vrot.slane %v6711_v45, 1  ;;  %v3063_v21 = vsel %vm3002_vm6, %v2998_v18, %v17394_v34  ;;  %v2999_v11 = vsel %vm19208_vm4, %v2934_v58, %v17399_v53  ;;  %v17446_v52 = vpop.permute.xlu1 %1841 }
 0x461   :  { %v6727_v63 = vmax.f32 %v6725_v42, %v6726_v29  ;;  %v6734_v46 = vmax.f32 %v6732_v41, %v6733_v7  ;;  %v6699_v61 = vmax.f32 %v6697_v35, %v6698_v60  ;;  %v7456_v8 = vsel %vm7190_vm11, %v6692_v27, -inf  ;;  %v114_v35 = vld [vmem:[%s19070_s0 + $0x320] sm:$0xff] }
 0x462   :  { %v1588_v43 = vpop.permute.xlu0 %1587  ;;  %v6741_v44 = vmax.f32 %v6739_v17, %v6740_v10  ;;  %v7468_v28 = vsel %vm7190_vm11, %v6720_v32, -inf  ;;  %v6713_v56 = vmax.f32 %v6711_v45, %v6712_v9  ;;  %v7462_v2 = vsel %vm7190_vm11, %v6706_v51, -inf }
 0x463   :  { %v7457_v4 = vmax.f32 %v7455_v13, %v7456_v8  ;;  %v7459_v34 = vsel %vm7190_vm11, %v6699_v61, -inf  ;;  %v7463_v1 = vmax.f32 %v17430_v55, %v7462_v2  ;;  %v3128_v53 = vsel %vm3067_vm7, %v3063_v21, %v17418_v3  ;;  %v113_v13 = vld [vmem:[%s19070_s0 + $0x318] sm:$0xff] }
 0x464   :  { %v7460_v42 = vmax.f32 %v7458_v30, %v7459_v34  ;;  %v7465_v41 = vsel %vm7190_vm11, %v6713_v56, -inf  ;;  %v3064_v54 = vsel %vm3002_vm6, %v2999_v11, %v17422_v39  ;;  %v3193_v17 = vsel %vm3132_vm8, %v3128_v53, %v2606_v36  ;;  %v1844_v37 = vpop.permute.xlu1 %1843 }
 0x465   :  { %v7470_v47 = vsel %vm7190_vm11, %v17387_v0, -inf  ;;  %v7471_v55 = vsel %vm7190_vm11, %v6727_v63, -inf  ;;  %v7466_v49 = vmax.f32 %v7464_v22, %v7465_v41  ;;  %v3129_v3 = vsel %vm3067_vm7, %v3064_v54, %v2352_v12  ;;  %12114 = vmatprep.mubr.msk.f32.mxu0 %vm3201_vm9, %v3193_v17 }
 0x466   :  { %v2608_v30 = vpop.permute.xlu0 %2607  ;;  %v7473_v39 = vsel %vm7190_vm11, %v17389_v40, -inf  ;;  %v7474_v33 = vsel %vm7190_vm11, %v6734_v46, -inf  ;;  %v7827_v29 = vsel %vm7743_vm12, %v7460_v42, %v7457_v4  ;;  %v7469_v7 = vmax.f32 %v17392_v19, %v7468_v28 }
 0x467   :  { %v3194_v0 = vsel %vm3132_vm8, %v3129_v3, %v2608_v30  ;;  %v12098_v36 = vpop.f32.mrf.mxu0  ;;  %v7477_v57 = vsel %vm7190_vm11, %v6741_v44, -inf  ;;  %v7828_v5 = vsel %vm7745_vm13, %v7463_v1, %v7827_v29  ;;  %v7476_v40 = vsel %vm7190_vm11, %v17396_v23, -inf }
 0x468   :  { %v3839_v12 = vmul.f32 %v17359_v16, %v12098_v36  ;;  %12115 = vmatmul.mubr.msk.f32.gmra.mxu0 %vm3201_vm9, %v3194_v0  ;;  %v2740_v22 = vsel %vm2677_vm1, %v113_v13, %v17328_v31  ;;  %v7472_v32 = vmax.f32 %v7470_v47, %v7471_v55  ;;  %v7829_v19 = vsel %vm7747_vm14, %v7466_v49, %v7828_v5  ;;  %v2100_v10 = vpop.permute.xlu1 %2099 }
 0x469   :  { %v3704_v45 = vpop.f32.mrf.mxu0  ;;  %v7475_v58 = vmax.f32 %v7473_v39, %v7474_v33  ;;  %v7830_v18 = vsel %vm7749_vm15, %v7469_v7, %v7829_v19  ;;  %v7478_v9 = vmax.f32 %v7476_v40, %v7477_v57  ;;  %v2805_v23 = vsel %vm2742_vm2, %v2740_v22, %v17365_v38 }
 0x46a   :  { %v3910_v27 = vadd.f32 %v17370_v25, %v3839_v12  ;;  %v17487_v60 = vpop.permute.xlu0 %2097  ;;  %v3838_v51 = vmul.f32 %v17359_v16, %v3704_v45  ;;  %v2741_v31 = vsel %vm2677_vm1, %v114_v35, %v17373_v24  ;;  %vm19209_vm5 = vcmask 1045509  }
 0x46b   :  { %v7831_v21 = vsel %vm19209_vm5, %v7472_v32, %v7830_v18  ;;  %vm19210_vm0 = vcmask 1046534   ;;  %v2806_v63 = vsel %vm2742_vm2, %v2741_v31, %v17413_v59  ;;  %vm19211_vm4 = vcmask 1047559  }
 0x46c   :  { %v7832_v11 = vsel %vm19210_vm0, %v7475_v58, %v7831_v21  ;;  %v3974_v46 = vmax.f32 %v3910_v27, 0.0  ;;  %v3909_v61 = vadd.f32 %v17370_v25, %v3838_v51  ;;  %v2870_v44 = vsel %vm2807_vm3, %v2805_v23, %v17408_v26  ;;  %v17504_v28 = vpop.permute.xlu1 %2355 }
 0x46d   :  { %v7833_v8 = vsel %vm19211_vm4, %v7478_v9, %v7832_v11  ;;  %v2871_v38 = vsel %vm2807_vm3, %v2806_v63, %v17426_v48  ;;  %vm19212_vm1 = vcmask 97280   ;;  %vm19214_vm5 = vcmask 121856  }
 0x46e   :  { %7890 = vst.msk [vmem:[#allocation2 + $0xe1] sm:$0xff] %vm7190_vm11, %v7833_v8  ;;  %v2936_v24 = vsel %vm19212_vm1, %v2871_v38, %v1588_v43  ;;  %v4886_v56 = vcombine.high %v3974_v46, %v3974_v46  ;;  %v4893_v59 = vrot.slane %v3974_v46, %v13627_v50  ;;  %v3973_v2 = vmax.f32 %v3909_v61, 0.0  ;;  %v17509_v4 = vpop.permute.xlu0 %2353  ;;  %vm19213_vm2 = vmmov %vm19212_vm1 }
 0x46f   :  { %v2935_v34 = vsel %vm19213_vm2, %v2870_v44, %v17424_v20  ;;  %v3001_v26 = vsel %vm19214_vm5, %v2936_v24, %v1844_v37  ;;  %vm19215_vm3 = vmmov %vm19214_vm5  ;;  %vm8504_vm0 = vcmask 261120   ;;  %vm8521_vm4 = vcmask 392192  }
 0x470   :  { %v4900_v1 = vrot.slane %v4886_v56, %v13627_v50  ;;  %v4901_v48 = vcombine.high %v4893_v59, %v4893_v59  ;;  %v6770_v53 = vsel %vm5397_vm10, %v4893_v59, -inf  ;;  %v4869_v42 = vcombine.high %v3973_v2, %v3973_v2  ;;  %v17522_v47 = vpop.permute.xlu1 %2611 }
 0x471   :  { %v3000_v43 = vsel %vm19215_vm3, %v2935_v34, %v17446_v52  ;;  %v6771_v41 = vrot.slane %v6770_v53, 4  ;;  %v17519_v54 = vsel %vm3002_vm6, %v3001_v26, %v2100_v10  ;;  %v4876_v17 = vrot.slane %v3973_v2, %v13627_v50 }
 0x472   :  { %v4902_v20 = vcombine.high %v4900_v1, %v4900_v1  ;;  %v6777_v37 = vsel %vm5397_vm10, %v4901_v48, -inf  ;;  %v6784_v13 = vsel %vm5397_vm10, %v4900_v1, -inf  ;;  %v4883_v55 = vrot.slane %v4869_v42, %v13627_v50  ;;  %v17527_v49 = vpop.permute.xlu0 %2609 }
 0x473   :  { %v6772_v3 = vmax.f32 %v6770_v53, %v6771_v41  ;;  %v6778_v30 = vrot.slane %v6777_v37, 4  ;;  %v6785_v52 = vrot.slane %v6784_v13, 4  ;;  %v4884_v39 = vcombine.high %v4876_v17, %v4876_v17 }
 0x474   :  { %v6791_v33 = vsel %vm5397_vm10, %v4902_v20, -inf  ;;  %v4885_v29 = vcombine.high %v4883_v55, %v4883_v55  ;;  %v6742_v0 = vsel %vm5397_vm10, %v4876_v17, -inf  ;;  %v6756_v36 = vsel %vm5397_vm10, %v4883_v55, -inf  ;;  %v17532_v12 = vpop.permute.xlu1 %12213 }
 0x475   :  { %v6773_v7 = vrot.slane %v6772_v3, 2  ;;  %v6779_v57 = vmax.f32 %v6777_v37, %v6778_v30  ;;  %v6786_v35 = vmax.f32 %v6784_v13, %v6785_v52  ;;  %v6792_v5 = vrot.slane %v6791_v33, 4 }
 0x476   :  { %v6743_v40 = vrot.slane %v6742_v0, 4  ;;  %v6749_v22 = vsel %vm5397_vm10, %v4884_v39, -inf  ;;  %v6757_v32 = vrot.slane %v6756_v36, 4  ;;  %v6763_v19 = vsel %vm5397_vm10, %v4885_v29, -inf  ;;  %v17536_v10 = vpop.permute.xlu0 %12208 }
 0x477   :  { %v6774_v45 = vmax.f32 %v6772_v3, %v6773_v7  ;;  %v6780_v58 = vrot.slane %v6779_v57, 2  ;;  %v6787_v18 = vrot.slane %v6786_v35, 2  ;;  %v6793_v27 = vmax.f32 %v6791_v33, %v6792_v5 }
 0x478   :  { %v6744_v51 = vmax.f32 %v6742_v0, %v6743_v40  ;;  %v6750_v9 = vrot.slane %v6749_v22, 4  ;;  %v6758_v23 = vmax.f32 %v6756_v36, %v6757_v32  ;;  %v6764_v31 = vrot.slane %v6763_v19, 4  ;;  %v17538_v61 = vpop.permute.xlu1 %12223 }
 0x479   :  { %v6775_v21 = vrot.slane %v6774_v45, 1  ;;  %v6781_v11 = vmax.f32 %v6779_v57, %v6780_v58  ;;  %v6788_v63 = vmax.f32 %v6786_v35, %v6787_v18  ;;  %v6794_v46 = vrot.slane %v6793_v27, 2  ;;  %v17555_v57 = vld [vmem:[#allocation2 + $0xe1] sm:$0xff] }
 0x47a   :  { %v6745_v8 = vrot.slane %v6744_v51, 2  ;;  %v6751_v44 = vmax.f32 %v6749_v22, %v6750_v9  ;;  %v6759_v38 = vrot.slane %v6758_v23, 2  ;;  %v6765_v24 = vmax.f32 %v6763_v19, %v6764_v31  ;;  %v17540_v56 = vpop.permute.xlu0 %12218  ;;  %v17557_v35 = vld [vmem:[#allocation2 + $0xe0] sm:$0xff] }
 0x47b   :  { %v6782_v59 = vrot.slane %v6781_v11, 1  ;;  %v6789_v2 = vrot.slane %v6788_v63, 1  ;;  %v6795_v34 = vmax.f32 %v6793_v27, %v6794_v46  ;;  %v3065_v26 = vsel %vm3002_vm6, %v3000_v43, %v17487_v60  ;;  %v17585_v9 = vld [vmem:[#allocation2 + $0xe2] sm:$0xff] }
 0x47c   :  { %v6746_v1 = vmax.f32 %v6744_v51, %v6745_v8  ;;  %v6752_v48 = vrot.slane %v6751_v44, 2  ;;  %v6760_v53 = vmax.f32 %v6758_v23, %v6759_v38  ;;  %v6766_v42 = vrot.slane %v6765_v24, 2 }
 0x47d   :  { %v6776_v41 = vmax.f32 %v6774_v45, %v6775_v21  ;;  %v6783_v17 = vmax.f32 %v6781_v11, %v6782_v59  ;;  %v6790_v20 = vmax.f32 %v6788_v63, %v6789_v2  ;;  %v6796_v37 = vrot.slane %v6795_v34, 1  ;;  %v17544_v13 = vpop.permute.xlu1 %12233  ;;  %v7895_v45 = vld [vmem:[#allocation2] sm:$0xff]  ;;  %v7896_v21 = vld [vmem:[#allocation2 + $0x10] sm:$0xff] }
 0x47e   :  { %v6747_v55 = vrot.slane %v6746_v1, 1  ;;  %v6753_v3 = vmax.f32 %v6751_v44, %v6752_v48  ;;  %v6761_v30 = vrot.slane %v6760_v53, 1  ;;  %v6767_v52 = vmax.f32 %v6765_v24, %v6766_v42  ;;  %v17546_v39 = vpop.permute.xlu0 %12228 }
 0x47f   :  { %vm8538_vm1 = vcmask 523264   ;;  %v6797_v60 = vmax.f32 %v6795_v34, %v6796_v37  ;;  %v3131_v43 = vsel %vm3067_vm7, %v17519_v54, %v17504_v28  ;;  %v3130_v33 = vsel %vm3067_vm7, %v3065_v26, %v17509_v4 }
 0x480   :  { %vm8555_vm6 = vcmask 654336   ;;  %v6748_v29 = vmax.f32 %v6746_v1, %v6747_v55  ;;  %v6754_v0 = vrot.slane %v6753_v3, 1  ;;  %v6768_v36 = vrot.slane %v6767_v52, 1 }
 0x481   :  { %v3196_v7 = vsel %vm3132_vm8, %v3131_v43, %v17522_v47  ;;  %vm8572_vm2 = vcmask 785408   ;;  %v17560_v5 = vsel %vm7190_vm11, %v6776_v41, -inf  ;;  %v17563_v28 = vsel %vm7190_vm11, %v6783_v17, -inf  ;;  %v12244_v40 = vpop.permute.xlu1 %12243  ;;  %v7898_v41 = vld [vmem:[#allocation2 + $0x30] sm:$0xff] }
 0x482   :  { %v17566_v4 = vsel %vm7190_vm11, %v6790_v20, -inf  ;;  %v3195_v54 = vsel %vm3132_vm8, %v3130_v33, %v17527_v49  ;;  %vm8589_vm7 = vcmask 916480   ;;  %v17571_v47 = vsel %vm7190_vm11, %v6797_v60, -inf  ;;  %v17576_v58 = vpop.permute.xlu0 %12238 }
 0x483   :  { %v6762_v22 = vmax.f32 %v6760_v53, %v6761_v30  ;;  %12117 = vmatprep.mubr.msk.f32.mxu0 %vm3201_vm9, %v3195_v54  ;;  %v12216_v32 = vunpack.i.h.bf16 %v17532_v12  ;;  %v12215_v19 = vunpack.i.l.bf16 %v17532_v12  ;;  %v12211_v18 = vunpack.i.h.bf16 %v17536_v10 }
 0x484   :  { %12118 = vmatmul.mubr.msk.f32.gmra.mxu0 %vm3201_vm9, %v3196_v7  ;;  %v12210_v49 = vunpack.i.l.bf16 %v17536_v10  ;;  %v12397_v27 = vpack.i.bf16 %v17555_v57, %v17335_v14  ;;  %v12392_v51 = vpack.i.bf16 %v17557_v35, %v17332_v6  ;;  %v6755_v23 = vmax.f32 %v6753_v3, %v6754_v0  ;;  %v7897_v3 = vld [vmem:[#allocation2 + $0x20] sm:$0xff] }
 0x485   :  { %v6769_v31 = vmax.f32 %v6767_v52, %v6768_v36  ;;  %v17588_v12 = vsel %vm7190_vm11, %v6748_v29, -inf  ;;  %v12225_v11 = vunpack.i.l.bf16 %v17538_v61  ;;  %v8489_v10 = vsel %vm7190_vm11, %v7896_v21, %v12211_v18  ;;  %v12254_v46 = vpop.permute.xlu1 %12253 }
 0x486   :  { %v8488_v63 = vsel %vm7190_vm11, %v7895_v45, %v12210_v49  ;;  %12398 = vrot.lane.b32.xlu0 %v12397_v27, %s12669_s20  ;;  %12393 = vrot.lane.b32.xlu1 %v12392_v51, %s12670_s26  ;;  %v12221_v6 = vunpack.i.h.bf16 %v17540_v56  ;;  %v12220_v14 = vunpack.i.l.bf16 %v17540_v56  ;;  %v12226_v8 = vunpack.i.h.bf16 %v17538_v61  ;;  %v12101_v42 = vpop.f32.mrf.mxu0  ;;  %v8025_v45 = vld [vmem:[#allocation2 + $0x32] sm:$0xff] }
 0x487   :  { %v8505_v44 = vsel %vm8504_vm0, %v8488_v63, %v12215_v19  ;;  %v8506_v38 = vsel %vm8504_vm0, %v8489_v10, %v12216_v32  ;;  %v12402_v24 = vpack.i.bf16 %v17585_v9, %v17350_v62  ;;  %v12231_v26 = vunpack.i.h.bf16 %v17546_v39 }
 0x488   :  { %v12249_v59 = vpop.permute.xlu0 %12248  ;;  %v8523_v2 = vsel %vm8521_vm4, %v8506_v38, %v12221_v6  ;;  %v8522_v34 = vsel %vm8521_vm4, %v8505_v44, %v12220_v14  ;;  %v12230_v1 = vunpack.i.l.bf16 %v17546_v39  ;;  %v12236_v56 = vunpack.i.h.bf16 %v17544_v13  ;;  %v3714_v32 = vpop.f32.mrf.mxu0 }
 0x489   :  { %v12235_v61 = vunpack.i.l.bf16 %v17544_v13  ;;  %v12240_v48 = vunpack.i.l.bf16 %v17576_v58  ;;  %v12246_v53 = vunpack.i.h.bf16 %v12244_v40  ;;  %v12245_v62 = vunpack.i.l.bf16 %v12244_v40  ;;  %v17611_v55 = vpop.permute.xlu1 %12263 }
 0x48a   :  { %12403 = vrot.lane.b32.xlu1 %v12402_v24, %s12672_s17  ;;  %v8539_v17 = vsel %vm8538_vm1, %v8522_v34, %v12225_v11  ;;  %v12251_v20 = vunpack.i.h.bf16 %v12249_v59  ;;  %v12250_v37 = vunpack.i.l.bf16 %v12249_v59  ;;  %v12256_v13 = vunpack.i.h.bf16 %v12254_v46  ;;  %v8026_v34 = vld [vmem:[#allocation2 + $0x42] sm:$0xff] }
 0x48b   :  { %v8491_v30 = vsel %vm7190_vm11, %v7898_v41, %v12246_v53  ;;  %v8556_v52 = vsel %vm8555_vm6, %v8539_v17, %v12230_v1  ;;  %v12255_v39 = vunpack.i.l.bf16 %v12254_v46  ;;  %v8490_v43 = vsel %vm7190_vm11, %v7897_v3, %v12245_v62 }
 0x48c   :  { %v12259_v60 = vpop.permute.xlu0 %12258  ;;  %v8573_v33 = vsel %vm8572_vm2, %v8556_v52, %v12235_v61  ;;  %v8508_v29 = vsel %vm8504_vm0, %v8491_v30, %v12251_v20  ;;  %v3841_v0 = vmul.f32 %v17359_v16, %v12101_v42  ;;  %v12241_v36 = vunpack.i.h.bf16 %v17576_v58 }
 0x48d   :  { %v8590_v7 = vsel %vm8589_vm7, %v8573_v33, %v12240_v48  ;;  %v8507_v54 = vsel %vm8504_vm0, %v8490_v43, %v12250_v37  ;;  %v8540_v40 = vsel %vm8538_vm1, %v8523_v2, %v12226_v8  ;;  %v17624_v19 = vsel %vm7190_vm11, %v6762_v22, -inf  ;;  %v17628_v51 = vpop.permute.xlu1 %12273 }
 0x48e   :  { %8737 = vmatmul.mubr.f32.vlgmr.msra.gmra.mxu1 %v8590_v7  ;;  %v3912_v18 = vadd.f32 %v17370_v25, %v3841_v0  ;;  %v8557_v49 = vsel %vm8555_vm6, %v8540_v40, %v12231_v26  ;;  %v12261_v27 = vunpack.i.h.bf16 %v12259_v60  ;;  %v17631_v58 = vsel %vm7190_vm11, %v6755_v23, -inf }
 0x48f   :  { %v17634_v21 = vsel %vm7190_vm11, %v6769_v31, -inf  ;;  %v8525_v11 = vsel %vm8521_vm4, %v8508_v29, %v12256_v13  ;;  %11773 = vmatprep.mubr.msk.f32.mxu1 %vm7190_vm11, %v8025_v45  ;;  %v12260_v22 = vunpack.i.l.bf16 %v12259_v60  ;;  %v8524_v10 = vsel %vm8521_vm4, %v8507_v54, %v12255_v39 }
 0x490   :  { %v17638_v63 = vpop.permute.xlu0 %12268  ;;  %v3976_v6 = vmax.f32 %v3912_v18, 0.0  ;;  %v8574_v14 = vsel %vm8572_vm2, %v8557_v49, %v12236_v56  ;;  %v3840_v46 = vmul.f32 %v17359_v16, %v3714_v32  ;;  %v8542_v8 = vsel %vm8538_vm1, %v8525_v11, %v12261_v27 }
 0x491   :  { %v8591_v23 = vsel %vm8589_vm7, %v8574_v14, %v12241_v36  ;;  %v12266_v31 = vunpack.i.h.bf16 %v17611_v55  ;;  %v12265_v44 = vunpack.i.l.bf16 %v17611_v55  ;;  %v8541_v59 = vsel %vm8538_vm1, %v8524_v10, %v12260_v22 }
 0x492   :  { %v4920_v38 = vcombine.high %v3976_v6, %v3976_v6  ;;  %v4927_v24 = vrot.slane %v3976_v6, %v13627_v50  ;;  %8742 = vmatmul.mubr.f32.gmra.mxu1 %v8591_v23  ;;  %v3911_v2 = vadd.f32 %v17370_v25, %v3840_v46  ;;  %v12276_v16 = vunpack.i.h.bf16 %v17628_v51 }
 0x493   :  { %11774 = vmatprep.mubr.msk.f32.mxu1 %vm7190_vm11, %v8026_v34  ;;  %v12275_v1 = vunpack.i.l.bf16 %v17628_v51  ;;  %v12271_v56 = vunpack.i.h.bf16 %v17638_v63  ;;  %v12270_v61 = vunpack.i.l.bf16 %v17638_v63  ;;  %v8558_v37 = vsel %vm8555_vm6, %v8541_v59, %v12265_v44  ;;  %v8028_v63 = vld [vmem:[#allocation2 + $0x62] sm:$0xff] }
 0x494   :  { %v17650_v26 = vpop.permute.xlu1 %12283  ;;  %v17657_v48 = vpop.permute.xlu0 %12278  ;;  %v4934_v53 = vrot.slane %v4920_v38, %v13627_v50  ;;  %v4935_v42 = vcombine.high %v4927_v24, %v4927_v24  ;;  %v6826_v25 = vsel %vm5397_vm10, %v4927_v24, -inf  ;;  %v3975_v62 = vmax.f32 %v3911_v2, 0.0 }
 0x495   :  { %v6827_v41 = vrot.slane %v6826_v25, 4  ;;  %v12286_v17 = vunpack.i.h.bf16 %v17650_v26  ;;  %v12285_v20 = vunpack.i.l.bf16 %v17650_v26  ;;  %v12280_v7 = vunpack.i.l.bf16 %v17657_v48 }
 0x496   :  { %v4936_v55 = vcombine.high %v4934_v53, %v4934_v53  ;;  %v6833_v3 = vsel %vm5397_vm10, %v4935_v42, -inf  ;;  %v6840_v30 = vsel %vm5397_vm10, %v4934_v53, -inf  ;;  %v4903_v52 = vcombine.high %v3975_v62, %v3975_v62 }
 0x497   :  { %v6828_v39 = vmax.f32 %v6826_v25, %v6827_v41  ;;  %v6834_v60 = vrot.slane %v6833_v3, 4  ;;  %v6841_v43 = vrot.slane %v6840_v30, 4  ;;  %v4910_v33 = vrot.slane %v3975_v62, %v13627_v50 }
 0x498   :  { %v17666_v13 = vpop.permute.xlu1 %12293  ;;  %v6847_v0 = vsel %vm5397_vm10, %v4936_v55, -inf  ;;  %v4917_v36 = vrot.slane %v4903_v52, %v13627_v50  ;;  %v17675_v54 = vsel %vm8555_vm6, %v8542_v8, %v12266_v31  ;;  %vm19216_vm8 = vcmask 1045509  }
 0x499   :  { %v17669_v29 = vpop.permute.xlu0 %12288  ;;  %v6829_v40 = vrot.slane %v6828_v39, 2  ;;  %v6835_v32 = vmax.f32 %v6833_v3, %v6834_v60  ;;  %v6842_v45 = vmax.f32 %v6840_v30, %v6841_v43  ;;  %v6848_v18 = vrot.slane %v6847_v0, 4  ;;  %vm19219_vm3 = vmmov %vm19216_vm8 }
 0x49a   :  { %v4918_v49 = vcombine.high %v4910_v33, %v4910_v33  ;;  %v4919_v27 = vcombine.high %v4917_v36, %v4917_v36  ;;  %v6798_v11 = vsel %vm5397_vm10, %v4910_v33, -inf  ;;  %v6812_v22 = vsel %vm5397_vm10, %v4917_v36, -inf }
 0x49b   :  { %v6830_v10 = vmax.f32 %v6828_v39, %v6829_v40  ;;  %v6836_v6 = vrot.slane %v6835_v32, 2  ;;  %v6843_v14 = vrot.slane %v6842_v45, 2  ;;  %v6849_v46 = vmax.f32 %v6847_v0, %v6848_v18 }
 0x49c   :  { %v6799_v44 = vrot.slane %v6798_v11, 4  ;;  %v6805_v8 = vsel %vm5397_vm10, %v4918_v49, -inf  ;;  %v6813_v31 = vrot.slane %v6812_v22, 4  ;;  %v6819_v38 = vsel %vm5397_vm10, %v4919_v27, -inf  ;;  %v17683_v24 = vpop.permute.xlu1 %12303 }
 0x49d   :  { %v17679_v23 = vpop.permute.xlu0 %12298  ;;  %v6831_v59 = vrot.slane %v6830_v10, 1  ;;  %v6837_v2 = vmax.f32 %v6835_v32, %v6836_v6  ;;  %v6844_v34 = vmax.f32 %v6842_v45, %v6843_v14  ;;  %v6850_v53 = vrot.slane %v6849_v46, 2 }
 0x49e   :  { %v6800_v42 = vmax.f32 %v6798_v11, %v6799_v44  ;;  %v6806_v25 = vrot.slane %v6805_v8, 4  ;;  %v6814_v62 = vmax.f32 %v6812_v22, %v6813_v31  ;;  %v6820_v41 = vrot.slane %v6819_v38, 4 }
 0x49f   :  { %v6832_v55 = vmax.f32 %v6830_v10, %v6831_v59  ;;  %v6838_v3 = vrot.slane %v6837_v2, 1  ;;  %v6845_v30 = vrot.slane %v6844_v34, 1  ;;  %v6851_v52 = vmax.f32 %v6849_v46, %v6850_v53 }
 0x4a0   :  { %v6801_v39 = vrot.slane %v6800_v42, 2  ;;  %v6807_v60 = vmax.f32 %v6805_v8, %v6806_v25  ;;  %v6815_v43 = vrot.slane %v6814_v62, 2  ;;  %v6821_v33 = vmax.f32 %v6819_v38, %v6820_v41  ;;  %v17691_v22 = vpop.permute.xlu1 %12313  ;;  %v7900_v38 = vld [vmem:[#allocation2 + $0x50] sm:$0xff] }
 0x4a1   :  { %v6839_v0 = vmax.f32 %v6837_v2, %v6838_v3  ;;  %v6846_v36 = vmax.f32 %v6844_v34, %v6845_v30  ;;  %v6852_v40 = vrot.slane %v6851_v52, 1  ;;  %v12281_v18 = vunpack.i.h.bf16 %v17657_v48  ;;  %v17686_v32 = vpop.permute.xlu0 %12308  ;;  %v7899_v48 = vld [vmem:[#allocation2 + $0x40] sm:$0xff]  ;;  %v8027_v41 = vld [vmem:[#allocation2 + $0x52] sm:$0xff] }
 0x4a2   :  { %v6802_v45 = vmax.f32 %v6800_v42, %v6801_v39  ;;  %v6808_v49 = vrot.slane %v6807_v60, 2  ;;  %v6816_v27 = vmax.f32 %v6814_v62, %v6815_v43  ;;  %v8575_v11 = vsel %vm8572_vm2, %v8558_v37, %v12270_v61 }
 0x4a3   :  { %v6853_v10 = vmax.f32 %v6851_v52, %v6852_v40  ;;  %v17694_v6 = vsel %vm7190_vm11, %v6832_v55, -inf  ;;  %v17697_v14 = vsel %vm7190_vm11, %v6839_v0, -inf  ;;  %v6822_v46 = vrot.slane %v6821_v33, 2 }
 0x4a4   :  { %v17700_v44 = vsel %vm7190_vm11, %v6846_v36, -inf  ;;  %v6803_v8 = vrot.slane %v6802_v45, 1  ;;  %v6809_v31 = vmax.f32 %v6807_v60, %v6808_v49  ;;  %v8492_v59 = vsel %vm7190_vm11, %v7899_v48, %v12280_v7  ;;  %v17722_v60 = vpop.permute.xlu1 %12323 }
 0x4a5   :  { %v6817_v61 = vrot.slane %v6816_v27, 1  ;;  %v6823_v37 = vmax.f32 %v6821_v33, %v6822_v46  ;;  %v8493_v2 = vsel %vm7190_vm11, %v7900_v38, %v12281_v18  ;;  %v8592_v34 = vsel %vm8589_vm7, %v8575_v11, %v12275_v1  ;;  %v17715_v1 = vpop.permute.xlu0 %12318  ;;  %v7901_v46 = vld [vmem:[#allocation2 + $0x60] sm:$0xff] }
 0x4a6   :  { %v7493_v53 = vmax.f32 %v17560_v5, %v17694_v6  ;;  %v7496_v42 = vmax.f32 %v17563_v28, %v17697_v14  ;;  %v6804_v25 = vmax.f32 %v6802_v45, %v6803_v8  ;;  %v6810_v62 = vrot.slane %v6809_v31, 1  ;;  %8747 = vmatmul.mubr.f32.gmra.mxu1 %v8592_v34 }
 0x4a7   :  { %v7499_v7 = vmax.f32 %v17566_v4, %v17700_v44  ;;  %v7501_v55 = vsel %vm7190_vm11, %v6853_v10, -inf  ;;  %v6818_v3 = vmax.f32 %v6816_v27, %v6817_v61  ;;  %v6824_v30 = vrot.slane %v6823_v37, 1  ;;  %11775 = vmatprep.mubr.msk.f32.mxu1 %vm7190_vm11, %v8027_v41  ;;  %v12104_v61 = vpop.f32.mrf.mxu0 }
 0x4a8   :  { %v6811_v52 = vmax.f32 %v6809_v31, %v6810_v62  ;;  %v7480_v5 = vsel %vm7190_vm11, %v6804_v25, -inf  ;;  %v12295_v28 = vunpack.i.l.bf16 %v17666_v13  ;;  %v8509_v39 = vsel %vm8504_vm0, %v8492_v59, %v12285_v20  ;;  %v17757_v14 = vpop.permute.xlu1 %12333  ;;  %v8029_v62 = vld [vmem:[#allocation2 + $0x72] sm:$0xff] }
 0x4a9   :  { %v6825_v4 = vmax.f32 %v6823_v37, %v6824_v30  ;;  %v7486_v43 = vsel %vm7190_vm11, %v6818_v3, -inf  ;;  %v12291_v33 = vunpack.i.h.bf16 %v17669_v29  ;;  %v12290_v0 = vunpack.i.l.bf16 %v17669_v29 }
 0x4aa   :  { %v7481_v36 = vmax.f32 %v17588_v12, %v7480_v5  ;;  %v7483_v40 = vsel %vm7190_vm11, %v6811_v52, -inf  ;;  %v7487_v18 = vmax.f32 %v17624_v19, %v7486_v43  ;;  %v8576_v20 = vsel %vm8572_vm2, %v17675_v54, %v12271_v56  ;;  %v3724_v52 = vpop.f32.mrf.mxu0  ;;  %v17791_v43 = vld [vmem:[%s19072_s2] ss:$0 sm:$0xff] }
 0x4ab   :  { %v7484_v45 = vmax.f32 %v17631_v58, %v7483_v40  ;;  %v7489_v49 = vsel %vm7190_vm11, %v6825_v4, -inf  ;;  %v8526_v27 = vsel %vm8521_vm4, %v8509_v39, %v12290_v0  ;;  %v8593_v29 = vsel %vm8589_vm7, %v8576_v20, %v12276_v16  ;;  %v17751_v16 = vpop.permute.xlu0 %12328  ;;  %v8030_v4 = vld [vmem:[#allocation2 + $0x82] sm:$0xff] }
 0x4ac   :  { %v7502_v12 = vmax.f32 %v17571_v47, %v7501_v55  ;;  %v7490_v11 = vmax.f32 %v17634_v21, %v7489_v49  ;;  %v12296_v19 = vunpack.i.h.bf16 %v17666_v13  ;;  %8752 = vmatmul.mubr.f32.gmra.mxu1 %v8593_v29  ;;  %v12300_v56 = vunpack.i.l.bf16 %v17679_v23  ;;  %v17783_v30 = vpop.permute.xlu1 %12343  ;;  %v8031_v29 = vld [vmem:[#allocation2 + $0x92] sm:$0xff] }
 0x4ad   :  { %v7834_v58 = vsel %vm7743_vm12, %v7484_v45, %v7481_v36  ;;  %v8510_v54 = vsel %vm8504_vm0, %v8493_v2, %v12286_v17  ;;  %11776 = vmatprep.mubr.msk.f32.mxu1 %vm7190_vm11, %v8028_v63  ;;  %v12305_v51 = vunpack.i.l.bf16 %v17683_v24  ;;  %v12310_v47 = vunpack.i.l.bf16 %v17686_v32 }
 0x4ae   :  { %v7835_v21 = vsel %vm7745_vm13, %v7487_v18, %v7834_v58  ;;  %v8527_v13 = vsel %vm8521_vm4, %v8510_v54, %v12291_v33  ;;  %v12315_v10 = vunpack.i.l.bf16 %v17691_v22  ;;  %v8543_v6 = vsel %vm8538_vm1, %v8526_v27, %v12295_v28  ;;  %v17801_v18 = vld [vmem:[%s19073_s3] ss:$0 sm:$0xff] }
 0x4af   :  { %v7836_v26 = vsel %vm7747_vm14, %v7490_v11, %v7835_v21  ;;  %v12301_v17 = vunpack.i.h.bf16 %v17679_v23  ;;  %v8560_v48 = vsel %vm8555_vm6, %v8543_v6, %v12300_v56  ;;  %v12320_v44 = vunpack.i.l.bf16 %v17715_v1  ;;  %v17778_v55 = vpop.permute.xlu0 %12338 }
 0x4b0   :  { %v7837_v8 = vsel %vm7749_vm15, %v7493_v53, %v7836_v26  ;;  %v12306_v31 = vunpack.i.h.bf16 %v17683_v24  ;;  %v8494_v38 = vsel %vm7190_vm11, %v7901_v46, %v12315_v10  ;;  %v8577_v59 = vsel %vm8572_vm2, %v8560_v48, %v12305_v51 }
 0x4b1   :  { %v7838_v37 = vsel %vm19216_vm8, %v7496_v42, %v7837_v8  ;;  %v12311_v2 = vunpack.i.h.bf16 %v17686_v32  ;;  %v8594_v23 = vsel %vm8589_vm7, %v8577_v59, %v12310_v47  ;;  %v8511_v34 = vsel %vm8504_vm0, %v8494_v38, %v12320_v44 }
 0x4b2   :  { %vm19217_vm9 = vcmask 1046534   ;;  %8757 = vmatmul.mubr.f32.gmra.mxu1 %v8594_v23  ;;  %v12325_v53 = vunpack.i.l.bf16 %v17722_v60  ;;  %v8544_v24 = vsel %vm8538_vm1, %v8527_v13, %v12296_v19  ;;  %vm19218_vm5 = vcmask 1047559   ;;  %v7902_v13 = vld [vmem:[#allocation2 + $0x70] sm:$0xff] }
 0x4b3   :  { %v7839_v25 = vsel %vm19217_vm9, %v7499_v7, %v7838_v37  ;;  %11777 = vmatprep.mubr.msk.f32.mxu1 %vm7190_vm11, %v8029_v62  ;;  %v8561_v42 = vsel %vm8555_vm6, %v8544_v24, %v12301_v17  ;;  %v12330_v32 = vunpack.i.l.bf16 %v17751_v16  ;;  %v12335_v39 = vunpack.i.l.bf16 %v17757_v14  ;;  %v12349_v54 = vpop.permute.xlu0 %12348  ;;  %vm19220_vm8 = vmmov %vm19217_vm9 }
 0x4b4   :  { %v7840_v41 = vsel %vm19218_vm5, %v7502_v12, %v7839_v25  ;;  %v8528_v7 = vsel %vm8521_vm4, %v8511_v34, %v12325_v53  ;;  %v8578_v3 = vsel %vm8572_vm2, %v8561_v42, %v12306_v31  ;;  %v3843_v33 = vmul.f32 %v17791_v43, %v12104_v61  ;;  %v7903_v25 = vld [vmem:[#allocation2 + $0xa0] sm:$0xff]  ;;  %vm19221_vm9 = vmmov %vm19218_vm5 }
 0x4b5   :  { %7891 = vst.msk [vmem:[#allocation2 + $0xf1] sm:$0xff] %vm7190_vm11, %v7840_v41  ;;  %v8595_v5 = vsel %vm8589_vm7, %v8578_v3, %v12311_v2  ;;  %v8545_v28 = vsel %vm8538_vm1, %v8528_v7, %v12330_v32  ;;  %v12340_v0 = vunpack.i.l.bf16 %v17778_v55  ;;  %v12345_v36 = vunpack.i.l.bf16 %v17783_v30 }
 0x4b6   :  { %8762 = vmatmul.mubr.f32.gmra.mxu1 %v8595_v5  ;;  %v3842_v40 = vmul.f32 %v17791_v43, %v3724_v52  ;;  %v3914_v20 = vadd.f32 %v17801_v18, %v3843_v33  ;;  %v8562_v45 = vsel %vm8555_vm6, %v8545_v28, %v12335_v39  ;;  %v12316_v63 = vunpack.i.h.bf16 %v17691_v22 }
 0x4b7   :  { %11778 = vmatprep.mubr.msk.f32.mxu1 %vm7190_vm11, %v8030_v4  ;;  %v8579_v27 = vsel %vm8572_vm2, %v8562_v45, %v12340_v0  ;;  %v12321_v51 = vunpack.i.h.bf16 %v17715_v1  ;;  %v12326_v22 = vunpack.i.h.bf16 %v17722_v60  ;;  %v12331_v48 = vunpack.i.h.bf16 %v17751_v16  ;;  %v12354_v1 = vpop.permute.xlu1 %12353  ;;  %v12359_v38 = vpop.permute.xlu0 %12358  ;;  %v7904_v0 = vld [vmem:[#allocation2 + $0xb0] sm:$0xff] }
 0x4b8   :  { %v3913_v49 = vadd.f32 %v17801_v18, %v3842_v40  ;;  %v3978_v12 = vmax.f32 %v3914_v20, 0.0  ;;  %v8596_v11 = vsel %vm8589_vm7, %v8579_v27, %v12345_v36  ;;  %v8495_v17 = vsel %vm7190_vm11, %v7902_v13, %v12316_v63 }
 0x4b9   :  { %v8512_v46 = vsel %vm8504_vm0, %v8495_v17, %v12321_v51  ;;  %v12350_v37 = vunpack.i.l.bf16 %v12349_v54  ;;  %v12336_v60 = vunpack.i.h.bf16 %v17757_v14  ;;  %v12341_v62 = vunpack.i.h.bf16 %v17778_v55 }
 0x4ba   :  { %v3977_v19 = vmax.f32 %v3913_v49, 0.0  ;;  %8767 = vmatmul.mubr.f32.gmra.mxu1 %v8596_v11  ;;  %v4954_v56 = vcombine.high %v3978_v12, %v3978_v12  ;;  %v4961_v58 = vrot.slane %v3978_v12, %v13627_v50  ;;  %v8529_v2 = vsel %vm8521_vm4, %v8512_v46, %v12326_v22 }
 0x4bb   :  { %11779 = vmatprep.mubr.msk.f32.mxu1 %vm7190_vm11, %v8031_v29  ;;  %v8546_v16 = vsel %vm8538_vm1, %v8529_v2, %v12331_v48  ;;  %v12351_v24 = vunpack.i.h.bf16 %v12349_v54  ;;  %v12346_v3 = vunpack.i.h.bf16 %v17783_v30  ;;  %v12356_v52 = vunpack.i.h.bf16 %v12354_v1  ;;  %v17829_v14 = vpop.permute.xlu1 %12363  ;;  %v17834_v36 = vpop.permute.xlu0 %12368 }
 0x4bc   :  { %v4944_v47 = vrot.slane %v3977_v19, %v13627_v50  ;;  %v4937_v21 = vcombine.high %v3977_v19, %v3977_v19  ;;  %v4968_v10 = vrot.slane %v4954_v56, %v13627_v50  ;;  %v4969_v6 = vcombine.high %v4961_v58, %v4961_v58 }
 0x4bd   :  { %v6882_v26 = vsel %vm5397_vm10, %v4961_v58, -inf  ;;  %v12355_v5 = vunpack.i.l.bf16 %v12354_v1  ;;  %v8496_v28 = vsel %vm7190_vm11, %v7903_v25, %v12350_v37  ;;  %v8563_v55 = vsel %vm8555_vm6, %v8546_v16, %v12336_v60  ;;  %v17848_v1 = vld [vmem:[#allocation2 + $0xf0] sm:$0xff] }
 0x4be   :  { %v6854_v44 = vsel %vm5397_vm10, %v4944_v47, -inf  ;;  %v6883_v8 = vrot.slane %v6882_v26, 4  ;;  %v4951_v31 = vrot.slane %v4937_v21, %v13627_v50  ;;  %v6889_v59 = vsel %vm5397_vm10, %v4969_v6, -inf }
 0x4bf   :  { %v6896_v61 = vsel %vm5397_vm10, %v4968_v10, -inf  ;;  %v4952_v23 = vcombine.high %v4944_v47, %v4944_v47  ;;  %v6855_v34 = vrot.slane %v6854_v44, 4  ;;  %v4970_v53 = vcombine.high %v4968_v10, %v4968_v10  ;;  %v12374_v6 = vpop.permute.xlu1 %12373 }
 0x4c0   :  { %v6884_v41 = vmax.f32 %v6882_v26, %v6883_v8  ;;  %v6890_v42 = vrot.slane %v6889_v59, 4  ;;  %v6897_v32 = vrot.slane %v6896_v61, 4  ;;  %v4953_v7 = vcombine.high %v4951_v31, %v4951_v31  ;;  %v17845_v26 = vld [vmem:[#allocation2 + $0xf1] sm:$0xff]  ;;  %v12379_v8 = vpop.permute.xlu0 %12378 }
 0x4c1   :  { %v6856_v39 = vmax.f32 %v6854_v44, %v6855_v34  ;;  %v6861_v4 = vsel %vm5397_vm10, %v4952_v23, -inf  ;;  %v6868_v33 = vsel %vm5397_vm10, %v4951_v31, -inf  ;;  %v6903_v40 = vsel %vm5397_vm10, %v4970_v53, -inf  ;;  %v8032_v44 = vld [vmem:[#allocation2 + $0xc2] sm:$0xff] }
 0x4c2   :  { %v8497_v30 = vsel %vm7190_vm11, %v7904_v0, %v12351_v24  ;;  %v12361_v20 = vunpack.i.h.bf16 %v12359_v38  ;;  %v8580_v45 = vsel %vm8572_vm2, %v8563_v55, %v12341_v62  ;;  %v6885_v49 = vrot.slane %v6884_v41, 2  ;;  %v17858_v24 = vld [vmem:[#allocation2 + $0xf2] sm:$0xff] }
 0x4c3   :  { %v6891_v27 = vmax.f32 %v6889_v59, %v6890_v42  ;;  %v6898_v29 = vmax.f32 %v6896_v61, %v6897_v32  ;;  %v6875_v12 = vsel %vm5397_vm10, %v4953_v7, -inf  ;;  %v6862_v11 = vrot.slane %v6861_v4, 4 }
 0x4c4   :  { %v6869_v19 = vrot.slane %v6868_v33, 4  ;;  %v12360_v63 = vunpack.i.l.bf16 %v12359_v38  ;;  %v6904_v56 = vrot.slane %v6903_v40, 4  ;;  %v6857_v58 = vrot.slane %v6856_v39, 2 }
 0x4c5   :  { %v12366_v54 = vunpack.i.h.bf16 %v17829_v14  ;;  %v12365_v51 = vunpack.i.l.bf16 %v17829_v14  ;;  %v6876_v47 = vrot.slane %v6875_v12, 4  ;;  %v8513_v21 = vsel %vm8504_vm0, %v8496_v28, %v12355_v5 }
 0x4c6   :  { %v8514_v13 = vsel %vm8504_vm0, %v8497_v30, %v12356_v52  ;;  %v8597_v10 = vsel %vm8589_vm7, %v8580_v45, %v12346_v3  ;;  %v6886_v17 = vmax.f32 %v6884_v41, %v6885_v49  ;;  %v6892_v22 = vrot.slane %v6891_v27, 2  ;;  %v12107_v37 = vpop.f32.mrf.mxu0  ;;  %v8033_v30 = vld [vmem:[#allocation2 + $0xd2] sm:$0xff] }
 0x4c7   :  { %v6899_v46 = vrot.slane %v6898_v29, 2  ;;  %v8531_v48 = vsel %vm8521_vm4, %v8514_v13, %v12361_v20  ;;  %8772 = vmatmul.mubr.f32.gmra.mxu1 %v8597_v10  ;;  %v6863_v31 = vmax.f32 %v6861_v4, %v6862_v11  ;;  %v6870_v38 = vmax.f32 %v6868_v33, %v6869_v19 }
 0x4c8   :  { %v8530_v59 = vsel %vm8521_vm4, %v8513_v21, %v12360_v63  ;;  %11780 = vmatprep.mubr.msk.f32.mxu1 %vm7190_vm11, %v8032_v44  ;;  %v12370_v61 = vunpack.i.l.bf16 %v17834_v36  ;;  %v6905_v2 = vmax.f32 %v6903_v40, %v6904_v56  ;;  %v6858_v60 = vmax.f32 %v6856_v39, %v6857_v58  ;;  %v3734_v28 = vpop.f32.mrf.mxu0 }
 0x4c9   :  { %v12375_v23 = vunpack.i.l.bf16 %v12374_v6  ;;  %v12412_v34 = vpack.i.bf16 %v17845_v26, %v17555_v57  ;;  %v6877_v25 = vmax.f32 %v6875_v12, %v6876_v47  ;;  %v12371_v16 = vunpack.i.h.bf16 %v17834_v36 }
 0x4ca   :  { %v12407_v53 = vpack.i.bf16 %v17848_v1, %v17557_v35  ;;  %v12380_v62 = vunpack.i.l.bf16 %v12379_v8  ;;  %v6887_v41 = vrot.slane %v6886_v17, 1  ;;  %v6893_v42 = vmax.f32 %v6891_v27, %v6892_v22 }
 0x4cb   :  { %v6900_v32 = vmax.f32 %v6898_v29, %v6899_v46  ;;  %12413 = vrot.lane.b32.xlu1 %v12412_v34, %s12673_s21  ;;  %v8547_v7 = vsel %vm8538_vm1, %v8530_v59, %v12365_v51  ;;  %v6864_v3 = vrot.slane %v6863_v31, 2  ;;  %v6871_v52 = vrot.slane %v6870_v38, 2 }
 0x4cc   :  { %v12376_v5 = vunpack.i.h.bf16 %v12374_v6  ;;  %12408 = vrot.lane.b32.xlu0 %v12407_v53, %s12671_s16  ;;  %v8564_v57 = vsel %vm8555_vm6, %v8547_v7, %v12370_v61  ;;  %v12422_v35 = vpack.i.bf16 %v17858_v24, %v17585_v9  ;;  %v8548_v39 = vsel %vm8538_vm1, %v8531_v48, %v12366_v54 }
 0x4cd   :  { %v8581_v14 = vsel %vm8572_vm2, %v8564_v57, %v12375_v23  ;;  %v3845_v4 = vmul.f32 %v17791_v43, %v12107_v37  ;;  %v6878_v33 = vrot.slane %v6877_v25, 2  ;;  %v12381_v0 = vunpack.i.h.bf16 %v12379_v8 }
 0x4ce   :  { %v8598_v55 = vsel %vm8589_vm7, %v8581_v14, %v12380_v62  ;;  %v8565_v36 = vsel %vm8555_vm6, %v8548_v39, %v12371_v16  ;;  %v6906_v40 = vrot.slane %v6905_v2, 2  ;;  %v3844_v45 = vmul.f32 %v17791_v43, %v3734_v28 }
 0x4cf   :  { %12423 = vrot.lane.b32.xlu1 %v12422_v35, %s12667_s1  ;;  %8777 = vmatmul.mubr.f32.gmra.mxu1 %v8598_v55  ;;  %v3916_v20 = vadd.f32 %v17801_v18, %v3845_v4  ;;  %v6894_v49 = vrot.slane %v6893_v42, 1  ;;  %v6901_v27 = vrot.slane %v6900_v32, 1  ;;  %v6859_v29 = vrot.slane %v6858_v60, 1 }
 0x4d0   :  { %v6865_v12 = vmax.f32 %v6863_v31, %v6864_v3  ;;  %12418 = vrot.lane.b32.xlu0 %v12412_v34, %s12668_s19  ;;  %11781 = vmatprep.mubr.msk.f32.mxu1 %vm7190_vm11, %v8033_v30  ;;  %v8582_v11 = vsel %vm8572_vm2, %v8565_v36, %v12376_v5  ;;  %v3915_v63 = vadd.f32 %v17801_v18, %v3844_v45  ;;  %vm9776_vm5 = vcmask 259072  }
 0x4d1   :  { %v3980_v19 = vmax.f32 %v3916_v20, 0.0  ;;  %v17878_v56 = vmax.f32 %v6886_v17, %v6887_v41  ;;  %v6872_v58 = vmax.f32 %v6870_v38, %v6871_v52  ;;  %v6879_v54 = vmax.f32 %v6877_v25, %v6878_v33  ;;  %9778 = vst.msk [vmem:[#allocation3 + $0x8] sm:$0x3f] %vm9776_vm5, %v12665_v15  ;;  %9777 = vst.msk [vmem:[#allocation3] sm:$0x3f] %vm9776_vm5, %v12665_v15 }
 0x4d2   :  { %v8599_v51 = vsel %vm8589_vm7, %v8582_v11, %v12381_v0  ;;  %v17881_v47 = vmax.f32 %v6905_v2, %v6906_v40  ;;  %v3979_v10 = vmax.f32 %v3915_v63, 0.0  ;;  %v17884_v6 = vmax.f32 %v6893_v42, %v6894_v49  ;;  %9779 = vst.msk [vmem:[#allocation3 + $0x10] sm:$0x3f] %vm9776_vm5, %v12665_v15  ;;  %9780 = vst.msk [vmem:[#allocation3 + $0x18] sm:$0x3f] %vm9776_vm5, %v12665_v15 }
 0x4d3   :  { %8782 = vmatmul.mubr.f32.gmra.mxu1 %v8599_v51  ;;  %v4988_v21 = vcombine.high %v3980_v19, %v3980_v19  ;;  %v4995_v13 = vrot.slane %v3980_v19, %v13627_v50  ;;  %v17886_v22 = vmax.f32 %v6900_v32, %v6901_v27  ;;  %v6860_v46 = vmax.f32 %v6858_v60, %v6859_v29 }
 0x4d4   :  { %v6866_v48 = vrot.slane %v6865_v12, 1  ;;  %11782 = vmatprep.mubr.msk.f32.mxu1 %vm7190_vm11, %v17585_v9  ;;  %v4971_v31 = vcombine.high %v3979_v10, %v3979_v10  ;;  %v6873_v38 = vrot.slane %v6872_v58, 1  ;;  %v6880_v59 = vrot.slane %v6879_v54, 1  ;;  %9781 = vst.msk [vmem:[#allocation3 + $0x20] sm:$0x3f] %vm9776_vm5, %v12665_v15 }
 0x4d5   :  { %v5002_v17 = vrot.slane %v4988_v21, %v13627_v50  ;;  %v5003_v44 = vcombine.high %v4995_v13, %v4995_v13  ;;  %v6938_v8 = vsel %vm5397_vm10, %v4995_v13, -inf  ;;  %v4978_v37 = vrot.slane %v3979_v10, %v13627_v50  ;;  %9782 = vst.msk [vmem:[#allocation3 + $0x28] sm:$0x3f] %vm9776_vm5, %v12665_v15  ;;  %9783 = vst.msk [vmem:[#allocation3 + $0x30] sm:$0x3f] %vm9776_vm5, %v12665_v15 }
 0x4d6   :  { %v6939_v61 = vrot.slane %v6938_v8, 4  ;;  %v4985_v34 = vrot.slane %v4971_v31, %v13627_v50  ;;  %v6867_v20 = vmax.f32 %v6865_v12, %v6866_v48  ;;  %v6874_v51 = vmax.f32 %v6872_v58, %v6873_v38  ;;  %9784 = vst.msk [vmem:[#allocation3 + $0x38] sm:$0x3f] %vm9776_vm5, %v12665_v15  ;;  %9785 = vst.msk [vmem:[#allocation3 + $0x40] sm:$0x3f] %vm9776_vm5, %v12665_v15 }
 0x4d7   :  { %v5004_v2 = vcombine.high %v5002_v17, %v5002_v17  ;;  %v6945_v23 = vsel %vm5397_vm10, %v5003_v44, -inf  ;;  %v6952_v60 = vsel %vm5397_vm10, %v5002_v17, -inf  ;;  %v4986_v53 = vcombine.high %v4978_v37, %v4978_v37  ;;  %9786 = vst.msk [vmem:[#allocation3 + $0x48] sm:$0x3f] %vm9776_vm5, %v12665_v15  ;;  %9787 = vst.msk [vmem:[#allocation3 + $0x50] sm:$0x3f] %vm9776_vm5, %v12665_v15 }
 0x4d8   :  { %v6940_v25 = vmax.f32 %v6938_v8, %v6939_v61  ;;  %v6946_v9 = vrot.slane %v6945_v23, 4  ;;  %v6953_v16 = vrot.slane %v6952_v60, 4  ;;  %v4987_v41 = vcombine.high %v4985_v34, %v4985_v34  ;;  %9788 = vst.msk [vmem:[#allocation3 + $0x58] sm:$0x3f] %vm9776_vm5, %v12665_v15 }
 0x4d9   :  { %v6959_v62 = vsel %vm5397_vm10, %v5004_v2, -inf  ;;  %v6910_v42 = vsel %vm5397_vm10, %v4978_v37, -inf  ;;  %v6924_v32 = vsel %vm5397_vm10, %v4985_v34, -inf  ;;  %v6917_v28 = vsel %vm5397_vm10, %v4986_v53, -inf }
 0x4da   :  { %v6941_v7 = vrot.slane %v6940_v25, 2  ;;  %v6947_v3 = vmax.f32 %v6945_v23, %v6946_v9  ;;  %v6954_v52 = vmax.f32 %v6952_v60, %v6953_v16  ;;  %v6960_v5 = vrot.slane %v6959_v62, 4 }
 0x4db   :  { %v6911_v57 = vrot.slane %v6910_v42, 4  ;;  %v6925_v35 = vrot.slane %v6924_v32, 4  ;;  %v6931_v14 = vsel %vm5397_vm10, %v4987_v41, -inf  ;;  %v6918_v36 = vrot.slane %v6917_v28, 4 }
 0x4dc   :  { %v6942_v39 = vmax.f32 %v6940_v25, %v6941_v7  ;;  %v6948_v4 = vrot.slane %v6947_v3, 2  ;;  %v6955_v33 = vrot.slane %v6954_v52, 2  ;;  %v6961_v0 = vmax.f32 %v6959_v62, %v6960_v5 }
 0x4dd   :  { %v6912_v55 = vmax.f32 %v6910_v42, %v6911_v57  ;;  %v6926_v40 = vmax.f32 %v6924_v32, %v6925_v35  ;;  %v6932_v30 = vrot.slane %v6931_v14, 4  ;;  %v6919_v11 = vmax.f32 %v6917_v28, %v6918_v36 }
 0x4de   :  { %v6949_v45 = vmax.f32 %v6947_v3, %v6948_v4  ;;  %v6956_v49 = vmax.f32 %v6954_v52, %v6955_v33  ;;  %v6962_v27 = vrot.slane %v6961_v0, 2  ;;  %v6881_v21 = vmax.f32 %v6879_v54, %v6880_v59 }
 0x4df   :  { %v6913_v29 = vrot.slane %v6912_v55, 2  ;;  %v6927_v19 = vrot.slane %v6926_v40, 2  ;;  %v6933_v63 = vmax.f32 %v6931_v14, %v6932_v30  ;;  %v6943_v13 = vrot.slane %v6942_v39, 1 }
 0x4e0   :  { %v6963_v10 = vmax.f32 %v6961_v0, %v6962_v27  ;;  %v6920_v44 = vrot.slane %v6919_v11, 2  ;;  %v6908_v61 = vrot.slane %v17881_v47, 1  ;;  %v7515_v12 = vsel %vm7190_vm11, %v17878_v56, -inf }
 0x4e1   :  { %v6914_v17 = vmax.f32 %v6912_v55, %v6913_v29  ;;  %v6928_v8 = vmax.f32 %v6926_v40, %v6927_v19  ;;  %v6934_v31 = vrot.slane %v6933_v63, 2  ;;  %v7503_v48 = vsel %vm7190_vm11, %v6860_v46, -inf }
 0x4e2   :  { %v6950_v37 = vrot.slane %v6949_v45, 1  ;;  %v6957_v23 = vrot.slane %v6956_v49, 1  ;;  %v6921_v34 = vmax.f32 %v6919_v11, %v6920_v44  ;;  %v7506_v54 = vsel %vm7190_vm11, %v6867_v20, -inf }
 0x4e3   :  { %v6915_v60 = vrot.slane %v6914_v17, 1  ;;  %v6929_v58 = vrot.slane %v6928_v8, 1  ;;  %v7509_v38 = vsel %vm7190_vm11, %v6874_v51, -inf  ;;  %v6944_v59 = vmax.f32 %v6942_v39, %v6943_v13 }
 0x4e4   :  { %v6935_v25 = vmax.f32 %v6933_v63, %v6934_v31  ;;  %v7512_v16 = vsel %vm7190_vm11, %v6881_v21, -inf  ;;  %v6964_v53 = vrot.slane %v6963_v10, 1  ;;  %v6922_v56 = vrot.slane %v6921_v34, 1 }
 0x4e5   :  { %v6916_v62 = vmax.f32 %v6914_v17, %v6915_v60  ;;  %v6951_v41 = vmax.f32 %v6949_v45, %v6950_v37  ;;  %v6930_v46 = vmax.f32 %v6928_v8, %v6929_v58  ;;  %v6958_v7 = vmax.f32 %v6956_v49, %v6957_v23 }
 0x4e6   :  { %v6936_v42 = vrot.slane %v6935_v25, 1  ;;  %v6923_v3 = vmax.f32 %v6921_v34, %v6922_v56  ;;  %v7516_v57 = vsel %vm7190_vm11, %v6944_v59, -inf  ;;  %v6965_v39 = vmax.f32 %v6963_v10, %v6964_v53 }
 0x4e7   :  { %v7504_v52 = vsel %vm7190_vm11, %v6916_v62, -inf  ;;  %v7510_v35 = vsel %vm7190_vm11, %v6930_v46, -inf  ;;  %v6909_v20 = vmax.f32 %v17881_v47, %v6908_v61  ;;  %v7519_v45 = vsel %vm7190_vm11, %v6951_v41, -inf }
 0x4e8   :  { %v6937_v28 = vmax.f32 %v6935_v25, %v6936_v42  ;;  %v7507_v4 = vsel %vm7190_vm11, %v6923_v3, -inf  ;;  %v7511_v33 = vmax.f32 %v7509_v38, %v7510_v35  ;;  %v7505_v55 = vmax.f32 %v7503_v48, %v7504_v52 }
 0x4e9   :  { %v12110_v2 = vpop.f32.mrf.mxu0  ;;  %v7508_v36 = vmax.f32 %v7506_v54, %v7507_v4  ;;  %v7522_v29 = vsel %vm7190_vm11, %v6958_v7, -inf  ;;  %v7518_v51 = vsel %vm7190_vm11, %v17884_v6, -inf  ;;  %v7517_v21 = vmax.f32 %v7515_v12, %v7516_v57 }
 0x4ea   :  { %v3847_v32 = vmul.f32 %v17791_v43, %v12110_v2  ;;  %v7513_v40 = vsel %vm7190_vm11, %v6937_v28, -inf  ;;  %v7525_v13 = vsel %vm7190_vm11, %v6965_v39, -inf  ;;  %v7521_v47 = vsel %vm7190_vm11, %v17886_v22, -inf }
 0x4eb   :  { %v3744_v9 = vpop.f32.mrf.mxu0  ;;  %v7514_v49 = vmax.f32 %v7512_v16, %v7513_v40  ;;  %v7841_v11 = vsel %vm7743_vm12, %v7508_v36, %v7505_v55  ;;  %v7520_v17 = vmax.f32 %v7518_v51, %v7519_v45  ;;  %v7524_v31 = vsel %vm7190_vm11, %v6909_v20, -inf }
 0x4ec   :  { %v3846_v5 = vmul.f32 %v17791_v43, %v3744_v9  ;;  %v3918_v14 = vadd.f32 %v17801_v18, %v3847_v32  ;;  %v7842_v10 = vsel %vm7745_vm13, %v7511_v33, %v7841_v11  ;;  %v7523_v61 = vmax.f32 %v7521_v47, %v7522_v29 }
 0x4ed   :  { %v7843_v44 = vsel %vm7747_vm14, %v7514_v49, %v7842_v10  ;;  %v7526_v6 = vmax.f32 %v7524_v31, %v7525_v13  ;;  %vm9231_vm5 = vcmask 254976  }
 0x4ee   :  { %v3917_v0 = vadd.f32 %v17801_v18, %v3846_v5  ;;  %v3982_v30 = vmax.f32 %v3918_v14, 0.0  ;;  %v7844_v48 = vsel %vm7749_vm15, %v7517_v21, %v7843_v44 }
 0x4ef   :  { %v7845_v12 = vsel %vm19219_vm3, %v7520_v17, %v7844_v48 }
 0x4f0   :  { %v3981_v27 = vmax.f32 %v3917_v0, 0.0  ;;  %v5022_v19 = vcombine.high %v3982_v30, %v3982_v30  ;;  %v5029_v63 = vrot.slane %v3982_v30, %v13627_v50  ;;  %v7846_v60 = vsel %vm19220_vm8, %v7523_v61, %v7845_v12 }
 0x4f1   :  { %v7847_v22 = vsel %vm19221_vm9, %v7526_v6, %v7846_v60 }
 0x4f2   :  { %v5012_v8 = vrot.slane %v3981_v27, %v13627_v50  ;;  %v5037_v37 = vcombine.high %v5029_v63, %v5029_v63  ;;  %v5036_v2 = vrot.slane %v5022_v19, %v13627_v50  ;;  %v5005_v23 = vcombine.high %v3981_v27, %v3981_v27  ;;  %7892 = vst.msk [vmem:[#allocation2 + $0x101] sm:$0xff] %vm7190_vm11, %v7847_v22 }
 0x4f3   :  { %v6994_v58 = vsel %vm5397_vm10, %v5029_v63, -inf }
 0x4f4   :  { %v5020_v34 = vcombine.high %v5012_v8, %v5012_v8  ;;  %v7001_v54 = vsel %vm5397_vm10, %v5037_v37, -inf  ;;  %v7008_v38 = vsel %vm5397_vm10, %v5036_v2, -inf  ;;  %v5019_v59 = vrot.slane %v5005_v23, %v13627_v50 }
 0x4f5   :  { %v6966_v25 = vsel %vm5397_vm10, %v5012_v8, -inf  ;;  %v6995_v9 = vrot.slane %v6994_v58, 4  ;;  %v7002_v16 = vrot.slane %v7001_v54, 4  ;;  %v5038_v62 = vcombine.high %v5036_v2, %v5036_v2 }
 0x4f6   :  { %v6973_v53 = vsel %vm5397_vm10, %v5020_v34, -inf  ;;  %v7009_v56 = vrot.slane %v7008_v38, 4  ;;  %v6967_v41 = vrot.slane %v6966_v25, 4  ;;  %v6980_v42 = vsel %vm5397_vm10, %v5019_v59, -inf }
 0x4f7   :  { %v6974_v46 = vrot.slane %v6973_v53, 4  ;;  %v5021_v32 = vcombine.high %v5019_v59, %v5019_v59  ;;  %v6996_v7 = vmax.f32 %v6994_v58, %v6995_v9  ;;  %v7003_v3 = vmax.f32 %v7001_v54, %v7002_v16 }
 0x4f8   :  { %v7010_v52 = vmax.f32 %v7008_v38, %v7009_v56  ;;  %v7015_v5 = vsel %vm5397_vm10, %v5038_v62, -inf  ;;  %v6981_v57 = vrot.slane %v6980_v42, 4  ;;  %v6968_v28 = vmax.f32 %v6966_v25, %v6967_v41 }
 0x4f9   :  { %v6975_v35 = vmax.f32 %v6973_v53, %v6974_v46  ;;  %v17945_v14 = vld [vmem:[#allocation2 + $0x101] sm:$0xff]  ;;  %v6987_v4 = vsel %vm5397_vm10, %v5021_v32, -inf  ;;  %v6997_v33 = vrot.slane %v6996_v7, 2  ;;  %v7004_v0 = vrot.slane %v7003_v3, 2 }
 0x4fa   :  { %v17947_v39 = vld [vmem:[#allocation2 + $0x100] sm:$0xff]  ;;  %v7016_v55 = vrot.slane %v7015_v5, 4  ;;  %v7011_v36 = vrot.slane %v7010_v52, 2  ;;  %v6982_v40 = vmax.f32 %v6980_v42, %v6981_v57  ;;  %v12432_v30 = vpack.i.bf16 %v17945_v14, %v17845_v26 }
 0x4fb   :  { %v12427_v20 = vpack.i.bf16 %v17947_v39, %v17848_v1  ;;  %v6969_v45 = vrot.slane %v6968_v28, 2  ;;  %v6976_v49 = vrot.slane %v6975_v35, 2  ;;  %v6988_v27 = vrot.slane %v6987_v4, 4  ;;  %v17954_v29 = vld [vmem:[#allocation2 + $0x102] sm:$0xff] }
 0x4fc   :  { %12433 = vrot.lane.b32.xlu1 %v12432_v30, %s12669_s20  ;;  %v6998_v19 = vmax.f32 %v6996_v7, %v6997_v33  ;;  %v17958_v63 = vmax.f32 %v7003_v3, %v7004_v0  ;;  %v7017_v51 = vmax.f32 %v7015_v5, %v7016_v55  ;;  %v17972_v26 = vmax.f32 %v7010_v52, %v7011_v36 }
 0x4fd   :  { %12428 = vrot.lane.b32.xlu0 %v12427_v20, %s12670_s26  ;;  %v6983_v1 = vrot.slane %v6982_v40, 2  ;;  %v12437_v21 = vpack.i.bf16 %v17954_v29, %v17858_v24  ;;  %v17977_v47 = vmax.f32 %v6968_v28, %v6969_v45  ;;  %v17979_v17 = vmax.f32 %v6975_v35, %v6976_v49 }
 0x4fe   :  { %v6989_v44 = vmax.f32 %v6987_v4, %v6988_v27  ;;  %v6999_v61 = vrot.slane %v6998_v19, 1  ;;  %v7018_v48 = vrot.slane %v7017_v51, 2  ;;  %v7006_v6 = vrot.slane %v17958_v63, 1 }
 0x4ff   :  { %v7013_v12 = vrot.slane %v17972_v26, 1  ;;  %v17987_v2 = vmax.f32 %v6982_v40, %v6983_v1  ;;  %v6971_v60 = vrot.slane %v17977_v47, 1  ;;  %v6978_v22 = vrot.slane %v17979_v17, 1 }
 0x500   :  { %v6990_v34 = vrot.slane %v6989_v44, 2  ;;  %v17992_v59 = vmax.f32 %v6998_v19, %v6999_v61  ;;  %v17994_v25 = vmax.f32 %v7017_v51, %v7018_v48 }
 0x501   :  { %12438 = vrot.lane.b32.xlu0 %v12437_v21, %s12672_s17  ;;  %v6985_v53 = vrot.slane %v17987_v2, 1 }
 0x506   :  { %v12113_v11 = vpop.f32.mrf.mxu0 }
 0x507   :  { %v3849_v13 = vmul.f32 %v17791_v43, %v12113_v11 }
 0x508   :  { %v3754_v10 = vpop.f32.mrf.mxu0 }
 0x509   :  { %v3848_v8 = vmul.f32 %v17791_v43, %v3754_v10  ;;  %v3920_v31 = vadd.f32 %v17801_v18, %v3849_v13 }
 0x50b   :  { %v3919_v37 = vadd.f32 %v17801_v18, %v3848_v8  ;;  %v3984_v23 = vmax.f32 %v3920_v31, 0.0 }
 0x50d   :  { %v3983_v58 = vmax.f32 %v3919_v37, 0.0  ;;  %v5056_v54 = vcombine.high %v3984_v23, %v3984_v23  ;;  %v5063_v38 = vrot.slane %v3984_v23, %v13627_v50  ;;  %v6991_v37 = vmax.f32 %v6989_v44, %v6990_v34 }
 0x50f   :  { %v5039_v9 = vcombine.high %v3983_v58, %v3983_v58  ;;  %v5046_v16 = vrot.slane %v3983_v58, %v13627_v50  ;;  %v5070_v62 = vrot.slane %v5056_v54, %v13627_v50  ;;  %v5071_v56 = vcombine.high %v5063_v38, %v5063_v38 }
 0x510   :  { %v7050_v41 = vsel %vm5397_vm10, %v5063_v38, -inf  ;;  %v6992_v44 = vrot.slane %v6991_v37, 1 }
 0x511   :  { %v7051_v46 = vrot.slane %v7050_v41, 4  ;;  %v5053_v42 = vrot.slane %v5039_v9, %v13627_v50  ;;  %v5054_v32 = vcombine.high %v5046_v16, %v5046_v16  ;;  %v7022_v7 = vsel %vm5397_vm10, %v5046_v16, -inf }
 0x512   :  { %v5072_v3 = vcombine.high %v5070_v62, %v5070_v62  ;;  %v7057_v52 = vsel %vm5397_vm10, %v5071_v56, -inf  ;;  %v7064_v5 = vsel %vm5397_vm10, %v5070_v62, -inf  ;;  %v7023_v57 = vrot.slane %v7022_v7, 4 }
 0x513   :  { %v7052_v28 = vmax.f32 %v7050_v41, %v7051_v46  ;;  %v7058_v35 = vrot.slane %v7057_v52, 4  ;;  %v7065_v4 = vrot.slane %v7064_v5, 4  ;;  %v5055_v33 = vcombine.high %v5053_v42, %v5053_v42 }
 0x514   :  { %v7071_v0 = vsel %vm5397_vm10, %v5072_v3, -inf  ;;  %v7024_v55 = vmax.f32 %v7022_v7, %v7023_v57  ;;  %v7029_v36 = vsel %vm5397_vm10, %v5054_v32, -inf  ;;  %v7036_v40 = vsel %vm5397_vm10, %v5053_v42, -inf }
 0x515   :  { %v7053_v30 = vrot.slane %v7052_v28, 2  ;;  %v7059_v20 = vmax.f32 %v7057_v52, %v7058_v35  ;;  %v7066_v45 = vmax.f32 %v7064_v5, %v7065_v4  ;;  %v7072_v49 = vrot.slane %v7071_v0, 4 }
 0x516   :  { %v7025_v27 = vrot.slane %v7024_v55, 2  ;;  %v7030_v11 = vrot.slane %v7029_v36, 4  ;;  %v7037_v19 = vrot.slane %v7036_v40, 4  ;;  %v7043_v51 = vsel %vm5397_vm10, %v5055_v33, -inf }
 0x517   :  { %v7054_v1 = vmax.f32 %v7052_v28, %v7053_v30  ;;  %v7060_v21 = vrot.slane %v7059_v20, 2  ;;  %v7067_v13 = vrot.slane %v7066_v45, 2  ;;  %v7073_v10 = vmax.f32 %v7071_v0, %v7072_v49 }
 0x518   :  { %v7026_v8 = vmax.f32 %v7024_v55, %v7025_v27  ;;  %v7031_v31 = vmax.f32 %v7029_v36, %v7030_v11  ;;  %v7038_v61 = vmax.f32 %v7036_v40, %v7037_v19  ;;  %v7044_v48 = vrot.slane %v7043_v51, 4 }
 0x519   :  { %v7061_v23 = vmax.f32 %v7059_v20, %v7060_v21  ;;  %v7068_v58 = vmax.f32 %v7066_v45, %v7067_v13  ;;  %v7074_v54 = vrot.slane %v7073_v10, 2  ;;  %v6972_v56 = vmax.f32 %v17977_v47, %v6971_v60 }
 0x51a   :  { %v7027_v38 = vrot.slane %v7026_v8, 1  ;;  %v7032_v9 = vrot.slane %v7031_v31, 2  ;;  %v7039_v16 = vrot.slane %v7038_v61, 2  ;;  %v7045_v62 = vmax.f32 %v7043_v51, %v7044_v48 }
 0x51b   :  { %v6979_v41 = vmax.f32 %v17979_v17, %v6978_v22  ;;  %v7055_v46 = vrot.slane %v7054_v1, 1  ;;  %v7075_v42 = vmax.f32 %v7073_v10, %v7074_v54  ;;  %v6986_v5 = vmax.f32 %v17987_v2, %v6985_v53 }
 0x51c   :  { %v7028_v32 = vmax.f32 %v7026_v8, %v7027_v38  ;;  %v7033_v7 = vmax.f32 %v7031_v31, %v7032_v9  ;;  %v7040_v3 = vmax.f32 %v7038_v61, %v7039_v16  ;;  %v7046_v52 = vrot.slane %v7045_v62, 2 }
 0x51d   :  { %v7062_v34 = vrot.slane %v7061_v23, 1  ;;  %v7069_v57 = vrot.slane %v7068_v58, 1  ;;  %v7076_v28 = vrot.slane %v7075_v42, 1  ;;  %v7007_v47 = vmax.f32 %v17958_v63, %v7006_v6 }
 0x51e   :  { %v7034_v35 = vrot.slane %v7033_v7, 1  ;;  %v7041_v4 = vrot.slane %v7040_v3, 1  ;;  %v7047_v33 = vmax.f32 %v7045_v62, %v7046_v52  ;;  %v7020_v17 = vrot.slane %v17994_v25, 1 }
 0x51f   :  { %v7527_v60 = vsel %vm7190_vm11, %v6972_v56, -inf  ;;  %v7530_v22 = vsel %vm7190_vm11, %v6979_v41, -inf  ;;  %v7056_v0 = vmax.f32 %v7054_v1, %v7055_v46  ;;  %v7528_v53 = vsel %vm7190_vm11, %v7028_v32, -inf }
 0x520   :  { %v7035_v55 = vmax.f32 %v7033_v7, %v7034_v35  ;;  %v7042_v2 = vmax.f32 %v7040_v3, %v7041_v4  ;;  %v6993_v36 = vmax.f32 %v6991_v37, %v6992_v44  ;;  %v7533_v40 = vsel %vm7190_vm11, %v6986_v5, -inf }
 0x521   :  { %v7063_v30 = vmax.f32 %v7061_v23, %v7062_v34  ;;  %v7048_v20 = vrot.slane %v7047_v33, 1  ;;  %v7070_v45 = vmax.f32 %v7068_v58, %v7069_v57  ;;  %v7077_v49 = vmax.f32 %v7075_v42, %v7076_v28  ;;  %v12384_v57 = vpop.permute.xlu1 %12383 }
 0x522   :  { %v7531_v63 = vsel %vm7190_vm11, %v7035_v55, -inf  ;;  %v7534_v6 = vsel %vm7190_vm11, %v7042_v2, -inf  ;;  %v7529_v11 = vmax.f32 %v7527_v60, %v7528_v53  ;;  %v7014_v1 = vmax.f32 %v17972_v26, %v7013_v12 }
 0x523   :  { %v7049_v27 = vmax.f32 %v7047_v33, %v7048_v20  ;;  %v7532_v19 = vmax.f32 %v7530_v22, %v7531_v63  ;;  %v7535_v51 = vmax.f32 %v7533_v40, %v7534_v6  ;;  %v7021_v21 = vmax.f32 %v17994_v25, %v7020_v17 }
 0x524   :  { %v7540_v13 = vsel %vm7190_vm11, %v7056_v0, -inf  ;;  %v7536_v10 = vsel %vm7190_vm11, %v6993_v36, -inf  ;;  %v7543_v8 = vsel %vm7190_vm11, %v7063_v30, -inf  ;;  %v7539_v48 = vsel %vm7190_vm11, %v17992_v59, -inf }
 0x525   :  { %v7537_v31 = vsel %vm7190_vm11, %v7049_v27, -inf  ;;  %v7848_v61 = vsel %vm7743_vm12, %v7532_v19, %v7529_v11  ;;  %v7546_v37 = vsel %vm7190_vm11, %v7070_v45, -inf  ;;  %v7542_v12 = vsel %vm7190_vm11, %v7007_v47, -inf  ;;  %v12389_v45 = vpop.permute.xlu0 %12388 }
 0x526   :  { %v7538_v23 = vmax.f32 %v7536_v10, %v7537_v31  ;;  %v7849_v26 = vsel %vm7745_vm13, %v7535_v51, %v7848_v61  ;;  %v7541_v25 = vmax.f32 %v7539_v48, %v7540_v13  ;;  %v7549_v58 = vsel %vm7190_vm11, %v7077_v49, -inf  ;;  %v12394_v49 = vpop.permute.xlu1 %12393 }
 0x527   :  { %v7545_v38 = vsel %vm7190_vm11, %v7014_v1, -inf  ;;  %v7544_v9 = vmax.f32 %v7542_v12, %v7543_v8  ;;  %v7548_v59 = vsel %vm7190_vm11, %v7021_v21, -inf  ;;  %v12386_v60 = vunpack.i.h.bf16 %v12384_v57 }
 0x528   :  { %v12116_v54 = vpop.f32.mrf.mxu0  ;;  %v7850_v16 = vsel %vm7747_vm14, %v7538_v23, %v7849_v26  ;;  %v7547_v56 = vmax.f32 %v7545_v38, %v7546_v37  ;;  %v7550_v42 = vmax.f32 %v7548_v59, %v7549_v58  ;;  %v12385_v19 = vunpack.i.l.bf16 %v12384_v57  ;;  %v7905_v26 = vld [vmem:[#allocation2 + $0xc0] sm:$0xff] }
 0x529   :  { %v3851_v62 = vmul.f32 %v17791_v43, %v12116_v54  ;;  %v7851_v41 = vsel %vm7749_vm15, %v7541_v25, %v7850_v16  ;;  %v12391_v61 = vunpack.i.h.bf16 %v12389_v45  ;;  %v12390_v48 = vunpack.i.l.bf16 %v12389_v45 }
 0x52a   :  { %v3764_v46 = vpop.f32.mrf.mxu0  ;;  %v7852_v32 = vsel %vm19219_vm3, %v7544_v9, %v7851_v41  ;;  %v8498_v38 = vsel %vm7190_vm11, %v7905_v26, %v12385_v19  ;;  %v12399_v9 = vpop.permute.xlu0 %12398  ;;  %v12395_v16 = vunpack.i.l.bf16 %v12394_v49 }
 0x52b   :  { %v3922_v7 = vadd.f32 %v17801_v18, %v3851_v62  ;;  %v3850_v3 = vmul.f32 %v17791_v43, %v3764_v46  ;;  %v7853_v52 = vsel %vm19220_vm8, %v7547_v56, %v7852_v32  ;;  %v7906_v56 = vld [vmem:[#allocation2 + $0xd0] sm:$0xff]  ;;  %v18061_v41 = vpop.permute.xlu1 %12403  ;;  %v12400_v57 = vunpack.i.l.bf16 %v12399_v9 }
 0x52c   :  { %v7854_v5 = vsel %vm19221_vm9, %v7550_v42, %v7853_v52  ;;  %v8515_v52 = vsel %vm8504_vm0, %v8498_v38, %v12390_v48  ;;  %v12613_v38 = vld [vmem:[%s19073_s3] ss:$0 sm:$0xff] }
 0x52d   :  { %v3986_v44 = vmax.f32 %v3922_v7, 0.0  ;;  %v3921_v34 = vadd.f32 %v17801_v18, %v3850_v3  ;;  %7893 = vst.msk [vmem:[#allocation2 + $0x111] sm:$0xff] %vm7190_vm11, %v7854_v5  ;;  %v8499_v3 = vsel %vm7190_vm11, %v7906_v56, %v12386_v60  ;;  %v12396_v5 = vunpack.i.h.bf16 %v12394_v49 }
 0x52f   :  { %v5090_v28 = vcombine.high %v3986_v44, %v3986_v44  ;;  %v5097_v35 = vrot.slane %v3986_v44, %v13627_v50  ;;  %v3985_v4 = vmax.f32 %v3921_v34, 0.0  ;;  %v8516_v34 = vsel %vm8504_vm0, %v8499_v3, %v12391_v61  ;;  %v12612_v61 = vld [vmem:[%s19072_s2] ss:$0 sm:$0xff] }
 0x531   :  { %v5104_v33 = vrot.slane %v5090_v28, %v13627_v50  ;;  %v5105_v47 = vcombine.high %v5097_v35, %v5097_v35  ;;  %v7106_v17 = vsel %vm5397_vm10, %v5097_v35, -inf  ;;  %v5073_v43 = vcombine.high %v3985_v4, %v3985_v4 }
 0x532   :  { %v7107_v22 = vrot.slane %v7106_v17, 4  ;;  %v5080_v0 = vrot.slane %v3985_v4, %v13627_v50 }
 0x533   :  { %v5106_v55 = vcombine.high %v5104_v33, %v5104_v33  ;;  %v7113_v18 = vsel %vm5397_vm10, %v5105_v47, -inf  ;;  %v7120_v2 = vsel %vm5397_vm10, %v5104_v33, -inf  ;;  %v5087_v53 = vrot.slane %v5073_v43, %v13627_v50 }
 0x534   :  { %v7108_v36 = vmax.f32 %v7106_v17, %v7107_v22  ;;  %v7114_v40 = vrot.slane %v7113_v18, 4  ;;  %v7121_v30 = vrot.slane %v7120_v2, 4  ;;  %v5088_v20 = vcombine.high %v5080_v0, %v5080_v0  ;;  %v18066_v4 = vld [vmem:[#allocation2 + $0x111] sm:$0xff] }
 0x535   :  { %v7127_v63 = vsel %vm5397_vm10, %v5106_v55, -inf  ;;  %v5089_v6 = vcombine.high %v5087_v53, %v5087_v53  ;;  %v7078_v27 = vsel %vm5397_vm10, %v5080_v0, -inf  ;;  %v7092_v11 = vsel %vm5397_vm10, %v5087_v53, -inf  ;;  %v18077_v49 = vld [vmem:[#allocation2 + $0x112] sm:$0xff] }
 0x536   :  { %v7115_v51 = vmax.f32 %v7113_v18, %v7114_v40  ;;  %v7122_v1 = vmax.f32 %v7120_v2, %v7121_v30  ;;  %v7128_v21 = vrot.slane %v7127_v63, 4  ;;  %v7079_v13 = vrot.slane %v7078_v27, 4  ;;  %v18070_v18 = vld [vmem:[#allocation2 + $0x110] sm:$0xff] }
 0x537   :  { %v7085_v10 = vsel %vm5397_vm10, %v5088_v20, -inf  ;;  %v7093_v8 = vrot.slane %v7092_v11, 4  ;;  %v7099_v31 = vsel %vm5397_vm10, %v5089_v6, -inf  ;;  %v7109_v37 = vrot.slane %v7108_v36, 2 }
 0x538   :  { %v7129_v23 = vmax.f32 %v7127_v63, %v7128_v21  ;;  %v7080_v12 = vmax.f32 %v7078_v27, %v7079_v13  ;;  %v7086_v25 = vrot.slane %v7085_v10, 4  ;;  %v7100_v54 = vrot.slane %v7099_v31, 4 }
 0x539   :  { %v7094_v58 = vmax.f32 %v7092_v11, %v7093_v8  ;;  %v7116_v62 = vrot.slane %v7115_v51, 2  ;;  %v7123_v59 = vrot.slane %v7122_v1, 2  ;;  %v7110_v28 = vmax.f32 %v7108_v36, %v7109_v37 }
 0x53a   :  { %v7130_v46 = vrot.slane %v7129_v23, 2  ;;  %v7081_v42 = vrot.slane %v7080_v12, 2  ;;  %v7087_v32 = vmax.f32 %v7085_v10, %v7086_v25  ;;  %v7101_v7 = vmax.f32 %v7099_v31, %v7100_v54 }
 0x53b   :  { %v7095_v44 = vrot.slane %v7094_v58, 2  ;;  %v8532_v33 = vsel %vm8521_vm4, %v8515_v52, %v12395_v16  ;;  %v12405_v47 = vunpack.i.l.bf16 %v18061_v41  ;;  %v7117_v17 = vmax.f32 %v7115_v51, %v7116_v62 }
 0x53c   :  { %v7088_v35 = vrot.slane %v7087_v32, 2  ;;  %v7124_v43 = vmax.f32 %v7122_v1, %v7123_v59  ;;  %v12401_v22 = vunpack.i.h.bf16 %v12399_v9  ;;  %v7131_v0 = vmax.f32 %v7129_v23, %v7130_v46 }
 0x53d   :  { %v7082_v60 = vmax.f32 %v7080_v12, %v7081_v42  ;;  %v7102_v55 = vrot.slane %v7101_v7, 2  ;;  %v8533_v2 = vsel %vm8521_vm4, %v8516_v34, %v12396_v5  ;;  %v7096_v53 = vmax.f32 %v7094_v58, %v7095_v44  ;;  %v12414_v19 = vpop.permute.xlu1 %12413 }
 0x53e   :  { %v12447_v36 = vpack.i.bf16 %v18066_v4, %v17945_v14  ;;  %v12406_v40 = vunpack.i.h.bf16 %v18061_v41  ;;  %v7111_v30 = vrot.slane %v7110_v28, 1  ;;  %v7089_v20 = vmax.f32 %v7087_v32, %v7088_v35  ;;  %v12409_v8 = vpop.permute.xlu0 %12408 }
 0x53f   :  { %v8549_v45 = vsel %vm8538_vm1, %v8532_v33, %v12400_v57  ;;  %v7118_v63 = vrot.slane %v7117_v17, 1  ;;  %v7125_v6 = vrot.slane %v7124_v43, 1  ;;  %v12442_v11 = vpack.i.bf16 %v18070_v18, %v17947_v39 }
 0x540   :  { %v8566_v27 = vsel %vm8555_vm6, %v8549_v45, %v12405_v47  ;;  %12448 = vrot.lane.b32.xlu0 %v12447_v36, %s12673_s21  ;;  %v7132_v51 = vrot.slane %v7131_v0, 1  ;;  %v7083_v14 = vrot.slane %v7082_v60, 1  ;;  %v7103_v1 = vmax.f32 %v7101_v7, %v7102_v55 }
 0x541   :  { %v8550_v21 = vsel %vm8538_vm1, %v8533_v2, %v12401_v22  ;;  %v12415_v10 = vunpack.i.l.bf16 %v12414_v19  ;;  %v7097_v31 = vrot.slane %v7096_v53, 1  ;;  %12443 = vrot.lane.b32.xlu1 %v12442_v11, %s12671_s16  ;;  %v12457_v39 = vpack.i.bf16 %v18077_v49, %v17954_v29 }
 0x542   :  { %v12411_v37 = vunpack.i.h.bf16 %v12409_v8  ;;  %v12410_v23 = vunpack.i.l.bf16 %v12409_v8  ;;  %v7112_v26 = vmax.f32 %v7110_v28, %v7111_v30  ;;  %v7090_v12 = vrot.slane %v7089_v20, 1 }
 0x543   :  { %v7119_v58 = vmax.f32 %v7117_v17, %v7118_v63  ;;  %v7126_v54 = vmax.f32 %v7124_v43, %v7125_v6  ;;  %v7133_v62 = vmax.f32 %v7131_v0, %v7132_v51  ;;  %v7104_v59 = vrot.slane %v7103_v1, 1  ;;  %v18117_v43 = vld [vmem:[%s19075_s5] ss:$0 sm:$0xff] }
 0x544   :  { %v12119_v13 = vpop.f32.mrf.mxu0  ;;  %12458 = vrot.lane.b32.xlu0 %v12457_v39, %s12667_s1  ;;  %v8583_v56 = vsel %vm8572_vm2, %v8566_v27, %v12410_v23  ;;  %v8567_v41 = vsel %vm8555_vm6, %v8550_v21, %v12406_v40  ;;  %v12416_v46 = vunpack.i.h.bf16 %v12414_v19  ;;  %v7084_v42 = vmax.f32 %v7082_v60, %v7083_v14  ;;  %v18138_v6 = vld [vmem:[%s19076_s6] ss:$0 sm:$0xff] }
 0x545   :  { %v3853_v48 = vmul.f32 %v12612_v61, %v12119_v13  ;;  %v7098_v32 = vmax.f32 %v7096_v53, %v7097_v31  ;;  %v8600_v7 = vsel %vm8589_vm7, %v8583_v56, %v12415_v10  ;;  %12453 = vrot.lane.b32.xlu1 %v12447_v36, %s12668_s19  ;;  %v7091_v3 = vmax.f32 %v7089_v20, %v7090_v12 }
 0x546   :  { %v3774_v25 = vpop.f32.mrf.mxu0  ;;  %8787 = vmatmul.mubr.f32.gmra.mxu1 %v8600_v7  ;;  %v8584_v52 = vsel %vm8572_vm2, %v8567_v41, %v12411_v37  ;;  %v18100_v34 = vsel %vm7190_vm11, %v7112_v26, -inf  ;;  %v18103_v57 = vsel %vm7190_vm11, %v7119_v58, -inf  ;;  %v18106_v28 = vsel %vm7190_vm11, %v7126_v54, -inf }
 0x547   :  { %v3924_v9 = vadd.f32 %v12613_v38, %v3853_v48  ;;  %v3852_v16 = vmul.f32 %v12612_v61, %v3774_v25  ;;  %11783 = vmatprep.mubr.msk.f32.mxu1 %vm7190_vm11, %v17858_v24  ;;  %v18111_v35 = vsel %vm7190_vm11, %v7133_v62, -inf  ;;  %v7105_v33 = vmax.f32 %v7103_v1, %v7104_v59 }
 0x548   :  { %v18120_v22 = vsel %vm7190_vm11, %v7084_v42, -inf  ;;  %v18123_v0 = vsel %vm7190_vm11, %v7098_v32, -inf  ;;  %v8601_v24 = vsel %vm8589_vm7, %v8584_v52, %v12416_v46  ;;  %v18127_v55 = vsel %vm7190_vm11, %v7091_v3, -inf }
 0x549   :  { %v3988_v5 = vmax.f32 %v3924_v9, 0.0  ;;  %v3923_v44 = vadd.f32 %v12613_v38, %v3852_v16  ;;  %v18141_v27 = vsel %vm7190_vm11, %v7105_v33, -inf }
 0x54a   :  { %8792 = vmatmul.mubr.f32.gmra.mxu1 %v8601_v24 }
 0x54b   :  { %v5124_v47 = vcombine.high %v3988_v5, %v3988_v5  ;;  %v5131_v17 = vrot.slane %v3988_v5, %v13627_v50  ;;  %v3987_v60 = vmax.f32 %v3923_v44, 0.0  ;;  %11784 = vmatprep.mubr.msk.f32.mxu1 %vm7190_vm11, %v17954_v29 }
 0x54d   :  { %v5138_v2 = vrot.slane %v5124_v47, %v13627_v50  ;;  %v5139_v53 = vcombine.high %v5131_v17, %v5131_v17  ;;  %v7162_v36 = vsel %vm5397_vm10, %v5131_v17, -inf  ;;  %v5107_v20 = vcombine.high %v3987_v60, %v3987_v60  ;;  %v18152_v17 = vpop.permute.xlu0 %12418 }
 0x54e   :  { %v8738_v40 = vpop.f32.mrf.mxu1  ;;  %v7163_v30 = vrot.slane %v7162_v36, 4  ;;  %v5114_v45 = vrot.slane %v3987_v60, %v13627_v50 }
 0x54f   :  { %v8824_v63 = vmul.f32 %v18117_v43, %v8738_v40  ;;  %v5140_v11 = vcombine.high %v5138_v2, %v5138_v2  ;;  %v7169_v19 = vsel %vm5397_vm10, %v5139_v53, -inf  ;;  %v7176_v51 = vsel %vm5397_vm10, %v5138_v2, -inf }
 0x550   :  { %v8740_v29 = vpop.f32.mrf.mxu1  ;;  %v7164_v14 = vmax.f32 %v7162_v36, %v7163_v30  ;;  %v7170_v1 = vrot.slane %v7169_v19, 4  ;;  %v7177_v21 = vrot.slane %v7176_v51, 4  ;;  %v5121_v13 = vrot.slane %v5107_v20, %v13627_v50 }
 0x551   :  { %v7183_v10 = vsel %vm5397_vm10, %v5140_v11, -inf  ;;  %v5122_v8 = vcombine.high %v5114_v45, %v5114_v45  ;;  %v7134_v31 = vsel %vm5397_vm10, %v5114_v45, -inf  ;;  %v8847_v61 = vadd.f32 %v18138_v6, %v8824_v63 }
 0x552   :  { %v8743_v48 = vpop.f32.mrf.mxu1  ;;  %v7165_v39 = vrot.slane %v7164_v14, 2  ;;  %v7171_v37 = vmax.f32 %v7169_v19, %v7170_v1  ;;  %v7178_v23 = vmax.f32 %v7176_v51, %v7177_v21  ;;  %v7184_v26 = vrot.slane %v7183_v10, 4 }
 0x553   :  { %v5123_v12 = vcombine.high %v5121_v13, %v5121_v13  ;;  %v7135_v25 = vrot.slane %v7134_v31, 4  ;;  %v7141_v58 = vsel %vm5397_vm10, %v5122_v8, -inf  ;;  %v7148_v54 = vsel %vm5397_vm10, %v5121_v13, -inf }
 0x554   :  { %v8745_v38 = vpop.f32.mrf.mxu1  ;;  %v7166_v9 = vmax.f32 %v7164_v14, %v7165_v39  ;;  %v7172_v16 = vrot.slane %v7171_v37, 2  ;;  %v7179_v62 = vrot.slane %v7178_v23, 2  ;;  %v7185_v59 = vmax.f32 %v7183_v10, %v7184_v26 }
 0x555   :  { %v7136_v56 = vmax.f32 %v7134_v31, %v7135_v25  ;;  %v7142_v41 = vrot.slane %v7141_v58, 4  ;;  %v7149_v46 = vrot.slane %v7148_v54, 4  ;;  %v7155_v42 = vsel %vm5397_vm10, %v5123_v12, -inf  ;;  %vm19222_vm10 = vmmov %vm19219_vm3 }
 0x556   :  { %v7167_v32 = vrot.slane %v7166_v9, 1  ;;  %v7173_v7 = vmax.f32 %v7171_v37, %v7172_v16  ;;  %v7180_v3 = vmax.f32 %v7178_v23, %v7179_v62  ;;  %v7186_v52 = vrot.slane %v7185_v59, 2  ;;  %vm19223_vm3 = vmmov %vm19220_vm8 }
 0x557   :  { %v7137_v5 = vrot.slane %v7136_v56, 2  ;;  %v7143_v44 = vmax.f32 %v7141_v58, %v7142_v41  ;;  %v7150_v33 = vmax.f32 %v7148_v54, %v7149_v46  ;;  %v7156_v47 = vrot.slane %v7155_v42, 4  ;;  %vm19224_vm8 = vmmov %vm19221_vm9 }
 0x558   :  { %v7168_v24 = vmax.f32 %v7166_v9, %v7167_v32  ;;  %v7174_v60 = vrot.slane %v7173_v7, 1  ;;  %v7181_v2 = vrot.slane %v7180_v3, 1  ;;  %v7187_v53 = vmax.f32 %v7185_v59, %v7186_v52 }
 0x559   :  { %v7138_v36 = vmax.f32 %v7136_v56, %v7137_v5  ;;  %v7144_v40 = vrot.slane %v7143_v44, 2  ;;  %v7151_v30 = vrot.slane %v7150_v33, 2  ;;  %v7157_v20 = vmax.f32 %v7155_v42, %v7156_v47 }
 0x55a   :  { %v7175_v45 = vmax.f32 %v7173_v7, %v7174_v60  ;;  %v7182_v63 = vmax.f32 %v7180_v3, %v7181_v2  ;;  %v7188_v11 = vrot.slane %v7187_v53, 1  ;;  %v7564_v19 = vsel %vm7190_vm11, %v7168_v24, -inf }
 0x55b   :  { %v12421_v51 = vunpack.i.h.bf16 %v18152_v17  ;;  %v7139_v29 = vrot.slane %v7138_v36, 1  ;;  %v7145_v14 = vmax.f32 %v7143_v44, %v7144_v40  ;;  %v7152_v1 = vmax.f32 %v7150_v33, %v7151_v30 }
 0x55c   :  { %v7189_v21 = vmax.f32 %v7187_v53, %v7188_v11  ;;  %v7567_v13 = vsel %vm7190_vm11, %v7175_v45, -inf  ;;  %v7570_v10 = vsel %vm7190_vm11, %v7182_v63, -inf  ;;  %v7158_v8 = vrot.slane %v7157_v20, 2 }
 0x55d   :  { %v7565_v31 = vmax.f32 %v18100_v34, %v7564_v19  ;;  %v7568_v39 = vmax.f32 %v18103_v57, %v7567_v13  ;;  %v7140_v37 = vmax.f32 %v7138_v36, %v7139_v29  ;;  %v7146_v23 = vrot.slane %v7145_v14, 1 }
 0x55e   :  { %v7573_v26 = vsel %vm7190_vm11, %v7189_v21, -inf  ;;  %v7153_v12 = vrot.slane %v7152_v1, 1  ;;  %v7159_v25 = vmax.f32 %v7157_v20, %v7158_v8  ;;  %v8863_v58 = vmax.f32 %v8847_v61, 0.0 }
 0x55f   :  { %v7571_v54 = vmax.f32 %v18106_v28, %v7570_v10  ;;  %v7147_v38 = vmax.f32 %v7145_v14, %v7146_v23  ;;  %v7552_v9 = vsel %vm7190_vm11, %v7140_v37, -inf  ;;  %v8825_v16 = vmul.f32 %v18117_v43, %v8743_v48 }
 0x560   :  { %v7574_v62 = vmax.f32 %v18111_v35, %v7573_v26  ;;  %v7154_v59 = vmax.f32 %v7152_v1, %v7153_v12  ;;  %v7160_v34 = vrot.slane %v7159_v25, 1  ;;  %v8895_v56 = vcombine.high %v8863_v58, %v8863_v58 }
 0x561   :  { %v7553_v57 = vmax.f32 %v18120_v22, %v7552_v9  ;;  %v7555_v41 = vsel %vm7190_vm11, %v7147_v38, -inf  ;;  %v8902_v46 = vrot.slane %v8863_v58, %v13627_v50  ;;  %v8848_v61 = vadd.f32 %v18138_v6, %v8825_v16 }
 0x562   :  { %v7161_v42 = vmax.f32 %v7159_v25, %v7160_v34  ;;  %v7556_v28 = vmax.f32 %v18127_v55, %v7555_v41  ;;  %v7558_v32 = vsel %vm7190_vm11, %v7154_v59, -inf  ;;  %v8909_v48 = vrot.slane %v8895_v56, %v13627_v50 }
 0x563   :  { %v7559_v35 = vmax.f32 %v18123_v0, %v7558_v32  ;;  %v8910_v7 = vcombine.high %v8902_v46, %v8902_v46  ;;  %v9232_v3 = vsel %vm9231_vm5, %v8902_v46, -inf  ;;  %v8864_v52 = vmax.f32 %v8848_v61, 0.0 }
 0x564   :  { %v7561_v22 = vsel %vm7190_vm11, %v7161_v42, -inf  ;;  %v7855_v5 = vsel %vm7743_vm12, %v7556_v28, %v7553_v57  ;;  %v8911_v44 = vcombine.high %v8909_v48, %v8909_v48  ;;  %v9233_v33 = vrot.slane %v9232_v3, 4 }
 0x565   :  { %v7562_v47 = vmax.f32 %v18141_v27, %v7561_v22  ;;  %v7856_v55 = vsel %vm7745_vm13, %v7559_v35, %v7855_v5  ;;  %v9239_v24 = vsel %vm9231_vm5, %v8910_v7, -inf  ;;  %v9246_v60 = vsel %vm9231_vm5, %v8909_v48, -inf }
 0x566   :  { %v8748_v2 = vpop.f32.mrf.mxu1  ;;  %v9234_v0 = vmax.f32 %v9232_v3, %v9233_v33  ;;  %v9240_v53 = vrot.slane %v9239_v24, 4  ;;  %v9247_v36 = vrot.slane %v9246_v60, 4  ;;  %v9253_v40 = vsel %vm9231_vm5, %v8911_v44, -inf }
 0x567   :  { %v7857_v30 = vsel %vm7747_vm14, %v7562_v47, %v7856_v55  ;;  %v9254_v20 = vrot.slane %v9253_v40, 4  ;;  %v8912_v45 = vcombine.high %v8864_v52, %v8864_v52  ;;  %v8919_v63 = vrot.slane %v8864_v52, %v13627_v50 }
 0x568   :  { %v8750_v11 = vpop.f32.mrf.mxu1  ;;  %v7858_v27 = vsel %vm7749_vm15, %v7565_v31, %v7857_v30  ;;  %v9235_v19 = vrot.slane %v9234_v0, 2  ;;  %v9241_v29 = vmax.f32 %v9239_v24, %v9240_v53  ;;  %v9248_v14 = vmax.f32 %v9246_v60, %v9247_v36 }
 0x569   :  { %v7859_v1 = vsel %vm19222_vm10, %v7568_v39, %v7858_v27  ;;  %v9255_v21 = vmax.f32 %v9253_v40, %v9254_v20  ;;  %v8926_v13 = vrot.slane %v8912_v45, %v13627_v50  ;;  %v8927_v10 = vcombine.high %v8919_v63, %v8919_v63 }
 0x56a   :  { %v7860_v8 = vsel %vm19223_vm3, %v7571_v54, %v7859_v1  ;;  %v9236_v37 = vmax.f32 %v9234_v0, %v9235_v19  ;;  %v9242_v23 = vrot.slane %v9241_v29, 2  ;;  %v9249_v26 = vrot.slane %v9248_v14, 2 }
 0x56b   :  { %v7861_v12 = vsel %vm19224_vm8, %v7574_v62, %v7860_v8  ;;  %v9256_v25 = vrot.slane %v9255_v21, 2  ;;  %v8928_v58 = vcombine.high %v8926_v13, %v8926_v13  ;;  %v9260_v31 = vsel %vm9231_vm5, %v8919_v63, -inf }
 0x56c   :  { %v8753_v38 = vpop.f32.mrf.mxu1  ;;  %7894 = vst.msk [vmem:[#allocation2 + $0x121] sm:$0xff] %vm7190_vm11, %v7861_v12  ;;  %v9237_v9 = vrot.slane %v9236_v37, 1  ;;  %v9243_v39 = vmax.f32 %v9241_v29, %v9242_v23  ;;  %v9250_v16 = vmax.f32 %v9248_v14, %v9249_v26  ;;  %v9261_v59 = vrot.slane %v9260_v31, 4 }
 0x56d   :  { %v9257_v34 = vmax.f32 %v9255_v21, %v9256_v25  ;;  %v9267_v56 = vsel %vm9231_vm5, %v8927_v10, -inf  ;;  %v9274_v54 = vsel %vm9231_vm5, %v8926_v13, -inf  ;;  %v9281_v57 = vsel %vm9231_vm5, %v8928_v58, -inf }
 0x56e   :  { %v8755_v41 = vpop.f32.mrf.mxu1  ;;  %v9238_v62 = vmax.f32 %v9236_v37, %v9237_v9  ;;  %v9244_v46 = vrot.slane %v9243_v39, 1  ;;  %v9251_v61 = vrot.slane %v9250_v16, 1  ;;  %v9262_v42 = vmax.f32 %v9260_v31, %v9261_v59 }
 0x56f   :  { %v9258_v28 = vrot.slane %v9257_v34, 1  ;;  %v9268_v32 = vrot.slane %v9267_v56, 4  ;;  %v9275_v48 = vrot.slane %v9274_v54, 4  ;;  %v9282_v35 = vrot.slane %v9281_v57, 4 }
 0x570   :  { %v9245_v7 = vmax.f32 %v9243_v39, %v9244_v46  ;;  %v9252_v3 = vmax.f32 %v9250_v16, %v9251_v61  ;;  %v18194_v52 = vsel %vm8504_vm0, %v9238_v62, -inf  ;;  %v9263_v22 = vrot.slane %v9262_v42, 2  ;;  %v10179_v61 = vld [vmem:[%s19077_s7 + $0xf8] sm:$0xff] }
 0x571   :  { %v9259_v5 = vmax.f32 %v9257_v34, %v9258_v28  ;;  %v9269_v44 = vmax.f32 %v9267_v56, %v9268_v32  ;;  %v9276_v33 = vmax.f32 %v9274_v54, %v9275_v48  ;;  %v9283_v47 = vmax.f32 %v9281_v57, %v9282_v35  ;;  %v10178_v28 = vld [vmem:[%s19077_s7 + $0xf0] sm:$0xff]  ;;  %11868 = vmatprep.subr.mxu1 %v10179_v61 }
 0x572   :  { %v8758_v55 = vpop.f32.mrf.mxu1  ;;  %v18197_v24 = vsel %vm8504_vm0, %v9245_v7, -inf  ;;  %v18200_v60 = vsel %vm8504_vm0, %v9252_v3, -inf  ;;  %v9264_v0 = vmax.f32 %v9262_v42, %v9263_v22  ;;  %v8826_v53 = vmul.f32 %v18117_v43, %v8748_v2  ;;  %v10163_v42 = vld [vmem:[%s19077_s7 + $0x78] sm:$0xff]  ;;  %v10162_v3 = vld [vmem:[%s19077_s7 + $0x70] sm:$0xff] }
 0x573   :  { %v18204_v36 = vsel %vm8504_vm0, %v9259_v5, -inf  ;;  %v9270_v40 = vrot.slane %v9269_v44, 2  ;;  %v9277_v30 = vrot.slane %v9276_v33, 2  ;;  %v9284_v20 = vrot.slane %v9283_v47, 2  ;;  %v18206_v45 = vld [vmem:[#allocation2 + $0x121] sm:$0xff]  ;;  %11869 = vmatpush3.msra.mxu1 %v10163_v42 }
 0x574   :  { %v8760_v63 = vpop.f32.mrf.mxu1  ;;  %v9265_v11 = vrot.slane %v9264_v0, 1  ;;  %v8849_v27 = vadd.f32 %v18138_v6, %v8826_v53  ;;  %v8827_v19 = vmul.f32 %v18117_v43, %v8753_v38  ;;  %v8828_v29 = vmul.f32 %v18117_v43, %v8758_v55  ;;  %v7958_v14 = vld [vmem:[#allocation2 + $0x120] sm:$0xff]  ;;  %11870 = vmatprep.subr.mxu1 %v10178_v28 }
 0x575   :  { %v9271_v1 = vmax.f32 %v9269_v44, %v9270_v40  ;;  %v9278_v21 = vmax.f32 %v9276_v33, %v9277_v30  ;;  %v9285_v2 = vmax.f32 %v9283_v47, %v9284_v20  ;;  %v12467_v13 = vpack.i.bf16 %v18206_v45, %v18066_v4  ;;  %v10177_v47 = vld [vmem:[%s19077_s7 + $0xe8] sm:$0xff]  ;;  %11871 = vmatpush3.msra.mxu1 %v10162_v3 }
 0x576   :  { %v18213_v10 = vpop.f32.mrf.mxu1  ;;  %v9266_v8 = vmax.f32 %v9264_v0, %v9265_v11  ;;  %vm9854_vm15 = vcmask 257024   ;;  %v8865_v37 = vmax.f32 %v8849_v27, 0.0  ;;  %v8850_v23 = vadd.f32 %v18138_v6, %v8827_v19  ;;  %v18258_v20 = vld [vmem:[#allocation2 + $0x122] sm:$0xff]  ;;  %11872 = vmatprep.subr.mxu1 %v10177_v47 }
 0x577   :  { %v18217_v26 = vadd.f32 %v18138_v6, %v8828_v29  ;;  %v9272_v12 = vrot.slane %v9271_v1, 1  ;;  %v9279_v25 = vrot.slane %v9278_v21, 1  ;;  %v9286_v58 = vrot.slane %v9285_v2, 1  ;;  %12468 = vrot.lane.b32.xlu0 %v12467_v13, %s12669_s20 }
 0x578   :  { %v12462_v31 = vpack.i.bf16 %v7958_v14, %v18070_v18  ;;  %v8765_v38 = vpop.f32.mrf.mxu1  ;;  %v9681_v4 = vsel %vm8504_vm0, %v9266_v8, -inf  ;;  %v8929_v9 = vcombine.high %v8865_v37, %v8865_v37  ;;  %v8936_v39 = vrot.slane %v8865_v37, %v13627_v50 }
 0x579   :  { %v8866_v16 = vmax.f32 %v8850_v23, 0.0  ;;  %v9273_v59 = vmax.f32 %v9271_v1, %v9272_v12  ;;  %v9280_v34 = vmax.f32 %v9278_v21, %v9279_v25  ;;  %v9287_v56 = vmax.f32 %v9285_v2, %v9286_v58  ;;  %v8023_v21 = vld [vmem:[#allocation2 + $0x131] sm:$0xff] }
 0x57a   :  { %v9682_v54 = vmax.f32 %v18194_v52, %v9681_v4  ;;  %12463 = vrot.lane.b32.xlu1 %v12462_v31, %s12670_s26  ;;  %v8943_v57 = vrot.slane %v8929_v9, %v13627_v50  ;;  %v8944_v41 = vcombine.high %v8936_v39, %v8936_v39  ;;  %v9288_v62 = vsel %vm9231_vm5, %v8936_v39, -inf  ;;  %v18227_v46 = vpop.f32.mrf.mxu1  ;;  %v8007_v31 = vld [vmem:[#allocation2 + $0x130] sm:$0xff] }
 0x57b   :  { %v8946_v18 = vcombine.high %v8866_v16, %v8866_v16  ;;  %v9684_v32 = vsel %vm8504_vm0, %v9273_v59, -inf  ;;  %v9687_v48 = vsel %vm8504_vm0, %v9280_v34, -inf  ;;  %v9690_v35 = vsel %vm8504_vm0, %v9287_v56, -inf  ;;  %8404 = vrot.lane.b32.xlu0 %v7958_v14, %s12671_s16 }
 0x57c   :  { %v9289_v7 = vrot.slane %v9288_v62, 4  ;;  %v9685_v52 = vmax.f32 %v18197_v24, %v9684_v32  ;;  %v9688_v22 = vmax.f32 %v18200_v60, %v9687_v48  ;;  %v9691_v5 = vmax.f32 %v18204_v36, %v9690_v35  ;;  %v8770_v33 = vpop.f32.mrf.mxu1 }
 0x57d   :  { %v8945_v44 = vcombine.high %v8943_v57, %v8943_v57  ;;  %v9295_v0 = vsel %vm9231_vm5, %v8944_v41, -inf  ;;  %v9302_v53 = vsel %vm9231_vm5, %v8943_v57, -inf  ;;  %v8953_v40 = vrot.slane %v8866_v16, %v13627_v50 }
 0x57e   :  { %v9290_v55 = vmax.f32 %v9288_v62, %v9289_v7  ;;  %8340 = vrot.lane.b32.xlu1 %v18077_v49, %s12672_s17  ;;  %v9821_v24 = vsel %vm7743_vm12, %v9685_v52, %v9682_v54  ;;  %v9296_v60 = vrot.slane %v9295_v0, 4  ;;  %v9303_v36 = vrot.slane %v9302_v53, 4 }
 0x57f   :  { %v9309_v30 = vsel %vm9231_vm5, %v8945_v44, -inf  ;;  %v9822_v63 = vsel %vm7745_vm13, %v9688_v22, %v9821_v24  ;;  %v8960_v19 = vrot.slane %v8946_v18, %v13627_v50  ;;  %8342 = vrot.lane.b32.xlu0 %v18258_v20, %s12672_s17  ;;  %v8961_v1 = vcombine.high %v8953_v40, %v8953_v40 }
 0x580   :  { %v9291_v11 = vrot.slane %v9290_v55, 2  ;;  %v9310_v27 = vrot.slane %v9309_v30, 4  ;;  %v9823_v49 = vsel %vm7747_vm14, %v9691_v5, %v9822_v63  ;;  %v9297_v29 = vmax.f32 %v9295_v0, %v9296_v60 }
 0x581   :  { %v9304_v14 = vmax.f32 %v9302_v53, %v9303_v36  ;;  %9855 = vst.msk [vmem:[#allocation3 + $0x9] sm:$0xf] %vm9854_vm15, %v9823_v49  ;;  %v8962_v8 = vcombine.high %v8960_v19, %v8960_v19  ;;  %v9316_v37 = vsel %vm9231_vm5, %v8953_v40, -inf  ;;  %v9323_v58 = vsel %vm9231_vm5, %v8961_v1, -inf }
 0x582   :  { %v9292_v2 = vmax.f32 %v9290_v55, %v9291_v11  ;;  %v9311_v13 = vmax.f32 %v9309_v30, %v9310_v27  ;;  %8468 = vrot.lane.b32.xlu1 %v18206_v45, %s12673_s21  ;;  %v9298_v23 = vrot.slane %v9297_v29, 2  ;;  %v9317_v25 = vrot.slane %v9316_v37, 4 }
 0x583   :  { %v9305_v12 = vrot.slane %v9304_v14, 2  ;;  %v9324_v9 = vrot.slane %v9323_v58, 4  ;;  %v9330_v39 = vsel %vm9231_vm5, %v8960_v19, -inf  ;;  %8470 = vrot.lane.b32.xlu0 %v8023_v21, %s12673_s21  ;;  %v9337_v41 = vsel %vm9231_vm5, %v8962_v8, -inf }
 0x584   :  { %v9293_v38 = vrot.slane %v9292_v2, 1  ;;  %v9312_v4 = vrot.slane %v9311_v13, 2  ;;  %v9299_v16 = vmax.f32 %v9297_v29, %v9298_v23  ;;  %v9318_v34 = vmax.f32 %v9316_v37, %v9317_v25 }
 0x585   :  { %v9306_v59 = vmax.f32 %v9304_v14, %v9305_v12  ;;  %v9331_v56 = vrot.slane %v9330_v39, 4  ;;  %v9325_v45 = vmax.f32 %v9323_v58, %v9324_v9  ;;  %v12420_v28 = vunpack.i.l.bf16 %v18152_v17 }
 0x586   :  { %v9294_v54 = vmax.f32 %v9292_v2, %v9293_v38  ;;  %v9313_v57 = vmax.f32 %v9311_v13, %v9312_v4  ;;  %8406 = vrot.lane.b32.xlu1 %v8007_v31, %s12671_s16  ;;  %v9300_v62 = vrot.slane %v9299_v16, 1  ;;  %v9319_v61 = vrot.slane %v9318_v34, 2 }
 0x587   :  { %v9307_v18 = vrot.slane %v9306_v59, 1  ;;  %v9332_v42 = vmax.f32 %v9330_v39, %v9331_v56  ;;  %v9326_v48 = vrot.slane %v9325_v45, 2  ;;  %v9338_v35 = vrot.slane %v9337_v41, 4  ;;  %v18284_v1 = vpop.f32.mrf.mxu1 }
 0x588   :  { %v9314_v32 = vrot.slane %v9313_v57, 1  ;;  %v9301_v7 = vmax.f32 %v9299_v16, %v9300_v62  ;;  %v9320_v52 = vmax.f32 %v9318_v34, %v9319_v61  ;;  %v8867_v47 = vmax.f32 %v18217_v26, 0.0  ;;  %v12424_v34 = vpop.permute.xlu1 %12423 }
 0x589   :  { %v9308_v3 = vmax.f32 %v9306_v59, %v9307_v18  ;;  %v9333_v22 = vrot.slane %v9332_v42, 2  ;;  %v9327_v44 = vmax.f32 %v9325_v45, %v9326_v48  ;;  %v9339_v33 = vmax.f32 %v9337_v41, %v9338_v35  ;;  %v8775_v58 = vpop.f32.mrf.mxu1 }
 0x58a   :  { %v9315_v5 = vmax.f32 %v9313_v57, %v9314_v32  ;;  %v9692_v55 = vsel %vm8504_vm0, %v9294_v54, -inf  ;;  %v9695_v0 = vsel %vm8504_vm0, %v9301_v7, -inf  ;;  %v9321_v53 = vrot.slane %v9320_v52, 1 }
 0x58b   :  { %v9334_v40 = vmax.f32 %v9332_v42, %v9333_v22  ;;  %v9698_v24 = vsel %vm8504_vm0, %v9308_v3, -inf  ;;  %v9328_v60 = vrot.slane %v9327_v44, 1  ;;  %v9340_v36 = vrot.slane %v9339_v33, 2  ;;  %v7907_v42 = vld [vmem:[#allocation2 + $0xe0] sm:$0xff] }
 0x58c   :  { %v8963_v30 = vcombine.high %v8867_v47, %v8867_v47  ;;  %v9701_v63 = vsel %vm8504_vm0, %v9315_v5, -inf  ;;  %v9322_v11 = vmax.f32 %v9320_v52, %v9321_v53  ;;  %v8970_v19 = vrot.slane %v8867_v47, %v13627_v50 }
 0x58d   :  { %v9335_v27 = vrot.slane %v9334_v40, 1  ;;  %v9329_v49 = vmax.f32 %v9327_v44, %v9328_v60  ;;  %v9341_v29 = vmax.f32 %v9339_v33, %v9340_v36  ;;  %v8829_v14 = vmul.f32 %v18117_v43, %v18213_v10 }
 0x58e   :  { %v8977_v26 = vrot.slane %v8963_v30, %v13627_v50  ;;  %v9693_v2 = vsel %vm8504_vm0, %v9322_v11, -inf  ;;  %v8978_v13 = vcombine.high %v8970_v19, %v8970_v19  ;;  %v9344_v8 = vsel %vm9231_vm5, %v8970_v19, -inf }
 0x58f   :  { %v9336_v21 = vmax.f32 %v9334_v40, %v9335_v27  ;;  %v9342_v37 = vrot.slane %v9341_v29, 1  ;;  %v9694_v23 = vmax.f32 %v9692_v55, %v9693_v2  ;;  %v9696_v12 = vsel %vm8504_vm0, %v9329_v49, -inf  ;;  %v8778_v44 = vpop.f32.mrf.mxu1  ;;  %v12614_v40 = vld [vmem:[#allocation2 + $0xf0] sm:$0xff] }
 0x590   :  { %v8979_v25 = vcombine.high %v8977_v26, %v8977_v26  ;;  %v9697_v31 = vmax.f32 %v9695_v0, %v9696_v12  ;;  %v9345_v4 = vrot.slane %v9344_v8, 4  ;;  %v9351_v10 = vsel %vm9231_vm5, %v8978_v13, -inf }
 0x591   :  { %v9699_v38 = vsel %vm8504_vm0, %v9336_v21, -inf  ;;  %v9343_v9 = vmax.f32 %v9341_v29, %v9342_v37  ;;  %v9352_v16 = vrot.slane %v9351_v10, 4  ;;  %v9358_v59 = vsel %vm9231_vm5, %v8977_v26, -inf  ;;  %v8780_v30 = vpop.f32.mrf.mxu1 }
 0x592   :  { %v9700_v39 = vmax.f32 %v9698_v24, %v9699_v38  ;;  %v9824_v56 = vsel %vm7743_vm12, %v9697_v31, %v9694_v23  ;;  %v9346_v54 = vmax.f32 %v9344_v8, %v9345_v4  ;;  %v9359_v57 = vrot.slane %v9358_v59, 4 }
 0x593   :  { %v9365_v45 = vsel %vm9231_vm5, %v8979_v25, -inf  ;;  %v9702_v41 = vsel %vm8504_vm0, %v9343_v9, -inf  ;;  %v9353_v18 = vmax.f32 %v9351_v10, %v9352_v16  ;;  %v8852_v7 = vadd.f32 %v18138_v6, %v8829_v14  ;;  %v8783_v26 = vpop.f32.mrf.mxu1 }
 0x594   :  { %v9825_v62 = vsel %vm7745_vm13, %v9700_v39, %v9824_v56  ;;  %v9366_v61 = vrot.slane %v9365_v45, 4  ;;  %v9703_v32 = vmax.f32 %v9701_v63, %v9702_v41  ;;  %v9347_v48 = vrot.slane %v9346_v54, 2  ;;  %v12542_v39 = vld [vmem:[#allocation3 + $0x1] ss:$8 sps:$4 sm:$0xff]  }
 0x595   :  { %v9360_v35 = vmax.f32 %v9358_v59, %v9359_v57  ;;  %v12425_v3 = vunpack.i.l.bf16 %v12424_v34  ;;  %v8500_v52 = vsel %vm7190_vm11, %v7907_v42, %v12420_v28  ;;  %v9354_v22 = vrot.slane %v9353_v18, 2  ;;  %v8785_v23 = vpop.f32.mrf.mxu1 }
 0x596   :  { %v9367_v5 = vmax.f32 %v9365_v45, %v9366_v61  ;;  %v9826_v33 = vsel %vm7747_vm14, %v9703_v32, %v9825_v62  ;;  %v9348_v47 = vmax.f32 %v9346_v54, %v9347_v48  ;;  %v8868_v0 = vmax.f32 %v8852_v7, 0.0 }
 0x597   :  { %v9361_v55 = vrot.slane %v9360_v35, 2  ;;  %v12426_v53 = vunpack.i.h.bf16 %v12424_v34  ;;  %v8501_v24 = vsel %vm7190_vm11, %v12614_v40, %v12421_v51  ;;  %9856 = vst.msk [vmem:[#allocation3 + $0x11] sm:$0xf] %vm9854_vm15, %v9826_v33  ;;  %v9355_v60 = vmax.f32 %v9353_v18, %v9354_v22 }
 0x598   :  { %v9368_v36 = vrot.slane %v9367_v5, 2  ;;  %v9349_v28 = vrot.slane %v9348_v47, 1  ;;  %v8980_v11 = vcombine.high %v8868_v0, %v8868_v0  ;;  %v8987_v27 = vrot.slane %v8868_v0, %v13627_v50  ;;  %v10161_v0 = vld [vmem:[%s19077_s7 + $0x68] sm:$0xff] }
 0x599   :  { %v9362_v63 = vmax.f32 %v9360_v35, %v9361_v55  ;;  %v9356_v19 = vrot.slane %v9355_v60, 1  ;;  %v18305_v29 = vsel %vm8504_vm0, %v8500_v52, %v12425_v3  ;;  %v18310_v37 = vsel %vm8504_vm0, %v8501_v24, %v12426_v53  ;;  %v10160_v53 = vld [vmem:[%s19077_s7 + $0x60] sm:$0xff]  ;;  %11873 = vmatpush3.msra.mxu1 %v10161_v0 }
 0x59a   :  { %v9369_v49 = vmax.f32 %v9367_v5, %v9368_v36  ;;  %v9350_v14 = vmax.f32 %v9348_v47, %v9349_v28  ;;  %v8994_v51 = vrot.slane %v8980_v11, %v13627_v50  ;;  %v8995_v21 = vcombine.high %v8987_v27, %v8987_v27 }
 0x59b   :  { %v9363_v17 = vrot.slane %v9362_v63, 1  ;;  %v9357_v2 = vmax.f32 %v9355_v60, %v9356_v19  ;;  %v9372_v8 = vsel %vm9231_vm5, %v8987_v27, -inf  ;;  %v8830_v45 = vmul.f32 %v18117_v43, %v18227_v46 }
 0x59c   :  { %v9370_v13 = vrot.slane %v9369_v49, 1  ;;  %v18313_v25 = vsel %vm8504_vm0, %v9350_v14, -inf  ;;  %v8996_v58 = vcombine.high %v8994_v51, %v8994_v51  ;;  %v9373_v31 = vrot.slane %v9372_v8, 4 }
 0x59d   :  { %v9364_v12 = vmax.f32 %v9362_v63, %v9363_v17  ;;  %v18316_v4 = vsel %vm8504_vm0, %v9357_v2, -inf  ;;  %v9379_v10 = vsel %vm9231_vm5, %v8995_v21, -inf  ;;  %v9386_v9 = vsel %vm9231_vm5, %v8994_v51, -inf }
 0x59e   :  { %v9371_v38 = vmax.f32 %v9369_v49, %v9370_v13  ;;  %v9374_v59 = vmax.f32 %v9372_v8, %v9373_v31  ;;  %v9380_v34 = vrot.slane %v9379_v10, 4  ;;  %v9387_v56 = vrot.slane %v9386_v9, 4  ;;  %v12543_v62 = vld [vmem:[#allocation3 + $0xa] ss:$8 sps:$4 sm:$0xff]  }
 0x59f   :  { %v18321_v16 = vsel %vm8504_vm0, %v9364_v12, -inf  ;;  %v9393_v57 = vsel %vm9231_vm5, %v8996_v58, -inf  ;;  %v8831_v41 = vmul.f32 %v18117_v43, %v18284_v1  ;;  %v8853_v48 = vadd.f32 %v18138_v6, %v8830_v45 }
 0x5a0   :  { %v18324_v54 = vsel %vm8504_vm0, %v9371_v38, -inf  ;;  %v9375_v18 = vrot.slane %v9374_v59, 2  ;;  %v9381_v61 = vmax.f32 %v9379_v10, %v9380_v34  ;;  %v9388_v42 = vmax.f32 %v9386_v9, %v9387_v56 }
 0x5a1   :  { %v9394_v32 = vrot.slane %v9393_v57, 4  ;;  %v8854_v35 = vadd.f32 %v18138_v6, %v8831_v41  ;;  %v8832_v7 = vmul.f32 %v18117_v43, %v8778_v44  ;;  %v12472_v3 = vpack.i.bf16 %v12542_v39, %v12543_v62  ;;  %v10176_v44 = vld [vmem:[%s19077_s7 + $0xe0] sm:$0xff] }
 0x5a2   :  { %v9376_v52 = vmax.f32 %v9374_v59, %v9375_v18  ;;  %v9382_v22 = vrot.slane %v9381_v61, 2  ;;  %v9389_v5 = vrot.slane %v9388_v42, 2  ;;  %v8869_v46 = vmax.f32 %v8853_v48, 0.0  ;;  %11874 = vmatprep.subr.mxu1 %v10176_v44 }
 0x5a3   :  { %v9395_v33 = vmax.f32 %v9393_v57, %v9394_v32  ;;  %v8870_v47 = vmax.f32 %v8854_v35, 0.0  ;;  %v18335_v1 = vadd.f32 %v18138_v6, %v8832_v7  ;;  %12473 = vrot.lane.b32.xlu1 %v12472_v3, %s12667_s1  ;;  %v18339_v55 = vmul.f32 %v18117_v43, %v8783_v26  ;;  %v10175_v43 = vld [vmem:[%s19077_s7 + $0xd8] sm:$0xff]  ;;  %11875 = vmatpush3.msra.mxu1 %v10160_v53  ;;  %v10174_v3 = vld [vmem:[%s19077_s7 + $0xd0] sm:$0xff] }
 0x5a4   :  { %v9377_v40 = vrot.slane %v9376_v52, 1  ;;  %v9383_v6 = vmax.f32 %v9381_v61, %v9382_v22  ;;  %v9390_v24 = vmax.f32 %v9388_v42, %v9389_v5  ;;  %v8997_v36 = vcombine.high %v8869_v46, %v8869_v46  ;;  %11876 = vmatprep.subr.mxu1 %v10175_v43  ;;  %v10159_v7 = vld [vmem:[%s19077_s7 + $0x58] sm:$0xff] }
 0x5a5   :  { %v9396_v60 = vrot.slane %v9395_v33, 2  ;;  %v9004_v30 = vrot.slane %v8869_v46, %v13627_v50  ;;  %v9014_v28 = vcombine.high %v8870_v47, %v8870_v47  ;;  %v9021_v63 = vrot.slane %v8870_v47, %v13627_v50  ;;  %11877 = vmatpush3.msra.mxu1 %v10159_v7  ;;  %v10173_v46 = vld [vmem:[%s19077_s7 + $0xc8] sm:$0xff] }
 0x5a6   :  { %v9378_v11 = vmax.f32 %v9376_v52, %v9377_v40  ;;  %v9384_v27 = vrot.slane %v9383_v6, 1  ;;  %v9391_v19 = vrot.slane %v9390_v24, 1  ;;  %v9011_v26 = vrot.slane %v8997_v36, %v13627_v50  ;;  %11878 = vmatprep.subr.mxu1 %v10174_v3  ;;  %v10157_v40 = vld [vmem:[%s19077_s7 + $0x48] sm:$0xff]  ;;  %v10172_v36 = vld [vmem:[%s19077_s7 + $0xc0] sm:$0xff] }
 0x5a7   :  { %v9397_v49 = vmax.f32 %v9395_v33, %v9396_v60  ;;  %v9012_v14 = vcombine.high %v9004_v30, %v9004_v30  ;;  %v9400_v17 = vsel %vm9231_vm5, %v9004_v30, -inf  ;;  %v9028_v51 = vrot.slane %v9014_v28, %v13627_v50  ;;  %v12544_v3 = vld [vmem:[#allocation3 + $0x2] ss:$8 sps:$4 sm:$0xff]  }
 0x5a8   :  { %v9385_v21 = vmax.f32 %v9383_v6, %v9384_v27  ;;  %v9392_v2 = vmax.f32 %v9390_v24, %v9391_v19  ;;  %v9705_v8 = vsel %vm8504_vm0, %v9378_v11, -inf  ;;  %v9013_v12 = vcombine.high %v9011_v26, %v9011_v26  ;;  %v10156_v27 = vld [vmem:[%s19077_s7 + $0x40] sm:$0xff] }
 0x5a9   :  { %v9398_v13 = vrot.slane %v9397_v49, 1  ;;  %v9706_v23 = vmax.f32 %v18313_v25, %v9705_v8  ;;  %v9401_v58 = vrot.slane %v9400_v17, 4  ;;  %v9407_v31 = vsel %vm9231_vm5, %v9012_v14, -inf  ;;  %v10155_v8 = vld [vmem:[%s19077_s7 + $0x38] sm:$0xff] }
 0x5aa   :  { %v9708_v10 = vsel %vm8504_vm0, %v9385_v21, -inf  ;;  %v9711_v9 = vsel %vm8504_vm0, %v9392_v2, -inf  ;;  %v9408_v39 = vrot.slane %v9407_v31, 4  ;;  %v9414_v57 = vsel %vm9231_vm5, %v9011_v26, -inf }
 0x5ab   :  { %v9399_v38 = vmax.f32 %v9397_v49, %v9398_v13  ;;  %v9709_v59 = vmax.f32 %v18316_v4, %v9708_v10  ;;  %v9712_v34 = vmax.f32 %v18321_v16, %v9711_v9  ;;  %v9402_v56 = vmax.f32 %v9400_v17, %v9401_v58  ;;  %v10171_v17 = vld [vmem:[%s19077_s7 + $0xb8] sm:$0xff] }
 0x5ac   :  { %v9409_v25 = vmax.f32 %v9407_v31, %v9408_v39  ;;  %v9415_v41 = vrot.slane %v9414_v57, 4  ;;  %v9421_v62 = vsel %vm9231_vm5, %v9013_v12, -inf  ;;  %v9029_v16 = vcombine.high %v9021_v63, %v9021_v63 }
 0x5ad   :  { %v9714_v45 = vsel %vm8504_vm0, %v9399_v38, -inf  ;;  %v9827_v61 = vsel %vm7743_vm12, %v9709_v59, %v9706_v23  ;;  %v9403_v42 = vrot.slane %v9402_v56, 2  ;;  %v9422_v32 = vrot.slane %v9421_v62, 4  ;;  %v10170_v38 = vld [vmem:[%s19077_s7 + $0xb0] sm:$0xff] }
 0x5ae   :  { %v9715_v18 = vmax.f32 %v18324_v54, %v9714_v45  ;;  %v9828_v48 = vsel %vm7745_vm13, %v9712_v34, %v9827_v61  ;;  %v9410_v4 = vrot.slane %v9409_v25, 2  ;;  %v9416_v35 = vmax.f32 %v9414_v57, %v9415_v41  ;;  %v10158_v54 = vld [vmem:[%s19077_s7 + $0x50] sm:$0xff] }
 0x5af   :  { %v9404_v22 = vmax.f32 %v9402_v56, %v9403_v42  ;;  %v9423_v5 = vmax.f32 %v9421_v62, %v9422_v32  ;;  %v9030_v33 = vcombine.high %v9028_v51, %v9028_v51  ;;  %v9428_v44 = vsel %vm9231_vm5, %v9021_v63, -inf  ;;  %11879 = vmatpush3.msra.mxu1 %v10158_v54  ;;  %v10154_v34 = vld [vmem:[%s19077_s7 + $0x30] sm:$0xff]  ;;  %v10169_v62 = vld [vmem:[%s19077_s7 + $0xa8] sm:$0xff]  ;;  %v18426_v32 = vld [vmem:[%s19076_s6] ss:$0 sm:$0xff] }
 0x5b0   :  { %v9829_v52 = vsel %vm7747_vm14, %v9715_v18, %v9828_v48  ;;  %v9411_v47 = vmax.f32 %v9409_v25, %v9410_v4  ;;  %v9417_v0 = vrot.slane %v9416_v35, 2  ;;  %v9435_v53 = vsel %vm9231_vm5, %v9029_v16, -inf  ;;  %11880 = vmatprep.subr.mxu1 %v10173_v46  ;;  %v10168_v54 = vld [vmem:[%s19077_s7 + $0xa0] sm:$0xff] }
 0x5b1   :  { %9857 = vst.msk [vmem:[#allocation3 + $0x19] sm:$0xf] %vm9854_vm15, %v9829_v52  ;;  %v9405_v6 = vrot.slane %v9404_v22, 1  ;;  %v9424_v24 = vrot.slane %v9423_v5, 2  ;;  %v9429_v60 = vrot.slane %v9428_v44, 4  ;;  %v9436_v43 = vrot.slane %v9435_v53, 4  ;;  %11881 = vmatpush3.msra.mxu1 %v10157_v40 }
 0x5b2   :  { %v9412_v30 = vrot.slane %v9411_v47, 1  ;;  %v9418_v28 = vmax.f32 %v9416_v35, %v9417_v0  ;;  %v9442_v63 = vsel %vm9231_vm5, %v9028_v51, -inf  ;;  %v9449_v11 = vsel %vm9231_vm5, %v9030_v33, -inf  ;;  %11882 = vmatprep.subr.mxu1 %v10172_v36  ;;  %v10152_v33 = vld [vmem:[%s19077_s7 + $0x20] sm:$0xff] }
 0x5b3   :  { %v9406_v19 = vmax.f32 %v9404_v22, %v9405_v6  ;;  %v9425_v49 = vmax.f32 %v9423_v5, %v9424_v24  ;;  %v9430_v26 = vmax.f32 %v9428_v44, %v9429_v60  ;;  %v9437_v14 = vmax.f32 %v9435_v53, %v9436_v43  ;;  %11883 = vmatpush3.msra.mxu1 %v10156_v27  ;;  %v10167_v53 = vld [vmem:[%s19077_s7 + $0x98] sm:$0xff] }
 0x5b4   :  { %v9413_v21 = vmax.f32 %v9411_v47, %v9412_v30  ;;  %v9419_v2 = vrot.slane %v9418_v28, 1  ;;  %v9443_v13 = vrot.slane %v9442_v63, 4  ;;  %v9450_v51 = vrot.slane %v9449_v11, 4  ;;  %11884 = vmatprep.subr.mxu1 %v10171_v17  ;;  %v10151_v43 = vld [vmem:[%s19077_s7 + $0x18] sm:$0xff] }
 0x5b5   :  { %v9426_v23 = vrot.slane %v9425_v49, 1  ;;  %v18405_v12 = vsel %vm8504_vm0, %v9406_v19, -inf  ;;  %v9431_v58 = vrot.slane %v9430_v26, 2  ;;  %v9438_v31 = vrot.slane %v9437_v14, 2  ;;  %11885 = vmatpush3.msra.mxu1 %v10155_v8  ;;  %v10165_v8 = vld [vmem:[%s19077_s7 + $0x88] sm:$0xff] }
 0x5b6   :  { %v9420_v10 = vmax.f32 %v9418_v28, %v9419_v2  ;;  %v18411_v9 = vsel %vm8504_vm0, %v9413_v21, -inf  ;;  %v9444_v39 = vmax.f32 %v9442_v63, %v9443_v13  ;;  %v9451_v59 = vmax.f32 %v9449_v11, %v9450_v51  ;;  %11886 = vmatprep.subr.mxu1 %v10170_v38  ;;  %v10166_v11 = vld [vmem:[%s19077_s7 + $0x90] sm:$0xff]  ;;  %v10149_v38 = vld [vmem:[%s19077_s7 + $0x8] sm:$0xff] }
 0x5b7   :  { %v9427_v56 = vmax.f32 %v9425_v49, %v9426_v23  ;;  %v9432_v57 = vmax.f32 %v9430_v26, %v9431_v58  ;;  %v9439_v45 = vmax.f32 %v9437_v14, %v9438_v31  ;;  %v8871_v25 = vmax.f32 %v18335_v1, 0.0  ;;  %v10153_v1 = vld [vmem:[%s19077_s7 + $0x28] sm:$0xff]  ;;  %11887 = vmatpush3.msra.mxu1 %v10154_v34  ;;  %v10150_v14 = vld [vmem:[%s19077_s7 + $0x10] sm:$0xff] }
 0x5b8   :  { %v12545_v41 = vld [vmem:[#allocation3 + $0x10] ss:$8 sps:$4 sm:$0xff]   ;;  %v18421_v18 = vsel %vm8504_vm0, %v9420_v10, -inf  ;;  %v9445_v61 = vrot.slane %v9444_v39, 2  ;;  %v9452_v42 = vrot.slane %v9451_v59, 2  ;;  %v8856_v48 = vadd.f32 %v18426_v32, %v18339_v55  ;;  %11888 = vmatprep.subr.mxu1 %v10169_v62 }
 0x5b9   :  { %v18434_v4 = vsel %vm8504_vm0, %v9427_v56, -inf  ;;  %v9433_v35 = vrot.slane %v9432_v57, 1  ;;  %v9440_v16 = vrot.slane %v9439_v45, 1  ;;  %v9031_v7 = vcombine.high %v8871_v25, %v8871_v25  ;;  %11889 = vmatpush3.msra.mxu1 %v10153_v1  ;;  %v12547_v51 = vld [vmem:[#allocation3 + $0x11] ss:$8 sps:$4 sm:$0xff]   ;;  %v10164_v56 = vld [vmem:[%s19077_s7 + $0x80] sm:$0xff] }
 0x5ba   :  { %v9446_v52 = vmax.f32 %v9444_v39, %v9445_v61  ;;  %v9453_v22 = vmax.f32 %v9451_v59, %v9452_v42  ;;  %v9038_v55 = vrot.slane %v8871_v25, %v13627_v50  ;;  %v18440_v5 = vmax.f32 %v8856_v48, 0.0  ;;  %11890 = vmatprep.subr.mxu1 %v10168_v54  ;;  %v12546_v34 = vld [vmem:[#allocation3 + $0x8] ss:$8 sps:$4 sm:$0xff]  }
 0x5bb   :  { %v9434_v46 = vmax.f32 %v9432_v57, %v9433_v35  ;;  %v9441_v47 = vmax.f32 %v9439_v45, %v9440_v16  ;;  %v9045_v0 = vrot.slane %v9031_v7, %v13627_v50  ;;  %v12477_v44 = vpack.i.bf16 %v12544_v3, %v12545_v41  ;;  %11891 = vmatpush3.msra.mxu1 %v10152_v33  ;;  %v12429_v57 = vpop.permute.xlu0 %12428 }
 0x5bc   :  { %v9447_v40 = vrot.slane %v9446_v52, 1  ;;  %v9454_v6 = vrot.slane %v9453_v22, 1  ;;  %v9046_v24 = vcombine.high %v9038_v55, %v9038_v55  ;;  %v9456_v60 = vsel %vm9231_vm5, %v9038_v55, -inf  ;;  %11892 = vmatprep.subr.mxu1 %v10167_v53  ;;  %v18494_v55 = vpop.permute.xlu1 %12433 }
 0x5bd   :  { %v9717_v36 = vsel %vm8504_vm0, %v9434_v46, -inf  ;;  %v9720_v30 = vsel %vm8504_vm0, %v9441_v47, -inf  ;;  %v9047_v28 = vcombine.high %v9045_v0, %v9045_v0  ;;  %v9457_v63 = vrot.slane %v9456_v60, 4  ;;  %12478 = vrot.lane.b32.xlu0 %v12477_v44, %s12669_s20  ;;  %11893 = vmatpush3.msra.mxu1 %v10151_v43 }
 0x5be   :  { %v9448_v27 = vmax.f32 %v9446_v52, %v9447_v40  ;;  %v9455_v19 = vmax.f32 %v9453_v22, %v9454_v6  ;;  %v9718_v49 = vmax.f32 %v18405_v12, %v9717_v36  ;;  %v9721_v26 = vmax.f32 %v18411_v9, %v9720_v30  ;;  %11894 = vmatprep.subr.mxu1 %v10166_v11 }
 0x5bf   :  { %v9458_v17 = vmax.f32 %v9456_v60, %v9457_v63  ;;  %v9463_v21 = vsel %vm9231_vm5, %v9046_v24, -inf  ;;  %v9470_v2 = vsel %vm9231_vm5, %v9045_v0, -inf  ;;  %v9477_v13 = vsel %vm9231_vm5, %v9047_v28, -inf  ;;  %11895 = vmatpush3.msra.mxu1 %v10150_v14 }
 0x5c0   :  { %v9723_v23 = vsel %vm8504_vm0, %v9448_v27, -inf  ;;  %v9726_v12 = vsel %vm8504_vm0, %v9455_v19, -inf  ;;  %v9830_v58 = vsel %vm7743_vm12, %v9721_v26, %v9718_v49  ;;  %v9464_v31 = vrot.slane %v9463_v21, 4  ;;  %11896 = vmatprep.subr.mxu1 %v10165_v8  ;;  %v18505_v19 = vpop.permute.xlu0 %12438 }
 0x5c1   :  { %v9724_v10 = vmax.f32 %v18421_v18, %v9723_v23  ;;  %v9727_v9 = vmax.f32 %v18434_v4, %v9726_v12  ;;  %v9459_v39 = vrot.slane %v9458_v17, 2  ;;  %v9471_v59 = vrot.slane %v9470_v2, 4  ;;  %v10148_v18 = vld [vmem:[%s19077_s7] sm:$0xff]  ;;  %11897 = vmatpush3.msra.mxu1 %v10149_v38 }
 0x5c2   :  { %v9465_v45 = vmax.f32 %v9463_v21, %v9464_v31  ;;  %v9478_v25 = vrot.slane %v9477_v13, 4  ;;  %v9048_v41 = vcombine.high %v18440_v5, %v18440_v5  ;;  %v9055_v62 = vrot.slane %v18440_v5, %v13627_v50  ;;  %11898 = vmatprep.subr.mxu1 %v10164_v56 }
 0x5c3   :  { %v9831_v61 = vsel %vm7745_vm13, %v9724_v10, %v9830_v58  ;;  %v9460_v42 = vmax.f32 %v9458_v17, %v9459_v39  ;;  %v9472_v48 = vmax.f32 %v9470_v2, %v9471_v59  ;;  %v12482_v1 = vpack.i.bf16 %v12546_v34, %v12547_v51  ;;  %11899 = vmatpush3.msra.mxu1 %v10148_v18  ;;  %v12550_v51 = vld [vmem:[#allocation3 + $0x12] ss:$8 sps:$4 sm:$0xff]  }
 0x5c4   :  { %v9832_v4 = vsel %vm7747_vm14, %v9727_v9, %v9831_v61  ;;  %v9466_v35 = vrot.slane %v9465_v45, 2  ;;  %v9479_v16 = vmax.f32 %v9477_v13, %v9478_v25  ;;  %v9062_v7 = vrot.slane %v9048_v41, %v13627_v50  ;;  %v12548_v13 = vld [vmem:[#allocation3 + $0x11] ss:$8 sps:$4 sm:$0xff]  }
 0x5c5   :  { %v12431_v3 = vunpack.i.h.bf16 %v12429_v57  ;;  %9858 = vst.msk [vmem:[#allocation3 + $0x21] sm:$0xf] %vm9854_vm15, %v9832_v4  ;;  %v9473_v54 = vrot.slane %v9472_v48, 2  ;;  %v9063_v52 = vcombine.high %v9055_v62, %v9055_v62  ;;  %v9484_v22 = vsel %vm9231_vm5, %v9055_v62, -inf  ;;  %12483 = vrot.lane.b32.xlu1 %v12482_v1, %s12671_s16 }
 0x5c6   :  { %v9467_v5 = vmax.f32 %v9465_v45, %v9466_v35  ;;  %v9480_v33 = vrot.slane %v9479_v16, 2  ;;  %v9064_v46 = vcombine.high %v9062_v7, %v9062_v7  ;;  %v9485_v47 = vrot.slane %v9484_v22, 4 }
 0x5c7   :  { %v12430_v0 = vunpack.i.l.bf16 %v12429_v57  ;;  %v9474_v44 = vmax.f32 %v9472_v48, %v9473_v54  ;;  %v9491_v53 = vsel %vm9231_vm5, %v9063_v52, -inf  ;;  %v9498_v40 = vsel %vm9231_vm5, %v9062_v7, -inf  ;;  %v12444_v57 = vpop.permute.xlu1 %12443 }
 0x5c8   :  { %v9461_v6 = vrot.slane %v9460_v42, 1  ;;  %v9481_v24 = vmax.f32 %v9479_v16, %v9480_v33  ;;  %v9486_v60 = vmax.f32 %v9484_v22, %v9485_v47  ;;  %v9492_v43 = vrot.slane %v9491_v53, 4 }
 0x5c9   :  { %v12436_v36 = vunpack.i.h.bf16 %v18494_v55  ;;  %v9468_v30 = vrot.slane %v9467_v5, 1  ;;  %v9499_v28 = vrot.slane %v9498_v40, 4  ;;  %v9505_v63 = vsel %vm9231_vm5, %v9064_v46, -inf }
 0x5ca   :  { %v12435_v11 = vunpack.i.l.bf16 %v18494_v55  ;;  %v18503_v27 = vsel %vm8521_vm4, %v18310_v37, %v12431_v3  ;;  %v9487_v49 = vrot.slane %v9486_v60, 2  ;;  %v9493_v26 = vmax.f32 %v9491_v53, %v9492_v43 }
 0x5cb   :  { %v8534_v14 = vsel %vm8521_vm4, %v18305_v29, %v12430_v0  ;;  %v9475_v17 = vrot.slane %v9474_v44, 1  ;;  %v9500_v21 = vmax.f32 %v9498_v40, %v9499_v28  ;;  %v9506_v2 = vrot.slane %v9505_v63, 4 }
 0x5cc   :  { %v9462_v8 = vmax.f32 %v9460_v42, %v9461_v6  ;;  %v9482_v23 = vrot.slane %v9481_v24, 1  ;;  %v9488_v12 = vmax.f32 %v9486_v60, %v9487_v49  ;;  %v9494_v58 = vrot.slane %v9493_v26, 2  ;;  %v12549_v31 = vld [vmem:[#allocation3 + $0x1a] ss:$8 sps:$4 sm:$0xff]   ;;  %v12449_v42 = vpop.permute.xlu0 %12448 }
 0x5cd   :  { %v12441_v37 = vunpack.i.h.bf16 %v18505_v19  ;;  %v9469_v38 = vmax.f32 %v9467_v5, %v9468_v30  ;;  %v9501_v10 = vrot.slane %v9500_v21, 2  ;;  %v9507_v9 = vmax.f32 %v9505_v63, %v9506_v2  ;;  %v12551_v39 = vld [vmem:[#allocation3 + $0x20] ss:$8 sps:$4 sm:$0xff]  }
 0x5ce   :  { %v12440_v59 = vunpack.i.l.bf16 %v18505_v19  ;;  %v9489_v34 = vrot.slane %v9488_v12, 1  ;;  %v9495_v29 = vmax.f32 %v9493_v26, %v9494_v58  ;;  %v12487_v56 = vpack.i.bf16 %v12548_v13, %v12549_v31  ;;  %v12552_v18 = vld [vmem:[#allocation3 + $0x18] ss:$8 sps:$4 sm:$0xff]  }
 0x5cf   :  { %v9476_v45 = vmax.f32 %v9474_v44, %v9475_v17  ;;  %v9502_v25 = vmax.f32 %v9500_v21, %v9501_v10  ;;  %v9508_v41 = vrot.slane %v9507_v9, 2  ;;  %v12492_v62 = vpack.i.bf16 %v12550_v51, %v12551_v39  ;;  %v12553_v61 = vld [vmem:[#allocation3 + $0x21] ss:$8 sps:$4 sm:$0xff]   ;;  %v8037_v21 = vld [vmem:[#allocation2 + $0x112] sm:$0xff] }
 0x5d0   :  { %v9483_v48 = vmax.f32 %v9481_v24, %v9482_v23  ;;  %v9728_v1 = vsel %vm8504_vm0, %v9462_v8, -inf  ;;  %v9490_v4 = vmax.f32 %v9488_v12, %v9489_v34  ;;  %v9496_v35 = vrot.slane %v9495_v29, 1  ;;  %12488 = vrot.lane.b32.xlu0 %v12487_v56, %s12667_s1  ;;  %v12459_v23 = vpop.permute.xlu0 %12458  ;;  %v7909_v31 = vld [vmem:[#allocation2 + $0x100] sm:$0xff] }
 0x5d1   :  { %v9731_v16 = vsel %vm8504_vm0, %v9469_v38, -inf  ;;  %v9503_v7 = vrot.slane %v9502_v25, 1  ;;  %v9509_v3 = vmax.f32 %v9507_v9, %v9508_v41  ;;  %12493 = vrot.lane.b32.xlu1 %v12492_v62, %s12669_s20  ;;  %v12445_v54 = vunpack.i.l.bf16 %v12444_v57 }
 0x5d2   :  { %v9497_v52 = vmax.f32 %v9495_v29, %v9496_v35  ;;  %v9729_v22 = vsel %vm8504_vm0, %v9490_v4, -inf  ;;  %v12497_v5 = vpack.i.bf16 %v12552_v18, %v12553_v61  ;;  %v12450_v33 = vunpack.i.l.bf16 %v12449_v42 }
 0x5d3   :  { %v9734_v46 = vsel %vm8504_vm0, %v9476_v45, -inf  ;;  %v9504_v47 = vmax.f32 %v9502_v25, %v9503_v7  ;;  %v9510_v0 = vrot.slane %v9509_v3, 1  ;;  %v8551_v44 = vsel %vm8538_vm1, %v8534_v14, %v12435_v11 }
 0x5d4   :  { %v9730_v53 = vmax.f32 %v9728_v1, %v9729_v22  ;;  %v9732_v40 = vsel %vm8504_vm0, %v9497_v52, -inf  ;;  %12498 = vrot.lane.b32.xlu0 %v12497_v5, %s12671_s16  ;;  %v12446_v6 = vunpack.i.h.bf16 %v12444_v57  ;;  %v8568_v24 = vsel %vm8555_vm6, %v8551_v44, %v12440_v59  ;;  %v7910_v57 = vld [vmem:[#allocation2 + $0x110] sm:$0xff] }
 0x5d5   :  { %v9511_v60 = vmax.f32 %v9509_v3, %v9510_v0  ;;  %v9733_v43 = vmax.f32 %v9731_v16, %v9732_v40  ;;  %v9735_v30 = vsel %vm8504_vm0, %v9504_v47, -inf  ;;  %v8585_v28 = vsel %vm8572_vm2, %v8568_v24, %v12445_v54  ;;  %v8039_v16 = vld [vmem:[#allocation2 + $0x132] sm:$0xff]  ;;  %v18558_v47 = vld [vmem:[%s19075_s5] ss:$0 sm:$0xff] }
 0x5d6   :  { %v9736_v63 = vmax.f32 %v9734_v46, %v9735_v30  ;;  %v12451_v19 = vunpack.i.h.bf16 %v12449_v42  ;;  %v8602_v49 = vsel %vm8589_vm7, %v8585_v28, %v12450_v33  ;;  %v8552_v11 = vsel %vm8538_vm1, %v18503_v27, %v12436_v36  ;;  %v12454_v27 = vpop.permute.xlu1 %12453 }
 0x5d7   :  { %v9737_v26 = vsel %vm8504_vm0, %v9483_v48, -inf  ;;  %v9738_v14 = vsel %vm8504_vm0, %v9511_v60, -inf  ;;  %v9833_v17 = vsel %vm7743_vm12, %v9733_v43, %v9730_v53  ;;  %8797 = vmatmul.mubr.f32.gmra.mxu1 %v8602_v49  ;;  %v8569_v2 = vsel %vm8555_vm6, %v8552_v11, %v12441_v37 }
 0x5d8   :  { %v9739_v13 = vmax.f32 %v9737_v26, %v9738_v14  ;;  %v9834_v51 = vsel %vm7745_vm13, %v9736_v63, %v9833_v17  ;;  %11785 = vmatprep.mubr.msk.f32.mxu1 %vm7190_vm11, %v8037_v21  ;;  %v8586_v55 = vsel %vm8572_vm2, %v8569_v2, %v12446_v6  ;;  %v12455_v12 = vunpack.i.l.bf16 %v12454_v27 }
 0x5d9   :  { %v8603_v36 = vsel %vm8589_vm7, %v8586_v55, %v12451_v19  ;;  %v12460_v58 = vunpack.i.l.bf16 %v12459_v23  ;;  %v12456_v10 = vunpack.i.h.bf16 %v12454_v27  ;;  %v12461_v56 = vunpack.i.h.bf16 %v12459_v23 }
 0x5da   :  { %v9835_v8 = vsel %vm7747_vm14, %v9739_v13, %v9834_v51  ;;  %v8502_v38 = vsel %vm7190_vm11, %v7909_v31, %v12455_v12 }
 0x5db   :  { %9859 = vst.msk [vmem:[#allocation3 + $0x39] sm:$0xf] %vm9854_vm15, %v9835_v8  ;;  %8802 = vmatmul.mubr.f32.gmra.mxu1 %v8603_v36  ;;  %v8519_v29 = vsel %vm8504_vm0, %v8502_v38, %v12460_v58 }
 0x5dc   :  { %11786 = vmatprep.mubr.msk.f32.mxu1 %vm7190_vm11, %v18258_v20  ;;  %v8503_v20 = vsel %vm7190_vm11, %v7910_v57, %v12456_v10 }
 0x5dd   :  { %v8520_v48 = vsel %vm8504_vm0, %v8503_v20, %v12461_v56 }
 0x5e9   :  { %v12469_v37 = vpop.permute.xlu0 %12468 }
 0x5ea   :  { %v12470_v9 = vunpack.i.l.bf16 %v12469_v37  ;;  %v12471_v42 = vunpack.i.h.bf16 %v12469_v37 }
 0x5ec   :  { %v12464_v39 = vpop.permute.xlu1 %12463 }
 0x5ed   :  { %v12465_v59 = vunpack.i.l.bf16 %v12464_v39  ;;  %v8405_v34 = vpop.permute.xlu0 %8404  ;;  %v12466_v25 = vunpack.i.h.bf16 %v12464_v39 }
 0x5ef   :  { %v8536_v45 = vsel %vm8521_vm4, %v8519_v29, %v12465_v59  ;;  %v8537_v1 = vsel %vm8521_vm4, %v8520_v48, %v12466_v25  ;;  %vm11305_vm4 = vcmask 74752  }
 0x5f0   :  { %v8341_v41 = vpop.permute.xlu1 %8340  ;;  %v8553_v62 = vsel %vm8538_vm1, %v8536_v45, %v12470_v9  ;;  %v8554_v3 = vsel %vm8538_vm1, %v8537_v1, %v12471_v42 }
 0x5f1   :  { %v8570_v18 = vsel %vm8555_vm6, %v8553_v62, %v8341_v41  ;;  %v8343_v61 = vpop.permute.xlu0 %8342 }
 0x5f2   :  { %v8587_v35 = vsel %vm8572_vm2, %v8570_v18, %v8405_v34  ;;  %v8571_v52 = vsel %vm8555_vm6, %v8554_v3, %v8343_v61 }
 0x5f4   :  { %v8469_v4 = vpop.permute.xlu1 %8468 }
 0x5f5   :  { %v8604_v7 = vsel %vm8589_vm7, %v8587_v35, %v8469_v4  ;;  %v8471_v54 = vpop.permute.xlu0 %8470 }
 0x5f6   :  { %8807 = vmatmul.mubr.f32.gmra.mxu1 %v8604_v7 }
 0x5f7   :  { %11787 = vmatprep.mubr.msk.f32.mxu1 %vm7190_vm11, %v8039_v16  ;;  %vm10613_vm11 = vcmask 519168  }
 0x5f8   :  { %v8407_v22 = vpop.permute.xlu1 %8406  ;;  %10616 = vst.msk [vmem:[#allocation4 + $0x8] sm:$0xf] %vm10613_vm11, %v12665_v15  ;;  %10614 = vst.msk [vmem:[#allocation4] sm:$0xf] %vm10613_vm11, %v12665_v15 }
 0x5f9   :  { %v8588_v5 = vsel %vm8572_vm2, %v8571_v52, %v8407_v22  ;;  %10615 = vst.msk [vmem:[#allocation4 + $0x4] sm:$0xf] %vm10613_vm11, %v12665_v15  ;;  %10617 = vst.msk [vmem:[#allocation4 + $0xc] sm:$0xf] %vm10613_vm11, %v12665_v15 }
 0x5fa   :  { %v8605_v33 = vsel %vm8589_vm7, %v8588_v5, %v8471_v54  ;;  %10618 = vst.msk [vmem:[#allocation4 + $0x10] sm:$0xf] %vm10613_vm11, %v12665_v15  ;;  %10619 = vst.msk [vmem:[#allocation4 + $0x14] sm:$0xf] %vm10613_vm11, %v12665_v15 }
 0x5fb   :  { %8812 = vmatmul.mubr.f32.gmra.mxu1 %v8605_v33  ;;  %10620 = vst.msk [vmem:[#allocation4 + $0x18] sm:$0xf] %vm10613_vm11, %v12665_v15  ;;  %10621 = vst.msk [vmem:[#allocation4 + $0x1c] sm:$0xf] %vm10613_vm11, %v12665_v15 }
 0x606   :  { %v8788_v46 = vpop.f32.mrf.mxu1 }
 0x607   :  { %v8834_v0 = vmul.f32 %v18558_v47, %v8788_v46 }
 0x608   :  { %v8790_v44 = vpop.f32.mrf.mxu1 }
 0x609   :  { %v8857_v53 = vadd.f32 %v18426_v32, %v8834_v0 }
 0x60a   :  { %v8793_v40 = vpop.f32.mrf.mxu1 }
 0x60b   :  { %v8873_v6 = vmax.f32 %v8857_v53, 0.0  ;;  %v8835_v24 = vmul.f32 %v18558_v47, %v8793_v40 }
 0x60c   :  { %v8795_v60 = vpop.f32.mrf.mxu1 }
 0x60d   :  { %v9065_v43 = vcombine.high %v8873_v6, %v8873_v6  ;;  %v9072_v30 = vrot.slane %v8873_v6, %v13627_v50  ;;  %v8858_v28 = vadd.f32 %v18426_v32, %v8835_v24 }
 0x60f   :  { %v9079_v63 = vrot.slane %v9065_v43, %v13627_v50  ;;  %v9080_v19 = vcombine.high %v9072_v30, %v9072_v30  ;;  %v9512_v49 = vsel %vm9231_vm5, %v9072_v30, -inf  ;;  %v8874_v11 = vmax.f32 %v8858_v28, 0.0 }
 0x610   :  { %v9513_v26 = vrot.slane %v9512_v49, 4 }
 0x611   :  { %v9081_v14 = vcombine.high %v9079_v63, %v9079_v63  ;;  %v9519_v17 = vsel %vm9231_vm5, %v9080_v19, -inf  ;;  %v9526_v21 = vsel %vm9231_vm5, %v9079_v63, -inf  ;;  %v9082_v2 = vcombine.high %v8874_v11, %v8874_v11 }
 0x612   :  { %v9514_v13 = vmax.f32 %v9512_v49, %v9513_v26  ;;  %v9520_v51 = vrot.slane %v9519_v17, 4  ;;  %v9527_v55 = vrot.slane %v9526_v21, 4  ;;  %v9089_v8 = vrot.slane %v8874_v11, %v13627_v50 }
 0x613   :  { %v9533_v36 = vsel %vm9231_vm5, %v9081_v14, -inf  ;;  %v9096_v27 = vrot.slane %v9082_v2, %v13627_v50 }
 0x614   :  { %v9515_v23 = vrot.slane %v9514_v13, 2  ;;  %v9521_v12 = vmax.f32 %v9519_v17, %v9520_v51  ;;  %v9528_v58 = vmax.f32 %v9526_v21, %v9527_v55  ;;  %v9534_v31 = vrot.slane %v9533_v36, 4 }
 0x615   :  { %v9097_v37 = vcombine.high %v9089_v8, %v9089_v8  ;;  %v9098_v38 = vcombine.high %v9096_v27, %v9096_v27  ;;  %v9540_v10 = vsel %vm9231_vm5, %v9089_v8, -inf  ;;  %v9554_v9 = vsel %vm9231_vm5, %v9096_v27, -inf }
 0x616   :  { %v9522_v39 = vrot.slane %v9521_v12, 2  ;;  %v9529_v59 = vrot.slane %v9528_v58, 2  ;;  %v9535_v34 = vmax.f32 %v9533_v36, %v9534_v31  ;;  %v9541_v29 = vrot.slane %v9540_v10, 4 }
 0x617   :  { %v9547_v56 = vsel %vm9231_vm5, %v9097_v37, -inf  ;;  %v9555_v57 = vrot.slane %v9554_v9, 4  ;;  %v9561_v45 = vsel %vm9231_vm5, %v9098_v38, -inf  ;;  %v9516_v20 = vmax.f32 %v9514_v13, %v9515_v23  ;;  %v12474_v38 = vpop.permute.xlu1 %12473 }
 0x618   :  { %v9523_v25 = vmax.f32 %v9521_v12, %v9522_v39  ;;  %v9530_v41 = vmax.f32 %v9528_v58, %v9529_v59  ;;  %v9536_v62 = vrot.slane %v9535_v34, 2  ;;  %v9542_v18 = vmax.f32 %v9540_v10, %v9541_v29  ;;  %v12554_v29 = vld [vmem:[#allocation3] ss:$8 sps:$4 sm:$0xff]  }
 0x619   :  { %v9548_v61 = vrot.slane %v9547_v56, 4  ;;  %v9556_v42 = vmax.f32 %v9554_v9, %v9555_v57  ;;  %v9562_v48 = vrot.slane %v9561_v45, 4  ;;  %v9517_v3 = vrot.slane %v9516_v20, 1  ;;  %v12558_v57 = vld [vmem:[#allocation3 + $0x31] ss:$8 sps:$4 sm:$0xff]  }
 0x61a   :  { %v9537_v1 = vmax.f32 %v9535_v34, %v9536_v62  ;;  %v9543_v4 = vrot.slane %v9542_v18, 2  ;;  %v9524_v54 = vrot.slane %v9523_v25, 1  ;;  %v9531_v52 = vrot.slane %v9530_v41, 1 }
 0x61b   :  { %v9549_v35 = vmax.f32 %v9547_v56, %v9548_v61  ;;  %v9557_v16 = vrot.slane %v9556_v42, 2  ;;  %v9563_v7 = vmax.f32 %v9561_v45, %v9562_v48  ;;  %v9518_v24 = vmax.f32 %v9516_v20, %v9517_v3  ;;  %v12555_v56 = vld [vmem:[#allocation3 + $0x9] ss:$8 sps:$4 sm:$0xff]  }
 0x61c   :  { %v9538_v22 = vrot.slane %v9537_v1, 1  ;;  %v9544_v5 = vmax.f32 %v9542_v18, %v9543_v4  ;;  %v9525_v60 = vmax.f32 %v9523_v25, %v9524_v54  ;;  %v9532_v43 = vmax.f32 %v9530_v41, %v9531_v52  ;;  %v12556_v54 = vld [vmem:[#allocation3 + $0x19] ss:$8 sps:$4 sm:$0xff]  }
 0x61d   :  { %v9550_v33 = vrot.slane %v9549_v35, 2  ;;  %v9558_v46 = vmax.f32 %v9556_v42, %v9557_v16  ;;  %v9564_v0 = vrot.slane %v9563_v7, 2  ;;  %v9740_v21 = vsel %vm8504_vm0, %v9518_v24, -inf  ;;  %v12557_v52 = vld [vmem:[#allocation3 + $0x10] ss:$8 sps:$4 sm:$0xff]  }
 0x61e   :  { %v9545_v44 = vrot.slane %v9544_v5, 1  ;;  %v9539_v30 = vmax.f32 %v9537_v1, %v9538_v22  ;;  %v9743_v2 = vsel %vm8504_vm0, %v9525_v60, -inf  ;;  %v9746_v13 = vsel %vm8504_vm0, %v9532_v43, -inf }
 0x61f   :  { %v9551_v53 = vmax.f32 %v9549_v35, %v9550_v33  ;;  %v9559_v40 = vrot.slane %v9558_v46, 1  ;;  %v9565_v6 = vmax.f32 %v9563_v7, %v9564_v0  ;;  %v12476_v9 = vunpack.i.h.bf16 %v12474_v38 }
 0x620   :  { %v9546_v28 = vmax.f32 %v9544_v5, %v9545_v44  ;;  %v9749_v51 = vsel %vm8504_vm0, %v9539_v30, -inf  ;;  %v12475_v39 = vunpack.i.l.bf16 %v12474_v38 }
 0x621   :  { %v9552_v63 = vrot.slane %v9551_v53, 1  ;;  %v9560_v19 = vmax.f32 %v9558_v46, %v9559_v40  ;;  %v9566_v49 = vrot.slane %v9565_v6, 1  ;;  %v10124_v20 = vsel %vm8504_vm0, %v12554_v29, %v12476_v9 }
 0x622   :  { %v9741_v14 = vsel %vm8504_vm0, %v9546_v28, -inf  ;;  %v10136_v25 = vsel %vm8504_vm0, %v12555_v56, %v12475_v39 }
 0x623   :  { %v9553_v11 = vmax.f32 %v9551_v53, %v9552_v63  ;;  %v9567_v26 = vmax.f32 %v9565_v6, %v9566_v49  ;;  %v9747_v17 = vsel %vm8504_vm0, %v9560_v19, -inf  ;;  %v9742_v27 = vmax.f32 %v9740_v21, %v9741_v14 }
 0x624   :  { %v9748_v8 = vmax.f32 %v9746_v13, %v9747_v17 }
 0x625   :  { %v9744_v55 = vsel %vm8504_vm0, %v9553_v11, -inf  ;;  %v9750_v36 = vsel %vm8504_vm0, %v9567_v26, -inf }
 0x626   :  { %v9745_v23 = vmax.f32 %v9743_v2, %v9744_v55  ;;  %v9751_v12 = vmax.f32 %v9749_v51, %v9750_v36 }
 0x628   :  { %v9836_v58 = vsel %vm7743_vm12, %v9745_v23, %v9742_v27 }
 0x629   :  { %v9837_v31 = vsel %vm7745_vm13, %v9748_v8, %v9836_v58 }
 0x62a   :  { %v9838_v37 = vsel %vm7747_vm14, %v9751_v12, %v9837_v31 }
 0x62b   :  { %9860 = vst.msk [vmem:[#allocation3 + $0x41] sm:$0xf] %vm9854_vm15, %v9838_v37 }
 0x62f   :  { %v12479_v10 = vpop.permute.xlu0 %12478 }
 0x630   :  { %v12481_v59 = vunpack.i.h.bf16 %v12479_v10  ;;  %v12480_v34 = vunpack.i.l.bf16 %v12479_v10 }
 0x632   :  { %v12559_v45 = vld [vmem:[#allocation3 + $0x3a] ss:$8 sps:$4 sm:$0xff]   ;;  %v10128_v41 = vsel %vm8538_vm1, %v10124_v20, %v12481_v59  ;;  %v10140_v18 = vsel %vm8538_vm1, %v10136_v25, %v12480_v34 }
 0x633   :  { %v12502_v61 = vpack.i.bf16 %v12558_v57, %v12559_v45 }
 0x635   :  { %12503 = vrot.lane.b32.xlu1 %v12502_v61, %s12667_s1 }
 0x637   :  { %v12484_v62 = vpop.permute.xlu1 %12483 }
 0x638   :  { %v12486_v42 = vunpack.i.h.bf16 %v12484_v62  ;;  %v12485_v48 = vunpack.i.l.bf16 %v12484_v62 }
 0x63a   :  { %v10144_v1 = vsel %vm8572_vm2, %v10140_v18, %v12485_v48  ;;  %v10132_v4 = vsel %vm8572_vm2, %v10128_v41, %v12486_v42 }
 0x63b   :  { %10256 = vmatprep.mubr.f32.mxu1 %v10144_v1 }
 0x63c   :  { %10257 = vmatmul.mubr.f32.vlgmr.msra.gmra.mxu1 %v10132_v4 }
 0x642   :  { %v12489_v35 = vpop.permute.xlu0 %12488 }
 0x643   :  { %v12491_v16 = vunpack.i.h.bf16 %v12489_v35  ;;  %v12490_v7 = vunpack.i.l.bf16 %v12489_v35  ;;  %v12494_v3 = vpop.permute.xlu1 %12493 }
 0x644   :  { %v12496_v22 = vunpack.i.h.bf16 %v12494_v3  ;;  %v12495_v5 = vunpack.i.l.bf16 %v12494_v3 }
 0x645   :  { %v10137_v33 = vsel %vm8504_vm0, %v12556_v54, %v12490_v7  ;;  %v10125_v46 = vsel %vm8504_vm0, %v12557_v52, %v12491_v16 }
 0x646   :  { %v12499_v0 = vpop.permute.xlu0 %12498  ;;  %v10141_v40 = vsel %vm8538_vm1, %v10137_v33, %v12495_v5  ;;  %v10129_v6 = vsel %vm8538_vm1, %v10125_v46, %v12496_v22 }
 0x647   :  { %v12501_v44 = vunpack.i.h.bf16 %v12499_v0  ;;  %v12500_v53 = vunpack.i.l.bf16 %v12499_v0 }
 0x649   :  { %v10145_v24 = vsel %vm8572_vm2, %v10141_v40, %v12500_v53  ;;  %v10133_v60 = vsel %vm8572_vm2, %v10129_v6, %v12501_v44 }
 0x64a   :  { %10261 = vmatprep.mubr.f32.mxu1 %v10145_v24 }
 0x64b   :  { %10262 = vmatmul.mubr.f32.gmra.mxu1 %v10133_v60 }
 0x697   :  { %v8798_v43 = vpop.f32.mrf.mxu1 }
 0x698   :  { %v8836_v30 = vmul.f32 %v18558_v47, %v8798_v43 }
 0x699   :  { %v8800_v28 = vpop.f32.mrf.mxu1 }
 0x69a   :  { %v8859_v63 = vadd.f32 %v18426_v32, %v8836_v30 }
 0x69b   :  { %v8803_v19 = vpop.f32.mrf.mxu1 }
 0x69c   :  { %v8875_v49 = vmax.f32 %v8859_v63, 0.0  ;;  %v8837_v11 = vmul.f32 %v18558_v47, %v8803_v19 }
 0x69d   :  { %v8805_v26 = vpop.f32.mrf.mxu1 }
 0x69e   :  { %v9099_v14 = vcombine.high %v8875_v49, %v8875_v49  ;;  %v9106_v17 = vrot.slane %v8875_v49, %v13627_v50  ;;  %v8860_v21 = vadd.f32 %v18426_v32, %v8837_v11 }
 0x6a0   :  { %v9113_v2 = vrot.slane %v9099_v14, %v13627_v50  ;;  %v9114_v13 = vcombine.high %v9106_v17, %v9106_v17  ;;  %v9568_v51 = vsel %vm9231_vm5, %v9106_v17, -inf  ;;  %v8876_v55 = vmax.f32 %v8860_v21, 0.0 }
 0x6a1   :  { %v9569_v8 = vrot.slane %v9568_v51, 4 }
 0x6a2   :  { %v9115_v36 = vcombine.high %v9113_v2, %v9113_v2  ;;  %v9575_v27 = vsel %vm9231_vm5, %v9114_v13, -inf  ;;  %v9582_v23 = vsel %vm9231_vm5, %v9113_v2, -inf  ;;  %v9116_v12 = vcombine.high %v8876_v55, %v8876_v55 }
 0x6a3   :  { %v9570_v58 = vmax.f32 %v9568_v51, %v9569_v8  ;;  %v9576_v31 = vrot.slane %v9575_v27, 4  ;;  %v9583_v37 = vrot.slane %v9582_v23, 4  ;;  %v9123_v38 = vrot.slane %v8876_v55, %v13627_v50 }
 0x6a4   :  { %v9589_v10 = vsel %vm9231_vm5, %v9115_v36, -inf  ;;  %v9130_v9 = vrot.slane %v9116_v12, %v13627_v50 }
 0x6a5   :  { %v9571_v39 = vrot.slane %v9570_v58, 2  ;;  %v9577_v59 = vmax.f32 %v9575_v27, %v9576_v31  ;;  %v9584_v34 = vmax.f32 %v9582_v23, %v9583_v37  ;;  %v9590_v29 = vrot.slane %v9589_v10, 4 }
 0x6a6   :  { %v9131_v56 = vcombine.high %v9123_v38, %v9123_v38  ;;  %v9132_v57 = vcombine.high %v9130_v9, %v9130_v9  ;;  %v9596_v45 = vsel %vm9231_vm5, %v9123_v38, -inf  ;;  %v9610_v20 = vsel %vm9231_vm5, %v9130_v9, -inf }
 0x6a7   :  { %v9578_v25 = vrot.slane %v9577_v59, 2  ;;  %v9585_v41 = vrot.slane %v9584_v34, 2  ;;  %v9591_v62 = vmax.f32 %v9589_v10, %v9590_v29  ;;  %v9597_v18 = vrot.slane %v9596_v45, 4 }
 0x6a8   :  { %v9603_v61 = vsel %vm9231_vm5, %v9131_v56, -inf  ;;  %v9611_v42 = vrot.slane %v9610_v20, 4  ;;  %v9617_v48 = vsel %vm9231_vm5, %v9132_v57, -inf  ;;  %v9572_v1 = vmax.f32 %v9570_v58, %v9571_v39 }
 0x6a9   :  { %v9579_v4 = vmax.f32 %v9577_v59, %v9578_v25  ;;  %v9586_v35 = vmax.f32 %v9584_v34, %v9585_v41  ;;  %v9592_v16 = vrot.slane %v9591_v62, 2  ;;  %v9598_v7 = vmax.f32 %v9596_v45, %v9597_v18 }
 0x6aa   :  { %v9604_v3 = vrot.slane %v9603_v61, 4  ;;  %v9612_v54 = vmax.f32 %v9610_v20, %v9611_v42  ;;  %v9618_v52 = vrot.slane %v9617_v48, 4  ;;  %v9573_v44 = vrot.slane %v9572_v1, 1 }
 0x6ab   :  { %v9593_v22 = vmax.f32 %v9591_v62, %v9592_v16  ;;  %v9599_v5 = vrot.slane %v9598_v7, 2  ;;  %v9580_v53 = vrot.slane %v9579_v4, 1  ;;  %v9587_v40 = vrot.slane %v9586_v35, 1 }
 0x6ac   :  { %v9605_v33 = vmax.f32 %v9603_v61, %v9604_v3  ;;  %v9613_v46 = vrot.slane %v9612_v54, 2  ;;  %v9619_v0 = vmax.f32 %v9617_v48, %v9618_v52  ;;  %v9574_v11 = vmax.f32 %v9572_v1, %v9573_v44  ;;  %v12560_v44 = vld [vmem:[#allocation3 + $0x32] ss:$8 sps:$4 sm:$0xff]  }
 0x6ad   :  { %v9594_v6 = vrot.slane %v9593_v22, 1  ;;  %v9600_v24 = vmax.f32 %v9598_v7, %v9599_v5  ;;  %v9581_v26 = vmax.f32 %v9579_v4, %v9580_v53  ;;  %v9588_v14 = vmax.f32 %v9586_v35, %v9587_v40  ;;  %v12562_v53 = vld [vmem:[#allocation3 + $0x38] ss:$8 sps:$4 sm:$0xff]  }
 0x6ae   :  { %v9606_v60 = vrot.slane %v9605_v33, 2  ;;  %v9614_v43 = vmax.f32 %v9612_v54, %v9613_v46  ;;  %v9620_v30 = vrot.slane %v9619_v0, 2  ;;  %v9752_v23 = vsel %vm8504_vm0, %v9574_v11, -inf  ;;  %v10183_v54 = vld [vmem:[%s19077_s7 + $0x118] sm:$0xff] }
 0x6af   :  { %v9601_v28 = vrot.slane %v9600_v24, 1  ;;  %v9595_v17 = vmax.f32 %v9593_v22, %v9594_v6  ;;  %v9755_v12 = vsel %vm8504_vm0, %v9581_v26, -inf  ;;  %v9758_v58 = vsel %vm8504_vm0, %v9588_v14, -inf  ;;  %12120 = vmatprep.subr.mxu1 %v10183_v54 }
 0x6b0   :  { %v9607_v63 = vmax.f32 %v9605_v33, %v9606_v60  ;;  %v9615_v19 = vrot.slane %v9614_v43, 1  ;;  %v9621_v49 = vmax.f32 %v9619_v0, %v9620_v30  ;;  %12121 = vmatpush3.msra.mxu1 %v10183_v54 }
 0x6b1   :  { %v9602_v21 = vmax.f32 %v9600_v24, %v9601_v28  ;;  %v9761_v31 = vsel %vm8504_vm0, %v9595_v17, -inf }
 0x6b2   :  { %v9608_v2 = vrot.slane %v9607_v63, 1  ;;  %v9616_v13 = vmax.f32 %v9614_v43, %v9615_v19  ;;  %v9622_v51 = vrot.slane %v9621_v49, 1 }
 0x6b3   :  { %v9753_v36 = vsel %vm8504_vm0, %v9602_v21, -inf }
 0x6b4   :  { %v9609_v55 = vmax.f32 %v9607_v63, %v9608_v2  ;;  %v9623_v8 = vmax.f32 %v9621_v49, %v9622_v51  ;;  %v9759_v27 = vsel %vm8504_vm0, %v9616_v13, -inf  ;;  %v9754_v59 = vmax.f32 %v9752_v23, %v9753_v36 }
 0x6b5   :  { %v9760_v10 = vmax.f32 %v9758_v58, %v9759_v27 }
 0x6b6   :  { %v8808_v37 = vpop.f32.mrf.mxu1  ;;  %v9756_v38 = vsel %vm8504_vm0, %v9609_v55, -inf  ;;  %v9762_v9 = vsel %vm8504_vm0, %v9623_v8, -inf }
 0x6b7   :  { %v8838_v39 = vmul.f32 %v18558_v47, %v8808_v37  ;;  %v9757_v34 = vmax.f32 %v9755_v12, %v9756_v38  ;;  %v9763_v29 = vmax.f32 %v9761_v31, %v9762_v9 }
 0x6b8   :  { %v8810_v56 = vpop.f32.mrf.mxu1 }
 0x6b9   :  { %v8861_v57 = vadd.f32 %v18426_v32, %v8838_v39  ;;  %v9839_v45 = vsel %vm7743_vm12, %v9757_v34, %v9754_v59 }
 0x6ba   :  { %v9840_v20 = vsel %vm7745_vm13, %v9760_v10, %v9839_v45 }
 0x6bb   :  { %v8877_v25 = vmax.f32 %v8861_v57, 0.0  ;;  %v8813_v41 = vpop.f32.mrf.mxu1  ;;  %v9841_v62 = vsel %vm7747_vm14, %v9763_v29, %v9840_v20 }
 0x6bc   :  { %v8839_v18 = vmul.f32 %v18558_v47, %v8813_v41  ;;  %9861 = vst.msk [vmem:[#allocation3 + $0x49] sm:$0xf] %vm9854_vm15, %v9841_v62  ;;  %v10182_v47 = vld [vmem:[%s19077_s7 + $0x110] sm:$0xff] }
 0x6bd   :  { %v9133_v61 = vcombine.high %v8877_v25, %v8877_v25  ;;  %v9140_v42 = vrot.slane %v8877_v25, %v13627_v50  ;;  %v8815_v48 = vpop.f32.mrf.mxu1  ;;  %12122 = vmatprep.subr.mxu1 %v10182_v47 }
 0x6be   :  { %v8862_v1 = vadd.f32 %v18426_v32, %v8839_v18  ;;  %12123 = vmatpush3.msra.mxu1 %v10182_v47 }
 0x6bf   :  { %v9147_v4 = vrot.slane %v9133_v61, %v13627_v50  ;;  %v9148_v35 = vcombine.high %v9140_v42, %v9140_v42  ;;  %v9624_v16 = vsel %vm9231_vm5, %v9140_v42, -inf }
 0x6c0   :  { %v9625_v7 = vrot.slane %v9624_v16, 4  ;;  %v8878_v3 = vmax.f32 %v8862_v1, 0.0 }
 0x6c1   :  { %v9149_v52 = vcombine.high %v9147_v4, %v9147_v4  ;;  %v9631_v22 = vsel %vm9231_vm5, %v9148_v35, -inf  ;;  %v9638_v32 = vsel %vm9231_vm5, %v9147_v4, -inf }
 0x6c2   :  { %v9626_v5 = vmax.f32 %v9624_v16, %v9625_v7  ;;  %v9632_v33 = vrot.slane %v9631_v22, 4  ;;  %v9639_v46 = vrot.slane %v9638_v32, 4  ;;  %v9150_v0 = vcombine.high %v8878_v3, %v8878_v3 }
 0x6c3   :  { %v9645_v40 = vsel %vm9231_vm5, %v9149_v52, -inf  ;;  %v9157_v6 = vrot.slane %v8878_v3, %v13627_v50  ;;  %v12561_v24 = vld [vmem:[#allocation3 + $0x40] ss:$8 sps:$4 sm:$0xff]  }
 0x6c4   :  { %v9633_v60 = vmax.f32 %v9631_v22, %v9632_v33  ;;  %v9640_v43 = vmax.f32 %v9638_v32, %v9639_v46  ;;  %v9164_v30 = vrot.slane %v9150_v0, %v13627_v50  ;;  %v12563_v28 = vld [vmem:[#allocation3 + $0x41] ss:$8 sps:$4 sm:$0xff]   ;;  %v9627_v63 = vrot.slane %v9626_v5, 2 }
 0x6c5   :  { %v9646_v19 = vrot.slane %v9645_v40, 4  ;;  %v9165_v49 = vcombine.high %v9157_v6, %v9157_v6  ;;  %v9652_v11 = vsel %vm9231_vm5, %v9157_v6, -inf  ;;  %v12507_v26 = vpack.i.bf16 %v12560_v44, %v12561_v24 }
 0x6c6   :  { %v9634_v14 = vrot.slane %v9633_v60, 2  ;;  %v9641_v17 = vrot.slane %v9640_v43, 2  ;;  %v9166_v21 = vcombine.high %v9164_v30, %v9164_v30  ;;  %v12512_v2 = vpack.i.bf16 %v12562_v53, %v12563_v28 }
 0x6c7   :  { %v9647_v13 = vmax.f32 %v9645_v40, %v9646_v19  ;;  %v9653_v51 = vrot.slane %v9652_v11, 4  ;;  %12508 = vrot.lane.b32.xlu0 %v12507_v26, %s12669_s20  ;;  %v9628_v55 = vmax.f32 %v9626_v5, %v9627_v63  ;;  %v9659_v36 = vsel %vm9231_vm5, %v9165_v49, -inf  ;;  %v12564_v26 = vld [vmem:[#allocation3 + $0x42] ss:$8 sps:$4 sm:$0xff]  }
 0x6c8   :  { %v9635_v8 = vmax.f32 %v9633_v60, %v9634_v14  ;;  %v9666_v27 = vsel %vm9231_vm5, %v9164_v30, -inf  ;;  %12513 = vrot.lane.b32.xlu1 %v12512_v2, %s12671_s16  ;;  %v9642_v23 = vmax.f32 %v9640_v43, %v9641_v17  ;;  %v9660_v31 = vrot.slane %v9659_v36, 4  ;;  %v12566_v14 = vld [vmem:[#allocation3 + $0x41] ss:$8 sps:$4 sm:$0xff]  }
 0x6c9   :  { %v9648_v12 = vrot.slane %v9647_v13, 2  ;;  %v9654_v58 = vmax.f32 %v9652_v11, %v9653_v51  ;;  %v9667_v37 = vrot.slane %v9666_v27, 4  ;;  %v9673_v38 = vsel %vm9231_vm5, %v9166_v21, -inf  ;;  %v10181_v11 = vld [vmem:[%s19077_s7 + $0x108] sm:$0xff]  ;;  %v10180_v17 = vld [vmem:[%s19077_s7 + $0x100] sm:$0xff] }
 0x6ca   :  { %v9661_v9 = vmax.f32 %v9659_v36, %v9660_v31  ;;  %v9629_v39 = vrot.slane %v9628_v55, 1  ;;  %v9674_v29 = vrot.slane %v9673_v38, 4  ;;  %v9636_v56 = vrot.slane %v9635_v8, 1  ;;  %12124 = vmatprep.subr.mxu1 %v10181_v11  ;;  %v12570_v31 = vld [vmem:[#allocation3 + $0x39] ss:$8 sps:$4 sm:$0xff]  }
 0x6cb   :  { %v9655_v10 = vrot.slane %v9654_v58, 2  ;;  %v9649_v59 = vmax.f32 %v9647_v13, %v9648_v12  ;;  %v9668_v34 = vmax.f32 %v9666_v27, %v9667_v37  ;;  %v9643_v57 = vrot.slane %v9642_v23, 1  ;;  %12125 = vmatpush3.msra.mxu1 %v10181_v11  ;;  %v12504_v27 = vpop.permute.xlu1 %12503  ;;  %v12571_v37 = vld [vmem:[#allocation3 + $0x30] ss:$8 sps:$4 sm:$0xff]   ;;  %v10898_v11 = vld [vmem:[%s19080_s10 + $0x48] sm:$0xff] }
 0x6cc   :  { %v9662_v20 = vrot.slane %v9661_v9, 2  ;;  %v9675_v41 = vmax.f32 %v9673_v38, %v9674_v29  ;;  %v9630_v61 = vmax.f32 %v9628_v55, %v9629_v39  ;;  %v9637_v4 = vmax.f32 %v9635_v8, %v9636_v56  ;;  %12126 = vmatprep.subr.mxu1 %v10180_v17 }
 0x6cd   :  { %v9656_v45 = vmax.f32 %v9654_v58, %v9655_v10  ;;  %v9669_v25 = vrot.slane %v9668_v34, 2  ;;  %v9650_v42 = vrot.slane %v9649_v59, 1  ;;  %v9644_v35 = vmax.f32 %v9642_v23, %v9643_v57  ;;  %12127 = vmatpush3.msra.mxu1 %v10180_v17  ;;  %v10913_v17 = vld [vmem:[%s19080_s10 + $0xc0] sm:$0xff] }
 0x6ce   :  { %v9663_v18 = vmax.f32 %v9661_v9, %v9662_v20  ;;  %v9676_v1 = vrot.slane %v9675_v41, 2  ;;  %v9764_v33 = vsel %vm8504_vm0, %v9630_v61, -inf  ;;  %v9767_v46 = vsel %vm8504_vm0, %v9637_v4, -inf }
 0x6cf   :  { %v9657_v62 = vrot.slane %v9656_v45, 1  ;;  %v9670_v48 = vmax.f32 %v9668_v34, %v9669_v25  ;;  %v9651_v22 = vmax.f32 %v9649_v59, %v9650_v42  ;;  %v9770_v0 = vsel %vm8504_vm0, %v9644_v35, -inf  ;;  %v12573_v42 = vld [vmem:[#allocation3 + $0x40] ss:$8 sps:$4 sm:$0xff]  }
 0x6d0   :  { %v9664_v7 = vrot.slane %v9663_v18, 1  ;;  %v9677_v54 = vmax.f32 %v9675_v41, %v9676_v1  ;;  %v12506_v23 = vunpack.i.h.bf16 %v12504_v27  ;;  %v12505_v12 = vunpack.i.l.bf16 %v12504_v27  ;;  %v10949_v27 = vld [vmem:[%s19080_s10 + $0x1e0] sm:$0xff] }
 0x6d1   :  { %v9658_v16 = vmax.f32 %v9656_v45, %v9657_v62  ;;  %v9671_v3 = vrot.slane %v9670_v48, 1  ;;  %v9773_v43 = vsel %vm8504_vm0, %v9651_v22, -inf }
 0x6d2   :  { %v9665_v47 = vmax.f32 %v9663_v18, %v9664_v7  ;;  %v9678_v5 = vrot.slane %v9677_v54, 1  ;;  %v10138_v34 = vsel %vm8504_vm0, %v12570_v31, %v12505_v12  ;;  %v10126_v29 = vsel %vm8504_vm0, %v12571_v37, %v12506_v23  ;;  %v10911_v23 = vld [vmem:[%s19080_s10 + $0xb0] sm:$0xff]  ;;  %v10933_v12 = vld [vmem:[%s19080_s10 + $0x160] sm:$0xff]  ;;  %v10948_v31 = vld [vmem:[%s19080_s10 + $0x1d8] sm:$0xff] }
 0x6d3   :  { %v9765_v52 = vsel %vm8504_vm0, %v9658_v16, -inf  ;;  %v9672_v32 = vmax.f32 %v9670_v48, %v9671_v3  ;;  %v10910_v37 = vld [vmem:[%s19080_s10 + $0xa8] sm:$0xff] }
 0x6d4   :  { %v9768_v44 = vsel %vm8504_vm0, %v9665_v47, -inf  ;;  %v9679_v53 = vmax.f32 %v9677_v54, %v9678_v5  ;;  %v9766_v40 = vmax.f32 %v9764_v33, %v9765_v52  ;;  %v12575_v5 = vld [vmem:[#allocation3 + $0x22] ss:$8 sps:$4 sm:$0xff]  }
 0x6d5   :  { %v9769_v6 = vmax.f32 %v9767_v46, %v9768_v44  ;;  %v9771_v24 = vsel %vm8504_vm0, %v9672_v32, -inf  ;;  %v12574_v32 = vld [vmem:[#allocation3 + $0x12] ss:$8 sps:$4 sm:$0xff]   ;;  %v12576_v33 = vld [vmem:[#allocation3 + $0x42] ss:$8 sps:$4 sm:$0xff]  }
 0x6d6   :  { %v9772_v60 = vmax.f32 %v9770_v0, %v9771_v24  ;;  %v9774_v30 = vsel %vm8504_vm0, %v9679_v53, -inf  ;;  %v10920_v0 = vld [vmem:[%s19080_s10 + $0xf8] sm:$0xff]  ;;  %v10919_v53 = vld [vmem:[%s19080_s10 + $0xf0] sm:$0xff]  ;;  %v10902_v24 = vld [vmem:[%s19080_s10 + $0x68] sm:$0xff] }
 0x6d7   :  { %v9842_v28 = vsel %vm7743_vm12, %v9769_v6, %v9766_v40  ;;  %v9775_v63 = vmax.f32 %v9773_v43, %v9774_v30  ;;  %v10904_v44 = vld [vmem:[%s19080_s10 + $0x78] sm:$0xff]  ;;  %11920 = vmatprep.subr.mxu0 %v10920_v0  ;;  %v10903_v40 = vld [vmem:[%s19080_s10 + $0x70] sm:$0xff]  ;;  %v10918_v6 = vld [vmem:[%s19080_s10 + $0xe8] sm:$0xff] }
 0x6d8   :  { %v9843_v19 = vsel %vm7745_vm13, %v9772_v60, %v9842_v28  ;;  %11921 = vmatpush3.msra.mxu0 %v10904_v44  ;;  %v10917_v60 = vld [vmem:[%s19080_s10 + $0xe0] sm:$0xff]  ;;  %v10916_v30 = vld [vmem:[%s19080_s10 + $0xd8] sm:$0xff]  ;;  %vm10476_vm13 = vcmask 517120  }
 0x6d9   :  { %v9844_v49 = vsel %vm7747_vm14, %v9775_v63, %v9843_v19  ;;  %11922 = vmatprep.subr.mxu0 %v10919_v53  ;;  %v10901_v43 = vld [vmem:[%s19080_s10 + $0x60] sm:$0xff]  ;;  %v10900_v28 = vld [vmem:[%s19080_s10 + $0x58] sm:$0xff]  ;;  %v10915_v63 = vld [vmem:[%s19080_s10 + $0xd0] sm:$0xff]  ;;  %vm12674_vm14 = vmmov 0  }
 0x6da   :  { %9862 = vst.msk [vmem:[#allocation3 + $0x51] sm:$0xf] %vm9854_vm15, %v9844_v49  ;;  %11923 = vmatpush3.msra.mxu0 %v10903_v40  ;;  %v10899_v19 = vld [vmem:[%s19080_s10 + $0x50] sm:$0xff]  ;;  %v10914_v49 = vld [vmem:[%s19080_s10 + $0xc8] sm:$0xff] }
 0x6db   :  { %11924 = vmatprep.subr.mxu0 %v10918_v6 }
 0x6dc   :  { %11925 = vmatpush3.msra.mxu0 %v10902_v24 }
 0x6dd   :  { %11926 = vmatprep.subr.mxu0 %v10917_v60 }
 0x6de   :  { %11927 = vmatpush3.msra.mxu0 %v10901_v43 }
 0x6df   :  { %11928 = vmatprep.subr.mxu0 %v10916_v30  ;;  %v11794_v30 = vld [vmem:[%s19078_s8] ss:$0 sm:$0xff] }
 0x6e0   :  { %11929 = vmatpush3.msra.mxu0 %v10900_v28 }
 0x6e1   :  { %v12565_v21 = vld [vmem:[#allocation3 + $0x50] ss:$8 sps:$4 sm:$0xff]   ;;  %11930 = vmatprep.subr.mxu0 %v10915_v63 }
 0x6e2   :  { %v12567_v2 = vld [vmem:[#allocation3 + $0x4a] ss:$8 sps:$4 sm:$0xff]   ;;  %v12522_v13 = vpack.i.bf16 %v12564_v26, %v12565_v21  ;;  %v10952_v26 = vld [vmem:[%s19080_s10 + $0x1f8] sm:$0xff]  ;;  %11931 = vmatpush3.msra.mxu0 %v10899_v19  ;;  %v11795_v19 = vld [vmem:[%s19079_s9] ss:$0 sm:$0xff] }
 0x6e3   :  { %v12517_v51 = vpack.i.bf16 %v12566_v14, %v12567_v2  ;;  %v12568_v55 = vld [vmem:[#allocation3 + $0x48] ss:$8 sps:$4 sm:$0xff]   ;;  %v10936_v14 = vld [vmem:[%s19080_s10 + $0x178] sm:$0xff]  ;;  %11955 = vmatprep.subr.mxu1 %v10952_v26  ;;  %11932 = vmatprep.subr.mxu0 %v10914_v49 }
 0x6e4   :  { %v12569_v8 = vld [vmem:[#allocation3 + $0x51] ss:$8 sps:$4 sm:$0xff]   ;;  %12523 = vrot.lane.b32.xlu1 %v12522_v13, %s12669_s20  ;;  %v10897_v13 = vld [vmem:[%s19080_s10 + $0x40] sm:$0xff]  ;;  %11933 = vmatpush3.msra.mxu0 %v10898_v11 }
 0x6e5   :  { %12518 = vrot.lane.b32.xlu0 %v12517_v51, %s12667_s1  ;;  %v12527_v36 = vpack.i.bf16 %v12568_v55, %v12569_v8  ;;  %v12572_v61 = vld [vmem:[#allocation3 + $0x49] ss:$8 sps:$4 sm:$0xff]   ;;  %v10912_v55 = vld [vmem:[%s19080_s10 + $0xb8] sm:$0xff]  ;;  %11934 = vmatprep.subr.mxu0 %v10913_v17 }
 0x6e6   :  { %v12577_v46 = vld [vmem:[#allocation3 + $0x52] ss:$8 sps:$4 sm:$0xff]   ;;  %v10950_v51 = vld [vmem:[%s19080_s10 + $0x1e8] sm:$0xff]  ;;  %11935 = vmatpush3.msra.mxu0 %v10897_v13 }
 0x6e7   :  { %v10951_v21 = vld [vmem:[%s19080_s10 + $0x1f0] sm:$0xff]  ;;  %v10934_v8 = vld [vmem:[%s19080_s10 + $0x168] sm:$0xff]  ;;  %11936 = vmatprep.subr.mxu0 %v10912_v55 }
 0x6e8   :  { %v10935_v2 = vld [vmem:[%s19080_s10 + $0x170] sm:$0xff] }
 0x6e9   :  { %12528 = vrot.lane.b32.xlu0 %v12527_v36, %s12671_s16  ;;  %v10896_v36 = vld [vmem:[%s19080_s10 + $0x38] sm:$0xff] }
 0x6ea   :  { %11937 = vmatpush3.msra.mxu0 %v10896_v36 }
 0x6eb   :  { %11938 = vmatprep.subr.mxu0 %v10911_v23 }
 0x739   :  { %v12509_v58 = vpop.permute.xlu0 %12508 }
 0x73a   :  { %v12511_v38 = vunpack.i.h.bf16 %v12509_v58  ;;  %v12510_v10 = vunpack.i.l.bf16 %v12509_v58  ;;  %v12514_v9 = vpop.permute.xlu1 %12513  ;;  %v10895_v58 = vld [vmem:[%s19080_s10 + $0x30] sm:$0xff] }
 0x73b   :  { %v12516_v39 = vunpack.i.h.bf16 %v12514_v9  ;;  %v12515_v59 = vunpack.i.l.bf16 %v12514_v9  ;;  %v10947_v9 = vld [vmem:[%s19080_s10 + $0x1d0] sm:$0xff]  ;;  %11939 = vmatpush3.msra.mxu0 %v10895_v58 }
 0x73c   :  { %v10142_v56 = vsel %vm8538_vm1, %v10138_v34, %v12510_v10  ;;  %v10130_v57 = vsel %vm8538_vm1, %v10126_v29, %v12511_v38  ;;  %v10932_v38 = vld [vmem:[%s19080_s10 + $0x158] sm:$0xff]  ;;  %v10894_v10 = vld [vmem:[%s19080_s10 + $0x28] sm:$0xff]  ;;  %11940 = vmatprep.subr.mxu0 %v10910_v37  ;;  %v10893_v34 = vld [vmem:[%s19080_s10 + $0x20] sm:$0xff] }
 0x73d   :  { %v10146_v45 = vsel %vm8572_vm2, %v10142_v56, %v12515_v59  ;;  %v10134_v20 = vsel %vm8572_vm2, %v10130_v57, %v12516_v39  ;;  %v10909_v39 = vld [vmem:[%s19080_s10 + $0xa0] sm:$0xff]  ;;  %v10931_v59 = vld [vmem:[%s19080_s10 + $0x150] sm:$0xff]  ;;  %v10946_v29 = vld [vmem:[%s19080_s10 + $0x1c8] sm:$0xff]  ;;  %11941 = vmatpush3.msra.mxu0 %v10894_v10 }
 0x73e   :  { %10266 = vmatprep.mubr.f32.mxu1 %v10146_v45  ;;  %v10908_v56 = vld [vmem:[%s19080_s10 + $0x98] sm:$0xff]  ;;  %v10930_v57 = vld [vmem:[%s19080_s10 + $0x148] sm:$0xff]  ;;  %11942 = vmatprep.subr.mxu0 %v10909_v39 }
 0x73f   :  { %10267 = vmatmul.mubr.f32.gmra.mxu1 %v10134_v20  ;;  %v10892_v45 = vld [vmem:[%s19080_s10 + $0x18] sm:$0xff]  ;;  %v10945_v20 = vld [vmem:[%s19080_s10 + $0x1c0] sm:$0xff]  ;;  %11943 = vmatpush3.msra.mxu0 %v10893_v34 }
 0x740   :  { %11944 = vmatprep.subr.mxu0 %v10908_v56 }
 0x741   :  { %11945 = vmatpush3.msra.mxu0 %v10892_v45 }
 0x756   :  { %v12524_v25 = vpop.permute.xlu1 %12523 }
 0x757   :  { %v12519_v41 = vpop.permute.xlu0 %12518  ;;  %v12526_v48 = vunpack.i.h.bf16 %v12524_v25  ;;  %v12525_v1 = vunpack.i.l.bf16 %v12524_v25  ;;  %v10907_v25 = vld [vmem:[%s19080_s10 + $0x90] sm:$0xff] }
 0x758   :  { %v12521_v62 = vunpack.i.h.bf16 %v12519_v41  ;;  %v12520_v18 = vunpack.i.l.bf16 %v12519_v41  ;;  %v10929_v41 = vld [vmem:[%s19080_s10 + $0x140] sm:$0xff]  ;;  %11946 = vmatprep.subr.mxu0 %v10907_v25 }
 0x75a   :  { %v10139_v4 = vsel %vm8504_vm0, %v12572_v61, %v12520_v18  ;;  %v10127_v35 = vsel %vm8504_vm0, %v12573_v42, %v12521_v62  ;;  %v10891_v62 = vld [vmem:[%s19080_s10 + $0x10] sm:$0xff]  ;;  %v10944_v18 = vld [vmem:[%s19080_s10 + $0x1b8] sm:$0xff]  ;;  %v10906_v61 = vld [vmem:[%s19080_s10 + $0x88] sm:$0xff] }
 0x75b   :  { %v12529_v16 = vpop.permute.xlu0 %12528  ;;  %v10143_v54 = vsel %vm8538_vm1, %v10139_v4, %v12525_v1  ;;  %v10131_v47 = vsel %vm8538_vm1, %v10127_v35, %v12526_v48  ;;  %v10928_v42 = vld [vmem:[%s19080_s10 + $0x138] sm:$0xff]  ;;  %v10890_v48 = vld [vmem:[%s19080_s10 + $0x8] sm:$0xff]  ;;  %v10943_v1 = vld [vmem:[%s19080_s10 + $0x1b0] sm:$0xff]  ;;  %11947 = vmatpush3.msra.mxu0 %v10891_v62 }
 0x75c   :  { %v12531_v7 = vunpack.i.h.bf16 %v12529_v16  ;;  %v12530_v3 = vunpack.i.l.bf16 %v12529_v16  ;;  %v10927_v4 = vld [vmem:[%s19080_s10 + $0x130] sm:$0xff]  ;;  %v10905_v35 = vld [vmem:[%s19080_s10 + $0x80] sm:$0xff]  ;;  %11948 = vmatprep.subr.mxu0 %v10906_v61  ;;  %v10942_v16 = vld [vmem:[%s19080_s10 + $0x1a8] sm:$0xff] }
 0x75d   :  { %11949 = vmatpush3.msra.mxu0 %v10890_v48 }
 0x75e   :  { %v10147_v52 = vsel %vm8572_vm2, %v10143_v54, %v12530_v3  ;;  %v10135_v22 = vsel %vm8572_vm2, %v10131_v47, %v12531_v7  ;;  %v10889_v7 = vld [vmem:[%s19080_s10] sm:$0xff]  ;;  %v10926_v3 = vld [vmem:[%s19080_s10 + $0x128] sm:$0xff]  ;;  %11950 = vmatprep.subr.mxu0 %v10905_v35 }
 0x75f   :  { %10271 = vmatprep.mubr.f32.mxu1 %v10147_v52  ;;  %v10941_v54 = vld [vmem:[%s19080_s10 + $0x1a0] sm:$0xff]  ;;  %11951 = vmatpush3.msra.mxu0 %v10889_v7  ;;  %v10940_v52 = vld [vmem:[%s19080_s10 + $0x198] sm:$0xff] }
 0x760   :  { %10272 = vmatmul.mubr.f32.gmra.mxu1 %v10135_v22  ;;  %v10925_v47 = vld [vmem:[%s19080_s10 + $0x120] sm:$0xff]  ;;  %12134 = vmatprep.subr.mxu0 %v12665_v15  ;;  %v11900_v22 = vpop.f32.mrf.mxu1 }
 0x761   :  { %12128 = vmatprep.mubr.msk.f32.mxu1 %vm8504_vm0, %v12574_v32  ;;  %v10924_v32 = vld [vmem:[%s19080_s10 + $0x118] sm:$0xff] }
 0x764   :  { %12129 = vmatmul.mubr.msk.f32.vlgmr.msra.gmra.mxu1 %vm8504_vm0, %v12575_v5  ;;  %v10939_v5 = vld [vmem:[%s19080_s10 + $0x190] sm:$0xff] }
 0x765   :  { %12131 = vmatprep.mubr.msk.f32.mxu1 %vm8504_vm0, %v12576_v33  ;;  %11956 = vmatpush3.msra.mxu1 %v10936_v14  ;;  %v10923_v33 = vld [vmem:[%s19080_s10 + $0x110] sm:$0xff] }
 0x766   :  { %11957 = vmatprep.subr.mxu1 %v10951_v21 }
 0x767   :  { %11958 = vmatpush3.msra.mxu1 %v10935_v2 }
 0x768   :  { %12132 = vmatmul.mubr.msk.f32.gmra.mxu1 %vm8504_vm0, %v12577_v46  ;;  %11959 = vmatprep.subr.mxu1 %v10950_v51  ;;  %v11901_v46 = vpop.f32.mrf.mxu1  ;;  %vm11193_vm0 = vcmask 1043456  }
 0x769   :  { %11960 = vmatpush3.msra.mxu1 %v10934_v8  ;;  %v11902_v28 = vadd.f32 %v11901_v46, %v11900_v22 }
 0x76a   :  { %11961 = vmatprep.subr.mxu1 %v10949_v27  ;;  %v11903_v0 = vpop.f32.mrf.mxu1 }
 0x76b   :  { %11962 = vmatpush3.msra.mxu1 %v10933_v12 }
 0x76c   :  { %11963 = vmatprep.subr.mxu1 %v10948_v31  ;;  %v11904_v44 = vpop.f32.mrf.mxu1 }
 0x76d   :  { %11964 = vmatpush3.msra.mxu1 %v10932_v38  ;;  %v11905_v60 = vadd.f32 %v11904_v44, %v11903_v0 }
 0x76e   :  { %11965 = vmatprep.subr.mxu1 %v10947_v9 }
 0x76f   :  { %11966 = vmatpush3.msra.mxu1 %v10931_v59 }
 0x770   :  { %11967 = vmatprep.subr.mxu1 %v10946_v29 }
 0x771   :  { %11968 = vmatpush3.msra.mxu1 %v10930_v57 }
 0x772   :  { %11969 = vmatprep.subr.mxu1 %v10945_v20 }
 0x773   :  { %11970 = vmatpush3.msra.mxu1 %v10929_v41 }
 0x774   :  { %11971 = vmatprep.subr.mxu1 %v10944_v18 }
 0x775   :  { %11972 = vmatpush3.msra.mxu1 %v10928_v42 }
 0x776   :  { %11973 = vmatprep.subr.mxu1 %v10943_v1 }
 0x777   :  { %11974 = vmatpush3.msra.mxu1 %v10927_v4 }
 0x778   :  { %11975 = vmatprep.subr.mxu1 %v10942_v16 }
 0x779   :  { %11976 = vmatpush3.msra.mxu1 %v10926_v3 }
 0x77a   :  { %11977 = vmatprep.subr.mxu1 %v10941_v54 }
 0x77b   :  { %11978 = vmatpush3.msra.mxu1 %v10925_v47 }
 0x77c   :  { %11979 = vmatprep.subr.mxu1 %v10940_v52 }
 0x77d   :  { %11980 = vmatpush3.msra.mxu1 %v10924_v32 }
 0x77e   :  { %11981 = vmatprep.subr.mxu1 %v10939_v5 }
 0x77f   :  { %11982 = vmatpush3.msra.mxu1 %v10923_v33 }
 0x7ff   :  { %v11906_v53 = vpop.f32.mrf.mxu1 }
 0x801   :  { %v11907_v40 = vpop.f32.mrf.mxu1 }
 0x802   :  { %v11908_v21 = vadd.f32 %v11907_v40, %v11906_v53 }
 0x820   :  { %v11909_v6 = vpop.f32.mrf.mxu1 }
 0x822   :  { %v11910_v24 = vpop.f32.mrf.mxu1 }
 0x823   :  { %v11911_v11 = vadd.f32 %v11910_v24, %v11909_v6 }
 0x824   :  { %v12130_v43 = vpop.f32.mrf.mxu1 }
 0x825   :  { %v10349_v63 = vadd.f32 %v12130_v43, %v11905_v60 }
 0x826   :  { %v10343_v49 = vpop.f32.mrf.mxu1 }
 0x827   :  { %v10370_v26 = vmul.f32 %v11794_v30, %v10349_v63  ;;  %v10344_v14 = vadd.f32 %v11902_v28, %v10343_v49 }
 0x828   :  { %v12133_v17 = vpop.f32.mrf.mxu1 }
 0x829   :  { %v10381_v2 = vadd.f32 %v11795_v19, %v10370_v26  ;;  %v10369_v13 = vmul.f32 %v11794_v30, %v10344_v14  ;;  %v10359_v51 = vadd.f32 %v12133_v17, %v11911_v11 }
 0x82a   :  { %v10353_v55 = vpop.f32.mrf.mxu1 }
 0x82b   :  { %v10385_v8 = vmax.f32 %v10381_v2, 0.0  ;;  %v10380_v36 = vadd.f32 %v11795_v19, %v10369_v13  ;;  %v10372_v27 = vmul.f32 %v11794_v30, %v10359_v51  ;;  %v10354_v23 = vadd.f32 %v11908_v21, %v10353_v55 }
 0x82d   :  { %v10409_v12 = vcombine.high %v10385_v8, %v10385_v8  ;;  %v10416_v58 = vrot.slane %v10385_v8, %v13627_v50  ;;  %v10384_v31 = vmax.f32 %v10380_v36, 0.0  ;;  %v10383_v37 = vadd.f32 %v11795_v19, %v10372_v27 }
 0x82e   :  { %v10371_v38 = vmul.f32 %v11794_v30, %v10354_v23 }
 0x82f   :  { %v10423_v10 = vrot.slane %v10409_v12, %v13627_v50  ;;  %v10424_v9 = vcombine.high %v10416_v58, %v10416_v58  ;;  %v10505_v39 = vsel %vm10476_vm13, %v10416_v58, -inf  ;;  %v10392_v59 = vcombine.high %v10384_v31, %v10384_v31 }
 0x830   :  { %v10506_v34 = vrot.slane %v10505_v39, 4  ;;  %v10399_v29 = vrot.slane %v10384_v31, %v13627_v50  ;;  %v18889_v56 = vmax.f32 %v10383_v37, 0.0  ;;  %v18891_v57 = vadd.f32 %v11795_v19, %v10371_v38 }
 0x831   :  { %v10425_v45 = vcombine.high %v10423_v10, %v10423_v10  ;;  %v10512_v20 = vsel %vm10476_vm13, %v10424_v9, -inf  ;;  %v10519_v25 = vsel %vm10476_vm13, %v10423_v10, -inf  ;;  %v10406_v41 = vrot.slane %v10392_v59, %v13627_v50 }
 0x832   :  { %v10507_v62 = vmax.f32 %v10505_v39, %v10506_v34  ;;  %v10513_v18 = vrot.slane %v10512_v20, 4  ;;  %v10520_v61 = vrot.slane %v10519_v25, 4  ;;  %v10407_v42 = vcombine.high %v10399_v29, %v10399_v29 }
 0x833   :  { %v10526_v48 = vsel %vm10476_vm13, %v10425_v45, -inf  ;;  %v10408_v1 = vcombine.high %v10406_v41, %v10406_v41  ;;  %v10477_v4 = vsel %vm10476_vm13, %v10399_v29, -inf  ;;  %v10491_v35 = vsel %vm10476_vm13, %v10406_v41, -inf }
 0x834   :  { %v10508_v16 = vrot.slane %v10507_v62, 2  ;;  %v10514_v7 = vmax.f32 %v10512_v20, %v10513_v18  ;;  %v10521_v3 = vmax.f32 %v10519_v25, %v10520_v61  ;;  %v10527_v54 = vrot.slane %v10526_v48, 4 }
 0x835   :  { %v10478_v47 = vrot.slane %v10477_v4, 4  ;;  %v10484_v52 = vsel %vm10476_vm13, %v10407_v42, -inf  ;;  %v10492_v22 = vrot.slane %v10491_v35, 4  ;;  %v10498_v32 = vsel %vm10476_vm13, %v10408_v1, -inf }
 0x836   :  { %v10509_v5 = vmax.f32 %v10507_v62, %v10508_v16  ;;  %v10515_v33 = vrot.slane %v10514_v7, 2  ;;  %v10522_v46 = vrot.slane %v10521_v3, 2  ;;  %v10528_v0 = vmax.f32 %v10526_v48, %v10527_v54 }
 0x837   :  { %v10479_v44 = vmax.f32 %v10477_v4, %v10478_v47  ;;  %v10485_v53 = vrot.slane %v10484_v52, 4  ;;  %v10493_v40 = vmax.f32 %v10491_v35, %v10492_v22  ;;  %v10499_v6 = vrot.slane %v10498_v32, 4 }
 0x838   :  { %v10510_v24 = vrot.slane %v10509_v5, 1  ;;  %v10516_v60 = vmax.f32 %v10514_v7, %v10515_v33  ;;  %v10523_v43 = vmax.f32 %v10521_v3, %v10522_v46  ;;  %v10529_v30 = vrot.slane %v10528_v0, 2 }
 0x839   :  { %v10480_v28 = vrot.slane %v10479_v44, 2  ;;  %v10486_v63 = vmax.f32 %v10484_v52, %v10485_v53  ;;  %v10494_v19 = vrot.slane %v10493_v40, 2  ;;  %v10500_v49 = vmax.f32 %v10498_v32, %v10499_v6 }
 0x83a   :  { %v10511_v11 = vmax.f32 %v10509_v5, %v10510_v24  ;;  %v10517_v26 = vrot.slane %v10516_v60, 1  ;;  %v10524_v14 = vrot.slane %v10523_v43, 1  ;;  %v10530_v17 = vmax.f32 %v10528_v0, %v10529_v30 }
 0x83b   :  { %v10481_v21 = vmax.f32 %v10479_v44, %v10480_v28  ;;  %v10487_v2 = vrot.slane %v10486_v63, 2  ;;  %v10495_v13 = vmax.f32 %v10493_v40, %v10494_v19  ;;  %v10501_v51 = vrot.slane %v10500_v49, 2 }
 0x83c   :  { %v10518_v55 = vmax.f32 %v10516_v60, %v10517_v26  ;;  %v10525_v8 = vmax.f32 %v10523_v43, %v10524_v14  ;;  %v10531_v36 = vrot.slane %v10530_v17, 1  ;;  %v10595_v27 = vsel %vm8538_vm1, %v10511_v11, -inf }
 0x83d   :  { %v10482_v23 = vrot.slane %v10481_v21, 1  ;;  %v10488_v12 = vmax.f32 %v10486_v63, %v10487_v2  ;;  %v10496_v58 = vrot.slane %v10495_v13, 1  ;;  %v10502_v31 = vmax.f32 %v10500_v49, %v10501_v51 }
 0x83e   :  { %v10532_v37 = vmax.f32 %v10530_v17, %v10531_v36  ;;  %v10596_v38 = vsel %vm8538_vm1, %v10525_v8, -inf  ;;  %v10598_v10 = vsel %vm8538_vm1, %v10518_v55, -inf  ;;  %v10443_v9 = vcombine.high %v18889_v56, %v18889_v56 }
 0x83f   :  { %v10597_v39 = vmax.f32 %v10595_v27, %v10596_v38  ;;  %v10483_v59 = vmax.f32 %v10481_v21, %v10482_v23  ;;  %v10489_v34 = vrot.slane %v10488_v12, 1  ;;  %v10497_v29 = vmax.f32 %v10495_v13, %v10496_v58 }
 0x840   :  { %v10599_v45 = vsel %vm8538_vm1, %v10532_v37, -inf  ;;  %v10503_v20 = vrot.slane %v10502_v31, 1  ;;  %v10450_v25 = vrot.slane %v18889_v56, %v13627_v50  ;;  %v10457_v41 = vrot.slane %v10443_v9, %v13627_v50 }
 0x841   :  { %v10600_v62 = vmax.f32 %v10598_v10, %v10599_v45  ;;  %v10490_v18 = vmax.f32 %v10488_v12, %v10489_v34  ;;  %v10589_v61 = vsel %vm8538_vm1, %v10483_v59, -inf  ;;  %v10590_v42 = vsel %vm8538_vm1, %v10497_v29, -inf }
 0x842   :  { %v10504_v48 = vmax.f32 %v10502_v31, %v10503_v20  ;;  %v10591_v1 = vmax.f32 %v10589_v61, %v10590_v42  ;;  %v10458_v4 = vcombine.high %v10450_v25, %v10450_v25  ;;  %v10459_v35 = vcombine.high %v10457_v41, %v10457_v41 }
 0x843   :  { %v10631_v16 = vsel %vm7743_vm12, %v10600_v62, %v10597_v39  ;;  %v10592_v7 = vsel %vm8538_vm1, %v10490_v18, -inf  ;;  %v10561_v3 = vsel %vm10476_vm13, %v10450_v25, -inf  ;;  %v10575_v56 = vsel %vm10476_vm13, %v10457_v41, -inf }
 0x844   :  { %10640 = vst.msk [vmem:[#allocation4 + $0x9] sm:$0x3] %vm10476_vm13, %v10631_v16  ;;  %v10593_v54 = vsel %vm8538_vm1, %v10504_v48, -inf  ;;  %v10562_v47 = vrot.slane %v10561_v3, 4  ;;  %v10568_v52 = vsel %vm10476_vm13, %v10458_v4, -inf  ;;  %v10576_v22 = vrot.slane %v10575_v56, 4 }
 0x845   :  { %v10594_v32 = vmax.f32 %v10592_v7, %v10593_v54  ;;  %v10569_v5 = vrot.slane %v10568_v52, 4  ;;  %v10582_v33 = vsel %vm10476_vm13, %v10459_v35, -inf  ;;  %v10386_v46 = vmax.f32 %v18891_v57, 0.0 }
 0x846   :  { %v10563_v0 = vmax.f32 %v10561_v3, %v10562_v47  ;;  %v10577_v44 = vmax.f32 %v10575_v56, %v10576_v22  ;;  %v10583_v53 = vrot.slane %v10582_v33, 4 }
 0x847   :  { %v10630_v40 = vsel %vm7743_vm12, %v10594_v32, %v10591_v1  ;;  %v10570_v6 = vmax.f32 %v10568_v52, %v10569_v5  ;;  %v10426_v24 = vcombine.high %v10386_v46, %v10386_v46  ;;  %v10433_v60 = vrot.slane %v10386_v46, %v13627_v50 }
 0x848   :  { %10639 = vst.msk [vmem:[#allocation4 + $0x5] sm:$0x3] %vm10476_vm13, %v10630_v40  ;;  %v10564_v43 = vrot.slane %v10563_v0, 2  ;;  %v10578_v30 = vrot.slane %v10577_v44, 2  ;;  %v10584_v28 = vmax.f32 %v10582_v33, %v10583_v53 }
 0x849   :  { %v10571_v63 = vrot.slane %v10570_v6, 2  ;;  %v10440_v19 = vrot.slane %v10426_v24, %v13627_v50  ;;  %v10441_v49 = vcombine.high %v10433_v60, %v10433_v60  ;;  %v10533_v57 = vsel %vm10476_vm13, %v10433_v60, -inf }
 0x84a   :  { %v10565_v11 = vmax.f32 %v10563_v0, %v10564_v43  ;;  %v10579_v26 = vmax.f32 %v10577_v44, %v10578_v30  ;;  %v10585_v14 = vrot.slane %v10584_v28, 2  ;;  %v10534_v17 = vrot.slane %v10533_v57, 4 }
 0x84b   :  { %v10572_v21 = vmax.f32 %v10570_v6, %v10571_v63  ;;  %v10442_v2 = vcombine.high %v10440_v19, %v10440_v19  ;;  %v10540_v13 = vsel %vm10476_vm13, %v10441_v49, -inf  ;;  %v10547_v51 = vsel %vm10476_vm13, %v10440_v19, -inf  ;;  %v12620_v30 = vld.sshfl [vmem:[#allocation4 + $0x9] sm:$0xf pattern:$0x76325410] }
 0x84c   :  { %v10566_v55 = vrot.slane %v10565_v11, 1  ;;  %v10580_v8 = vrot.slane %v10579_v26, 1  ;;  %v10586_v36 = vmax.f32 %v10584_v28, %v10585_v14  ;;  %v10535_v27 = vmax.f32 %v10533_v57, %v10534_v17  ;;  %v10938_v28 = vld [vmem:[%s19080_s10 + $0x188] sm:$0xff]  ;;  %v10937_v19 = vld [vmem:[%s19080_s10 + $0x180] sm:$0xff] }
 0x84d   :  { %v10573_v23 = vrot.slane %v10572_v21, 1  ;;  %v10541_v12 = vrot.slane %v10540_v13, 4  ;;  %v10548_v50 = vrot.slane %v10547_v51, 4  ;;  %v10554_v58 = vsel %vm10476_vm13, %v10442_v2, -inf  ;;  %v10922_v63 = vld [vmem:[%s19080_s10 + $0x108] sm:$0xff]  ;;  %11983 = vmatprep.subr.mxu1 %v10938_v28  ;;  %v11208_v28 = vld [vmem:[%s19083_s13] sm:$0xff] }
 0x84e   :  { %v10567_v31 = vmax.f32 %v10565_v11, %v10566_v55  ;;  %v10581_v37 = vmax.f32 %v10579_v26, %v10580_v8  ;;  %v10587_v38 = vrot.slane %v10586_v36, 1  ;;  %v10536_v10 = vrot.slane %v10535_v27, 2  ;;  %v10921_v11 = vld [vmem:[%s19080_s10 + $0x100] sm:$0xff]  ;;  %11984 = vmatpush3.msra.mxu1 %v10922_v63 }
 0x84f   :  { %v10574_v9 = vmax.f32 %v10572_v21, %v10573_v23  ;;  %v10542_v39 = vmax.f32 %v10540_v13, %v10541_v12  ;;  %v10549_v59 = vmax.f32 %v10547_v51, %v10548_v50  ;;  %v10555_v34 = vrot.slane %v10554_v58, 4  ;;  %v12618_v43 = vld.sshfl [vmem:[#allocation4 + $0x6] sm:$0xf pattern:$0x76325410]  ;;  %11985 = vmatprep.subr.mxu1 %v10937_v19 }
 0x850   :  { %v10588_v29 = vmax.f32 %v10586_v36, %v10587_v38  ;;  %v10608_v45 = vsel %vm8538_vm1, %v10581_v37, -inf  ;;  %v10537_v20 = vmax.f32 %v10535_v27, %v10536_v10  ;;  %v10607_v62 = vsel %vm8538_vm1, %v10567_v31, -inf  ;;  %v12621_v49 = vld.sshfl [vmem:[#allocation4 + $0x1] sm:$0xf pattern:$0x76325410]  ;;  %11986 = vmatpush3.msra.mxu1 %v10921_v11 }
 0x851   :  { %v10543_v25 = vrot.slane %v10542_v39, 2  ;;  %v10550_v41 = vrot.slane %v10549_v59, 2  ;;  %v10610_v18 = vsel %vm8538_vm1, %v10574_v9, -inf  ;;  %v10556_v42 = vmax.f32 %v10554_v58, %v10555_v34  ;;  %12153 = vmatprep.subr.mxu1 %v12665_v15 }
 0x852   :  { %v10611_v61 = vsel %vm8538_vm1, %v10588_v29, -inf  ;;  %v10609_v48 = vmax.f32 %v10607_v62, %v10608_v45  ;;  %v10538_v16 = vrot.slane %v10537_v20, 1  ;;  %v12623_v57 = vld.sshfl [vmem:[#allocation4 + $0x4] sm:$0xf pattern:$0x76325410] }
 0x853   :  { %v10612_v1 = vmax.f32 %v10610_v18, %v10611_v61  ;;  %v10544_v4 = vmax.f32 %v10542_v39, %v10543_v25  ;;  %v10551_v35 = vmax.f32 %v10549_v59, %v10550_v41  ;;  %v10557_v7 = vrot.slane %v10556_v42, 2  ;;  %v12629_v50 = vld.sshfl [vmem:[#allocation4 + $0x5] sm:$0xf pattern:$0x76325410] }
 0x854   :  { %v10539_v22 = vmax.f32 %v10537_v20, %v10538_v16  ;;  %v12630_v58 = vld.sshfl [vmem:[#allocation4 + $0x8] sm:$0xf pattern:$0x76325410] }
 0x855   :  { %v10633_v3 = vsel %vm7743_vm12, %v10612_v1, %v10609_v48  ;;  %v10545_v56 = vrot.slane %v10544_v4, 1  ;;  %v10552_v54 = vrot.slane %v10551_v35, 1  ;;  %v10558_v47 = vmax.f32 %v10556_v42, %v10557_v7  ;;  %v12631_v31 = vld.sshfl [vmem:[#allocation4] sm:$0xf pattern:$0x76325410] }
 0x856   :  { %10642 = vst.msk [vmem:[#allocation4 + $0x19] sm:$0x3] %vm10476_vm13, %v10633_v3  ;;  %v10601_v0 = vsel %vm8538_vm1, %v10539_v22, -inf  ;;  %v10960_v42 = vld [vmem:[%s19080_s10 + $0x238] sm:$0xff]  ;;  %v10959_v48 = vld [vmem:[%s19080_s10 + $0x230] sm:$0xff]  ;;  %v10958_v1 = vld [vmem:[%s19080_s10 + $0x228] sm:$0xff] }
 0x857   :  { %v10553_v52 = vmax.f32 %v10551_v35, %v10552_v54  ;;  %v10546_v32 = vmax.f32 %v10544_v4, %v10545_v56  ;;  %v10559_v5 = vrot.slane %v10558_v47, 1  ;;  %v12632_v37 = vld.sshfl [vmem:[#allocation4 + $0x2] sm:$0xf pattern:$0x76325410]  ;;  %v10956_v35 = vld [vmem:[%s19080_s10 + $0x218] sm:$0xff] }
 0x858   :  { %v10957_v4 = vld [vmem:[%s19080_s10 + $0x220] sm:$0xff]  ;;  %v10955_v7 = vld [vmem:[%s19080_s10 + $0x210] sm:$0xff]  ;;  %v12634_v3 = vld.sshfl [vmem:[#allocation4 + $0xa] sm:$0xf pattern:$0x76325410] }
 0x859   :  { %v10560_v33 = vmax.f32 %v10558_v47, %v10559_v5  ;;  %v10602_v46 = vsel %vm8538_vm1, %v10553_v52, -inf  ;;  %v10604_v44 = vsel %vm8538_vm1, %v10546_v32, -inf  ;;  %v10954_v56 = vld [vmem:[%s19080_s10 + $0x208] sm:$0xff]  ;;  %v10953_v54 = vld [vmem:[%s19080_s10 + $0x200] sm:$0xff]  ;;  %v11223_v52 = vld [vmem:[%s19083_s13 + $0x78] sm:$0xff] }
 0x85a   :  { %v10603_v40 = vmax.f32 %v10601_v0, %v10602_v46  ;;  %v11222_v22 = vld [vmem:[%s19083_s13 + $0x70] sm:$0xff]  ;;  %v11221_v32 = vld [vmem:[%s19083_s13 + $0x68] sm:$0xff]  ;;  %v11220_v5 = vld [vmem:[%s19083_s13 + $0x60] sm:$0xff] }
 0x85b   :  { %v10605_v53 = vsel %vm8538_vm1, %v10560_v33, -inf  ;;  %v11219_v33 = vld [vmem:[%s19083_s13 + $0x58] sm:$0xff]  ;;  %v11218_v46 = vld [vmem:[%s19083_s13 + $0x50] sm:$0xff]  ;;  %v11217_v0 = vld [vmem:[%s19083_s13 + $0x48] sm:$0xff] }
 0x85c   :  { %v10606_v6 = vmax.f32 %v10604_v44, %v10605_v53  ;;  %v11216_v44 = vld [vmem:[%s19083_s13 + $0x40] sm:$0xff]  ;;  %v11215_v53 = vld [vmem:[%s19083_s13 + $0x38] sm:$0xff] }
 0x85d   :  { %v12617_v60 = vld.sshfl [vmem:[#allocation4 + $0x19] sm:$0xf pattern:$0x76325410] }
 0x85e   :  { %v10632_v24 = vsel %vm7743_vm12, %v10606_v6, %v10603_v40  ;;  %v10860_v2 = vcombine.low %v12620_v30, %v12617_v60  ;;  %v12626_v27 = vld.sshfl [vmem:[#allocation4 + $0x18] sm:$0xf pattern:$0x76325410]  ;;  %v11214_v40 = vld [vmem:[%s19083_s13 + $0x30] sm:$0xff]  ;;  %v11213_v6 = vld [vmem:[%s19083_s13 + $0x28] sm:$0xff] }
 0x85f   :  { %10641 = vst.msk [vmem:[#allocation4 + $0x15] sm:$0x3] %vm10476_vm13, %v10632_v24  ;;  %v10838_v34 = vcombine.low %v12630_v58, %v12626_v27  ;;  %v12633_v16 = vld.sshfl [vmem:[#allocation4 + $0x1a] sm:$0xf pattern:$0x76325410] }
 0x860   :  { %v10884_v47 = vcombine.low %v12634_v3, %v12633_v16  ;;  %v11212_v24 = vld [vmem:[%s19083_s13 + $0x20] sm:$0xff]  ;;  %v11211_v60 = vld [vmem:[%s19083_s13 + $0x18] sm:$0xff]  ;;  %v11209_v30 = vld [vmem:[%s19083_s13 + $0x8] sm:$0xff] }
 0x866   :  { %v12619_v26 = vld.sshfl [vmem:[#allocation4 + $0x16] sm:$0xf pattern:$0x76325410] }
 0x867   :  { %v12622_v14 = vld.sshfl [vmem:[#allocation4 + $0x11] sm:$0xf pattern:$0x76325410]  ;;  %v10814_v21 = vcombine.low %v12618_v43, %v12619_v26 }
 0x868   :  { %v12624_v17 = vld.sshfl [vmem:[#allocation4 + $0x14] sm:$0xf pattern:$0x76325410]  ;;  %v10722_v13 = vcombine.low %v12621_v49, %v12622_v14 }
 0x869   :  { %v10768_v51 = vcombine.low %v12623_v57, %v12624_v17  ;;  %v12537_v55 = vpack.i.bf16 %v10814_v21, %v10860_v2  ;;  %v12625_v36 = vld.sshfl [vmem:[#allocation4 + $0x15] sm:$0xf pattern:$0x76325410]  ;;  %v11797_v21 = vld [vmem:[%s19081_s11] ss:$0 sm:$0xff] }
 0x86a   :  { %v12627_v23 = vld.sshfl [vmem:[#allocation4 + $0x10] sm:$0xf pattern:$0x76325410]  ;;  %v10792_v39 = vcombine.low %v12629_v50, %v12625_v36 }
 0x86b   :  { %v12532_v8 = vpack.i.bf16 %v10722_v13, %v10768_v51  ;;  %12538 = vrot.lane.b32.xlu0 %v12537_v55, %s12669_s20  ;;  %v12628_v12 = vld.sshfl [vmem:[#allocation4 + $0x12] sm:$0xf pattern:$0x76325410]  ;;  %v10700_v20 = vcombine.low %v12631_v31, %v12627_v23  ;;  %v11798_v13 = vld [vmem:[%s19082_s12] ss:$0 sm:$0xff] }
 0x86c   :  { %v10746_v25 = vcombine.low %v12632_v37, %v12628_v12  ;;  %v11210_v43 = vld [vmem:[%s19083_s13 + $0x10] sm:$0xff]  ;;  %s12675_s13 = smov [#allocation5]  }
 0x86d   :  { %12533 = vrot.lane.b32.xlu1 %v12532_v8, %s12669_s20  ;;  %s11313_s20 = sshll.u32 %s12675_s13, 4  ;;  %s11314_s20 = int_to_ptr.vmem [resolvable:$true] %s11313_s20 }
 0x86e   :  { %s12635_s18 = scalar_lea.vmem %s11314_s20, 32  ;;  %p12640_p1 = scmp.lt.s32.totalorder %s11314_s20, %s11314_s20 }
 0x86f   :  { %p12636_p0 = scmp.ne.s32.totalorder %s11314_s20, %s12635_s18  ;;  %p12641_p2 = scmp.lt.s32.totalorder %s12635_s18, %s12635_s18 }
 0x871   :  { %p12642_p3 = por %p12641_p2, %p12640_p1 }
 0x873   :  { %p12643_p4 = pnand %p12642_p3, %p12636_p0 }
 0x8dd   :  { %v12539_v38 = vpop.permute.xlu0 %12538 }
 0x8de   :  { %v12541_v10 = vunpack.i.h.bf16 %v12539_v38  ;;  %v12540_v9 = vunpack.i.l.bf16 %v12539_v38 }
 0x8df   :  { %v12534_v59 = vpop.permute.xlu1 %12533 }
 0x8e0   :  { %v12536_v29 = vunpack.i.h.bf16 %v12534_v59  ;;  %v12535_v45 = vunpack.i.l.bf16 %v12534_v59  ;;  %v10887_v41 = vsel %vm8538_vm1, %v10792_v39, %v12541_v10  ;;  %v10888_v62 = vsel %vm8538_vm1, %v10838_v34, %v12540_v9 }
 0x8e1   :  { %11097 = vmatprep.mubr.f32.mxu1 %v10888_v62 }
 0x8e2   :  { %v10885_v18 = vsel %vm8538_vm1, %v10700_v20, %v12536_v29  ;;  %v10886_v61 = vsel %vm8538_vm1, %v10746_v25, %v12535_v45  ;;  %11098 = vmatmul.mubr.f32.vlgmr.msra.gmra.mxu1 %v10887_v41  ;;  %v11799_v20 = vld [vmem:[%s19084_s14] ss:$0 sm:$0xff] }
 0x8e3   :  { %11027 = vmatprep.mubr.f32.mxu0 %v10886_v61  ;;  %12185 = vmatprep.mubr.msk.f32.mxu1 %vm12674_vm14, %v12665_v15 }
 0x8e4   :  { %11028 = vmatmul.mubr.f32.vlgmr.msra.gmra.mxu0 %v10885_v18  ;;  %12154 = vmatpush3.msra.mxu1 %v11223_v52 }
 0x8e5   :  { %12135 = vmatpush3.msra.mxu0 %v10960_v42  ;;  %12150 = vmatprep.mubr.msk.f32.mxu0 %vm12674_vm14, %v12665_v15 }
 0x8e6   :  { %12136 = vmatprep.subr.mxu0 %v12665_v15  ;;  %12155 = vmatprep.subr.mxu1 %v12665_v15 }
 0x8e7   :  { %12137 = vmatpush3.msra.mxu0 %v10959_v48  ;;  %12156 = vmatpush3.msra.mxu1 %v11222_v22 }
 0x8e8   :  { %12138 = vmatprep.subr.mxu0 %v12665_v15  ;;  %12157 = vmatprep.subr.mxu1 %v12665_v15 }
 0x8e9   :  { %12139 = vmatpush3.msra.mxu0 %v10958_v1  ;;  %12158 = vmatpush3.msra.mxu1 %v11221_v32 }
 0x8ea   :  { %12140 = vmatprep.subr.mxu0 %v12665_v15  ;;  %12159 = vmatprep.subr.mxu1 %v12665_v15 }
 0x8eb   :  { %12141 = vmatpush3.msra.mxu0 %v10957_v4  ;;  %12160 = vmatpush3.msra.mxu1 %v11220_v5 }
 0x8ec   :  { %12142 = vmatprep.subr.mxu0 %v12665_v15  ;;  %12161 = vmatprep.subr.mxu1 %v12665_v15 }
 0x8ed   :  { %12143 = vmatpush3.msra.mxu0 %v10956_v35  ;;  %12162 = vmatpush3.msra.mxu1 %v11219_v33 }
 0x8ee   :  { %12144 = vmatprep.subr.mxu0 %v12665_v15  ;;  %12163 = vmatprep.subr.mxu1 %v12665_v15 }
 0x8ef   :  { %12145 = vmatpush3.msra.mxu0 %v10955_v7  ;;  %12164 = vmatpush3.msra.mxu1 %v11218_v46 }
 0x8f0   :  { %12146 = vmatprep.subr.mxu0 %v12665_v15  ;;  %12165 = vmatprep.subr.mxu1 %v12665_v15 }
 0x8f1   :  { %12147 = vmatpush3.msra.mxu0 %v10954_v56  ;;  %12166 = vmatpush3.msra.mxu1 %v11217_v0 }
 0x8f2   :  { %12148 = vmatprep.subr.mxu0 %v12665_v15  ;;  %12167 = vmatprep.subr.mxu1 %v12665_v15 }
 0x8f3   :  { %12149 = vmatpush3.msra.mxu0 %v10953_v54  ;;  %12168 = vmatpush3.msra.mxu1 %v11216_v44 }
 0x8f4   :  { %12151 = vmatmul.mubr.msk.f32.vlgmr.msra.gmra.mxu0 %vm8538_vm1, %v10884_v47  ;;  %12169 = vmatprep.subr.mxu1 %v12665_v15 }
 0x8f5   :  { %12170 = vmatpush3.msra.mxu1 %v11215_v53 }
 0x8f6   :  { %12171 = vmatprep.subr.mxu1 %v12665_v15 }
 0x8f7   :  { %12172 = vmatpush3.msra.mxu1 %v11214_v40 }
 0x8f8   :  { %12173 = vmatprep.subr.mxu1 %v12665_v15 }
 0x8f9   :  { %12174 = vmatpush3.msra.mxu1 %v11213_v6 }
 0x8fa   :  { %12175 = vmatprep.subr.mxu1 %v12665_v15 }
 0x8fb   :  { %12176 = vmatpush3.msra.mxu1 %v11212_v24 }
 0x8fc   :  { %12177 = vmatprep.subr.mxu1 %v12665_v15 }
 0x8fd   :  { %12178 = vmatpush3.msra.mxu1 %v11211_v60 }
 0x8fe   :  { %12179 = vmatprep.subr.mxu1 %v12665_v15 }
 0x8ff   :  { %12180 = vmatpush3.msra.mxu1 %v11210_v43 }
 0x900   :  { %12181 = vmatprep.subr.mxu1 %v12665_v15 }
 0x901   :  { %12182 = vmatpush3.msra.mxu1 %v11209_v30 }
 0x902   :  { %12183 = vmatprep.subr.mxu1 %v12665_v15 }
 0x903   :  { %12184 = vmatpush3.msra.mxu1 %v11208_v28 }
 0x9a2   :  { %v11987_v19 = vpop.f32.mrf.mxu1 }
 0x9a4   :  { %v11952_v63 = vpop.f32.mrf.mxu0  ;;  %v11988_v57 = vpop.f32.mrf.mxu1 }
 0x9a5   :  { %v11989_v26 = vadd.f32 %v11988_v57, %v11987_v19 }
 0x9a6   :  { %v11953_v49 = vpop.f32.mrf.mxu0 }
 0x9a7   :  { %v11954_v11 = vadd.f32 %v11953_v49, %v11952_v63 }
 0x9a9   :  { %v11100_v14 = vadd.f32 %v11989_v26, %v11954_v11 }
 0x9b4   :  { %v11169_v17 = vpop.f32.mrf.mxu0 }
 0x9b5   :  { %v11170_v2 = vadd.f32 %v11169_v17, %v11100_v14 }
 0x9b6   :  { %v12152_v51 = vpop.f32.mrf.mxu0 }
 0x9b7   :  { %v11180_v15 = vmul.f32 %v11797_v21, %v11170_v2 }
 0x9b9   :  { %v11188_v55 = vadd.f32 %v11798_v13, %v11180_v15 }
 0x9bb   :  { %v11189_v8 = vmax.f32 %v11188_v55, 0.0 }
 0x9bd   :  { %v11191_v36 = vcombine.high %v11189_v8, %v11189_v8  ;;  %v11194_v27 = vsel %vm11193_vm0, %v11189_v8, -inf }
 0x9be   :  { %v11195_v23 = vrot.slane %v11194_v27, 4 }
 0x9bf   :  { %v11201_v12 = vsel %vm11193_vm0, %v11191_v36, -inf }
 0x9c0   :  { %v11196_v50 = vmax.f32 %v11194_v27, %v11195_v23  ;;  %v11202_v58 = vrot.slane %v11201_v12, 4 }
 0x9c2   :  { %v11197_v31 = vrot.slane %v11196_v50, 2  ;;  %v11203_v37 = vmax.f32 %v11201_v12, %v11202_v58 }
 0x9c4   :  { %v11198_v38 = vmax.f32 %v11196_v50, %v11197_v31  ;;  %v11204_v10 = vrot.slane %v11203_v37, 2 }
 0x9c6   :  { %v11199_v9 = vrot.slane %v11198_v38, 1  ;;  %v11205_v39 = vmax.f32 %v11203_v37, %v11204_v10 }
 0x9c8   :  { %v11206_v59 = vrot.slane %v11205_v39, 1  ;;  %v11200_v34 = vmax.f32 %v11198_v38, %v11199_v9 }
 0x9ca   :  { %v11207_v29 = vmax.f32 %v11205_v39, %v11206_v59 }
 0x9cc   :  { %v11233_v45 = vsel %vm7743_vm12, %v11207_v29, %v11200_v34 }
 0x9cd   :  { %12186 = vmatmul.mubr.f32.vlgmr.msra.gmra.mxu1 %v11233_v45 }
 0xa8d   :  { %v11301_v25 = vpop.f32.mrf.mxu1 }
 0xa8e   :  { %v11302_v41 = vadd.f32 %v11799_v20, %v11301_v25 }
 0xa8f   :  { %v12187_v62 = vpop.f32.mrf.mxu1 }
 0xa90   :  { %11306 = vst.msk [vmem:[#allocation5] sm:$0x3] %vm11305_vm4, %v11302_v41 }
 0xa91   :  { %12646 = shalt.err (!%p12643_p4)
}
 0xa92   :  { %11316 = dma.vmem_to_hbm [thread:$0]  %s11314_s20, 32, %s19085_s15, [#allocation6]  }
 0xa93   :  { %12655 = dma.done.wait [#allocation6], 32  }
 0xa94   :  { %12656 = vsyncadd [#allocation6], 4294967264 }
 0xa95   :  { %11320 = vsyncpa [#allocation6], 1 }

</bundles_post_ra>
